<compile_context>
chip_gen: v5e
topology: v5e:2x2
jax: 0.10.0
libtpu: 0.0.40
codegen_flags: <defaults>
</compile_context>

<pallas_src>
import jax
import jax.numpy as jnp
from jax import lax
from jax.experimental import pallas as pl
from jax.experimental.pallas import tpu as pltpu


# Static per-layer config: (C_in, C_out, kw, pad, has_bn). Kept out of the
# jitted pytrees so nothing shape-like ever becomes a tracer.
LAYER_CFG = [
    (1, 96, 5, 2, False),
    (96, 256, 3, 1, True),
    (256, 384, 3, 1, True),
    (384, 384, 3, 1, True),
    (384, 256, 3, 1, True),
]
BN_EPS = 1e-5
WIDTH = 2            # W pinned by the hard-coded view(-1, 256*66*2)
L1_CO_PAD = 128      # layer-1 output channels zero-padded 96 -> 128 (lane dense)
MAX_ROW_TILE = 256   # per-tile row count cap (keeps per-tile VMEM small on v7x)


# ----------------------------------------------------------------------------
# Fused kernel: 5 x (shifted-row conv + folded-BN bias + LeakyReLU), one tile
# ----------------------------------------------------------------------------
def _fused_kernel(x_ref, w1, b1, w2, b2, w3, b3, w4, b4, w5, b5, o_ref):
    TR = x_ref.shape[0]
    x = x_ref[...]                                            # (TR, 1) f32

    # Hoisted boundary masks, built ONCE per tile as (TR, 1): the width
    # coordinate of a row equals its index parity (rows are (b, h, w) with w
    # innermost and W == 2).  They lane-broadcast inside jnp.where.
    par = lax.broadcasted_iota(jnp.int32, (TR, 1), 0) & 1
    m_left = par == 1            # d = -1 tap valid only for w == 1 rows
    m_right = par == 0           # d = +1 tap valid only for w == 0 rows

    def shifted_taps(a):
        # row r of `left` is a[r-1], row r of `right` is a[r+1]; rows whose
        # source width index falls outside [0, W) (incl. roll wrap-around and
        # tile edges) are zeroed by the (TR, 1) parity masks.
        # TODO(synk): confirm in the Mosaic dump that shift=TR-1 lowers to a
        # single-step negative sublane rotate (review item 10).
        left = jnp.where(m_left, pltpu.roll(a, shift=1, axis=0), 0.0)
        right = jnp.where(m_right, pltpu.roll(a, shift=TR - 1, axis=0), 0.0)
        return left, right

    # ---- layer 1 (Ci = 1): three lane-broadcast multiply-adds on the VPU ----
    # (avoids the 128-padded MXU matmul that multiplied 127/128 zeros)
    w1v = w1[...]                                             # (3, 128)
    xl, xr = shifted_taps(x)
    y = xl * w1v[0:1, :] + x * w1v[1:2, :] + xr * w1v[2:3, :] + b1[...]
    act = jnp.maximum(y, 0.1 * y)                             # (TR, 128), lanes>=96 are 0

    # ---- layers 2-5: merged-tap matmul, K = 3*Ci, single dot per layer ----
    for w_ref, b_ref in ((w2, b2), (w3, b3), (w4, b4), (w5, b5)):
        al, ar = shifted_taps(act)
        big = jnp.concatenate([al, act, ar], axis=1)          # (TR, 3*Ci)
        y = jnp.dot(big, w_ref[...], preferred_element_type=jnp.float32)
        y = y + b_ref[...]                                    # conv bias + BN shift
        act = jnp.maximum(y, 0.1 * y)                         # LeakyReLU(0.1)

    o_ref[...] = act.astype(o_ref.dtype)


# ----------------------------------------------------------------------------
# pallas_call wrapper: row grid ("parallel"), weights resident in VMEM
# ----------------------------------------------------------------------------
def _row_tiling(n_rows, max_tile=MAX_ROW_TILE):
    """Largest row tile that is a multiple of 8 (sublane) -- and hence of W=2
    -- and divides n_rows if possible; otherwise the rows get zero-padded."""
    best = 0
    t = 8
    while t <= min(n_rows, max_tile):
        if n_rows % t == 0:
            best = t
        t += 8
    if best:
        return best, n_rows
    tile = min(max_tile, ((n_rows + 7) // 8) * 8)
    return tile, ((n_rows + tile - 1) // tile) * tile


def _fused_conv_stack(x_rows, folded, tile, n_tiles):
    """x_rows: (R_pad, 1) f32; folded: list of (w, bias) per layer."""
    r_pad = tile * n_tiles
    co_out = folded[-1][0].shape[1]

    flat_args = [x_rows]
    in_specs = [pl.BlockSpec((tile, x_rows.shape[1]), lambda i: (i, 0))]
    flops = r_pad * folded[0][0].shape[1] * 3 * 2              # layer-1 VPU MACs
    bytes_acc = r_pad * x_rows.shape[1] * 4 + r_pad * co_out * 4
    for w, b in folded:
        flat_args += [w, b]
        # Constant block index -> DMA'd once per core, resident across tiles.
        in_specs += [pl.BlockSpec(w.shape, lambda i: (0, 0)),
                     pl.BlockSpec(b.shape, lambda i: (0, 0))]
        bytes_acc += (w.shape[0] * w.shape[1] + b.shape[0] * b.shape[1]) * 4
    for w, _ in folded[1:]:
        flops += 2 * r_pad * w.shape[0] * w.shape[1]           # merged-K matmuls

    return pl.pallas_call(
        _fused_kernel,
        out_shape=jax.ShapeDtypeStruct((r_pad, co_out), jnp.float32),
        grid=(n_tiles,),
        in_specs=in_specs,
        out_specs=pl.BlockSpec((tile, co_out), lambda i: (i, 0)),
        cost_estimate=pl.CostEstimate(
            flops=flops, transcendentals=0, bytes_accessed=bytes_acc),
        compiler_params=pltpu.CompilerParams(
            dimension_semantics=("parallel",),
            vmem_limit_bytes=32 * 1024 * 1024),
    )(*flat_args)


# ----------------------------------------------------------------------------
# Host-side parameter folding (BN scale folded into weights, taps pruned)
# ----------------------------------------------------------------------------
def _fold_layer(idx, p):
    ci, co, kw, pad, has_bn = LAYER_CFG[idx]
    w, b = p["w"], p["b"]                                  # (Co, Ci, 1, kw), (Co,)
    if has_bn:
        scale = p["gamma"] / jnp.sqrt(p["var"] + BN_EPS)
        bias = (b - p["mean"]) * scale + p["beta"]
    else:
        scale = jnp.ones((co,), jnp.float32)
        bias = b
    # Per-tap weights: w_taps[t, c, o] = w[o, c, 0, t] * scale[o]
    w_taps = jnp.transpose(w[:, :, 0, :], (2, 1, 0)) * scale[None, None, :]
    # Prune taps that can never land inside the W=2 window (|t - pad| >= W);
    # the surviving taps are the contiguous range [pad-1, pad+1].
    keep = [t for t in range(kw) if -WIDTH < t - pad < WIDTH]
    w_taps = w_taps[keep[0]:keep[-1] + 1]                  # (3, Ci, Co)

    if idx == 0:
        # Layer 1 feeds the in-kernel VPU broadcast path: (3, Co) tap rows,
        # Co zero-padded to 128 lanes.
        w_out = jnp.pad(w_taps[:, 0, :], ((0, 0), (0, L1_CO_PAD - co)))
        bias = jnp.pad(bias, (0, L1_CO_PAD - co))
    else:
        # Ci padded to the previous layer's lane-padded output width, then the
        # taps are stacked along K for the single merged matmul.
        ci_pad = L1_CO_PAD if idx == 1 else ci
        if ci_pad != ci:
            w_taps = jnp.pad(w_taps, ((0, 0), (0, ci_pad - ci), (0, 0)))
        w_out = w_taps.reshape(3 * ci_pad, co)
    return w_out.astype(jnp.float32), bias[None, :].astype(jnp.float32)


@jax.jit
def featureextractor_forward(x, params):
    """x: (B, 1, 66, 2) NCHW float32 -> (B, 256*66*2)."""
    B, C, H, W = x.shape
    assert C == 1 and W == WIDTH
    folded = [_fold_layer(i, p) for i, p in enumerate(params)]
    rows = B * H * W
    # NCHW -> (B*H*W, 1) rows with w innermost (single real channel, no pad).
    x_rows = jnp.transpose(x, (0, 2, 3, 1)).reshape(rows, C)
    tile, rows_pad = _row_tiling(rows)
    if rows_pad != rows:
        x_rows = jnp.pad(x_rows, ((0, rows_pad - rows), (0, 0)))
    out_rows = _fused_conv_stack(x_rows, folded, tile, rows_pad // tile)
    co = LAYER_CFG[-1][1]
    out_rows = out_rows[:rows]
    y = out_rows.reshape(B, H, W, co).transpose(0, 3, 1, 2)    # NCHW
    return y.reshape(B, co * H * W)                            # matches .view()


def init_params(key):
    params = []
    for (ci, co, kw, pad, has_bn) in LAYER_CFG:
        key, kw_k, kb_k, kg_k, kbe_k, km_k, kv_k = jax.random.split(key, 7)
        w = 0.05 * jax.random.normal(kw_k, (co, ci, 1, kw), jnp.float32)
        b = 0.05 * jax.random.normal(kb_k, (co,), jnp.float32)
        if has_bn:
            gamma = 1.0 + 0.1 * jax.random.normal(kg_k, (co,), jnp.float32)
            beta = 0.1 * jax.random.normal(kbe_k, (co,), jnp.float32)
            mean = 0.1 * jax.random.normal(km_k, (co,), jnp.float32)
            var = 0.5 + jnp.abs(jax.random.normal(kv_k, (co,), jnp.float32))
        else:
            gamma = beta = mean = var = None
        params.append(dict(w=w, b=b, gamma=gamma, beta=beta, mean=mean, var=var))
    return params


# ----------------------------------------------------------------------------
# Pure-JAX reference for the correctness check
# ----------------------------------------------------------------------------
def ref_forward(x, params):
    y = x
    for idx, p in enumerate(params):
        _, _, kw, pad, has_bn = LAYER_CFG[idx]
        y = lax.conv_general_dilated(
            y, p["w"], window_strides=(1, 1),
            padding=((0, 0), (pad, pad)),
            dimension_numbers=("NCHW", "OIHW", "NCHW"),
            precision=lax.Precision.HIGHEST,
        ) + p["b"][None, :, None, None]
        if has_bn:
            y = (p["gamma"][None, :, None, None]
                 * (y - p["mean"][None, :, None, None])
                 / jnp.sqrt(p["var"][None, :, None, None] + BN_EPS)
                 + p["beta"][None, :, None, None])
        y = jnp.where(y > 0, y, 0.1 * y)
    return y.reshape(y.shape[0], -1)


if __name__ == "__main__":
    key = jax.random.PRNGKey(0)
    kx, kp = jax.random.split(key)
    # input_dim=1; H=66, W=2 are forced by the hard-coded view(-1, 256*66*2)
    x = jax.random.normal(kx, (2, 1, 66, 2), jnp.float32)
    params = init_params(kp)

    out = jax.block_until_ready(featureextractor_forward(x, params))
    ref = jax.block_until_ready(ref_forward(x, params))

    assert out.shape == (2, 256 * 66 * 2), out.shape
    # Tolerance covers MXU multi-pass f32 matmul vs XLA-HIGHEST conv rounding.
    max_err = float(jnp.max(jnp.abs(out - ref)))
    assert jnp.allclose(out, ref, atol=1e-3, rtol=1e-3), max_err

    print("KERNEL_OK")
</pallas_src>

<mosaic_0001>
module attributes {stable_mosaic.version = 11 : i64} {
  func.func @_fused_kernel(%arg0: i32, %arg1: memref<88x1xf32, #tpu.memory_space<vmem>>, %arg2: memref<3x128xf32, #tpu.memory_space<vmem>>, %arg3: memref<1x128xf32, #tpu.memory_space<vmem>>, %arg4: memref<384x256xf32, #tpu.memory_space<vmem>>, %arg5: memref<1x256xf32, #tpu.memory_space<vmem>>, %arg6: memref<768x384xf32, #tpu.memory_space<vmem>>, %arg7: memref<1x384xf32, #tpu.memory_space<vmem>>, %arg8: memref<1152x384xf32, #tpu.memory_space<vmem>>, %arg9: memref<1x384xf32, #tpu.memory_space<vmem>>, %arg10: memref<1152x256xf32, #tpu.memory_space<vmem>>, %arg11: memref<1x256xf32, #tpu.memory_space<vmem>>, %arg12: memref<88x256xf32, #tpu.memory_space<vmem>>) attributes {dimension_semantics = [#tpu.dimension_semantics<parallel>], iteration_bounds = array<i64: 3>, scalar_prefetch = 0 : i64, scratch_operands = 0 : i64, tpu.core_type = #tpu.core_type<tc>, window_params = [{transform_indices = @transform_0, window_bounds = array<i64: 88, 1>}, {pipeline_mode = #tpu.pipeline_mode<synchronous>, transform_indices = @transform_1, window_bounds = array<i64: 3, 128>}, {pipeline_mode = #tpu.pipeline_mode<synchronous>, transform_indices = @transform_2, window_bounds = array<i64: 1, 128>}, {pipeline_mode = #tpu.pipeline_mode<synchronous>, transform_indices = @transform_3, window_bounds = array<i64: 384, 256>}, {pipeline_mode = #tpu.pipeline_mode<synchronous>, transform_indices = @transform_4, window_bounds = array<i64: 1, 256>}, {pipeline_mode = #tpu.pipeline_mode<synchronous>, transform_indices = @transform_5, window_bounds = array<i64: 768, 384>}, {pipeline_mode = #tpu.pipeline_mode<synchronous>, transform_indices = @transform_6, window_bounds = array<i64: 1, 384>}, {pipeline_mode = #tpu.pipeline_mode<synchronous>, transform_indices = @transform_7, window_bounds = array<i64: 1152, 384>}, {pipeline_mode = #tpu.pipeline_mode<synchronous>, transform_indices = @transform_8, window_bounds = array<i64: 1, 384>}, {pipeline_mode = #tpu.pipeline_mode<synchronous>, transform_indices = @transform_9, window_bounds = array<i64: 1152, 256>}, {pipeline_mode = #tpu.pipeline_mode<synchronous>, transform_indices = @transform_10, window_bounds = array<i64: 1, 256>}, {transform_indices = @transform_11, window_bounds = array<i64: 88, 256>}]} {
    %c0 = arith.constant 0 : index
    %c0_0 = arith.constant 0 : index
    %0 = vector.load %arg1[%c0, %c0_0] : memref<88x1xf32, #tpu.memory_space<vmem>>, vector<88x1xf32>
    %1 = tpu.iota {dimensions = array<i32: 0>} : vector<88x1xi32>
    %c1_i32 = arith.constant 1 : i32
    %2 = vector.broadcast %c1_i32 : i32 to vector<88x1xi32>
    %3 = arith.andi %1, %2 : vector<88x1xi32>
    %c1_i32_1 = arith.constant 1 : i32
    %4 = vector.broadcast %c1_i32_1 : i32 to vector<88x1xi32>
    %5 = arith.cmpi eq, %3, %4 : vector<88x1xi32>
    %c0_i32 = arith.constant 0 : i32
    %6 = vector.broadcast %c0_i32 : i32 to vector<88x1xi32>
    %7 = arith.cmpi eq, %3, %6 : vector<88x1xi32>
    %c0_2 = arith.constant 0 : index
    %c0_3 = arith.constant 0 : index
    %8 = vector.load %arg2[%c0_2, %c0_3] : memref<3x128xf32, #tpu.memory_space<vmem>>, vector<3x128xf32>
    %c1_i32_4 = arith.constant 1 : i32
    %9 = tpu.dynamic_rotate %0 by %c1_i32_4 dim 0 : vector<88x1xf32>, i32 -> vector<88x1xf32>
    %cst = arith.constant 0.000000e+00 : f32
    %10 = vector.broadcast %cst : f32 to vector<88x1xf32>
    %11 = arith.select %5, %9, %10 : vector<88x1xi1>, vector<88x1xf32>
    %c87_i32 = arith.constant 87 : i32
    %12 = tpu.dynamic_rotate %0 by %c87_i32 dim 0 : vector<88x1xf32>, i32 -> vector<88x1xf32>
    %cst_5 = arith.constant 0.000000e+00 : f32
    %13 = vector.broadcast %cst_5 : f32 to vector<88x1xf32>
    %14 = arith.select %7, %12, %13 : vector<88x1xi1>, vector<88x1xf32>
    %15 = vector.extract_strided_slice %8 {offsets = [0, 0], sizes = [1, 128], strides = [1, 1]} : vector<3x128xf32> to vector<1x128xf32>
    %16 = vector.broadcast %11 : vector<88x1xf32> to vector<88x128xf32>
    %17 = vector.broadcast %15 : vector<1x128xf32> to vector<88x128xf32>
    %18 = arith.mulf %16, %17 : vector<88x128xf32>
    %19 = vector.extract_strided_slice %8 {offsets = [1, 0], sizes = [1, 128], strides = [1, 1]} : vector<3x128xf32> to vector<1x128xf32>
    %20 = vector.broadcast %0 : vector<88x1xf32> to vector<88x128xf32>
    %21 = vector.broadcast %19 : vector<1x128xf32> to vector<88x128xf32>
    %22 = arith.mulf %20, %21 : vector<88x128xf32>
    %23 = arith.addf %18, %22 : vector<88x128xf32>
    %24 = vector.extract_strided_slice %8 {offsets = [2, 0], sizes = [1, 128], strides = [1, 1]} : vector<3x128xf32> to vector<1x128xf32>
    %25 = vector.broadcast %14 : vector<88x1xf32> to vector<88x128xf32>
    %26 = vector.broadcast %24 : vector<1x128xf32> to vector<88x128xf32>
    %27 = arith.mulf %25, %26 : vector<88x128xf32>
    %28 = arith.addf %23, %27 : vector<88x128xf32>
    %c0_6 = arith.constant 0 : index
    %c0_7 = arith.constant 0 : index
    %29 = vector.load %arg3[%c0_6, %c0_7] : memref<1x128xf32, #tpu.memory_space<vmem>>, vector<1x128xf32>
    %30 = vector.broadcast %29 : vector<1x128xf32> to vector<88x128xf32>
    %31 = arith.addf %28, %30 : vector<88x128xf32>
    %cst_8 = arith.constant 1.000000e-01 : f32
    %32 = vector.broadcast %cst_8 : f32 to vector<88x128xf32>
    %33 = arith.mulf %32, %31 : vector<88x128xf32>
    %34 = arith.maximumf %31, %33 : vector<88x128xf32>
    %c1_i32_9 = arith.constant 1 : i32
    %35 = tpu.dynamic_rotate %34 by %c1_i32_9 dim 0 : vector<88x128xf32>, i32 -> vector<88x128xf32>
    %cst_10 = arith.constant 0.000000e+00 : f32
    %36 = vector.shape_cast %5 : vector<88x1xi1> to vector<88x1xi1>
    %37 = vector.broadcast %36 : vector<88x1xi1> to vector<88x128xi1>
    %38 = vector.broadcast %cst_10 : f32 to vector<88x128xf32>
    %39 = arith.select %37, %35, %38 : vector<88x128xi1>, vector<88x128xf32>
    %c87_i32_11 = arith.constant 87 : i32
    %40 = tpu.dynamic_rotate %34 by %c87_i32_11 dim 0 : vector<88x128xf32>, i32 -> vector<88x128xf32>
    %cst_12 = arith.constant 0.000000e+00 : f32
    %41 = vector.shape_cast %7 : vector<88x1xi1> to vector<88x1xi1>
    %42 = vector.broadcast %41 : vector<88x1xi1> to vector<88x128xi1>
    %43 = vector.broadcast %cst_12 : f32 to vector<88x128xf32>
    %44 = arith.select %42, %40, %43 : vector<88x128xi1>, vector<88x128xf32>
    %45 = tpu.concatenate %39, %34, %44 in 1 : vector<88x128xf32>, vector<88x128xf32>, vector<88x128xf32> -> vector<88x384xf32>
    %c0_13 = arith.constant 0 : index
    %c0_14 = arith.constant 0 : index
    %46 = vector.load %arg4[%c0_13, %c0_14] : memref<384x256xf32, #tpu.memory_space<vmem>>, vector<384x256xf32>
    %cst_15 = arith.constant dense<0.000000e+00> : vector<88x256xf32>
    %47 = tpu.matmul %45, %46, %cst_15 {dimension_numbers = #tpu.dot_dimension_numbers<[1], [0], [0], [1], [0, 0, 1, 1], [], []>} : vector<88x384xf32>, vector<384x256xf32>, vector<88x256xf32> -> vector<88x256xf32>
    %c0_16 = arith.constant 0 : index
    %c0_17 = arith.constant 0 : index
    %48 = vector.load %arg5[%c0_16, %c0_17] : memref<1x256xf32, #tpu.memory_space<vmem>>, vector<1x256xf32>
    %49 = vector.broadcast %48 : vector<1x256xf32> to vector<88x256xf32>
    %50 = arith.addf %47, %49 : vector<88x256xf32>
    %cst_18 = arith.constant 1.000000e-01 : f32
    %51 = vector.broadcast %cst_18 : f32 to vector<88x256xf32>
    %52 = arith.mulf %51, %50 : vector<88x256xf32>
    %53 = arith.maximumf %50, %52 : vector<88x256xf32>
    %c1_i32_19 = arith.constant 1 : i32
    %54 = tpu.dynamic_rotate %53 by %c1_i32_19 dim 0 : vector<88x256xf32>, i32 -> vector<88x256xf32>
    %cst_20 = arith.constant 0.000000e+00 : f32
    %55 = vector.shape_cast %5 : vector<88x1xi1> to vector<88x1xi1>
    %56 = vector.broadcast %55 : vector<88x1xi1> to vector<88x256xi1>
    %57 = vector.broadcast %cst_20 : f32 to vector<88x256xf32>
    %58 = arith.select %56, %54, %57 : vector<88x256xi1>, vector<88x256xf32>
    %c87_i32_21 = arith.constant 87 : i32
    %59 = tpu.dynamic_rotate %53 by %c87_i32_21 dim 0 : vector<88x256xf32>, i32 -> vector<88x256xf32>
    %cst_22 = arith.constant 0.000000e+00 : f32
    %60 = vector.shape_cast %7 : vector<88x1xi1> to vector<88x1xi1>
    %61 = vector.broadcast %60 : vector<88x1xi1> to vector<88x256xi1>
    %62 = vector.broadcast %cst_22 : f32 to vector<88x256xf32>
    %63 = arith.select %61, %59, %62 : vector<88x256xi1>, vector<88x256xf32>
    %64 = tpu.concatenate %58, %53, %63 in 1 : vector<88x256xf32>, vector<88x256xf32>, vector<88x256xf32> -> vector<88x768xf32>
    %c0_23 = arith.constant 0 : index
    %c0_24 = arith.constant 0 : index
    %65 = vector.load %arg6[%c0_23, %c0_24] : memref<768x384xf32, #tpu.memory_space<vmem>>, vector<768x384xf32>
    %cst_25 = arith.constant dense<0.000000e+00> : vector<88x384xf32>
    %66 = tpu.matmul %64, %65, %cst_25 {dimension_numbers = #tpu.dot_dimension_numbers<[1], [0], [0], [1], [0, 0, 1, 1], [], []>} : vector<88x768xf32>, vector<768x384xf32>, vector<88x384xf32> -> vector<88x384xf32>
    %c0_26 = arith.constant 0 : index
    %c0_27 = arith.constant 0 : index
    %67 = vector.load %arg7[%c0_26, %c0_27] : memref<1x384xf32, #tpu.memory_space<vmem>>, vector<1x384xf32>
    %68 = vector.broadcast %67 : vector<1x384xf32> to vector<88x384xf32>
    %69 = arith.addf %66, %68 : vector<88x384xf32>
    %cst_28 = arith.constant 1.000000e-01 : f32
    %70 = vector.broadcast %cst_28 : f32 to vector<88x384xf32>
    %71 = arith.mulf %70, %69 : vector<88x384xf32>
    %72 = arith.maximumf %69, %71 : vector<88x384xf32>
    %c1_i32_29 = arith.constant 1 : i32
    %73 = tpu.dynamic_rotate %72 by %c1_i32_29 dim 0 : vector<88x384xf32>, i32 -> vector<88x384xf32>
    %cst_30 = arith.constant 0.000000e+00 : f32
    %74 = vector.shape_cast %5 : vector<88x1xi1> to vector<88x1xi1>
    %75 = vector.broadcast %74 : vector<88x1xi1> to vector<88x384xi1>
    %76 = vector.broadcast %cst_30 : f32 to vector<88x384xf32>
    %77 = arith.select %75, %73, %76 : vector<88x384xi1>, vector<88x384xf32>
    %c87_i32_31 = arith.constant 87 : i32
    %78 = tpu.dynamic_rotate %72 by %c87_i32_31 dim 0 : vector<88x384xf32>, i32 -> vector<88x384xf32>
    %cst_32 = arith.constant 0.000000e+00 : f32
    %79 = vector.shape_cast %7 : vector<88x1xi1> to vector<88x1xi1>
    %80 = vector.broadcast %79 : vector<88x1xi1> to vector<88x384xi1>
    %81 = vector.broadcast %cst_32 : f32 to vector<88x384xf32>
    %82 = arith.select %80, %78, %81 : vector<88x384xi1>, vector<88x384xf32>
    %83 = tpu.concatenate %77, %72, %82 in 1 : vector<88x384xf32>, vector<88x384xf32>, vector<88x384xf32> -> vector<88x1152xf32>
    %c0_33 = arith.constant 0 : index
    %c0_34 = arith.constant 0 : index
    %84 = vector.load %arg8[%c0_33, %c0_34] : memref<1152x384xf32, #tpu.memory_space<vmem>>, vector<1152x384xf32>
    %cst_35 = arith.constant dense<0.000000e+00> : vector<88x384xf32>
    %85 = tpu.matmul %83, %84, %cst_35 {dimension_numbers = #tpu.dot_dimension_numbers<[1], [0], [0], [1], [0, 0, 1, 1], [], []>} : vector<88x1152xf32>, vector<1152x384xf32>, vector<88x384xf32> -> vector<88x384xf32>
    %c0_36 = arith.constant 0 : index
    %c0_37 = arith.constant 0 : index
    %86 = vector.load %arg9[%c0_36, %c0_37] : memref<1x384xf32, #tpu.memory_space<vmem>>, vector<1x384xf32>
    %87 = vector.broadcast %86 : vector<1x384xf32> to vector<88x384xf32>
    %88 = arith.addf %85, %87 : vector<88x384xf32>
    %cst_38 = arith.constant 1.000000e-01 : f32
    %89 = vector.broadcast %cst_38 : f32 to vector<88x384xf32>
    %90 = arith.mulf %89, %88 : vector<88x384xf32>
    %91 = arith.maximumf %88, %90 : vector<88x384xf32>
    %c1_i32_39 = arith.constant 1 : i32
    %92 = tpu.dynamic_rotate %91 by %c1_i32_39 dim 0 : vector<88x384xf32>, i32 -> vector<88x384xf32>
    %cst_40 = arith.constant 0.000000e+00 : f32
    %93 = vector.shape_cast %5 : vector<88x1xi1> to vector<88x1xi1>
    %94 = vector.broadcast %93 : vector<88x1xi1> to vector<88x384xi1>
    %95 = vector.broadcast %cst_40 : f32 to vector<88x384xf32>
    %96 = arith.select %94, %92, %95 : vector<88x384xi1>, vector<88x384xf32>
    %c87_i32_41 = arith.constant 87 : i32
    %97 = tpu.dynamic_rotate %91 by %c87_i32_41 dim 0 : vector<88x384xf32>, i32 -> vector<88x384xf32>
    %cst_42 = arith.constant 0.000000e+00 : f32
    %98 = vector.shape_cast %7 : vector<88x1xi1> to vector<88x1xi1>
    %99 = vector.broadcast %98 : vector<88x1xi1> to vector<88x384xi1>
    %100 = vector.broadcast %cst_42 : f32 to vector<88x384xf32>
    %101 = arith.select %99, %97, %100 : vector<88x384xi1>, vector<88x384xf32>
    %102 = tpu.concatenate %96, %91, %101 in 1 : vector<88x384xf32>, vector<88x384xf32>, vector<88x384xf32> -> vector<88x1152xf32>
    %c0_43 = arith.constant 0 : index
    %c0_44 = arith.constant 0 : index
    %103 = vector.load %arg10[%c0_43, %c0_44] : memref<1152x256xf32, #tpu.memory_space<vmem>>, vector<1152x256xf32>
    %cst_45 = arith.constant dense<0.000000e+00> : vector<88x256xf32>
    %104 = tpu.matmul %102, %103, %cst_45 {dimension_numbers = #tpu.dot_dimension_numbers<[1], [0], [0], [1], [0, 0, 1, 1], [], []>} : vector<88x1152xf32>, vector<1152x256xf32>, vector<88x256xf32> -> vector<88x256xf32>
    %c0_46 = arith.constant 0 : index
    %c0_47 = arith.constant 0 : index
    %105 = vector.load %arg11[%c0_46, %c0_47] : memref<1x256xf32, #tpu.memory_space<vmem>>, vector<1x256xf32>
    %106 = vector.broadcast %105 : vector<1x256xf32> to vector<88x256xf32>
    %107 = arith.addf %104, %106 : vector<88x256xf32>
    %cst_48 = arith.constant 1.000000e-01 : f32
    %108 = vector.broadcast %cst_48 : f32 to vector<88x256xf32>
    %109 = arith.mulf %108, %107 : vector<88x256xf32>
    %110 = arith.maximumf %107, %109 : vector<88x256xf32>
    %c0_49 = arith.constant 0 : index
    %c0_50 = arith.constant 0 : index
    %111 = vector.load %arg12[%c0_49, %c0_50] : memref<88x256xf32, #tpu.memory_space<vmem>>, vector<88x256xf32>
    tpu.vector_store %arg12[%c0_49, %c0_50], %110 {strides = array<i32>} : memref<88x256xf32, #tpu.memory_space<vmem>>, vector<88x256xf32>,
    return
  }
  func.func @transform_0(%arg0: i32) -> (i32, i32) {
    %c0_i32 = arith.constant 0 : i32
    %c0_i32_0 = arith.constant 0 : i32
    return %arg0, %c0_i32 : i32, i32
  }
  func.func @transform_1(%arg0: i32) -> (i32, i32) {
    %c0_i32 = arith.constant 0 : i32
    %c0_i32_0 = arith.constant 0 : i32
    %c0_i32_1 = arith.constant 0 : i32
    return %c0_i32, %c0_i32_0 : i32, i32
  }
  func.func @transform_2(%arg0: i32) -> (i32, i32) {
    %c0_i32 = arith.constant 0 : i32
    %c0_i32_0 = arith.constant 0 : i32
    %c0_i32_1 = arith.constant 0 : i32
    return %c0_i32, %c0_i32_0 : i32, i32
  }
  func.func @transform_3(%arg0: i32) -> (i32, i32) {
    %c0_i32 = arith.constant 0 : i32
    %c0_i32_0 = arith.constant 0 : i32
    %c0_i32_1 = arith.constant 0 : i32
    return %c0_i32, %c0_i32_0 : i32, i32
  }
  func.func @transform_4(%arg0: i32) -> (i32, i32) {
    %c0_i32 = arith.constant 0 : i32
    %c0_i32_0 = arith.constant 0 : i32
    %c0_i32_1 = arith.constant 0 : i32
    return %c0_i32, %c0_i32_0 : i32, i32
  }
  func.func @transform_5(%arg0: i32) -> (i32, i32) {
    %c0_i32 = arith.constant 0 : i32
    %c0_i32_0 = arith.constant 0 : i32
    %c0_i32_1 = arith.constant 0 : i32
    return %c0_i32, %c0_i32_0 : i32, i32
  }
  func.func @transform_6(%arg0: i32) -> (i32, i32) {
    %c0_i32 = arith.constant 0 : i32
    %c0_i32_0 = arith.constant 0 : i32
    %c0_i32_1 = arith.constant 0 : i32
    return %c0_i32, %c0_i32_0 : i32, i32
  }
  func.func @transform_7(%arg0: i32) -> (i32, i32) {
    %c0_i32 = arith.constant 0 : i32
    %c0_i32_0 = arith.constant 0 : i32
    %c0_i32_1 = arith.constant 0 : i32
    return %c0_i32, %c0_i32_0 : i32, i32
  }
  func.func @transform_8(%arg0: i32) -> (i32, i32) {
    %c0_i32 = arith.constant 0 : i32
    %c0_i32_0 = arith.constant 0 : i32
    %c0_i32_1 = arith.constant 0 : i32
    return %c0_i32, %c0_i32_0 : i32, i32
  }
  func.func @transform_9(%arg0: i32) -> (i32, i32) {
    %c0_i32 = arith.constant 0 : i32
    %c0_i32_0 = arith.constant 0 : i32
    %c0_i32_1 = arith.constant 0 : i32
    return %c0_i32, %c0_i32_0 : i32, i32
  }
  func.func @transform_10(%arg0: i32) -> (i32, i32) {
    %c0_i32 = arith.constant 0 : i32
    %c0_i32_0 = arith.constant 0 : i32
    %c0_i32_1 = arith.constant 0 : i32
    return %c0_i32, %c0_i32_0 : i32, i32
  }
  func.func @transform_11(%arg0: i32) -> (i32, i32) {
    %c0_i32 = arith.constant 0 : i32
    %c0_i32_0 = arith.constant 0 : i32
    return %arg0, %c0_i32 : i32, i32
  }
}

</mosaic_0001>

<bundles_post_ra>
// kernel: featureextractor_forward.1
= control target key start
LH: loop header
LB: loop body
LE: loop exit
PB: predicated region body
PF: predicated region fallthrough
CT: control target
= control target key end

     0   :  { %s6946_s17 = smov 0   ;;  %s15478_s0 = inlined_call_operand.vmem [shape: f32[264,1], index: 0, kind: input, shape index: {}]   ;;  %s15479_s1 = inlined_call_operand.vmem [shape: f32[3,128], index: 1, kind: input, shape index: {}]   ;;  %s15480_s2 = inlined_call_operand.vmem [shape: f32[1,128], index: 2, kind: input, shape index: {}]   ;;  %s15481_s3 = inlined_call_operand.vmem [shape: f32[384,256], index: 3, kind: input, shape index: {}]   ;;  %s15482_s4 = inlined_call_operand.vmem [shape: f32[1,256], index: 4, kind: input, shape index: {}]   ;;  %s15483_s5 = inlined_call_operand.vmem [shape: f32[768,384], index: 5, kind: input, shape index: {}]   ;;  %s15484_s6 = inlined_call_operand.vmem [shape: f32[1,384], index: 6, kind: input, shape index: {}]   ;;  %s15485_s7 = inlined_call_operand.vmem [shape: f32[1152,384], index: 7, kind: input, shape index: {}]   ;;  %s15486_s8 = inlined_call_operand.vmem [shape: f32[1,384], index: 8, kind: input, shape index: {}]   ;;  %s15487_s9 = inlined_call_operand.vmem [shape: f32[1152,256], index: 9, kind: input, shape index: {}]   ;;  %s15488_s10 = inlined_call_operand.vmem [shape: f32[1,256], index: 10, kind: input, shape index: {}]   ;;  %s15489_s11 = inlined_call_operand.vmem [shape: f32[264,256], index: 11, kind: output, shape index: {}]  }
   0x1 LB: > { %s6297_s18 = sadd.s32 4294967295, %s6883_s17   ;;  %p6301_p0 = scmp.ge.s32.totalorder %s6883_s17, 1  ;;  %s6883_s17 = sphi %s6946_s17, %s21_s17  }
   0x2   : > { %p338_p1 = scmp.lt.s32.totalorder %s6883_s17, 4 }
   0x4   : > { %p339_p2 = pnand %p6301_p0, %p338_p1 }
   0x6   : > { %342 = sbr.rel (%p339_p2) target bundleno = 2302 (0x8fe), region = 64 }
   0xb   : > { %s379_s19 = smul.u32 11, %s6297_s18  ;;  %v403_v0 = vlaneseq  ;;  %v6885_v1 = vmov 0   ;;  %v15989_v8 = vmov 0  ;;  %v15992_v10 = vmov 0 }
   0xc   : > { %6871 = vset.pattern.permute.xlu1 %v6885_v1  ;;  %6873 = vset.pattern.permute.xlu2 %v6885_v1  ;;  %v15995_v24 = vmov 0  ;;  %v15998_v26 = vmov 0  ;;  %v16001_v35 = vmov 0  ;;  %v16004_v37 = vmov 0 }
   0xd   : > { %p380_p3 = scmp.lt.s32.totalorder %s379_s19, 32  ;;  %6872 = vset.pattern.permute.xlu0 %v6885_v1  ;;  %v6954_v2 = vshrl.u32 %v403_v0, 7  ;;  %v16007_v46 = vmov 0  ;;  %v16010_v48 = vmov 0  ;;  %v16013_v56 = vmov 0 }
   0xe   : > { %v16016_v58 = vmov 0 }
   0xf   : > { %15988 = vst [vmem:[#allocation2_spill] sm:$0xff] %v6954_v2  ;;  %s17184_s19 = smov (!%p380_p3, %s379_s19), 32  ;;  %v407_v3 = vadd.s32 24, %v6954_v2  ;;  %v408_v5 = vadd.s32 32, %v6954_v2  ;;  %vm15490_vm0 = vcmp.lt.s32.totalorder %v6954_v2, 1  ;;  %vm15495_vm2 = vcmp.lt.s32.totalorder %v6954_v2, 7 }
  0x10   : > { %s6302_s20 = sshll.u32 %s17184_s19, 3  ;;  %v409_v23 = vadd.s32 40, %v6954_v2  ;;  %v410_v34 = vadd.s32 48, %v6954_v2  ;;  %v411_v45 = vadd.s32 56, %v6954_v2  ;;  %s6813_s13 = sshll.u32 %s17184_s19, 4 }
  0x11   : > { %v418_v4 = vand.u32 1, %v407_v3  ;;  %s6964_s23 = scalar_lea.vmem %s15478_s0, %s6302_s20  ;;  %v419_v16 = vand.u32 1, %v408_v5  ;;  %s15166_s16 = scalar_lea.vmem %s15489_s11, %s6813_s13 }
  0x12   : > { %v6968_v6 = vld [vmem:[%s6964_s23 + $0x18] sm:$0xff]  ;;  %v396_v7 = vld [vmem:[%s6964_s23 + $0x20] sm:$0xff]  ;;  %v6977_v9 = vld [vmem:[%s6964_s23 + $0x10] sm:$0xff]  ;;  %v420_v31 = vand.u32 1, %v409_v23  ;;  %v421_v42 = vand.u32 1, %v410_v34  ;;  %v422_v53 = vand.u32 1, %v411_v45 }
  0x13   : > { %vm6971_vm1 = vcmp.eq.s32.totalorder %v418_v4, 0  ;;  %vm6979_vm3 = vcmp.eq.s32.totalorder %v418_v4, 1  ;;  %601 = vperm.xlu1 %6871, %v6968_v6   ;;  %v452_v11 = vrot.slane %v6968_v6, 7  ;;  %v486_v12 = vrot.slane %v6968_v6, 1  ;;  %v397_v15 = vld [vmem:[%s6964_s23 + $0x28] sm:$0xff]  ;;  %v398_v28 = vld [vmem:[%s6964_s23 + $0x30] sm:$0xff] }
  0x14   : > { %v15990_v8 = vsel %vm6971_vm1, 4294967295, %v15989_v8  ;;  %v15993_v10 = vsel %vm6979_vm3, 4294967295, %v15992_v10  ;;  %v487_v13 = vrot.slane %v396_v7, 1  ;;  %v451_v14 = vrot.slane %v6977_v9, 7  ;;  %v7032_v39 = vld [vmem:[%s6964_s23 + $0x38] sm:$0xff]  ;;  %v7053_v50 = vld [vmem:[%s6964_s23 + $0x40] sm:$0xff] }
  0x15   : > { %15991 = vst [vmem:[#allocation3_spill] sm:$0xff] %v15990_v8  ;;  %v488_v19 = vrot.slane %v397_v15, 1  ;;  %v453_v20 = vrot.slane %v396_v7, 7  ;;  %vm7001_vm4 = vcmp.eq.s32.totalorder %v419_v16, 0  ;;  %vm7007_vm5 = vcmp.eq.s32.totalorder %v419_v16, 1  ;;  %v7076_v60 = vld [vmem:[%s6964_s23] sm:$0xff] }
  0x16   : > { %15994 = vst [vmem:[#allocation4_spill] sm:$0xff] %v15993_v10  ;;  %v501_v17 = vsel %vm15495_vm2, %v486_v12, %v487_v13  ;;  %v468_v18 = vsel %vm15490_vm0, %v451_v14, %v452_v11  ;;  %v15996_v24 = vsel %vm7001_vm4, 4294967295, %v15995_v24  ;;  %v15999_v26 = vsel %vm7007_vm5, 4294967295, %v15998_v26  ;;  %v393_v61 = vld [vmem:[%s6964_s23 + $0x8] sm:$0xff]  ;;  %v7080_v62 = vld [vmem:[%s6964_s23 + $0x50] sm:$0xff] }
  0x17   : > { %v509_v21 = vsel %vm6971_vm1, %v501_v17, 0.0  ;;  %v475_v22 = vsel %vm6979_vm3, %v468_v18, 0.0  ;;  %15997 = vst [vmem:[#allocation5_spill] sm:$0xff] %v15996_v24  ;;  %v500_v25 = vsel %vm15495_vm2, %v487_v13, %v488_v19  ;;  %v467_v27 = vsel %vm15490_vm0, %v452_v11, %v453_v20 }
  0x18   : > { %679 = vperm.xlu2 %6873, %v509_v21   ;;  %534 = vperm.xlu0 %6872, %v475_v22   ;;  %16000 = vst [vmem:[#allocation6_spill] sm:$0xff] %v15999_v26  ;;  %v510_v29 = vsel %vm7001_vm4, %v500_v25, 0.0  ;;  %v476_v30 = vsel %vm7007_vm5, %v467_v27, 0.0  ;;  %v489_v32 = vrot.slane %v398_v28, 1  ;;  %v454_v33 = vrot.slane %v397_v15, 7 }
  0x19   : > { %vm7019_vm6 = vcmp.eq.s32.totalorder %v420_v31, 0  ;;  %vm7025_vm7 = vcmp.eq.s32.totalorder %v420_v31, 1  ;;  %v490_v43 = vrot.slane %v7032_v39, 1  ;;  %v455_v44 = vrot.slane %v398_v28, 7 }
  0x1a   : > { %v16002_v35 = vsel %vm7019_vm6, 4294967295, %v16001_v35  ;;  %v499_v36 = vsel %vm15495_vm2, %v488_v19, %v489_v32  ;;  %v16005_v37 = vsel %vm7025_vm7, 4294967295, %v16004_v37  ;;  %v466_v38 = vsel %vm15490_vm0, %v453_v20, %v454_v33 }
  0x1b   : > { %606 = vperm.xlu1 %6871, %v396_v7   ;;  %16003 = vst [vmem:[#allocation7_spill] sm:$0xff] %v16002_v35  ;;  %v511_v40 = vsel %vm7019_vm6, %v499_v36, 0.0  ;;  %v477_v41 = vsel %vm7025_vm7, %v466_v38, 0.0  ;;  %vm7040_vm8 = vcmp.eq.s32.totalorder %v421_v42, 0  ;;  %v498_v47 = vsel %vm15495_vm2, %v489_v32, %v490_v43 }
  0x1c   : > { %16006 = vst [vmem:[#allocation8_spill] sm:$0xff] %v16005_v37  ;;  %v16008_v46 = vsel %vm7040_vm8, 4294967295, %v16007_v46  ;;  %vm7046_vm9 = vcmp.eq.s32.totalorder %v421_v42, 1  ;;  %v465_v49 = vsel %vm15490_vm0, %v454_v33, %v455_v44  ;;  %v512_v51 = vsel %vm7040_vm8, %v498_v47, 0.0 }
  0x1d   : > { %16009 = vst [vmem:[#allocation9_spill] sm:$0xff] %v16008_v46  ;;  %v16011_v48 = vsel %vm7046_vm9, 4294967295, %v16010_v48  ;;  %v478_v52 = vsel %vm7046_vm9, %v465_v49, 0.0  ;;  %v491_v54 = vrot.slane %v7053_v50, 1  ;;  %v456_v55 = vrot.slane %v7032_v39, 7 }
  0x1e   : > { %16012 = vst [vmem:[#allocation10_spill] sm:$0xff] %v16011_v48  ;;  %vm7061_vm10 = vcmp.eq.s32.totalorder %v422_v53, 0  ;;  %vm7069_vm11 = vcmp.eq.s32.totalorder %v422_v53, 1  ;;  %v449_v1 = vrot.slane %v7076_v60, 7  ;;  %v483_v3 = vrot.slane %v7076_v60, 1 }
  0x1f   : > { %v16014_v56 = vsel %vm7061_vm10, 4294967295, %v16013_v56  ;;  %v497_v57 = vsel %vm15495_vm2, %v490_v43, %v491_v54  ;;  %v16017_v58 = vsel %vm7069_vm11, 4294967295, %v16016_v58  ;;  %v464_v59 = vsel %vm15490_vm0, %v455_v44, %v456_v55 }
  0x20   : > { %684 = vperm.xlu2 %6873, %v510_v29   ;;  %539 = vperm.xlu0 %6872, %v476_v30   ;;  %16015 = vst [vmem:[#allocation11_spill] sm:$0xff] %v16014_v56  ;;  %v513_v63 = vsel %vm7061_vm10, %v497_v57, 0.0  ;;  %v479_v0 = vsel %vm7069_vm11, %v464_v59, 0.0  ;;  %v415_v4 = vand.u32 1, %v6954_v2  ;;  %v484_v5 = vrot.slane %v393_v61, 1 }
  0x21   : > { %16018 = vst [vmem:[#allocation12_spill] sm:$0xff] %v16017_v58  ;;  %v459_v7 = vrot.slane %v7080_v62, 7  ;;  %v405_v11 = vadd.s32 8, %v6954_v2  ;;  %v16019_v13 = vmov 0  ;;  %v16022_v16 = vmov 0  ;;  %v1592_v58 = vld [vmem:[%s15483_s5 + $0x3f8] sm:$0xff] }
  0x22   : > { %vm7092_vm12 = vcmp.eq.s32.totalorder %v415_v4, 0  ;;  %vm7098_vm13 = vcmp.eq.s32.totalorder %v415_v4, 1  ;;  %v485_v21 = vrot.slane %v6977_v9, 1  ;;  %v450_v22 = vrot.slane %v393_v61, 7 }
  0x23   : > { %611 = vperm.xlu1 %6871, %v397_v15   ;;  %v16020_v13 = vsel %vm7092_vm12, 4294967295, %v16019_v13  ;;  %v504_v15 = vsel %vm15495_vm2, %v483_v3, %v484_v5  ;;  %v16023_v16 = vsel %vm7098_vm13, 4294967295, %v16022_v16  ;;  %v471_v17 = vsel %vm15490_vm0, %v459_v7, %v449_v1 }
  0x24   : > { %16021 = vst [vmem:[#allocation13_spill] sm:$0xff] %v16020_v13  ;;  %v506_v18 = vsel %vm7092_vm12, %v504_v15, 0.0  ;;  %v472_v19 = vsel %vm7098_vm13, %v471_v17, 0.0  ;;  %v416_v20 = vand.u32 1, %v405_v11  ;;  %v16025_v23 = vmov 0  ;;  %v913_v17 = vld [vmem:[%s15481_s3 + $0xd0] sm:$0xff] }
  0x25   : > { %16024 = vst [vmem:[#allocation14_spill] sm:$0xff] %v16023_v16  ;;  %v503_v25 = vsel %vm15495_vm2, %v484_v5, %v485_v21  ;;  %v16028_v27 = vmov 0  ;;  %v406_v29 = vadd.s32 16, %v6954_v2  ;;  %v502_v33 = vsel %vm15495_vm2, %v485_v21, %v486_v12  ;;  %v905_v21 = vld [vmem:[%s15481_s3 + $0x90] sm:$0xff] }
  0x26   : > { %vm7110_vm14 = vcmp.eq.s32.totalorder %v416_v20, 0  ;;  %vm7116_vm15 = vcmp.eq.s32.totalorder %v416_v20, 1  ;;  %v412_v34 = vadd.s32 64, %v6954_v2  ;;  %v16031_v36 = vmov 0  ;;  %v907_v20 = vld [vmem:[%s15481_s3 + $0xa0] sm:$0xff] }
  0x27   : > { %v16026_v23 = vsel %vm7110_vm14, 4294967295, %v16025_v23  ;;  %v16029_v27 = vsel %vm7116_vm15, 4294967295, %v16028_v27  ;;  %v507_v30 = vsel %vm7110_vm14, %v503_v25, 0.0  ;;  %v417_v32 = vand.u32 1, %v406_v29  ;;  %v901_v25 = vld [vmem:[%s15481_s3 + $0x70] sm:$0xff] }
  0x28   : > { %689 = vperm.xlu2 %6873, %v511_v40   ;;  %544 = vperm.xlu0 %6872, %v477_v41   ;;  %16027 = vst [vmem:[#allocation15_spill] sm:$0xff] %v16026_v23  ;;  %v16034_v38 = vmov 0  ;;  %vm16037_vm8 = vcmp.lt.s32.totalorder %v6954_v2, 1  ;;  %v414_v6 = vadd.s32 80, %v6954_v2  ;;  %v401_v40 = vld [vmem:[%s6964_s23 + $0x48] sm:$0xff]  ;;  %v423_v42 = vand.u32 1, %v412_v34 }
  0x29   : > { %16030 = vst [vmem:[#allocation16_spill] sm:$0xff] %v16029_v27  ;;  %vm7136_vm10 = vcmp.eq.s32.totalorder %v417_v32, 1  ;;  %v457_v43 = vrot.slane %v7053_v50, 7  ;;  %v458_v45 = vrot.slane %v401_v40, 7  ;;  %v16041_v47 = vmov 0  ;;  %vm16044_vm4 = vmmov %vm16037_vm8  ;;  %v889_v34 = vld [vmem:[%s15481_s3 + $0x10] sm:$0xff] }
  0x2a   : > { %v16035_v38 = vsel %vm7136_vm10, 4294967295, %v16034_v38  ;;  %v425_v44 = vand.u32 1, %v414_v6  ;;  %vm7152_vm2 = vcmp.eq.s32.totalorder %v423_v42, 1  ;;  %v16045_v57 = vmov 0  ;;  %v887_v6 = vld [vmem:[%s15481_s3] sm:$0xff]  ;;  %v1638_v27 = vld [vmem:[%s15483_s5 + $0x568] sm:$0xff] }
  0x2b   : > { %616 = vperm.xlu1 %6871, %v398_v28   ;;  %v470_v28 = vsel %vm15490_vm0, %v449_v1, %v450_v22  ;;  %vm7132_vm0 = vcmp.eq.s32.totalorder %v417_v32, 0  ;;  %16036 = vst [vmem:[#allocation18_spill] sm:$0xff] %v16035_v38  ;;  %v461_v49 = vsel %vm16044_vm4, %v458_v45, %v459_v7  ;;  %v492_v59 = vrot.slane %v401_v40, 1  ;;  %v917_v7 = vld [vmem:[%s15481_s3 + $0xf0] sm:$0xff] }
  0x2c   : > { %v473_v31 = vsel %vm7116_vm15, %v470_v28, 0.0  ;;  %v16032_v36 = vsel %vm7132_vm0, 4294967295, %v16031_v36  ;;  %v508_v12 = vsel %vm7132_vm0, %v502_v33, 0.0  ;;  %vm7158_vm6 = vcmp.eq.s32.totalorder %v425_v44, 1  ;;  %6814 = vmatpush.msra.mxu1 %v917_v7  ;;  %6815 = vmatpush.msra.mxu2 %v917_v7  ;;  %v899_v28 = vld [vmem:[%s15481_s3 + $0x60] sm:$0xff]  ;;  %v893_v32 = vld [vmem:[%s15481_s3 + $0x30] sm:$0xff] }
  0x2d   : > { %16033 = vst [vmem:[#allocation17_spill] sm:$0xff] %v16032_v36  ;;  %v16042_v47 = vsel %vm7158_vm6, 4294967295, %v16041_v47  ;;  %v482_v53 = vsel %vm7158_vm6, %v461_v49, 0.0  ;;  %vm7170_vm1 = vcmp.eq.s32.totalorder %v425_v44, 0  ;;  %vm7178_vm4 = vcmp.eq.s32.totalorder %v423_v42, 0  ;;  %989 = vmatpush.msra.mxu0 %v917_v7  ;;  %v891_v33 = vld [vmem:[%s15481_s3 + $0x20] sm:$0xff] }
  0x2e   : > { %16043 = vst [vmem:[#allocation20_spill] sm:$0xff] %v16042_v47  ;;  %v16046_v57 = vsel %vm7170_vm1, 4294967295, %v16045_v57  ;;  %v16057_v5 = vmov 0  ;;  %v945_v44 = vld [vmem:[%s15481_s3 + $0x1d0] sm:$0xff]  ;;  %v943_v49 = vld [vmem:[%s15481_s3 + $0x1c0] sm:$0xff] }
  0x2f   : > { %16047 = vst [vmem:[#allocation21_spill] sm:$0xff] %v16046_v57  ;;  %v935_v7 = vld [vmem:[%s15481_s3 + $0x180] sm:$0xff] }
  0x30   : > { %694 = vperm.xlu2 %6873, %v512_v51   ;;  %549 = vperm.xlu0 %6872, %v478_v52   ;;  %v493_v51 = vrot.slane %v7080_v62, 1 }
  0x33   : > { %621 = vperm.xlu1 %6871, %v7032_v39   ;;  %v469_v39 = vsel %vm16037_vm8, %v450_v22, %v451_v14  ;;  %v16038_v14 = vmov 0  ;;  %v903_v22 = vld [vmem:[%s15481_s3 + $0x80] sm:$0xff] }
  0x34   : > { %v474_v41 = vsel %vm7136_vm10, %v469_v39, 0.0  ;;  %v16039_v14 = vsel %vm7152_vm2, 4294967295, %v16038_v14 }
  0x35   : > { %16040 = vst [vmem:[#allocation19_spill] sm:$0xff] %v16039_v14  ;;  %v1646_v14 = vld [vmem:[%s15483_s5 + $0x5a8] sm:$0xff] }
  0x38   : > { %699 = vperm.xlu2 %6873, %v513_v63   ;;  %554 = vperm.xlu0 %6872, %v479_v0   ;;  %v413_v63 = vadd.s32 72, %v6954_v2 }
  0x3a   : > { %v424_v1 = vand.u32 1, %v413_v63 }
  0x3b   : > { %586 = vperm.xlu1 %6871, %v7076_v60  }
  0x3c   : > { %vm7196_vm14 = vcmp.eq.s32.totalorder %v424_v1, 1 }
  0x3d   : > { %v16058_v5 = vsel %vm7196_vm14, 4294967295, %v16057_v5 }
  0x3e   : > { %16059 = vst [vmem:[#allocation24_spill] sm:$0xff] %v16058_v5 }
  0x40   : > { %664 = vperm.xlu2 %6873, %v506_v18   ;;  %519 = vperm.xlu0 %6872, %v472_v19   ;;  %v911_v18 = vld [vmem:[%s15481_s3 + $0xc0] sm:$0xff]  ;;  %v909_v19 = vld [vmem:[%s15481_s3 + $0xb0] sm:$0xff] }
  0x43   : > { %591 = vperm.xlu1 %6871, %v393_v61   ;;  %v16049_v61 = vmov 0 }
  0x44   : > { %v16050_v61 = vsel %vm7178_vm4, 4294967295, %v16049_v61 }
  0x45   : > { %16051 = vst [vmem:[#allocation22_spill] sm:$0xff] %v16050_v61 }
  0x48   : > { %669 = vperm.xlu2 %6873, %v507_v30   ;;  %524 = vperm.xlu0 %6872, %v473_v31   ;;  %v897_v30 = vld [vmem:[%s15481_s3 + $0x50] sm:$0xff]  ;;  %v895_v31 = vld [vmem:[%s15481_s3 + $0x40] sm:$0xff] }
  0x4b   : > { %596 = vperm.xlu1 %6871, %v6977_v9   ;;  %v463_v9 = vsel %vm16037_vm8, %v456_v55, %v457_v43  ;;  %vm16048_vm8 = vcmp.lt.s32.totalorder %v6954_v2, 7 }
  0x4c   : > { %v480_v52 = vsel %vm7152_vm2, %v463_v9, 0.0  ;;  %v505_v55 = vsel %vm16048_vm8, %v493_v51, %v483_v3  ;;  %vm16052_vm0 = vmmov %vm16048_vm8  ;;  %vm7190_vm8 = vcmp.eq.s32.totalorder %v424_v1, 0  ;;  %v16053_v3 = vmov 0  ;;  %v937_v1 = vld [vmem:[%s15481_s3 + $0x190] sm:$0xff] }
  0x4d   : > { %v516_v60 = vsel %vm7170_vm1, %v505_v55, 0.0  ;;  %v16054_v3 = vsel %vm7190_vm8, 4294967295, %v16053_v3  ;;  %vm16056_vm1 = vmmov %vm16052_vm0  ;;  %v941_v55 = vld [vmem:[%s15481_s3 + $0x1b0] sm:$0xff] }
  0x4e   : > { %16055 = vst [vmem:[#allocation23_spill] sm:$0xff] %v16054_v3  ;;  %v495_v4 = vsel %vm16056_vm1, %v492_v59, %v493_v51 }
  0x4f   : > { %v515_v11 = vsel %vm7190_vm8, %v495_v4, 0.0  ;;  %v7290_v4 = vld [vmem:[%s15480_s2] ss:$0 sm:$0xff] }
  0x50   : > { %674 = vperm.xlu2 %6873, %v508_v12   ;;  %529 = vperm.xlu0 %6872, %v474_v41   ;;  %v949_v12 = vld [vmem:[%s15481_s3 + $0x1f0] sm:$0xff]  ;;  %v947_v41 = vld [vmem:[%s15481_s3 + $0x1e0] sm:$0xff] }
  0x53   : > { %636 = vperm.xlu1 %6871, %v7080_v62   ;;  %v496_v62 = vsel %vm16052_vm0, %v491_v54, %v492_v59  ;;  %vm16060_vm0 = vcmp.lt.s32.totalorder %v6954_v2, 1 }
  0x54   : > { %v514_v0 = vsel %vm7178_vm4, %v496_v62, 0.0  ;;  %v462_v54 = vsel %vm16060_vm0, %v457_v43, %v458_v45  ;;  %v939_v62 = vld [vmem:[%s15481_s3 + $0x1a0] sm:$0xff]  ;;  %vm16061_vm1 = vmmov %vm16060_vm0 }
  0x55   : > { %v481_v15 = vsel %vm7196_vm14, %v462_v54, 0.0 }
  0x58   : > { %559 = vperm.xlu2 %6873, %v480_v52   ;;  %569 = vperm.xlu0 %6872, %v482_v53  }
  0x5b   : > { %714 = vperm.xlu1 %6871, %v516_v60  }
  0x60   : > { %704 = vperm.xlu2 %6873, %v514_v0   ;;  %626 = vperm.xlu0 %6872, %v7053_v50   ;;  %v915_v50 = vld [vmem:[%s15481_s3 + $0xe0] sm:$0xff] }
  0x61   : > { %6816 = vmatpush.msra.mxu1 %v915_v50  ;;  %6817 = vmatpush.msra.mxu2 %v915_v50 }
  0x62   : > { %990 = vmatpush.msra.mxu0 %v915_v50 }
  0x63   : > { %631 = vperm.xlu1 %6871, %v401_v40   ;;  %6818 = vmatpush.msra.mxu1 %v913_v17  ;;  %v448_v40 = vld [vmem:[%s15479_s1] sm:$0x7] }
  0x64   : > { %6819 = vmatpush.msra.mxu2 %v913_v17  ;;  %991 = vmatpush.msra.mxu0 %v913_v17  ;;  %v7263_v42 = vperm.slane %v448_v40, 1  ;;  %v7268_v45 = vperm.slane %v448_v40, 2  ;;  %v7270_v9 = vperm.slane %v448_v40, 0 }
  0x65   : > { %6820 = vmatpush.msra.mxu1 %v911_v18 }
  0x66   : > { %6821 = vmatpush.msra.mxu2 %v911_v18  ;;  %992 = vmatpush.msra.mxu0 %v911_v18 }
  0x67   : > { %6822 = vmatpush.msra.mxu1 %v909_v19 }
  0x68   : > { %709 = vperm.xlu2 %6873, %v515_v11   ;;  %564 = vperm.xlu0 %6872, %v481_v15   ;;  %v933_v11 = vld [vmem:[%s15481_s3 + $0x170] sm:$0xff] }
  0x69   : > { %6823 = vmatpush.msra.mxu2 %v909_v19  ;;  %6824 = vmatpush.msra.mxu1 %v907_v20 }
  0x6a   : > { %993 = vmatpush.msra.mxu0 %v909_v19 }
  0x6b   : > { %6825 = vmatpush.msra.mxu2 %v907_v20  ;;  %6826 = vmatpush.msra.mxu1 %v905_v21 }
  0x6c   : > { %994 = vmatpush.msra.mxu0 %v907_v20  ;;  %v931_v20 = vld [vmem:[%s15481_s3 + $0x160] sm:$0xff] }
  0x6d   : > { %6827 = vmatpush.msra.mxu2 %v905_v21  ;;  %6828 = vmatpush.msra.mxu1 %v903_v22 }
  0x6e   : > { %995 = vmatpush.msra.mxu0 %v905_v21 }
  0x6f   : > { %6829 = vmatpush.msra.mxu2 %v903_v22  ;;  %6830 = vmatpush.msra.mxu1 %v901_v25 }
  0x70   : > { %996 = vmatpush.msra.mxu0 %v903_v22 }
  0x71   : > { %6831 = vmatpush.msra.mxu2 %v901_v25  ;;  %6832 = vmatpush.msra.mxu1 %v899_v28 }
  0x72   : > { %997 = vmatpush.msra.mxu0 %v901_v25  ;;  %v680_v29 = vpop.permute.xlu2 %679 }
  0x73   : > { %6833 = vmatpush.msra.mxu2 %v899_v28  ;;  %6834 = vmatpush.msra.mxu1 %v897_v30  ;;  %v721_v59 = vmul.f32 %v7268_v45, %v680_v29 }
  0x74   : > { %998 = vmatpush.msra.mxu0 %v899_v28  ;;  %v929_v28 = vld [vmem:[%s15481_s3 + $0x150] sm:$0xff] }
  0x75   : > { %6835 = vmatpush.msra.mxu2 %v897_v30  ;;  %6836 = vmatpush.msra.mxu1 %v895_v31 }
  0x76   : > { %999 = vmatpush.msra.mxu0 %v897_v30 }
  0x77   : > { %6837 = vmatpush.msra.mxu2 %v895_v31  ;;  %6838 = vmatpush.msra.mxu1 %v893_v32 }
  0x78   : > { %1000 = vmatpush.msra.mxu0 %v895_v31  ;;  %v927_v31 = vld [vmem:[%s15481_s3 + $0x140] sm:$0xff] }
  0x79   : > { %6839 = vmatpush.msra.mxu2 %v893_v32  ;;  %6840 = vmatpush.msra.mxu1 %v891_v33 }
  0x7a   : > { %1001 = vmatpush.msra.mxu0 %v893_v32  ;;  %v685_v39 = vpop.permute.xlu2 %684 }
  0x7b   : > { %6841 = vmatpush.msra.mxu2 %v891_v33  ;;  %6842 = vmatpush.msra.mxu1 %v889_v34  ;;  %v722_v21 = vmul.f32 %v7268_v45, %v685_v39 }
  0x7c   : > { %1002 = vmatpush.msra.mxu0 %v891_v33 }
  0x7d   : > { %6843 = vmatpush.msra.mxu2 %v889_v34  ;;  %6844 = vmatpush.msra.mxu1 %v887_v6 }
  0x7e   : > { %1003 = vmatpush.msra.mxu0 %v889_v34  ;;  %v925_v34 = vld [vmem:[%s15481_s3 + $0x130] sm:$0xff] }
  0x7f   : > { %6845 = vmatpush.msra.mxu2 %v887_v6  ;;  %1039 = vmatpush.msrb.mxu1 %v949_v12 }
  0x80   : > { %1004 = vmatpush.msra.mxu0 %v887_v6 }
  0x81   : > { %1040 = vmatpush.msrb.mxu1 %v947_v41  ;;  %v923_v41 = vld [vmem:[%s15481_s3 + $0x120] sm:$0xff] }
  0x82   : > { %v690_v52 = vpop.permute.xlu2 %689 }
  0x83   : > { %1041 = vmatpush.msrb.mxu1 %v945_v44  ;;  %v723_v44 = vmul.f32 %v7268_v45, %v690_v52 }
  0x85   : > { %v602_v43 = vpop.permute.xlu1 %601  ;;  %1042 = vmatpush.msrb.mxu1 %v943_v49 }
  0x86   : > { %v643_v51 = vmul.f32 %v7263_v42, %v602_v43  ;;  %v918_v43 = vld [vmem:[%s15481_s3 + $0xf8] sm:$0xff] }
  0x87   : > { %1043 = vmatpush.msrb.mxu1 %v941_v55  ;;  %1139 = vmatpush.msra.mxu3 %v918_v43 }
  0x89   : > { %1044 = vmatpush.msrb.mxu1 %v939_v62 }
  0x8a   : > { %v535_v53 = vpop.permute.xlu0 %534  ;;  %v695_v19 = vpop.permute.xlu2 %694 }
  0x8b   : > { %v576_v60 = vmul.f32 %v7270_v9, %v535_v53  ;;  %1045 = vmatpush.msrb.mxu1 %v937_v1  ;;  %v914_v1 = vld [vmem:[%s15481_s3 + $0xd8] sm:$0xff] }
  0x8d   : > { %v654_v63 = vadd.f32 %v643_v51, %v576_v60  ;;  %v607_v0 = vpop.permute.xlu1 %606  ;;  %1046 = vmatpush.msrb.mxu1 %v935_v7  ;;  %v916_v60 = vld [vmem:[%s15481_s3 + $0xe8] sm:$0xff] }
  0x8e   : > { %v644_v17 = vmul.f32 %v7263_v42, %v607_v0  ;;  %1140 = vmatpush.msra.mxu3 %v916_v60  ;;  %v919_v0 = vld [vmem:[%s15481_s3 + $0x100] sm:$0xff] }
  0x8f   : > { %v732_v54 = vadd.f32 %v721_v59, %v654_v63  ;;  %1047 = vmatpush.msrb.mxu1 %v933_v11  ;;  %v921_v59 = vld [vmem:[%s15481_s3 + $0x110] sm:$0xff]  ;;  %v912_v11 = vld [vmem:[%s15481_s3 + $0xc8] sm:$0xff] }
  0x90   : > { %1141 = vmatpush.msra.mxu3 %v914_v1  ;;  %v900_v1 = vld [vmem:[%s15481_s3 + $0x68] sm:$0xff] }
  0x91   : > { %v747_v15 = vadd.f32 %v7290_v4, %v732_v54  ;;  %1048 = vmatpush.msrb.mxu1 %v931_v20  ;;  %v982_v20 = vld [vmem:[%s15481_s3 + $0x2f8] sm:$0xff] }
  0x92   : > { %v540_v50 = vpop.permute.xlu0 %539  ;;  %v700_v53 = vpop.permute.xlu2 %699  ;;  %1142 = vmatpush.msra.mxu3 %v912_v11 }
  0x93   : > { %v577_v18 = vmul.f32 %v7270_v9, %v540_v50  ;;  %v758_v29 = vmul.f32 0.1, %v747_v15  ;;  %1049 = vmatpush.msrb.mxu1 %v929_v28 }
  0x95   : > { %v655_v22 = vadd.f32 %v644_v17, %v577_v18  ;;  %v612_v25 = vpop.permute.xlu1 %611  ;;  %1050 = vmatpush.msrb.mxu1 %v927_v31  ;;  %v7315_v39 = vmax.f32 %v747_v15, %v758_v29 }
  0x96   : > { %v645_v40 = vmul.f32 %v7263_v42, %v612_v25 }
  0x97   : > { %v733_v30 = vadd.f32 %v722_v21, %v655_v22  ;;  %1051 = vmatpush.msrb.mxu1 %v925_v34  ;;  %v780_v63 = vrot.slane %v7315_v39, 7  ;;  %v910_v21 = vld [vmem:[%s15481_s3 + $0xb8] sm:$0xff]  ;;  %v724_v22 = vmul.f32 %v7268_v45, %v695_v19 }
  0x98   : > { %1143 = vmatpush.msra.mxu3 %v910_v21  ;;  %v906_v34 = vld [vmem:[%s15481_s3 + $0x98] sm:$0xff] }
  0x99   : > { %v748_v32 = vadd.f32 %v7290_v4, %v733_v30  ;;  %1052 = vmatpush.msrb.mxu1 %v923_v41  ;;  %v908_v30 = vld [vmem:[%s15481_s3 + $0xa8] sm:$0xff] }
  0x9a   : > { %v545_v33 = vpop.permute.xlu0 %544  ;;  %1144 = vmatpush.msra.mxu3 %v908_v30 }
  0x9b   : > { %v759_v6 = vmul.f32 0.1, %v748_v32  ;;  %v578_v12 = vmul.f32 %v7270_v9, %v545_v33  ;;  %1053 = vmatpush.msrb.mxu1 %v921_v59  ;;  %v665_v33 = vpop.permute.xlu2 %664  ;;  %v725_v59 = vmul.f32 %v7268_v45, %v700_v53  ;;  %v898_v53 = vld [vmem:[%s15481_s3 + $0x58] sm:$0xff] }
  0x9c   : > { %1145 = vmatpush.msra.mxu3 %v906_v34  ;;  %v718_v30 = vmul.f32 %v7268_v45, %v665_v33 }
  0x9d   : > { %v7326_v49 = vmax.f32 %v748_v32, %v759_v6  ;;  %v656_v51 = vadd.f32 %v645_v40, %v578_v12  ;;  %v617_v55 = vpop.permute.xlu1 %616  ;;  %1054 = vmatpush.msrb.mxu1 %v919_v0  ;;  %v904_v12 = vld [vmem:[%s15481_s3 + $0x88] sm:$0xff] }
  0x9e   : > { %v646_v17 = vmul.f32 %v7263_v42, %v617_v55  ;;  %1146 = vmatpush.msra.mxu3 %v904_v12  ;;  %v902_v55 = vld [vmem:[%s15481_s3 + $0x78] sm:$0xff] }
  0x9f   : > { %v734_v62 = vadd.f32 %v723_v44, %v656_v51  ;;  %v781_v52 = vrot.slane %v7326_v49, 7  ;;  %v980_v51 = vld [vmem:[%s15481_s3 + $0x2e8] sm:$0xff] }
  0xa0   : > { %1147 = vmatpush.msra.mxu3 %v902_v55  ;;  %v888_v55 = vld [vmem:[%s15481_s3 + $0x8] sm:$0xff] }
  0xa1   : > { %v749_v54 = vadd.f32 %v7290_v4, %v734_v62  ;;  %v7347_v7 = vsel %vm16061_vm1, %v780_v63, %v781_v52  ;;  %vm16062_vm1 = vmmov %vm16060_vm0 }
  0xa2   : > { %6309 = vmatmul.msk.f32.vlgmr.msra.gmra.mxu1 %vm7007_vm5, %v7347_v7  ;;  %v550_v50 = vpop.permute.xlu0 %549  ;;  %1148 = vmatpush.msra.mxu3 %v900_v1  ;;  %v979_v1 = vld [vmem:[%s15481_s3 + $0x2e0] sm:$0xff] }
  0xa3   : > { %v760_v15 = vmul.f32 0.1, %v749_v54  ;;  %v579_v18 = vmul.f32 %v7270_v9, %v550_v50  ;;  %1239 = vmatpush.msra.mxu1 %v982_v20  ;;  %v896_v20 = vld [vmem:[%s15481_s3 + $0x48] sm:$0xff] }
  0xa4   : > { %1149 = vmatpush.msra.mxu3 %v898_v53 }
  0xa5   : > { %v7364_v25 = vmax.f32 %v749_v54, %v760_v15  ;;  %v657_v28 = vadd.f32 %v646_v17, %v579_v18  ;;  %v622_v29 = vpop.permute.xlu1 %621  ;;  %1240 = vmatpush.msra.mxu1 %v980_v51  ;;  %v670_v17 = vpop.permute.xlu2 %669  ;;  %v981_v51 = vld [vmem:[%s15481_s3 + $0x2f0] sm:$0xff] }
  0xa6   : > { %v647_v43 = vmul.f32 %v7263_v42, %v622_v29  ;;  %1150 = vmatpush.msra.mxu3 %v896_v20  ;;  %v894_v29 = vld [vmem:[%s15481_s3 + $0x38] sm:$0xff]  ;;  %1089 = vmatpush.msrb.mxu2 %v981_v51  ;;  %v971_v51 = vld [vmem:[%s15481_s3 + $0x2a0] sm:$0xff] }
  0xa7   : > { %v735_v31 = vadd.f32 %v724_v22, %v657_v28  ;;  %v782_v32 = vrot.slane %v7364_v25, 7 }
  0xa8   : > { %1151 = vmatpush.msra.mxu3 %v894_v29  ;;  %1090 = vmatpush.msrb.mxu2 %v979_v1  ;;  %v975_v29 = vld [vmem:[%s15481_s3 + $0x2c0] sm:$0xff]  ;;  %v970_v1 = vld [vmem:[%s15481_s3 + $0x298] sm:$0xff] }
  0xa9   : > { %v750_v19 = vadd.f32 %v7290_v4, %v735_v31  ;;  %v7376_v6 = vsel %vm16060_vm0, %v781_v52, %v782_v32  ;;  %v978_v52 = vld [vmem:[%s15481_s3 + $0x2d8] sm:$0xff] }
  0xaa   : > { %6310 = vmatmul.msk.f32.gmra.mxu1 %vm7025_vm7, %v7376_v6  ;;  %v555_v40 = vpop.permute.xlu0 %554 }
  0xab   : > { %v761_v41 = vmul.f32 0.1, %v750_v19  ;;  %v580_v44 = vmul.f32 %v7270_v9, %v555_v40  ;;  %1241 = vmatpush.msra.mxu1 %v978_v52 }
  0xad   : > { %v7393_v60 = vmax.f32 %v750_v19, %v761_v41  ;;  %v658_v62 = vadd.f32 %v647_v43, %v580_v44  ;;  %v587_v0 = vpop.permute.xlu1 %586  ;;  %v892_v19 = vld [vmem:[%s15481_s3 + $0x28] sm:$0xff]  ;;  %v890_v41 = vld [vmem:[%s15481_s3 + $0x18] sm:$0xff]  ;;  %v675_v52 = vpop.permute.xlu2 %674 }
  0xae   : > { %v640_v22 = vmul.f32 %v7263_v42, %v587_v0  ;;  %1152 = vmatpush.msra.mxu3 %v892_v19  ;;  %v973_v19 = vld [vmem:[%s15481_s3 + $0x2b0] sm:$0xff] }
  0xaf   : > { %v736_v54 = vadd.f32 %v725_v59, %v658_v62  ;;  %v783_v50 = vrot.slane %v7393_v60, 7 }
  0xb0   : > { %1153 = vmatpush.msra.mxu3 %v890_v41 }
  0xb1   : > { %v751_v11 = vadd.f32 %v7290_v4, %v736_v54  ;;  %v7408_v15 = vsel %vm16062_vm1, %v782_v32, %v783_v50  ;;  %v950_v54 = vld [vmem:[%s15481_s3 + $0x1f8] sm:$0xff]  ;;  %vm16063_vm1 = vmmov %vm16060_vm0 }
  0xb2   : > { %6311 = vmatmul.msk.f32.gmra.mxu1 %vm7046_vm9, %v7408_v15  ;;  %v520_v18 = vpop.permute.xlu0 %519  ;;  %1154 = vmatpush.msra.mxu3 %v888_v55  ;;  %v942_v55 = vld [vmem:[%s15481_s3 + $0x1b8] sm:$0xff] }
  0xb3   : > { %v762_v21 = vmul.f32 0.1, %v751_v11  ;;  %v573_v28 = vmul.f32 %v7270_v9, %v520_v18  ;;  %v974_v18 = vld [vmem:[%s15481_s3 + $0x2b8] sm:$0xff]  ;;  %1189 = vmatpush.msrb.mxu0 %v950_v54  ;;  %v969_v54 = vld [vmem:[%s15481_s3 + $0x290] sm:$0xff] }
  0xb5   : > { %v7422_v31 = vmax.f32 %v751_v11, %v762_v21  ;;  %v651_v32 = vadd.f32 %v640_v22, %v573_v28  ;;  %v592_v34 = vpop.permute.xlu1 %591  ;;  %v976_v11 = vld [vmem:[%s15481_s3 + $0x2c8] sm:$0xff]  ;;  %v977_v21 = vld [vmem:[%s15481_s3 + $0x2d0] sm:$0xff] }
  0xb6   : > { %v641_v59 = vmul.f32 %v7263_v42, %v592_v34  ;;  %1242 = vmatpush.msra.mxu1 %v976_v11  ;;  %1091 = vmatpush.msrb.mxu2 %v977_v21  ;;  %v967_v11 = vld [vmem:[%s15481_s3 + $0x280] sm:$0xff] }
  0xb7   : > { %v729_v40 = vadd.f32 %v718_v30, %v651_v32  ;;  %v784_v12 = vrot.slane %v7422_v31, 7  ;;  %v946_v30 = vld [vmem:[%s15481_s3 + $0x1d8] sm:$0xff] }
  0xb8   : > { %1243 = vmatpush.msra.mxu1 %v974_v18  ;;  %1092 = vmatpush.msrb.mxu2 %v975_v29  ;;  %v938_v18 = vld [vmem:[%s15481_s3 + $0x198] sm:$0xff] }
  0xb9   : > { %v744_v43 = vadd.f32 %v7290_v4, %v729_v40  ;;  %v7436_v33 = vsel %vm16060_vm0, %v783_v50, %v784_v12  ;;  %v719_v50 = vmul.f32 %v7268_v45, %v670_v17  ;;  %v948_v17 = vld [vmem:[%s15481_s3 + $0x1e8] sm:$0xff] }
  0xba   : > { %6312 = vmatmul.msk.f32.gmra.mxu1 %vm7069_vm11, %v7436_v33  ;;  %v525_v44 = vpop.permute.xlu0 %524  ;;  %1190 = vmatpush.msrb.mxu0 %v948_v17  ;;  %v944_v40 = vld [vmem:[%s15481_s3 + $0x1c8] sm:$0xff] }
  0xbb   : > { %v574_v62 = vmul.f32 %v7270_v9, %v525_v44  ;;  %v755_v0 = vmul.f32 0.1, %v744_v43  ;;  %1093 = vmatpush.msrb.mxu2 %v973_v19  ;;  %v968_v17 = vld [vmem:[%s15481_s3 + $0x288] sm:$0xff] }
  0xbc   : > { %1191 = vmatpush.msrb.mxu0 %v946_v30  ;;  %v965_v30 = vld [vmem:[%s15481_s3 + $0x270] sm:$0xff] }
  0xbd   : > { %v652_v53 = vadd.f32 %v641_v59, %v574_v62  ;;  %v597_v20 = vpop.permute.xlu1 %596  ;;  %v7468_v28 = vmax.f32 %v744_v43, %v755_v0  ;;  %v720_v59 = vmul.f32 %v7268_v45, %v675_v52  ;;  %v972_v0 = vld [vmem:[%s15481_s3 + $0x2a8] sm:$0xff]  ;;  %1094 = vmatpush.msrb.mxu2 %v971_v51  ;;  %v961_v51 = vld [vmem:[%s15481_s3 + $0x250] sm:$0xff] }
  0xbe   : > { %v642_v41 = vmul.f32 %v7263_v42, %v597_v20  ;;  %1192 = vmatpush.msrb.mxu0 %v944_v40  ;;  %1244 = vmatpush.msra.mxu1 %v972_v0  ;;  %v940_v52 = vld [vmem:[%s15481_s3 + $0x1a8] sm:$0xff]  ;;  %v963_v40 = vld [vmem:[%s15481_s3 + $0x260] sm:$0xff] }
  0xbf   : > { %v730_v22 = vadd.f32 %v719_v50, %v652_v53  ;;  %v560_v50 = vpop.permute.xlu2 %559  ;;  %1095 = vmatpush.msrb.mxu2 %v969_v54  ;;  %v930_v54 = vld [vmem:[%s15481_s3 + $0x158] sm:$0xff] }
  0xc0   : > { %1193 = vmatpush.msrb.mxu0 %v942_v55  ;;  %1245 = vmatpush.msra.mxu1 %v970_v1  ;;  %v932_v55 = vld [vmem:[%s15481_s3 + $0x168] sm:$0xff] }
  0xc1   : > { %v745_v32 = vadd.f32 %v7290_v4, %v730_v22  ;;  %1096 = vmatpush.msrb.mxu2 %v967_v11 }
  0xc2   : > { %1055 = vmatmul.f32.vlgmr.msrb.gmra.mxu1 %v7468_v28  ;;  %v530_v34 = vpop.permute.xlu0 %529  ;;  %1194 = vmatpush.msrb.mxu0 %v940_v52 }
  0xc3   : > { %v575_v43 = vmul.f32 %v7270_v9, %v530_v34  ;;  %v756_v44 = vmul.f32 0.1, %v745_v32  ;;  %1246 = vmatpush.msra.mxu1 %v968_v17  ;;  %1097 = vmatpush.msrb.mxu2 %v965_v30  ;;  %v928_v17 = vld [vmem:[%s15481_s3 + $0x148] sm:$0xff] }
  0xc4   : > { %1195 = vmatpush.msrb.mxu0 %v938_v18 }
  0xc5   : > { %v653_v62 = vadd.f32 %v642_v41, %v575_v43  ;;  %v637_v53 = vpop.permute.xlu1 %636  ;;  %v7511_v21 = vmax.f32 %v745_v32, %v756_v44  ;;  %v936_v32 = vld [vmem:[%s15481_s3 + $0x188] sm:$0xff]  ;;  %v934_v41 = vld [vmem:[%s15481_s3 + $0x178] sm:$0xff]  ;;  %1098 = vmatpush.msrb.mxu2 %v963_v40 }
  0xc6   : > { %1196 = vmatpush.msrb.mxu0 %v936_v32  ;;  %v966_v43 = vld [vmem:[%s15481_s3 + $0x278] sm:$0xff]  ;;  %v650_v44 = vmul.f32 %v7263_v42, %v637_v53  ;;  %v964_v32 = vld [vmem:[%s15481_s3 + $0x268] sm:$0xff] }
  0xc7   : > { %v731_v20 = vadd.f32 %v720_v59, %v653_v62  ;;  %1247 = vmatpush.msra.mxu1 %v966_v43  ;;  %v959_v62 = vld [vmem:[%s15481_s3 + $0x240] sm:$0xff]  ;;  %1099 = vmatpush.msrb.mxu2 %v961_v51  ;;  %v705_v53 = vpop.permute.xlu2 %704  ;;  %v953_v43 = vld [vmem:[%s15481_s3 + $0x210] sm:$0xff] }
  0xc8   : > { %1197 = vmatpush.msrb.mxu0 %v934_v41  ;;  %v951_v51 = vld [vmem:[%s15481_s3 + $0x200] sm:$0xff] }
  0xc9   : > { %v746_v22 = vadd.f32 %v7290_v4, %v731_v20  ;;  %1100 = vmatpush.msrb.mxu2 %v959_v62  ;;  %v957_v20 = vld [vmem:[%s15481_s3 + $0x230] sm:$0xff]  ;;  %1248 = vmatpush.msra.mxu1 %v964_v32 }
  0xca   : > { %1058 = vmatmul.f32.gmra.mxu1 %v7511_v21  ;;  %v570_v29 = vpop.permute.xlu0 %569  ;;  %1198 = vmatpush.msrb.mxu0 %v932_v55  ;;  %v962_v55 = vld [vmem:[%s15481_s3 + $0x258] sm:$0xff] }
  0xcb   : > { %v583_v34 = vmul.f32 %v7270_v9, %v570_v29  ;;  %v757_v19 = vmul.f32 0.1, %v746_v22  ;;  %v581_v29 = vmul.f32 %v7270_v9, %v560_v50  ;;  %1101 = vmatpush.msrb.mxu2 %v957_v20  ;;  %v726_v50 = vmul.f32 %v7268_v45, %v705_v53  ;;  %1249 = vmatpush.msra.mxu1 %v962_v55 }
  0xcc   : > { %1199 = vmatpush.msrb.mxu0 %v930_v54  ;;  %v777_v53 = vrot.slane %v7468_v28, 7 }
  0xcd   : > { %v715_v59 = vpop.permute.xlu1 %714  ;;  %v661_v0 = vadd.f32 %v650_v44, %v583_v34  ;;  %v7548_v52 = vmax.f32 %v746_v22, %v757_v19  ;;  %v955_v34 = vld [vmem:[%s15481_s3 + $0x220] sm:$0xff]  ;;  %v926_v19 = vld [vmem:[%s15481_s3 + $0x138] sm:$0xff]  ;;  %v924_v44 = vld [vmem:[%s15481_s3 + $0x128] sm:$0xff] }
  0xce   : > { %v728_v1 = vmul.f32 %v7268_v45, %v715_v59  ;;  %1200 = vmatpush.msrb.mxu0 %v928_v17  ;;  %1102 = vmatpush.msrb.mxu2 %v955_v34  ;;  %v920_v17 = vld [vmem:[%s15481_s3 + $0x108] sm:$0xff] }
  0xcf   : > { %v960_v34 = vld [vmem:[%s15481_s3 + $0x248] sm:$0xff] }
  0xd0   : > { %v739_v11 = vadd.f32 %v728_v1, %v661_v0  ;;  %1201 = vmatpush.msrb.mxu0 %v926_v19  ;;  %1103 = vmatpush.msrb.mxu2 %v953_v43  ;;  %v922_v0 = vld [vmem:[%s15481_s3 + $0x118] sm:$0xff] }
  0xd1   : > { %1250 = vmatpush.msra.mxu1 %v960_v34 }
  0xd2   : > { %1061 = vmatmul.f32.gmra.mxu1 %v7548_v52  ;;  %v627_v18 = vpop.permute.xlu0 %626  ;;  %v754_v22 = vadd.f32 %v7290_v4, %v739_v11  ;;  %1202 = vmatpush.msrb.mxu0 %v924_v44 }
  0xd3   : > { %v648_v30 = vmul.f32 %v7263_v42, %v627_v18  ;;  %1104 = vmatpush.msrb.mxu2 %v951_v51  ;;  %v710_v18 = vpop.permute.xlu2 %709 }
  0xd4   : > { %v765_v40 = vmul.f32 0.1, %v754_v22  ;;  %1203 = vmatpush.msrb.mxu0 %v922_v0  ;;  %v727_v19 = vmul.f32 %v7268_v45, %v710_v18 }
  0xd5   : > { %v659_v41 = vadd.f32 %v648_v30, %v581_v29  ;;  %v632_v1 = vpop.permute.xlu1 %631 }
  0xd6   : > { %v7582_v59 = vmax.f32 %v754_v22, %v765_v40  ;;  %v649_v22 = vmul.f32 %v7263_v42, %v632_v1  ;;  %1204 = vmatpush.msrb.mxu0 %v920_v17  ;;  %v956_v1 = vld [vmem:[%s15481_s3 + $0x228] sm:$0xff]  ;;  %v833_v17 = vrot.slane %v7511_v21, 1 }
  0xd7   : > { %v737_v62 = vadd.f32 %v726_v50, %v659_v41  ;;  %v778_v41 = vrot.slane %v7511_v21, 7 }
  0xd8   : > { %v787_v11 = vrot.slane %v7582_v59, 7 }
  0xd9   : > { %v752_v54 = vadd.f32 %v7290_v4, %v737_v62  ;;  %v779_v62 = vrot.slane %v7548_v52, 7 }
  0xda   : > { %1064 = vmatmul.f32.gmra.mxu1 %v7315_v39  ;;  %v565_v20 = vpop.permute.xlu0 %564  ;;  %v798_v32 = vsel %vm16063_vm1, %v787_v11, %v777_v53  ;;  %vm16064_vm1 = vmmov %vm16060_vm0 }
  0xdb   : > { %v763_v29 = vmul.f32 0.1, %v752_v54  ;;  %v582_v30 = vmul.f32 %v7270_v9, %v565_v20  ;;  %6305 = vmatmul.msk.f32.vlgmr.msra.gmra.mxu0 %vm7098_vm13, %v798_v32  ;;  %6327 = vmatmul.msk.f32.vlgmr.msra.gmra.mxu3 %vm7098_vm13, %v798_v32  ;;  %v797_v51 = vsel %vm16064_vm1, %v777_v53, %v778_v41  ;;  %vm16065_vm1 = vmmov %vm16060_vm0  ;;  %v954_v53 = vld [vmem:[%s15481_s3 + $0x218] sm:$0xff] }
  0xdd   : > { %v7606_v50 = vmax.f32 %v752_v54, %v763_v29  ;;  %v660_v42 = vadd.f32 %v649_v22, %v582_v30  ;;  %v796_v54 = vsel %vm16065_vm1, %v778_v41, %v779_v62  ;;  %vm16066_vm1 = vmmov %vm16060_vm0  ;;  %v832_v29 = vrot.slane %v7468_v28, 1 }
  0xde   : > { %v795_v20 = vsel %vm16066_vm1, %v779_v62, %v780_v63  ;;  %v834_v22 = vrot.slane %v7548_v52, 1  ;;  %v1597_v62 = vld [vmem:[%s15483_s5 + $0x420] sm:$0xff] }
  0xdf   : > { %v738_v9 = vadd.f32 %v727_v19, %v660_v42  ;;  %v785_v40 = vrot.slane %v7606_v50, 7 }
  0xe1   : > { %v753_v43 = vadd.f32 %v7290_v4, %v738_v9  ;;  %v790_v44 = vsel %vm16060_vm0, %v784_v12, %v785_v40  ;;  %v958_v4 = vld [vmem:[%s15481_s3 + $0x238] sm:$0xff] }
  0xe2   : > { %6313 = vmatmul.msk.f32.vlgmr.msra.gmra.mxu2 %vm7152_vm2, %v790_v44  ;;  %1067 = vmatmul.f32.gmra.mxu1 %v7326_v49 }
  0xe3   : > { %v764_v45 = vmul.f32 0.1, %v753_v43  ;;  %6306 = vmatmul.msk.f32.gmra.mxu0 %vm7116_vm15, %v797_v51  ;;  %6328 = vmatmul.msk.f32.gmra.mxu3 %vm7116_vm15, %v797_v51  ;;  %v1606_v51 = vld [vmem:[%s15483_s5 + $0x468] sm:$0xff] }
  0xe4   : > { %1251 = vmatpush.msra.mxu1 %v958_v4  ;;  %1861 = vmatpush.msra.mxu0 %v1606_v51  ;;  %v1603_v4 = vld [vmem:[%s15483_s5 + $0x450] sm:$0xff]  ;;  %v1630_v51 = vld [vmem:[%s15483_s5 + $0x528] sm:$0xff] }
  0xe5   : > { %v7627_v12 = vmax.f32 %v753_v43, %v764_v45  ;;  %v842_v45 = vrot.slane %v7582_v59, 1 }
  0xe6   : > { %1252 = vmatpush.msra.mxu1 %v956_v1  ;;  %1862 = vmatpush.msra.mxu0 %v1603_v4  ;;  %v1591_v1 = vld [vmem:[%s15483_s5 + $0x3f0] sm:$0xff] }
  0xe7   : > { %v786_v55 = vrot.slane %v7627_v12, 7  ;;  %v841_v41 = vrot.slane %v7627_v12, 1  ;;  %v1627_v4 = vld [vmem:[%s15483_s5 + $0x510] sm:$0xff] }
  0xe8   : > { %1253 = vmatpush.msra.mxu1 %v954_v53  ;;  %v1582_v53 = vld [vmem:[%s15483_s5 + $0x3a8] sm:$0xff] }
  0xe9   : > { %v789_v0 = vsel %vm16060_vm0, %v785_v40, %v786_v55  ;;  %v788_v18 = vsel %vm16060_vm0, %v786_v55, %v787_v11  ;;  %v952_v11 = vld [vmem:[%s15481_s3 + $0x208] sm:$0xff]  ;;  %vm16067_vm0 = vcmp.lt.s32.totalorder %v6954_v2, 7 }
  0xea   : > { %6314 = vmatmul.msk.f32.gmra.mxu2 %vm7196_vm14, %v789_v0  ;;  %1070 = vmatmul.f32.gmra.mxu1 %v7364_v25  ;;  %v852_v63 = vsel %vm16067_vm0, %v832_v29, %v833_v17  ;;  %vm16068_vm1 = vmmov %vm16067_vm0  ;;  %vm16069_vm0 = vnez %v16026_v23 }
  0xeb   : > { %6307 = vmatmul.msk.f32.gmra.mxu0 %vm7136_vm10, %v796_v54  ;;  %6329 = vmatmul.msk.f32.gmra.mxu3 %vm7136_vm10, %v796_v54  ;;  %v851_v30 = vsel %vm16068_vm1, %v833_v17, %v834_v22  ;;  %v1588_v54 = vld [vmem:[%s15483_s5 + $0x3d8] sm:$0xff] }
  0xec   : > { %1254 = vmatpush.msra.mxu1 %v952_v11  ;;  %v1576_v17 = vld [vmem:[%s15483_s5 + $0x378] sm:$0xff] }
  0xf2   : > { %6315 = vmatmul.msk.f32.gmra.mxu2 %vm7158_vm6, %v788_v18  ;;  %1073 = vmatmul.f32.gmra.mxu1 %v7393_v60 }
  0xf3   : > { %6308 = vmatmul.msk.f32.gmra.mxu0 %vm6979_vm3, %v795_v20  ;;  %6330 = vmatmul.msk.f32.gmra.mxu3 %vm6979_vm3, %v795_v20  ;;  %vm16075_vm3 = vnez %v15996_v24  ;;  %v1579_v20 = vld [vmem:[%s15483_s5 + $0x390] sm:$0xff] }
  0xfa   : > { %1076 = vmatmul.f32.gmra.mxu1 %v7422_v31  ;;  %6316 = vmatmul.msk.f32.vlgmr.msrb.gmra.mxu2 %vm7092_vm12, %v852_v63 }
  0xfb   : > { %6331 = vmatmul.msk.f32.gmra.mxu3 %vm7007_vm5, %v7347_v7  ;;  %1205 = vmatmul.f32.vlgmr.msrb.gmra.mxu0 %v7468_v28  ;;  %v835_v7 = vrot.slane %v7315_v39, 1  ;;  %vm16070_vm5 = vmmov %vm16068_vm1  ;;  %vm16071_vm1 = vnez %v16032_v36  ;;  %v1594_v28 = vld [vmem:[%s15483_s5 + $0x408] sm:$0xff] }
  0xfd   : > { %v850_v32 = vsel %vm16070_vm5, %v834_v22, %v835_v7 }
 0x102   : > { %1079 = vmatmul.f32.gmra.mxu1 %v7606_v50  ;;  %6317 = vmatmul.msk.f32.gmra.mxu2 %vm16069_vm0, %v851_v30 }
 0x103   : > { %6332 = vmatmul.msk.f32.gmra.mxu3 %vm7025_vm7, %v7376_v6  ;;  %1208 = vmatmul.f32.gmra.mxu0 %v7511_v21  ;;  %v836_v6 = vrot.slane %v7326_v49, 1  ;;  %vm16072_vm7 = vmmov %vm16070_vm5  ;;  %vm16073_vm5 = vnez %v15990_v8  ;;  %v1653_v8 = vld [vmem:[%s15483_s5 + $0x5e0] sm:$0xff] }
 0x105   : > { %v849_v21 = vsel %vm16072_vm7, %v835_v7, %v836_v6  ;;  %v1654_v7 = vld [vmem:[%s15483_s5 + $0x5e8] sm:$0xff] }
 0x106   : > { %1911 = vmatpush.msrb.mxu1 %v1654_v7 }
 0x10a   : > { %1082 = vmatmul.f32.gmra.mxu1 %v7627_v12  ;;  %6318 = vmatmul.msk.f32.gmra.mxu2 %vm16071_vm1, %v850_v32 }
 0x10b   : > { %6333 = vmatmul.msk.f32.gmra.mxu3 %vm7046_vm9, %v7408_v15  ;;  %1211 = vmatmul.f32.gmra.mxu0 %v7548_v52  ;;  %v837_v15 = vrot.slane %v7364_v25, 1  ;;  %vm16074_vm9 = vmmov %vm16072_vm7 }
 0x10d   : > { %v848_v52 = vsel %vm16074_vm9, %v836_v6, %v837_v15  ;;  %vm16076_vm9 = vnez %v16002_v35  ;;  %v1564_v6 = vld [vmem:[%s15483_s5 + $0x318] sm:$0xff] }
 0x112   : > { %1085 = vmatmul.f32.gmra.mxu1 %v7582_v59  ;;  %6319 = vmatmul.msk.f32.gmra.mxu2 %vm16073_vm5, %v849_v21 }
 0x113   : > { %6334 = vmatmul.msk.f32.gmra.mxu3 %vm7069_vm11, %v7436_v33  ;;  %1214 = vmatmul.f32.gmra.mxu0 %v7315_v39  ;;  %v838_v33 = vrot.slane %v7393_v60, 1 }
 0x115   : > { %v847_v39 = vsel %vm16072_vm7, %v837_v15, %v838_v33  ;;  %v1561_v15 = vld [vmem:[%s15483_s5 + $0x300] sm:$0xff] }
 0x11a   : > { %6320 = vmatmul.msk.f32.gmra.mxu2 %vm16075_vm3, %v848_v52  ;;  %6338 = vmatmul.msk.f32.vlgmr.msra.gmra.mxu1 %vm7092_vm12, %v852_v63  ;;  %vm16077_vm12 = vmmov %vm16072_vm7  ;;  %vm16078_vm7 = vnez %v16008_v46  ;;  %v1570_v63 = vld [vmem:[%s15483_s5 + $0x348] sm:$0xff] }
 0x11b   : > { %6335 = vmatmul.msk.f32.gmra.mxu3 %vm7152_vm2, %v790_v44  ;;  %1217 = vmatmul.f32.gmra.mxu0 %v7326_v49  ;;  %v839_v49 = vrot.slane %v7422_v31, 1  ;;  %v1614_v46 = vld [vmem:[%s15483_s5 + $0x4a8] sm:$0xff] }
 0x11d   : > { %v846_v42 = vsel %vm16077_vm12, %v838_v33, %v839_v49 }
 0x11f   : > { %v7718_v34 = vpop.f32.mrf.mxu1 }
 0x122   : > { %6321 = vmatmul.msk.f32.gmra.mxu2 %vm16076_vm9, %v847_v39  ;;  %6339 = vmatmul.msk.f32.gmra.mxu1 %vm16069_vm0, %v851_v30  ;;  %vm16079_vm0 = vmmov %vm16077_vm12  ;;  %vm16080_vm12 = vnez %v16014_v56  ;;  %v1567_v30 = vld [vmem:[%s15483_s5 + $0x330] sm:$0xff]  ;;  %v1497_v56 = vld [vmem:[%s15483_s5 + $0x100] sm:$0xff] }
 0x123   : > { %6336 = vmatmul.msk.f32.gmra.mxu3 %vm7196_vm14, %v789_v0  ;;  %1220 = vmatmul.f32.gmra.mxu0 %v7364_v25  ;;  %v840_v25 = vrot.slane %v7606_v50, 1 }
 0x125   : > { %v845_v40 = vsel %vm16079_vm0, %v839_v49, %v840_v25 }
 0x127   : > { %v7730_v19 = vpop.f32.mrf.mxu1 }
 0x12a   : > { %6322 = vmatmul.msk.f32.gmra.mxu2 %vm16078_vm7, %v846_v42  ;;  %6340 = vmatmul.msk.f32.gmra.mxu1 %vm16071_vm1, %v850_v32  ;;  %vm16081_vm1 = vmmov %vm16079_vm0 }
 0x12b   : > { %6337 = vmatmul.msk.f32.gmra.mxu3 %vm7158_vm6, %v788_v18  ;;  %1223 = vmatmul.f32.gmra.mxu0 %v7393_v60  ;;  %v844_v60 = vsel %vm16081_vm1, %v840_v25, %v841_v41  ;;  %vm16082_vm1 = vmmov %vm16079_vm0  ;;  %v1639_v25 = vld [vmem:[%s15483_s5 + $0x570] sm:$0xff] }
 0x12c   : > { %v853_v55 = vsel %vm16082_vm1, %v842_v45, %v832_v29  ;;  %v1573_v29 = vld [vmem:[%s15483_s5 + $0x360] sm:$0xff]  ;;  %vm16084_vm1 = vcmp.lt.s32.totalorder %v6954_v2, 1 }
 0x12f   : > { %v7742_v9 = vpop.f32.mrf.mxu1 }
 0x132   : > { %6323 = vmatmul.msk.f32.gmra.mxu2 %vm16080_vm12, %v845_v40  ;;  %6341 = vmatmul.msk.f32.gmra.mxu1 %vm16073_vm5, %v849_v21  ;;  %v1651_v21 = vld [vmem:[%s15483_s5 + $0x5d0] sm:$0xff] }
 0x133   : > { %1226 = vmatmul.f32.gmra.mxu0 %v7422_v31  ;;  %v843_v31 = vsel %vm16079_vm0, %v841_v41, %v842_v45  ;;  %vm16083_vm0 = vnez %v16046_v57  ;;  %1912 = vmatpush.msrb.mxu1 %v1651_v21  ;;  %v1633_v45 = vld [vmem:[%s15483_s5 + $0x540] sm:$0xff] }
 0x134   : > { %v1609_v21 = vld [vmem:[%s15483_s5 + $0x480] sm:$0xff] }
 0x137   : > { %v7752_v43 = vpop.f32.mrf.mxu1 }
 0x13a   : > { %6324 = vmatmul.msk.f32.gmra.mxu2 %vm7178_vm4, %v844_v60  ;;  %6342 = vmatmul.msk.f32.gmra.mxu1 %vm16075_vm3, %v848_v52  ;;  %v1648_v52 = vld [vmem:[%s15483_s5 + $0x5b8] sm:$0xff] }
 0x13b   : > { %1229 = vmatmul.f32.gmra.mxu0 %v7606_v50  ;;  %1913 = vmatpush.msrb.mxu1 %v1648_v52 }
 0x13f   : > { %v7761_v44 = vpop.f32.mrf.mxu1 }
 0x142   : > { %6325 = vmatmul.msk.f32.gmra.mxu2 %vm7190_vm8, %v843_v31  ;;  %6343 = vmatmul.msk.f32.gmra.mxu1 %vm16076_vm9, %v847_v39  ;;  %v1645_v39 = vld [vmem:[%s15483_s5 + $0x5a0] sm:$0xff] }
 0x143   : > { %1232 = vmatmul.f32.gmra.mxu0 %v7627_v12  ;;  %v1600_v12 = vld [vmem:[%s15483_s5 + $0x438] sm:$0xff]  ;;  %1914 = vmatpush.msrb.mxu1 %v1645_v39 }
 0x144   : > { %1863 = vmatpush.msra.mxu0 %v1600_v12  ;;  %v983_v12 = vld [vmem:[%s15482_s4] sm:$0x3] }
 0x146   : > { %1864 = vmatpush.msra.mxu0 %v1597_v62 }
 0x147   : > { %v7774_v50 = vpop.f32.mrf.mxu1 }
 0x148   : > { %1865 = vmatpush.msra.mxu0 %v1594_v28 }
 0x14a   : > { %6326 = vmatmul.msk.f32.gmra.mxu2 %vm16083_vm0, %v853_v55  ;;  %6344 = vmatmul.msk.f32.gmra.mxu1 %vm16078_vm7, %v846_v42  ;;  %v1642_v42 = vld [vmem:[%s15483_s5 + $0x588] sm:$0xff] }
 0x14b   : > { %1235 = vmatmul.f32.gmra.mxu0 %v7582_v59  ;;  %v1585_v59 = vld [vmem:[%s15483_s5 + $0x3c0] sm:$0xff]  ;;  %1915 = vmatpush.msrb.mxu1 %v1642_v42 }
 0x14c   : > { %1866 = vmatpush.msra.mxu0 %v1591_v1  ;;  %v1621_v1 = vld [vmem:[%s15483_s5 + $0x4e0] sm:$0xff] }
 0x14d   : > { %1916 = vmatpush.msrb.mxu1 %v1639_v25 }
 0x14e   : > { %1867 = vmatpush.msra.mxu0 %v1588_v54  ;;  %v7893_v54 = vperm.slane %v983_v12, 0 }
 0x14f   : > { %v7797_v0 = vpop.f32.mrf.mxu1 }
 0x150   : > { %1868 = vmatpush.msra.mxu0 %v1585_v59 }
 0x152   : > { %6345 = vmatmul.msk.f32.gmra.mxu1 %vm16080_vm12, %v845_v40  ;;  %1869 = vmatpush.msra.mxu0 %v1582_v53  ;;  %v1636_v40 = vld [vmem:[%s15483_s5 + $0x558] sm:$0xff]  ;;  %v1618_v53 = vld [vmem:[%s15483_s5 + $0x4c8] sm:$0xff] }
 0x153   : > { %1917 = vmatpush.msrb.mxu1 %v1636_v40  ;;  %v1507_v40 = vld [vmem:[%s15483_s5 + $0x150] sm:$0xff] }
 0x154   : > { %1870 = vmatpush.msra.mxu0 %v1579_v20 }
 0x155   : > { %1918 = vmatpush.msrb.mxu1 %v1633_v45 }
 0x156   : > { %1871 = vmatpush.msra.mxu0 %v1576_v17  ;;  %v1615_v17 = vld [vmem:[%s15483_s5 + $0x4b0] sm:$0xff] }
 0x157   : > { %v7813_v18 = vpop.f32.mrf.mxu1  ;;  %1919 = vmatpush.msrb.mxu1 %v1630_v51  ;;  %v1555_v51 = vld [vmem:[%s15483_s5 + $0x2d0] sm:$0xff] }
 0x158   : > { %v1006_v11 = vpop.f32.mrf.mxu0  ;;  %1872 = vmatpush.msra.mxu0 %v1573_v29  ;;  %v1612_v29 = vld [vmem:[%s15483_s5 + $0x498] sm:$0xff] }
 0x159   : > { %1920 = vmatpush.msrb.mxu1 %v1627_v4  ;;  %v1007_v20 = vadd.f32 %v1006_v11, %v7893_v54  ;;  %v1558_v11 = vld [vmem:[%s15483_s5 + $0x2e8] sm:$0xff]  ;;  %v1552_v4 = vld [vmem:[%s15483_s5 + $0x2b8] sm:$0xff] }
 0x15a   : > { %6346 = vmatmul.msk.f32.gmra.mxu1 %vm7178_vm4, %v844_v60  ;;  %1873 = vmatpush.msra.mxu0 %v1570_v63 }
 0x15b   : > { %v1057_v63 = vadd.f32 %v7761_v44, %v1007_v20  ;;  %1811 = vmatpush.msrb.mxu3 %v1558_v11  ;;  %v1501_v11 = vld [vmem:[%s15483_s5 + $0x120] sm:$0xff] }
 0x15c   : > { %1874 = vmatpush.msra.mxu0 %v1567_v30  ;;  %v1510_v30 = vld [vmem:[%s15483_s5 + $0x168] sm:$0xff] }
 0x15d   : > { %1761 = vmatpush.msra.mxu2 %v1510_v30  ;;  %1812 = vmatpush.msrb.mxu3 %v1555_v51  ;;  %v1498_v51 = vld [vmem:[%s15483_s5 + $0x108] sm:$0xff] }
 0x15e   : > { %1875 = vmatpush.msra.mxu0 %v1564_v6  ;;  %v1156_v7 = vpop.f32.mrf.mxu3 }
 0x15f   : > { %v7829_v22 = vpop.f32.mrf.mxu1  ;;  %1762 = vmatpush.msra.mxu2 %v1507_v40  ;;  %1813 = vmatpush.msrb.mxu3 %v1552_v4 }
 0x160   : > { %v1009_v32 = vpop.f32.mrf.mxu0  ;;  %1876 = vmatpush.msra.mxu0 %v1561_v15 }
 0x161   : > { %v1010_v39 = vadd.f32 %v1009_v32, %v7893_v54  ;;  %v1504_v32 = vld [vmem:[%s15483_s5 + $0x138] sm:$0xff] }
 0x162   : > { %6347 = vmatmul.msk.f32.gmra.mxu1 %vm7190_vm8, %v843_v31  ;;  %1763 = vmatpush.msra.mxu2 %v1504_v32  ;;  %vm16089_vm8 = vmmov %vm16084_vm1 }
 0x163   : > { %v1060_v45 = vadd.f32 %v7774_v50, %v1010_v39  ;;  %v7951_v39 = vperm.slane %v983_v12, 1  ;;  %v1546_v12 = vld [vmem:[%s15483_s5 + $0x288] sm:$0xff] }
 0x164   : > { %1764 = vmatpush.msra.mxu2 %v1501_v11 }
 0x165   : > { %v7851_v33 = vpop.f32.mrf.mxu2  ;;  %v1157_v4 = vadd.f32 %v1156_v7, %v7951_v39 }
 0x166   : > { %1765 = vmatpush.msra.mxu2 %v1498_v51 }
 0x167   : > { %v7856_v49 = vpop.f32.mrf.mxu1 }
 0x168   : > { %v1012_v41 = vpop.f32.mrf.mxu0 }
 0x169   : > { %v1013_v50 = vadd.f32 %v1012_v41, %v7893_v54 }
 0x16a   : > { %6348 = vmatmul.msk.f32.gmra.mxu1 %vm16083_vm0, %v853_v55  ;;  %v1624_v55 = vld [vmem:[%s15483_s5 + $0x4f8] sm:$0xff]  ;;  %vm16088_vm0 = vnez %v15993_v10 }
 0x16b   : > { %1921 = vmatpush.msrb.mxu1 %v1624_v55  ;;  %v1063_v30 = vadd.f32 %v7797_v0, %v1013_v50  ;;  %v1580_v10 = vld [vmem:[%s15483_s5 + $0x398] sm:$0xff] }
 0x16d   : > { %v7869_v60 = vpop.f32.mrf.mxu2  ;;  %1922 = vmatpush.msrb.mxu1 %v1621_v1 }
 0x16f   : > { %v7874_v31 = vpop.f32.mrf.mxu1  ;;  %1923 = vmatpush.msrb.mxu1 %v1618_v53  ;;  %v1159_v53 = vpop.f32.mrf.mxu3 }
 0x170   : > { %v1015_v62 = vpop.f32.mrf.mxu0 }
 0x171   : > { %1924 = vmatpush.msrb.mxu1 %v1615_v17 }
 0x173   : > { %1925 = vmatpush.msrb.mxu1 %v1612_v29 }
 0x175   : > { %v7888_v28 = vpop.f32.mrf.mxu2  ;;  %1926 = vmatpush.msrb.mxu1 %v1609_v21 }
 0x177   : > { %v7895_v59 = vpop.f32.mrf.mxu1  ;;  %v1162_v0 = vpop.f32.mrf.mxu3 }
 0x178   : > { %v1206_v52 = vpop.f32.mrf.mxu0 }
 0x179   : > { %v1207_v50 = vadd.f32 %v1206_v52, %v1157_v4  ;;  %v1160_v52 = vadd.f32 %v1159_v53, %v7951_v39  ;;  %v1540_v4 = vld [vmem:[%s15483_s5 + $0x258] sm:$0xff] }
 0x17d   : > { %v1106_v6 = vpop.f32.mrf.mxu2 }
 0x17e   : > { %v1107_v15 = vadd.f32 %v1106_v6, %v1057_v63  ;;  %v1549_v6 = vld [vmem:[%s15483_s5 + $0x2a0] sm:$0xff] }
 0x17f   : > { %v7917_v44 = vpop.f32.mrf.mxu1  ;;  %1814 = vmatpush.msrb.mxu3 %v1549_v6  ;;  %v1019_v6 = vadd.f32 %v7718_v34, %v7893_v54  ;;  %v1492_v34 = vld [vmem:[%s15483_s5 + $0xd8] sm:$0xff] }
 0x180   : > { %v1289_v42 = vmul.f32 0.1, %v1107_v15  ;;  %v1209_v29 = vpop.f32.mrf.mxu0 }
 0x181   : > { %1815 = vmatpush.msrb.mxu3 %v1546_v12  ;;  %v1210_v53 = vadd.f32 %v1209_v29, %v1160_v52  ;;  %v1163_v52 = vadd.f32 %v1162_v0, %v7951_v39 }
 0x182   : > { %v7920_v25 = vmax.f32 %v1107_v15, %v1289_v42  ;;  %v1016_v42 = vadd.f32 %v1015_v62, %v7893_v54  ;;  %v1495_v62 = vld [vmem:[%s15483_s5 + $0xf0] sm:$0xff] }
 0x183   : > { %1766 = vmatpush.msra.mxu2 %v1495_v62 }
 0x184   : > { %1877 = vmatmul.f32.vlgmr.msra.gmra.mxu0 %v7920_v25 }
 0x185   : > { %v1109_v55 = vpop.f32.mrf.mxu2  ;;  %1767 = vmatpush.msra.mxu2 %v1492_v34 }
 0x186   : > { %v1110_v1 = vadd.f32 %v1109_v55, %v1060_v45  ;;  %v1066_v55 = vadd.f32 %v7813_v18, %v1016_v42  ;;  %v1165_v42 = vpop.f32.mrf.mxu3 }
 0x187   : > { %v7936_v20 = vpop.f32.mrf.mxu1 }
 0x188   : > { %v1291_v17 = vmul.f32 0.1, %v1110_v1  ;;  %v1212_v32 = vpop.f32.mrf.mxu0 }
 0x189   : > { %v1213_v0 = vadd.f32 %v1212_v32, %v1163_v52  ;;  %v1534_v32 = vld [vmem:[%s15483_s5 + $0x228] sm:$0xff] }
 0x18a   : > { %v7939_v63 = vmax.f32 %v1110_v1, %v1291_v17 }
 0x18c   : > { %1880 = vmatmul.f32.gmra.mxu0 %v7939_v63 }
 0x18d   : > { %v1112_v21 = vpop.f32.mrf.mxu2 }
 0x18e   : > { %v1113_v41 = vadd.f32 %v1112_v21, %v1063_v30 }
 0x18f   : > { %v7949_v15 = vpop.f32.mrf.mxu1 }
 0x190   : > { %v1293_v40 = vmul.f32 0.1, %v1113_v41 }
 0x192   : > { %v7954_v45 = vmax.f32 %v1113_v41, %v1293_v40  ;;  %v1543_v41 = vld [vmem:[%s15483_s5 + $0x270] sm:$0xff]  ;;  %v1069_v40 = vadd.f32 %v7829_v22, %v1019_v6 }
 0x193   : > { %1816 = vmatpush.msrb.mxu3 %v1543_v41  ;;  %v1511_v22 = vld [vmem:[%s15483_s5 + $0x170] sm:$0xff]  ;;  %v1502_v41 = vld [vmem:[%s15483_s5 + $0x128] sm:$0xff] }
 0x194   : > { %1883 = vmatmul.f32.gmra.mxu0 %v7954_v45 }
 0x195   : > { %v1115_v1 = vpop.f32.mrf.mxu2  ;;  %1817 = vmatpush.msrb.mxu3 %v1540_v4  ;;  %2061 = vmatpush.msrb.mxu0 %v1511_v22  ;;  %v1486_v4 = vld [vmem:[%s15483_s5 + $0xa8] sm:$0xff] }
 0x196   : > { %v1116_v17 = vadd.f32 %v1115_v1, %v1066_v55  ;;  %v1215_v55 = vpop.f32.mrf.mxu0 }
 0x197   : > { %v1256_v30 = vpop.f32.mrf.mxu1 }
 0x198   : > { %v1295_v11 = vmul.f32 0.1, %v1116_v17  ;;  %v1257_v7 = vadd.f32 %v1256_v30, %v1207_v50  ;;  %v1508_v50 = vld [vmem:[%s15483_s5 + $0x158] sm:$0xff] }
 0x199   : > { %2062 = vmatpush.msrb.mxu0 %v1508_v50  ;;  %v1496_v50 = vld [vmem:[%s15483_s5 + $0xf8] sm:$0xff] }
 0x19a   : > { %v7970_v18 = vmax.f32 %v1116_v17, %v1295_v11  ;;  %v1290_v21 = vmul.f32 0.1, %v1257_v7  ;;  %v1505_v11 = vld [vmem:[%s15483_s5 + $0x140] sm:$0xff] }
 0x19b   : > { %2063 = vmatpush.msrb.mxu0 %v1505_v11  ;;  %v1025_v11 = vadd.f32 %v7742_v9, %v7893_v54 }
 0x19c   : > { %v7977_v51 = vmax.f32 %v1257_v7, %v1290_v21  ;;  %1886 = vmatmul.f32.gmra.mxu0 %v7970_v18  ;;  %v1022_v7 = vadd.f32 %v7730_v19, %v7893_v54  ;;  %v1489_v21 = vld [vmem:[%s15483_s5 + $0xc0] sm:$0xff] }
 0x19d   : > { %v1118_v12 = vpop.f32.mrf.mxu2  ;;  %1768 = vmatpush.msra.mxu2 %v1489_v21  ;;  %v1537_v19 = vld [vmem:[%s15483_s5 + $0x240] sm:$0xff]  ;;  %2064 = vmatpush.msrb.mxu0 %v1502_v41  ;;  %v1483_v21 = vld [vmem:[%s15483_s5 + $0x90] sm:$0xff]  ;;  %v1075_v9 = vadd.f32 %v7874_v31, %v1025_v11  ;;  %v1474_v11 = vld [vmem:[%s15483_s5 + $0x48] sm:$0xff] }
 0x19e   : > { %v1119_v62 = vadd.f32 %v1118_v12, %v1069_v40  ;;  %1927 = vmatmul.f32.vlgmr.msrb.gmra.mxu1 %v7977_v51  ;;  %v1072_v40 = vadd.f32 %v7856_v49, %v1022_v7  ;;  %v1168_v12 = vpop.f32.mrf.mxu3  ;;  %1818 = vmatpush.msrb.mxu3 %v1537_v19  ;;  %v1499_v49 = vld [vmem:[%s15483_s5 + $0x110] sm:$0xff]  ;;  %v1493_v41 = vld [vmem:[%s15483_s5 + $0xe0] sm:$0xff] }
 0x19f   : > { %v1259_v1 = vpop.f32.mrf.mxu1  ;;  %1769 = vmatpush.msra.mxu2 %v1486_v4  ;;  %2065 = vmatpush.msrb.mxu0 %v1499_v49  ;;  %v1531_v19 = vld [vmem:[%s15483_s5 + $0x210] sm:$0xff]  ;;  %v1490_v4 = vld [vmem:[%s15483_s5 + $0xc8] sm:$0xff] }
 0x1a0   : > { %v1297_v17 = vmul.f32 0.1, %v1119_v62  ;;  %v1260_v30 = vadd.f32 %v1259_v1, %v1210_v53  ;;  %1819 = vmatpush.msrb.mxu3 %v1534_v32  ;;  %v1028_v32 = vadd.f32 %v7752_v43, %v7893_v54  ;;  %v1528_v43 = vld [vmem:[%s15483_s5 + $0x1f8] sm:$0xff] }
 0x1a1   : > { %2066 = vmatpush.msrb.mxu0 %v1496_v50  ;;  %1770 = vmatpush.msra.mxu2 %v1483_v21 }
 0x1a2   : > { %v7998_v29 = vmax.f32 %v1119_v62, %v1297_v17  ;;  %v1292_v6 = vmul.f32 0.1, %v1260_v30  ;;  %v1218_v62 = vpop.f32.mrf.mxu0  ;;  %1820 = vmatpush.msrb.mxu3 %v1531_v19  ;;  %v1078_v19 = vadd.f32 %v7895_v59, %v1028_v32 }
 0x1a3   : > { %2067 = vmatpush.msrb.mxu0 %v1493_v41 }
 0x1a4   : > { %v8008_v34 = vmax.f32 %v1260_v30, %v1292_v6  ;;  %1889 = vmatmul.f32.gmra.mxu0 %v7998_v29  ;;  %1821 = vmatpush.msrb.mxu3 %v1528_v43  ;;  %v1407_v5 = vrot.slane %v7998_v29, 1 }
 0x1a5   : > { %v1121_v22 = vpop.f32.mrf.mxu2  ;;  %2068 = vmatpush.msrb.mxu0 %v1490_v4  ;;  %v1169_v4 = vadd.f32 %v1168_v12, %v7951_v39  ;;  %v1465_v12 = vld [vmem:[%s15483_s5] sm:$0xff] }
 0x1a6   : > { %v1122_v53 = vadd.f32 %v1121_v22, %v1072_v40  ;;  %1930 = vmatmul.f32.gmra.mxu1 %v8008_v34  ;;  %v1166_v40 = vadd.f32 %v1165_v42, %v7951_v39  ;;  %v1480_v22 = vld [vmem:[%s15483_s5 + $0x78] sm:$0xff] }
 0x1a7   : > { %v1262_v1 = vpop.f32.mrf.mxu1  ;;  %1771 = vmatpush.msra.mxu2 %v1480_v22 }
 0x1a8   : > { %v1299_v17 = vmul.f32 0.1, %v1122_v53  ;;  %v1263_v30 = vadd.f32 %v1262_v1, %v1213_v0  ;;  %v1216_v31 = vadd.f32 %v1215_v55, %v1166_v40  ;;  %v1487_v0 = vld [vmem:[%s15483_s5 + $0xb0] sm:$0xff]  ;;  %v1171_v1 = vpop.f32.mrf.mxu3  ;;  %v1484_v55 = vld [vmem:[%s15483_s5 + $0x98] sm:$0xff] }
 0x1a9   : > { %2069 = vmatpush.msrb.mxu0 %v1487_v0  ;;  %v1471_v40 = vld [vmem:[%s15483_s5 + $0x30] sm:$0xff]  ;;  %v1219_v0 = vadd.f32 %v1218_v62, %v1169_v4  ;;  %v1472_v62 = vld [vmem:[%s15483_s5 + $0x38] sm:$0xff]  ;;  %v1469_v4 = vld [vmem:[%s15483_s5 + $0x20] sm:$0xff] }
 0x1aa   : > { %v8026_v7 = vmax.f32 %v1122_v53, %v1299_v17  ;;  %v1294_v6 = vmul.f32 0.1, %v1263_v30  ;;  %v1477_v53 = vld [vmem:[%s15483_s5 + $0x60] sm:$0xff] }
 0x1ab   : > { %1772 = vmatpush.msra.mxu2 %v1477_v53  ;;  %2070 = vmatpush.msrb.mxu0 %v1484_v55 }
 0x1ac   : > { %v8039_v52 = vmax.f32 %v1263_v30, %v1294_v6  ;;  %1892 = vmatmul.f32.gmra.mxu0 %v8026_v7  ;;  %v1221_v6 = vpop.f32.mrf.mxu0 }
 0x1ad   : > { %v1124_v49 = vpop.f32.mrf.mxu2  ;;  %1773 = vmatpush.msra.mxu2 %v1474_v11 }
 0x1ae   : > { %v1125_v42 = vadd.f32 %v1124_v49, %v1075_v9  ;;  %1933 = vmatmul.f32.gmra.mxu1 %v8039_v52  ;;  %v1481_v9 = vld [vmem:[%s15483_s5 + $0x80] sm:$0xff]  ;;  %v1478_v49 = vld [vmem:[%s15483_s5 + $0x68] sm:$0xff] }
 0x1af   : > { %v1265_v50 = vpop.f32.mrf.mxu1  ;;  %1774 = vmatpush.msra.mxu2 %v1471_v40  ;;  %2071 = vmatpush.msrb.mxu0 %v1481_v9  ;;  %v1031_v9 = vadd.f32 %v7851_v33, %v7893_v54  ;;  %v1522_v33 = vld [vmem:[%s15483_s5 + $0x1c8] sm:$0xff] }
 0x1b0   : > { %v1301_v17 = vmul.f32 0.1, %v1125_v42  ;;  %v1266_v30 = vadd.f32 %v1265_v50, %v1216_v31  ;;  %v1468_v31 = vld [vmem:[%s15483_s5 + $0x18] sm:$0xff]  ;;  %v1475_v50 = vld [vmem:[%s15483_s5 + $0x50] sm:$0xff]  ;;  %v1174_v32 = vpop.f32.mrf.mxu3 }
 0x1b1   : > { %1775 = vmatpush.msra.mxu2 %v1468_v31  ;;  %2072 = vmatpush.msrb.mxu0 %v1478_v49  ;;  %v1553_v49 = vld [vmem:[%s15483_s5 + $0x2c0] sm:$0xff]  ;;  %v1081_v31 = vadd.f32 %v7917_v44, %v1031_v9 }
 0x1b2   : > { %v8066_v21 = vmax.f32 %v1125_v42, %v1301_v17  ;;  %v1296_v41 = vmul.f32 0.1, %v1266_v30  ;;  %v1525_v42 = vld [vmem:[%s15483_s5 + $0x1e0] sm:$0xff] }
 0x1b3   : > { %1822 = vmatpush.msrb.mxu3 %v1525_v42  ;;  %1776 = vmatpush.msra.mxu2 %v1465_v12  ;;  %v1466_v42 = vld [vmem:[%s15483_s5 + $0x8] sm:$0xff] }
 0x1b4   : > { %v8076_v22 = vmax.f32 %v1266_v30, %v1296_v41  ;;  %1895 = vmatmul.f32.gmra.mxu0 %v8066_v21  ;;  %v1559_v30 = vld [vmem:[%s15483_s5 + $0x2f0] sm:$0xff]  ;;  %v1556_v41 = vld [vmem:[%s15483_s5 + $0x2d8] sm:$0xff]  ;;  %v1224_v43 = vpop.f32.mrf.mxu0 }
 0x1b5   : > { %v1127_v59 = vpop.f32.mrf.mxu2  ;;  %2111 = vmatpush.msra.mxu1 %v1559_v30  ;;  %2073 = vmatpush.msrb.mxu0 %v1475_v50 }
 0x1b6   : > { %v1128_v53 = vadd.f32 %v1127_v59, %v1078_v19  ;;  %1936 = vmatmul.f32.gmra.mxu1 %v8076_v22  ;;  %v1172_v59 = vadd.f32 %v1171_v1, %v7951_v39  ;;  %1823 = vmatpush.msrb.mxu3 %v1522_v33  ;;  %v1516_v33 = vld [vmem:[%s15483_s5 + $0x198] sm:$0xff] }
 0x1b7   : > { %v1268_v17 = vpop.f32.mrf.mxu1  ;;  %2112 = vmatpush.msra.mxu1 %v1556_v41  ;;  %2074 = vmatpush.msrb.mxu0 %v1472_v62 }
 0x1b8   : > { %v1303_v55 = vmul.f32 0.1, %v1128_v53  ;;  %v1269_v11 = vadd.f32 %v1268_v17, %v1219_v0  ;;  %v1550_v0 = vld [vmem:[%s15483_s5 + $0x2a8] sm:$0xff]  ;;  %v1222_v1 = vadd.f32 %v1221_v6, %v1172_v59  ;;  %v1547_v17 = vld [vmem:[%s15483_s5 + $0x290] sm:$0xff]  ;;  %v1034_v6 = vadd.f32 %v7869_v60, %v7893_v54  ;;  %v1177_v9 = vpop.f32.mrf.mxu3 }
 0x1b9   : > { %2113 = vmatpush.msra.mxu1 %v1553_v49  ;;  %2075 = vmatpush.msrb.mxu0 %v1469_v4  ;;  %v1175_v49 = vadd.f32 %v1174_v32, %v7951_v39  ;;  %v1519_v60 = vld [vmem:[%s15483_s5 + $0x1b0] sm:$0xff]  ;;  %v1538_v59 = vld [vmem:[%s15483_s5 + $0x248] sm:$0xff] }
 0x1ba   : > { %v8109_v40 = vmax.f32 %v1128_v53, %v1303_v55  ;;  %v1298_v19 = vmul.f32 0.1, %v1269_v11  ;;  %v1084_v4 = vadd.f32 %v7936_v20, %v1034_v6  ;;  %1824 = vmatpush.msrb.mxu3 %v1519_v60 }
 0x1bb   : > { %2076 = vmatpush.msrb.mxu0 %v1466_v42  ;;  %2114 = vmatpush.msra.mxu1 %v1550_v0  ;;  %v1225_v32 = vadd.f32 %v1224_v43, %v1175_v49  ;;  %v1037_v43 = vadd.f32 %v7888_v28, %v7893_v54  ;;  %v1513_v28 = vld [vmem:[%s15483_s5 + $0x180] sm:$0xff]  ;;  %v1526_v54 = vld [vmem:[%s15483_s5 + $0x1e8] sm:$0xff] }
 0x1bc   : > { %v8119_v12 = vmax.f32 %v1269_v11, %v1298_v19  ;;  %1898 = vmatmul.f32.gmra.mxu0 %v8109_v40  ;;  %v1544_v11 = vld [vmem:[%s15483_s5 + $0x278] sm:$0xff]  ;;  %v1541_v19 = vld [vmem:[%s15483_s5 + $0x260] sm:$0xff]  ;;  %v1227_v42 = vpop.f32.mrf.mxu0  ;;  %1825 = vmatpush.msrb.mxu3 %v1516_v33  ;;  %v1702_v33 = vld [vmem:[%s15483_s5 + $0x768] sm:$0xff] }
 0x1bd   : > { %v1130_v44 = vpop.f32.mrf.mxu2  ;;  %2115 = vmatpush.msra.mxu1 %v1547_v17  ;;  %v1532_v17 = vld [vmem:[%s15483_s5 + $0x218] sm:$0xff]  ;;  %v1087_v6 = vadd.f32 %v7949_v15, %v1037_v43  ;;  %1961 = vmatpush.msrb.mxu2 %v1702_v33 }
 0x1be   : > { %v1131_v53 = vadd.f32 %v1130_v44, %v1081_v31  ;;  %1939 = vmatmul.f32.gmra.mxu1 %v8119_v12  ;;  %1826 = vmatpush.msrb.mxu3 %v1513_v28  ;;  %v1744_v33 = vld [vmem:[%s15483_s5 + $0x8b8] sm:$0xff] }
 0x1bf   : > { %v1271_v50 = vpop.f32.mrf.mxu1  ;;  %2116 = vmatpush.msra.mxu1 %v1544_v11  ;;  %v1529_v11 = vld [vmem:[%s15483_s5 + $0x200] sm:$0xff] }
 0x1c0   : > { %v1305_v30 = vmul.f32 0.1, %v1131_v53  ;;  %v1272_v55 = vadd.f32 %v1271_v50, %v1222_v1  ;;  %v1535_v1 = vld [vmem:[%s15483_s5 + $0x230] sm:$0xff] }
 0x1c1   : > { %2117 = vmatpush.msra.mxu1 %v1541_v19 }
 0x1c2   : > { %v8140_v62 = vmax.f32 %v1131_v53, %v1305_v30  ;;  %v1300_v41 = vmul.f32 0.1, %v1272_v55 }
 0x1c3   : > { %2118 = vmatpush.msra.mxu1 %v1538_v59 }
 0x1c4   : > { %v8147_v31 = vmax.f32 %v1272_v55, %v1300_v41  ;;  %1901 = vmatmul.f32.gmra.mxu0 %v8140_v62  ;;  %v1178_v41 = vadd.f32 %v1177_v9, %v7951_v39  ;;  %v1230_v9 = vpop.f32.mrf.mxu0 }
 0x1c5   : > { %v1133_v20 = vpop.f32.mrf.mxu2  ;;  %2119 = vmatpush.msra.mxu1 %v1535_v1 }
 0x1c6   : > { %v1134_v0 = vadd.f32 %v1133_v20, %v1084_v4  ;;  %1942 = vmatmul.f32.gmra.mxu1 %v8147_v31  ;;  %v1180_v4 = vpop.f32.mrf.mxu3  ;;  %v1228_v60 = vadd.f32 %v1227_v42, %v1178_v41  ;;  %v1523_v20 = vld [vmem:[%s15483_s5 + $0x1d0] sm:$0xff]  ;;  %v1750_v42 = vld [vmem:[%s15483_s5 + $0x8e8] sm:$0xff] }
 0x1c7   : > { %v1274_v44 = vpop.f32.mrf.mxu1  ;;  %2120 = vmatpush.msra.mxu1 %v1532_v17  ;;  %2011 = vmatpush.msra.mxu3 %v1750_v42  ;;  %v1181_v17 = vadd.f32 %v1180_v4, %v7951_v39  ;;  %v1514_v41 = vld [vmem:[%s15483_s5 + $0x188] sm:$0xff] }
 0x1c8   : > { %v1307_v53 = vmul.f32 0.1, %v1134_v0  ;;  %v1275_v50 = vadd.f32 %v1274_v44, %v1225_v32  ;;  %v1520_v44 = vld [vmem:[%s15483_s5 + $0x1b8] sm:$0xff] }
 0x1c9   : > { %2121 = vmatpush.msra.mxu1 %v1529_v11  ;;  %v1231_v28 = vadd.f32 %v1230_v9, %v1181_v17  ;;  %v1693_v17 = vld [vmem:[%s15483_s5 + $0x720] sm:$0xff] }
 0x1ca   : > { %v8168_v30 = vmax.f32 %v1134_v0, %v1307_v53  ;;  %v1302_v55 = vmul.f32 0.1, %v1275_v50 }
 0x1cb   : > { %2122 = vmatpush.msra.mxu1 %v1526_v54 }
 0x1cc   : > { %v8175_v19 = vmax.f32 %v1275_v50, %v1302_v55  ;;  %1904 = vmatmul.f32.gmra.mxu0 %v8168_v30  ;;  %v1517_v50 = vld [vmem:[%s15483_s5 + $0x1a0] sm:$0xff]  ;;  %v1333_v55 = vrot.slane %v7920_v25, 7  ;;  %v1233_v9 = vpop.f32.mrf.mxu0 }
 0x1cd   : > { %v1136_v49 = vpop.f32.mrf.mxu2  ;;  %2123 = vmatpush.msra.mxu1 %v1523_v20 }
 0x1ce   : > { %v1137_v15 = vadd.f32 %v1136_v49, %v1087_v6  ;;  %1945 = vmatmul.f32.gmra.mxu1 %v8175_v19  ;;  %v1699_v6 = vld [vmem:[%s15483_s5 + $0x750] sm:$0xff]  ;;  %v1183_v4 = vpop.f32.mrf.mxu3 }
 0x1cf   : > { %v1277_v59 = vpop.f32.mrf.mxu1  ;;  %2124 = vmatpush.msra.mxu1 %v1520_v44  ;;  %1962 = vmatpush.msrb.mxu2 %v1699_v6 }
 0x1d0   : > { %v1309_v32 = vmul.f32 0.1, %v1137_v15  ;;  %v1278_v0 = vadd.f32 %v1277_v59, %v1228_v60  ;;  %v1747_v60 = vld [vmem:[%s15483_s5 + $0x8d0] sm:$0xff]  ;;  %v1696_v59 = vld [vmem:[%s15483_s5 + $0x738] sm:$0xff] }
 0x1d1   : > { %2125 = vmatpush.msra.mxu1 %v1517_v50  ;;  %2012 = vmatpush.msra.mxu3 %v1747_v60 }
 0x1d2   : > { %v8197_v1 = vmax.f32 %v1137_v15, %v1309_v32  ;;  %v1304_v53 = vmul.f32 0.1, %v1278_v0  ;;  %v1335_v32 = vrot.slane %v7939_v63, 7  ;;  %1963 = vmatpush.msrb.mxu2 %v1696_v59 }
 0x1d3   : > { %2126 = vmatpush.msra.mxu1 %v1514_v41  ;;  %2013 = vmatpush.msra.mxu3 %v1744_v33 }
 0x1d4   : > { %v8203_v43 = vmax.f32 %v1278_v0, %v1304_v53  ;;  %1907 = vmatmul.f32.gmra.mxu0 %v8197_v1  ;;  %v15528_v11 = vrot.slane %v8197_v1, 7  ;;  %v1184_v0 = vadd.f32 %v1183_v4, %v7951_v39  ;;  %v8243_v53 = vsel %vm16084_vm1, %v1333_v55, %v1335_v32  ;;  %1964 = vmatpush.msrb.mxu2 %v1693_v17 }
 0x1d5   : > { %16085 = vst [vmem:[#allocation25_spill] sm:$0xff] %v8243_v53  ;;  %v1339_v17 = vrot.slane %v7970_v18, 7 }
 0x1d6   : > { %1948 = vmatmul.f32.gmra.mxu1 %v8203_v43  ;;  %v8219_v54 = vsel %vm16084_vm1, %v15528_v11, %v1333_v55  ;;  %v1234_v44 = vadd.f32 %v1233_v9, %v1184_v0  ;;  %v1186_v41 = vpop.f32.mrf.mxu3  ;;  %v1337_v55 = vrot.slane %v7954_v45, 7  ;;  %v1690_v9 = vld [vmem:[%s15483_s5 + $0x708] sm:$0xff]  ;;  %v1340_v11 = vrot.slane %v8076_v22, 7 }
 0x1d7   : > { %v1280_v49 = vpop.f32.mrf.mxu1  ;;  %6349 = vmatmul.msk.f32.vlgmr.msra.gmra.mxu2 %vm7098_vm13, %v8219_v54  ;;  %v1187_v60 = vadd.f32 %v1186_v41, %v7951_v39  ;;  %v1738_v39 = vld [vmem:[%s15483_s5 + $0x888] sm:$0xff] }
 0x1d8   : > { %v1281_v15 = vadd.f32 %v1280_v49, %v1231_v28  ;;  %v1741_v28 = vld [vmem:[%s15483_s5 + $0x8a0] sm:$0xff]  ;;  %v1236_v49 = vpop.f32.mrf.mxu0  ;;  %1965 = vmatpush.msrb.mxu2 %v1690_v9  ;;  %v8267_v33 = vsel %vm16084_vm1, %v1335_v32, %v1337_v55  ;;  %v8290_v41 = vsel %vm16084_vm1, %v1337_v55, %v1339_v17  ;;  %v1732_v55 = vld [vmem:[%s15483_s5 + $0x858] sm:$0xff]  ;;  %v1341_v9 = vrot.slane %v7998_v29, 7 }
 0x1d9   : > { %2014 = vmatpush.msra.mxu3 %v1741_v28  ;;  %v1237_v59 = vadd.f32 %v1236_v49, %v1187_v60  ;;  %16086 = vst [vmem:[#allocation26_spill] sm:$0xff] %v8267_v33  ;;  %v1334_v28 = vrot.slane %v7977_v51, 7  ;;  %v1684_v49 = vld [vmem:[%s15483_s5 + $0x6d8] sm:$0xff] }
 0x1da   : > { %v1306_v20 = vmul.f32 0.1, %v1281_v15  ;;  %16087 = vst [vmem:[#allocation27_spill] sm:$0xff] %v8290_v41 }
 0x1db   : > { %2015 = vmatpush.msra.mxu3 %v1738_v39  ;;  %v1681_v39 = vld [vmem:[%s15483_s5 + $0x6c0] sm:$0xff] }
 0x1dc   : > { %v8235_v42 = vmax.f32 %v1281_v15, %v1306_v20  ;;  %6393 = vmatmul.msk.f32.vlgmr.msrb.gmra.mxu0 %vm7098_vm13, %v8219_v54 }
 0x1de   : > { %1951 = vmatmul.f32.gmra.mxu1 %v8235_v42 }
 0x1df   : > { %v1283_v50 = vpop.f32.mrf.mxu1  ;;  %6350 = vmatmul.msk.f32.gmra.mxu2 %vm7116_vm15, %v8243_v53 }
 0x1e0   : > { %v1284_v6 = vadd.f32 %v1283_v50, %v1234_v44  ;;  %v1687_v44 = vld [vmem:[%s15483_s5 + $0x6f0] sm:$0xff] }
 0x1e1   : > { %1966 = vmatpush.msrb.mxu2 %v1687_v44  ;;  %v1700_v44 = vld [vmem:[%s15483_s5 + $0x758] sm:$0xff] }
 0x1e2   : > { %v1308_v4 = vmul.f32 0.1, %v1284_v6 }
 0x1e3   : > { %1967 = vmatpush.msrb.mxu2 %v1684_v49  ;;  %v1343_v49 = vrot.slane %v8026_v7, 7 }
 0x1e4   : > { %v8256_v15 = vmax.f32 %v1284_v6, %v1308_v4  ;;  %6394 = vmatmul.msk.f32.gmra.mxu0 %vm7116_vm15, %v8243_v53  ;;  %v1735_v6 = vld [vmem:[%s15483_s5 + $0x870] sm:$0xff] }
 0x1e5   : > { %2016 = vmatpush.msra.mxu3 %v1735_v6  ;;  %1968 = vmatpush.msrb.mxu2 %v1681_v39  ;;  %v1726_v39 = vld [vmem:[%s15483_s5 + $0x828] sm:$0xff] }
 0x1e6   : > { %1954 = vmatmul.f32.gmra.mxu1 %v8256_v15 }
 0x1e7   : > { %v1286_v20 = vpop.f32.mrf.mxu1  ;;  %6351 = vmatmul.msk.f32.gmra.mxu2 %vm7136_vm10, %v8267_v33  ;;  %2017 = vmatpush.msra.mxu3 %v1732_v55  ;;  %v1678_v55 = vld [vmem:[%s15483_s5 + $0x6a8] sm:$0xff] }
 0x1e8   : > { %v1287_v0 = vadd.f32 %v1286_v20, %v1237_v59  ;;  %v1336_v59 = vrot.slane %v8008_v34, 7  ;;  %v1703_v20 = vld [vmem:[%s15483_s5 + $0x770] sm:$0xff]  ;;  %1969 = vmatpush.msrb.mxu2 %v1678_v55 }
 0x1e9   : > { %2261 = vmatpush.msra.mxu0 %v1703_v20  ;;  %v1338_v20 = vrot.slane %v8039_v52, 7 }
 0x1ea   : > { %v1310_v50 = vmul.f32 0.1, %v1287_v0 }
 0x1eb   : > { %2262 = vmatpush.msra.mxu0 %v1700_v44  ;;  %v1691_v44 = vld [vmem:[%s15483_s5 + $0x710] sm:$0xff] }
 0x1ec   : > { %v8279_v32 = vmax.f32 %v1287_v0, %v1310_v50  ;;  %6395 = vmatmul.msk.f32.gmra.mxu0 %vm7136_vm10, %v8267_v33  ;;  %v1729_v50 = vld [vmem:[%s15483_s5 + $0x840] sm:$0xff] }
 0x1ed   : > { %2018 = vmatpush.msra.mxu3 %v1729_v50 }
 0x1ee   : > { %1957 = vmatmul.f32.gmra.mxu1 %v8279_v32  ;;  %v15527_v4 = vrot.slane %v8279_v32, 7 }
 0x1ef   : > { %6352 = vmatmul.msk.f32.gmra.mxu2 %vm16088_vm0, %v8290_v41  ;;  %2019 = vmatpush.msra.mxu3 %v1726_v39  ;;  %v1685_v39 = vld [vmem:[%s15483_s5 + $0x6e0] sm:$0xff] }
 0x1f0   : > { %v8304_v60 = vsel %vm16089_vm8, %v15527_v4, %v1334_v28  ;;  %vm16091_vm8 = vmmov %vm16084_vm1  ;;  %vm16093_vm1 = vnez %v15999_v26  ;;  %v1672_v4 = vld [vmem:[%s15483_s5 + $0x678] sm:$0xff] }
 0x1f1   : > { %16090 = vst [vmem:[#allocation28_spill] sm:$0xff] %v8304_v60  ;;  %6360 = vmatmul.msk.f32.vlgmr.msrb.gmra.mxu3 %vm7098_vm13, %v8304_v60  ;;  %v8328_v0 = vsel %vm16091_vm8, %v1339_v17, %v1341_v9  ;;  %vm16094_vm4 = vmmov %vm16091_vm8  ;;  %v1697_v17 = vld [vmem:[%s15483_s5 + $0x740] sm:$0xff]  ;;  %vm16097_vm8 = vnez %v16005_v37  ;;  %v1708_v26 = vld [vmem:[%s15483_s5 + $0x798] sm:$0xff]  ;;  %v15570_v37 = vrot.slane %v7977_v51, 1 }
 0x1f2   : > { %16092 = vst [vmem:[#allocation29_spill] sm:$0xff] %v8328_v0  ;;  %v8341_v6 = vsel %vm16094_vm4, %v1334_v28, %v1336_v59  ;;  %2263 = vmatpush.msra.mxu0 %v1697_v17  ;;  %v1694_v28 = vld [vmem:[%s15483_s5 + $0x728] sm:$0xff]  ;;  %v8371_v50 = vsel %vm16094_vm4, %v1341_v9, %v1343_v49  ;;  %v1688_v17 = vld [vmem:[%s15483_s5 + $0x6f8] sm:$0xff]  ;;  %v1675_v9 = vld [vmem:[%s15483_s5 + $0x690] sm:$0xff] }
 0x1f3   : > { %16095 = vst [vmem:[#allocation30_spill] sm:$0xff] %v8341_v6  ;;  %1970 = vmatpush.msrb.mxu2 %v1675_v9  ;;  %v1679_v9 = vld [vmem:[%s15483_s5 + $0x6b0] sm:$0xff] }
 0x1f4   : > { %6396 = vmatmul.msk.f32.gmra.mxu0 %vm16088_vm0, %v8290_v41  ;;  %16096 = vst [vmem:[#allocation31_spill] sm:$0xff] %v8371_v50  ;;  %v1628_v41 = vld [vmem:[%s15483_s5 + $0x518] sm:$0xff] }
 0x1f5   : > { %2264 = vmatpush.msra.mxu0 %v1694_v28  ;;  %1971 = vmatpush.msrb.mxu2 %v1672_v4  ;;  %v1676_v4 = vld [vmem:[%s15483_s5 + $0x698] sm:$0xff] }
 0x1f6   : > { %6404 = vmatmul.msk.f32.vlgmr.msra.gmra.mxu1 %vm7098_vm13, %v8304_v60  ;;  %vm16098_vm13 = vmmov %vm16094_vm4  ;;  %v1586_v60 = vld [vmem:[%s15483_s5 + $0x3c8] sm:$0xff] }
 0x1f7   : > { %6353 = vmatmul.msk.f32.gmra.mxu2 %vm16093_vm1, %v8328_v0  ;;  %2265 = vmatpush.msra.mxu0 %v1691_v44  ;;  %v8381_v55 = vsel %vm16098_vm13, %v1336_v59, %v1338_v20  ;;  %v1345_v44 = vrot.slane %v8066_v21, 7  ;;  %v1723_v59 = vld [vmem:[%s15483_s5 + $0x810] sm:$0xff]  ;;  %vm16100_vm13 = vmmov %vm16094_vm4  ;;  %vm16102_vm4 = vnez %v16011_v48  ;;  %v1604_v48 = vld [vmem:[%s15483_s5 + $0x458] sm:$0xff] }
 0x1f8   : > { %16099 = vst [vmem:[#allocation32_spill] sm:$0xff] %v8381_v55  ;;  %2020 = vmatpush.msra.mxu3 %v1723_v59  ;;  %v1666_v59 = vld [vmem:[%s15483_s5 + $0x648] sm:$0xff] }
 0x1f9   : > { %6361 = vmatmul.msk.f32.gmra.mxu3 %vm7116_vm15, %v8341_v6  ;;  %2266 = vmatpush.msra.mxu0 %v1688_v17  ;;  %v1682_v17 = vld [vmem:[%s15483_s5 + $0x6c8] sm:$0xff] }
 0x1fb   : > { %2267 = vmatpush.msra.mxu0 %v1685_v39  ;;  %v1669_v39 = vld [vmem:[%s15483_s5 + $0x660] sm:$0xff] }
 0x1fc   : > { %6397 = vmatmul.msk.f32.gmra.mxu0 %vm16093_vm1, %v8328_v0  ;;  %1972 = vmatpush.msrb.mxu2 %v1669_v39  ;;  %v1670_v39 = vld [vmem:[%s15483_s5 + $0x668] sm:$0xff]  ;;  %v1657_v0 = vld [vmem:[%s15483_s5 + $0x600] sm:$0xff] }
 0x1fd   : > { %2268 = vmatpush.msra.mxu0 %v1682_v17  ;;  %v1720_v17 = vld [vmem:[%s15483_s5 + $0x7f8] sm:$0xff] }
 0x1fe   : > { %6405 = vmatmul.msk.f32.gmra.mxu1 %vm7116_vm15, %v8341_v6  ;;  %2021 = vmatpush.msra.mxu3 %v1720_v17  ;;  %v1663_v6 = vld [vmem:[%s15483_s5 + $0x630] sm:$0xff]  ;;  %v1342_v17 = vrot.slane %v8119_v12, 7 }
 0x1ff   : > { %6354 = vmatmul.msk.f32.gmra.mxu2 %vm16097_vm8, %v8371_v50  ;;  %2269 = vmatpush.msra.mxu0 %v1679_v9 }
 0x200   : > { %1973 = vmatpush.msrb.mxu2 %v1666_v59  ;;  %v1667_v59 = vld [vmem:[%s15483_s5 + $0x650] sm:$0xff] }
 0x201   : > { %6362 = vmatmul.msk.f32.gmra.mxu3 %vm7136_vm10, %v8381_v55  ;;  %v8386_v28 = vpop.f32.mrf.mxu0  ;;  %2270 = vmatpush.msra.mxu0 %v1676_v4  ;;  %v1660_v4 = vld [vmem:[%s15483_s5 + $0x618] sm:$0xff] }
 0x202   : > { %1974 = vmatpush.msrb.mxu2 %v1663_v6 }
 0x204   : > { %6398 = vmatmul.msk.f32.gmra.mxu0 %vm16097_vm8, %v8371_v50  ;;  %v8419_v50 = vsel %vm16100_vm13, %v1343_v49, %v1345_v44  ;;  %v8435_v49 = vsel %vm16100_vm13, %v1338_v20, %v1340_v11  ;;  %v1347_v20 = vrot.slane %v8109_v40, 7  ;;  %1975 = vmatpush.msrb.mxu2 %v1660_v4  ;;  %v1661_v4 = vld [vmem:[%s15483_s5 + $0x620] sm:$0xff] }
 0x205   : > { %16101 = vst [vmem:[#allocation33_spill] sm:$0xff] %v8419_v50 }
 0x206   : > { %6406 = vmatmul.msk.f32.gmra.mxu1 %vm7136_vm10, %v8381_v55  ;;  %16103 = vst [vmem:[#allocation34_spill] sm:$0xff] %v8435_v49  ;;  %v1673_v55 = vld [vmem:[%s15483_s5 + $0x680] sm:$0xff]  ;;  %v8473_v6 = vsel %vm16100_vm13, %v1345_v44, %v1347_v20  ;;  %1976 = vmatpush.msrb.mxu2 %v1657_v0  ;;  %v1714_v0 = vld [vmem:[%s15483_s5 + $0x7c8] sm:$0xff] }
 0x207   : > { %6355 = vmatmul.msk.f32.gmra.mxu2 %vm16102_vm4, %v8419_v50  ;;  %2271 = vmatpush.msra.mxu0 %v1673_v55  ;;  %v1717_v55 = vld [vmem:[%s15483_s5 + $0x7e0] sm:$0xff]  ;;  %16104 = vst [vmem:[#allocation35_spill] sm:$0xff] %v8473_v6 }
 0x208   : > { %2022 = vmatpush.msra.mxu3 %v1717_v55  ;;  %v1751_v55 = vld [vmem:[%s15483_s5 + $0x8f0] sm:$0xff] }
 0x209   : > { %6363 = vmatmul.msk.f32.gmra.mxu3 %vm16088_vm0, %v8435_v49  ;;  %v8440_v9 = vpop.f32.mrf.mxu0  ;;  %2272 = vmatpush.msra.mxu0 %v1670_v39  ;;  %v1664_v39 = vld [vmem:[%s15483_s5 + $0x638] sm:$0xff] }
 0x20a   : > { %2311 = vmatpush.msrb.mxu1 %v1751_v55  ;;  %v1745_v55 = vld [vmem:[%s15483_s5 + $0x8c0] sm:$0xff]  ;;  %2023 = vmatpush.msra.mxu3 %v1714_v0  ;;  %v1739_v0 = vld [vmem:[%s15483_s5 + $0x890] sm:$0xff] }
 0x20b   : > { %2273 = vmatpush.msra.mxu0 %v1667_v59  ;;  %v1748_v59 = vld [vmem:[%s15483_s5 + $0x8d8] sm:$0xff] }
 0x20c   : > { %6399 = vmatmul.msk.f32.gmra.mxu0 %vm16102_vm4, %v8419_v50  ;;  %2312 = vmatpush.msrb.mxu1 %v1748_v59  ;;  %v1344_v50 = vrot.slane %v8147_v31, 7 }
 0x20d   : > { %2274 = vmatpush.msra.mxu0 %v1664_v39  ;;  %v1658_v39 = vld [vmem:[%s15483_s5 + $0x608] sm:$0xff] }
 0x20e   : > { %6407 = vmatmul.msk.f32.gmra.mxu1 %vm16088_vm0, %v8435_v49  ;;  %vm16105_vm0 = vmmov %vm16100_vm13 }
 0x20f   : > { %6356 = vmatmul.msk.f32.gmra.mxu2 %vm7069_vm11, %v8473_v6  ;;  %v8486_v49 = vsel %vm16105_vm0, %v1340_v11, %v1342_v17  ;;  %v1349_v11 = vrot.slane %v8140_v62, 7  ;;  %2275 = vmatpush.msra.mxu0 %v1661_v4  ;;  %v1742_v4 = vld [vmem:[%s15483_s5 + $0x8a8] sm:$0xff]  ;;  %vm16108_vm13 = vmmov %vm16105_vm0 }
 0x210   : > { %16106 = vst [vmem:[#allocation36_spill] sm:$0xff] %v8486_v49  ;;  %2313 = vmatpush.msrb.mxu1 %v1745_v55 }
 0x211   : > { %6364 = vmatmul.msk.f32.gmra.mxu3 %vm16093_vm1, %v8486_v49  ;;  %v8491_v44 = vpop.f32.mrf.mxu0  ;;  %2276 = vmatpush.msra.mxu0 %v1658_v39  ;;  %v8521_v59 = vsel %vm16105_vm0, %v1347_v20, %v1349_v11  ;;  %v8531_v39 = vsel %vm16108_vm13, %v1342_v17, %v1344_v50  ;;  %v1711_v20 = vld [vmem:[%s15483_s5 + $0x7b0] sm:$0xff]  ;;  %v1733_v17 = vld [vmem:[%s15483_s5 + $0x860] sm:$0xff]  ;;  %vm16111_vm13 = vmmov %vm16105_vm0 }
 0x212   : > { %16107 = vst [vmem:[#allocation37_spill] sm:$0xff] %v8521_v59  ;;  %2314 = vmatpush.msrb.mxu1 %v1742_v4  ;;  %v1736_v4 = vld [vmem:[%s15483_s5 + $0x878] sm:$0xff]  ;;  %2024 = vmatpush.msra.mxu3 %v1711_v20 }
 0x213   : > { %16109 = vst [vmem:[#allocation38_spill] sm:$0xff] %v8531_v39 }
 0x214   : > { %6400 = vmatmul.msk.f32.gmra.mxu0 %vm7069_vm11, %v8473_v6  ;;  %2315 = vmatpush.msrb.mxu1 %v1739_v0  ;;  %v1346_v0 = vrot.slane %v8175_v19, 7  ;;  %v1730_v6 = vld [vmem:[%s15483_s5 + $0x848] sm:$0xff] }
 0x215   : > { %2025 = vmatpush.msra.mxu3 %v1708_v26 }
 0x216   : > { %6408 = vmatmul.msk.f32.gmra.mxu1 %vm16093_vm1, %v8486_v49  ;;  %v1351_v49 = vrot.slane %v8168_v30, 7  ;;  %v8573_v26 = vsel %vm16111_vm13, %v1344_v50, %v1346_v0  ;;  %v1705_v50 = vld [vmem:[%s15483_s5 + $0x780] sm:$0xff]  ;;  %vm16115_vm13 = vmmov %vm16105_vm0 }
 0x217   : > { %6357 = vmatmul.msk.f32.gmra.mxu2 %vm7152_vm2, %v8521_v59  ;;  %2316 = vmatpush.msrb.mxu1 %v1736_v4  ;;  %v1727_v4 = vld [vmem:[%s15483_s5 + $0x830] sm:$0xff]  ;;  %16112 = vst [vmem:[#allocation40_spill] sm:$0xff] %v8573_v26 }
 0x218   : > { %v8563_v20 = vsel %vm16105_vm0, %v1349_v11, %v1351_v49  ;;  %v1724_v11 = vld [vmem:[%s15483_s5 + $0x818] sm:$0xff]  ;;  %2026 = vmatpush.msra.mxu3 %v1705_v50  ;;  %v1607_v50 = vld [vmem:[%s15483_s5 + $0x470] sm:$0xff] }
 0x219   : > { %6365 = vmatmul.msk.f32.gmra.mxu3 %vm16097_vm8, %v8531_v39  ;;  %v8536_v55 = vpop.f32.mrf.mxu0  ;;  %2317 = vmatpush.msrb.mxu1 %v1733_v17  ;;  %16110 = vst [vmem:[#allocation39_spill] sm:$0xff] %v8563_v20 }
 0x21a   : > { %2161 = vmatpush.msra.mxu2 %v1607_v50  ;;  %v15547_v50 = vrot.slane %v7920_v25, 1 }
 0x21b   : > { %2318 = vmatpush.msrb.mxu1 %v1730_v6  ;;  %v1721_v6 = vld [vmem:[%s15483_s5 + $0x800] sm:$0xff] }
 0x21c   : > { %6401 = vmatmul.msk.f32.gmra.mxu0 %vm7152_vm2, %v8521_v59  ;;  %2162 = vmatpush.msra.mxu2 %v1604_v48 }
 0x21d   : > { %2319 = vmatpush.msrb.mxu1 %v1727_v4  ;;  %v1718_v4 = vld [vmem:[%s15483_s5 + $0x7e8] sm:$0xff] }
 0x21e   : > { %6409 = vmatmul.msk.f32.gmra.mxu1 %vm16097_vm8, %v8531_v39  ;;  %v1348_v39 = vrot.slane %v8203_v43, 7 }
 0x21f   : > { %6358 = vmatmul.msk.f32.gmra.mxu2 %vm7196_vm14, %v8563_v20  ;;  %2320 = vmatpush.msrb.mxu1 %v1724_v11  ;;  %v16113_v11 = vrot.slane %v8197_v1, 7 }
 0x221   : > { %6366 = vmatmul.msk.f32.gmra.mxu3 %vm16102_vm4, %v8573_v26  ;;  %v8578_v17 = vpop.f32.mrf.mxu0  ;;  %2321 = vmatpush.msrb.mxu1 %v1721_v6  ;;  %v8603_v59 = vsel %vm16105_vm0, %v1351_v49, %v16113_v11  ;;  %v1715_v6 = vld [vmem:[%s15483_s5 + $0x7d0] sm:$0xff]  ;;  %v1712_v11 = vld [vmem:[%s15483_s5 + $0x7b8] sm:$0xff]  ;;  %vm16117_vm0 = vcmp.lt.s32.totalorder %v6954_v2, 7 }
 0x222   : > { %16114 = vst [vmem:[#allocation41_spill] sm:$0xff] %v8603_v59 }
 0x223   : > { %2322 = vmatpush.msrb.mxu1 %v1718_v4  ;;  %v1655_v4 = vld [vmem:[%s15483_s5 + $0x5f0] sm:$0xff] }
 0x224   : > { %6402 = vmatmul.msk.f32.gmra.mxu0 %vm7196_vm14, %v8563_v20  ;;  %v1401_v20 = vrot.slane %v7939_v63, 1  ;;  %2211 = vmatpush.msrb.mxu3 %v1655_v4  ;;  %v1706_v4 = vld [vmem:[%s15483_s5 + $0x788] sm:$0xff] }
 0x225   : > { %2323 = vmatpush.msrb.mxu1 %v1715_v6  ;;  %v1350_v6 = vrot.slane %v8235_v42, 7 }
 0x226   : > { %6410 = vmatmul.msk.f32.gmra.mxu1 %vm16102_vm4, %v8573_v26  ;;  %v8616_v26 = vsel %vm16115_vm13, %v1346_v0, %v1348_v39  ;;  %v1709_v0 = vld [vmem:[%s15483_s5 + $0x7a0] sm:$0xff]  ;;  %vm16119_vm13 = vnez %v16020_v13  ;;  %vm16120_vm4 = vcmp.lt.s32.totalorder %v6954_v2, 1  ;;  %v1411_v13 = vrot.slane %v8066_v21, 1 }
 0x227   : > { %6359 = vmatmul.msk.f32.gmra.mxu2 %vm7158_vm6, %v8603_v59  ;;  %16116 = vst [vmem:[#allocation42_spill] sm:$0xff] %v8616_v26  ;;  %2324 = vmatpush.msrb.mxu1 %v1712_v11  ;;  %v8651_v11 = vsel %vm16117_vm0, %v15547_v50, %v1401_v20  ;;  %v8661_v48 = vsel %vm16120_vm4, %v1348_v39, %v1350_v6  ;;  %v1352_v39 = vrot.slane %v8256_v15, 7  ;;  %vm16122_vm4 = vmmov %vm16117_vm0  ;;  %vm16124_vm0 = vnez %v16026_v23 }
 0x228   : > { %16118 = vst [vmem:[#allocation43_spill] sm:$0xff] %v8651_v11 }
 0x229   : > { %6367 = vmatmul.msk.f32.gmra.mxu3 %vm7069_vm11, %v8616_v26  ;;  %v8621_v49 = vpop.f32.mrf.mxu0  ;;  %2325 = vmatpush.msrb.mxu1 %v1709_v0  ;;  %v1652_v0 = vld [vmem:[%s15483_s5 + $0x5d8] sm:$0xff]  ;;  %16121 = vst [vmem:[#allocation44_spill] sm:$0xff] %v8661_v48 }
 0x22a   : > { %2212 = vmatpush.msrb.mxu3 %v1652_v0 }
 0x22b   : > { %2326 = vmatpush.msrb.mxu1 %v1706_v4  ;;  %v1403_v4 = vrot.slane %v7954_v45, 1 }
 0x22c   : > { %6403 = vmatmul.msk.f32.gmra.mxu0 %vm7158_vm6, %v8603_v59  ;;  %v1649_v59 = vld [vmem:[%s15483_s5 + $0x5c0] sm:$0xff] }
 0x22d   : > { %2213 = vmatpush.msrb.mxu3 %v1649_v59  ;;  %v8684_v0 = vsel %vm16122_vm4, %v1401_v20, %v1403_v4 }
 0x22e   : > { %6411 = vmatmul.msk.f32.gmra.mxu1 %vm7069_vm11, %v8616_v26  ;;  %v1601_v26 = vld [vmem:[%s15483_s5 + $0x440] sm:$0xff]  ;;  %16123 = vst [vmem:[#allocation45_spill] sm:$0xff] %v8684_v0  ;;  %vm16125_vm11 = vcmp.lt.s32.totalorder %v6954_v2, 1 }
 0x22f   : > { %6371 = vmatmul.msk.f32.vlgmr.msrb.gmra.mxu2 %vm16119_vm13, %v8651_v11  ;;  %v8696_v59 = vsel %vm16125_vm11, %v1350_v6, %v1352_v39  ;;  %2214 = vmatpush.msrb.mxu3 %v1646_v14  ;;  %v1595_v6 = vld [vmem:[%s15483_s5 + $0x410] sm:$0xff]  ;;  %vm16127_vm11 = vmmov %vm16122_vm4  ;;  %vm16129_vm4 = vnez %v16032_v36 }
 0x230   : > { %2163 = vmatpush.msra.mxu2 %v1601_v26  ;;  %v1598_v26 = vld [vmem:[%s15483_s5 + $0x428] sm:$0xff]  ;;  %16126 = vst [vmem:[#allocation46_spill] sm:$0xff] %v8696_v59  ;;  %v1643_v14 = vld [vmem:[%s15483_s5 + $0x590] sm:$0xff] }
 0x231   : > { %6368 = vmatmul.msk.f32.gmra.mxu3 %vm7152_vm2, %v8661_v48  ;;  %v8666_v50 = vpop.f32.mrf.mxu0 }
 0x232   : > { %2164 = vmatpush.msra.mxu2 %v1598_v26  ;;  %2215 = vmatpush.msrb.mxu3 %v1643_v14 }
 0x234   : > { %6415 = vmatmul.msk.f32.vlgmr.msra.gmra.mxu0 %vm16119_vm13, %v8651_v11  ;;  %v8692_v11 = vpop.f32.mrf.mxu1  ;;  %2165 = vmatpush.msra.mxu2 %v1595_v6 }
 0x236   : > { %6412 = vmatmul.msk.f32.gmra.mxu1 %vm7152_vm2, %v8661_v48  ;;  %v1405_v48 = vrot.slane %v7970_v18, 1  ;;  %vm16131_vm2 = vcmp.lt.s32.totalorder %v6954_v2, 1  ;;  %2166 = vmatpush.msra.mxu2 %v1592_v58  ;;  %v1589_v58 = vld [vmem:[%s15483_s5 + $0x3e0] sm:$0xff] }
 0x237   : > { %6372 = vmatmul.msk.f32.gmra.mxu2 %vm16124_vm0, %v8684_v0 }
 0x238   : > { %v8718_v26 = vsel %vm16127_vm11, %v1403_v4, %v1405_v48  ;;  %2167 = vmatpush.msra.mxu2 %v1589_v58  ;;  %v1404_v58 = vrot.slane %v8039_v52, 1 }
 0x239   : > { %6369 = vmatmul.msk.f32.gmra.mxu3 %vm7196_vm14, %v8696_v59  ;;  %v8701_v20 = vpop.f32.mrf.mxu0  ;;  %16128 = vst [vmem:[#allocation47_spill] sm:$0xff] %v8718_v26 }
 0x23a   : > { %2168 = vmatpush.msra.mxu2 %v1586_v60 }
 0x23c   : > { %6416 = vmatmul.msk.f32.gmra.mxu0 %vm16124_vm0, %v8684_v0  ;;  %v16130_v0 = vrot.slane %v8279_v32, 7 }
 0x23e   : > { %6413 = vmatmul.msk.f32.gmra.mxu1 %vm7196_vm14, %v8696_v59  ;;  %v8730_v6 = vsel %vm16131_vm2, %v1352_v39, %v16130_v0  ;;  %v8737_v59 = vpop.f32.mrf.mxu1  ;;  %v1402_v39 = vrot.slane %v8008_v34, 1  ;;  %v1640_v0 = vld [vmem:[%s15483_s5 + $0x578] sm:$0xff]  ;;  %vm16134_vm2 = vmmov %vm16127_vm11 }
 0x23f   : > { %6373 = vmatmul.msk.f32.gmra.mxu2 %vm16129_vm4, %v8718_v26  ;;  %16132 = vst [vmem:[#allocation48_spill] sm:$0xff] %v8730_v6  ;;  %2216 = vmatpush.msrb.mxu3 %v1640_v0  ;;  %v8755_v14 = vsel %vm16134_vm2, %v1405_v48, %v1407_v5  ;;  %vm16136_vm11 = vmmov %vm16134_vm2  ;;  %v1409_v48 = vrot.slane %v8026_v7, 1 }
 0x240   : > { %16135 = vst [vmem:[#allocation50_spill] sm:$0xff] %v8755_v14  ;;  %v8768_v0 = vsel %vm16136_vm11, %v15570_v37, %v1402_v39  ;;  %v1608_v37 = vld [vmem:[%s15483_s5 + $0x478] sm:$0xff]  ;;  %vm16140_vm11 = vmmov %vm16134_vm2 }
 0x241   : > { %6370 = vmatmul.msk.f32.gmra.mxu3 %vm7158_vm6, %v8730_v6  ;;  %v8735_v4 = vpop.f32.mrf.mxu0  ;;  %16137 = vst [vmem:[#allocation51_spill] sm:$0xff] %v8768_v0  ;;  %2461 = vmatpush.msrb.mxu0 %v1608_v37  ;;  %v1634_v37 = vld [vmem:[%s15483_s5 + $0x548] sm:$0xff]  ;;  %v8809_v60 = vsel %vm16140_vm11, %v1402_v39, %v1404_v58  ;;  %v1599_v39 = vld [vmem:[%s15483_s5 + $0x430] sm:$0xff]  ;;  %vm16144_vm11 = vmmov %vm16134_vm2 }
 0x242   : > { %16133 = vst [vmem:[#allocation49_spill] sm:$0xff] %v8735_v4 }
 0x243   : > { %16141 = vst [vmem:[#allocation54_spill] sm:$0xff] %v8809_v60 }
 0x244   : > { %6417 = vmatmul.msk.f32.gmra.mxu0 %vm16129_vm4, %v8718_v26  ;;  %v1637_v26 = vld [vmem:[%s15483_s5 + $0x560] sm:$0xff] }
 0x245   : > { %2217 = vmatpush.msrb.mxu3 %v1637_v26  ;;  %v1605_v26 = vld [vmem:[%s15483_s5 + $0x460] sm:$0xff] }
 0x246   : > { %6414 = vmatmul.msk.f32.gmra.mxu1 %vm7158_vm6, %v8730_v6  ;;  %v8779_v47 = vpop.f32.mrf.mxu1  ;;  %2462 = vmatpush.msrb.mxu0 %v1605_v26  ;;  %v1406_v26 = vrot.slane %v8076_v22, 1 }
 0x247   : > { %6374 = vmatmul.msk.f32.gmra.mxu2 %vm16073_vm5, %v8755_v14  ;;  %2218 = vmatpush.msrb.mxu3 %v1634_v37  ;;  %v1583_v37 = vld [vmem:[%s15483_s5 + $0x3b0] sm:$0xff] }
 0x248   : > { %2169 = vmatpush.msra.mxu2 %v1583_v37  ;;  %v1593_v37 = vld [vmem:[%s15483_s5 + $0x400] sm:$0xff] }
 0x249   : > { %v8770_v6 = vpop.f32.mrf.mxu0  ;;  %6382 = vmatmul.msk.f32.vlgmr.msra.gmra.mxu3 %vm16119_vm13, %v8768_v0 }
 0x24a   : > { %16138 = vst [vmem:[#allocation52_spill] sm:$0xff] %v8770_v6  ;;  %2170 = vmatpush.msra.mxu2 %v1580_v10  ;;  %v1584_v10 = vld [vmem:[%s15483_s5 + $0x3b8] sm:$0xff]  ;;  %v1415_v6 = vrot.slane %v8140_v62, 1 }
 0x24c   : > { %6418 = vmatmul.msk.f32.gmra.mxu0 %vm16073_vm5, %v8755_v14  ;;  %v8796_v14 = vsel %vm16134_vm2, %v1407_v5, %v1409_v48 }
 0x24d   : > { %16139 = vst [vmem:[#allocation53_spill] sm:$0xff] %v8796_v14 }
 0x24e   : > { %6426 = vmatmul.msk.f32.vlgmr.msrb.gmra.mxu1 %vm16119_vm13, %v8768_v0  ;;  %v1602_v0 = vld [vmem:[%s15483_s5 + $0x448] sm:$0xff] }
 0x24f   : > { %6375 = vmatmul.msk.f32.gmra.mxu2 %vm16075_vm3, %v8796_v14  ;;  %2463 = vmatpush.msrb.mxu0 %v1602_v0  ;;  %v1596_v0 = vld [vmem:[%s15483_s5 + $0x418] sm:$0xff] }
 0x251   : > { %v8811_v5 = vpop.f32.mrf.mxu0  ;;  %6383 = vmatmul.msk.f32.gmra.mxu3 %vm16124_vm0, %v8809_v60  ;;  %2464 = vmatpush.msrb.mxu0 %v1599_v39  ;;  %v1631_v39 = vld [vmem:[%s15483_s5 + $0x530] sm:$0xff] }
 0x252   : > { %16142 = vst [vmem:[#allocation55_spill] sm:$0xff] %v8811_v5  ;;  %v8833_v5 = vpop.f32.mrf.mxu1  ;;  %2219 = vmatpush.msrb.mxu3 %v1631_v39  ;;  %v1587_v39 = vld [vmem:[%s15483_s5 + $0x3d0] sm:$0xff] }
 0x253   : > { %2465 = vmatpush.msrb.mxu0 %v1596_v0  ;;  %v1413_v0 = vrot.slane %v8109_v40, 1 }
 0x254   : > { %6419 = vmatmul.msk.f32.gmra.mxu0 %vm16075_vm3, %v8796_v14  ;;  %v8840_v14 = vsel %vm16134_vm2, %v1409_v48, %v1411_v13  ;;  %v1590_v48 = vld [vmem:[%s15483_s5 + $0x3e8] sm:$0xff]  ;;  %2220 = vmatpush.msrb.mxu3 %v1628_v41  ;;  %v1581_v41 = vld [vmem:[%s15483_s5 + $0x3a0] sm:$0xff] }
 0x255   : > { %16143 = vst [vmem:[#allocation56_spill] sm:$0xff] %v8840_v14  ;;  %2466 = vmatpush.msrb.mxu0 %v1593_v37  ;;  %v1408_v37 = vrot.slane %v8119_v12, 1 }
 0x256   : > { %6427 = vmatmul.msk.f32.gmra.mxu1 %vm16124_vm0, %v8809_v60  ;;  %v8853_v60 = vsel %vm16144_vm11, %v1404_v58, %v1406_v26  ;;  %vm16148_vm11 = vmmov %vm16134_vm2 }
 0x257   : > { %6376 = vmatmul.msk.f32.gmra.mxu2 %vm16076_vm9, %v8840_v14  ;;  %16145 = vst [vmem:[#allocation57_spill] sm:$0xff] %v8853_v60  ;;  %2467 = vmatpush.msrb.mxu0 %v1590_v48  ;;  %v8890_v48 = vsel %vm16134_vm2, %v1411_v13, %v1413_v0  ;;  %v1625_v13 = vld [vmem:[%s15483_s5 + $0x500] sm:$0xff] }
 0x258   : > { %16147 = vst [vmem:[#allocation59_spill] sm:$0xff] %v8890_v48  ;;  %2221 = vmatpush.msrb.mxu3 %v1625_v13 }
 0x259   : > { %6384 = vmatmul.msk.f32.gmra.mxu3 %vm16129_vm4, %v8853_v60  ;;  %v8867_v58 = vpop.f32.mrf.mxu0  ;;  %2468 = vmatpush.msrb.mxu0 %v1587_v39  ;;  %v1571_v39 = vld [vmem:[%s15483_s5 + $0x350] sm:$0xff] }
 0x25a   : > { %v8861_v23 = vpop.f32.mrf.mxu2  ;;  %16146 = vst [vmem:[#allocation58_spill] sm:$0xff] %v8867_v58  ;;  %v1577_v58 = vld [vmem:[%s15483_s5 + $0x380] sm:$0xff] }
 0x25b   : > { %2171 = vmatpush.msra.mxu2 %v1577_v58  ;;  %2469 = vmatpush.msrb.mxu0 %v1584_v10  ;;  %v8907_v58 = vpop.f32.mrf.mxu1  ;;  %v1578_v10 = vld [vmem:[%s15483_s5 + $0x388] sm:$0xff] }
 0x25c   : > { %6420 = vmatmul.msk.f32.gmra.mxu0 %vm16076_vm9, %v8840_v14  ;;  %v1574_v14 = vld [vmem:[%s15483_s5 + $0x368] sm:$0xff] }
 0x25d   : > { %2172 = vmatpush.msra.mxu2 %v1574_v14  ;;  %2470 = vmatpush.msrb.mxu0 %v1581_v41  ;;  %v1575_v14 = vld [vmem:[%s15483_s5 + $0x370] sm:$0xff]  ;;  %v1410_v41 = vrot.slane %v8147_v31, 1 }
 0x25e   : > { %6428 = vmatmul.msk.f32.gmra.mxu1 %vm16129_vm4, %v8853_v60  ;;  %v8911_v60 = vsel %vm16148_vm11, %v1406_v26, %v1408_v37  ;;  %v1568_v26 = vld [vmem:[%s15483_s5 + $0x338] sm:$0xff]  ;;  %vm16152_vm11 = vmmov %vm16134_vm2 }
 0x25f   : > { %6377 = vmatmul.msk.f32.gmra.mxu2 %vm16078_vm7, %v8890_v48  ;;  %16149 = vst [vmem:[#allocation60_spill] sm:$0xff] %v8911_v60  ;;  %2471 = vmatpush.msrb.mxu0 %v1578_v10  ;;  %v1572_v10 = vld [vmem:[%s15483_s5 + $0x358] sm:$0xff] }
 0x260   : > { %2173 = vmatpush.msra.mxu2 %v1571_v39  ;;  %v1565_v39 = vld [vmem:[%s15483_s5 + $0x320] sm:$0xff] }
 0x261   : > { %6385 = vmatmul.msk.f32.gmra.mxu3 %vm16073_vm5, %v8911_v60  ;;  %v8935_v13 = vpop.f32.mrf.mxu0  ;;  %2472 = vmatpush.msrb.mxu0 %v1575_v14  ;;  %v1622_v14 = vld [vmem:[%s15483_s5 + $0x4e8] sm:$0xff] }
 0x262   : > { %v8919_v36 = vpop.f32.mrf.mxu2  ;;  %2174 = vmatpush.msra.mxu2 %v1568_v26  ;;  %16150 = vst [vmem:[#allocation61_spill] sm:$0xff] %v8935_v13  ;;  %v1562_v26 = vld [vmem:[%s15483_s5 + $0x308] sm:$0xff]  ;;  %2222 = vmatpush.msrb.mxu3 %v1622_v14  ;;  %v1412_v14 = vrot.slane %v8175_v19, 1 }
 0x263   : > { %2473 = vmatpush.msrb.mxu0 %v1572_v10  ;;  %v1566_v10 = vld [vmem:[%s15483_s5 + $0x328] sm:$0xff]  ;;  %v8975_v13 = vpop.f32.mrf.mxu1 }
 0x264   : > { %6421 = vmatmul.msk.f32.gmra.mxu0 %vm16078_vm7, %v8890_v48  ;;  %v8945_v48 = vsel %vm16134_vm2, %v1413_v0, %v1415_v6  ;;  %2175 = vmatpush.msra.mxu2 %v1565_v39  ;;  %v1656_v0 = vld [vmem:[%s15483_s5 + $0x5f8] sm:$0xff]  ;;  %v8964_v39 = vsel %vm16152_vm11, %v1408_v37, %v1410_v41  ;;  %v1417_v37 = vrot.slane %v8168_v30, 1  ;;  %vm16157_vm11 = vnez %v16050_v61 }
 0x265   : > { %16151 = vst [vmem:[#allocation62_spill] sm:$0xff] %v8945_v48  ;;  %2511 = vmatpush.msra.mxu1 %v1656_v0  ;;  %v1619_v0 = vld [vmem:[%s15483_s5 + $0x4d0] sm:$0xff] }
 0x266   : > { %6429 = vmatmul.msk.f32.gmra.mxu1 %vm16073_vm5, %v8911_v60  ;;  %v1569_v60 = vld [vmem:[%s15483_s5 + $0x340] sm:$0xff]  ;;  %16153 = vst [vmem:[#allocation63_spill] sm:$0xff] %v8964_v39  ;;  %2176 = vmatpush.msra.mxu2 %v1562_v26 }
 0x267   : > { %6378 = vmatmul.msk.f32.gmra.mxu2 %vm16080_vm12, %v8945_v48  ;;  %2474 = vmatpush.msrb.mxu0 %v1569_v60  ;;  %v1563_v60 = vld [vmem:[%s15483_s5 + $0x310] sm:$0xff]  ;;  %v8986_v26 = vld [vmem:[%s15484_s6] sm:$0x7] }
 0x268   : > { %16154 = vst [vmem:[#allocation64_spill] sm:$0xff] %v8986_v26  ;;  %2512 = vmatpush.msra.mxu1 %v1653_v8  ;;  %2223 = vmatpush.msrb.mxu3 %v1619_v0  ;;  %v1647_v8 = vld [vmem:[%s15483_s5 + $0x5b0] sm:$0xff]  ;;  %v9009_v33 = vperm.slane %v8986_v26, 0  ;;  %v1414_v26 = vrot.slane %v8203_v43, 1 }
 0x269   : > { %6386 = vmatmul.msk.f32.gmra.mxu3 %vm16075_vm3, %v8964_v39  ;;  %2475 = vmatpush.msrb.mxu0 %v1566_v10  ;;  %v1650_v10 = vld [vmem:[%s15483_s5 + $0x5c8] sm:$0xff]  ;;  %v9011_v4 = vpop.f32.mrf.mxu0 }
 0x26a   : > { %v8977_v38 = vpop.f32.mrf.mxu2  ;;  %16156 = vst [vmem:[#allocation66_spill] sm:$0xff] %v9011_v4  ;;  %2513 = vmatpush.msra.mxu1 %v1650_v10  ;;  %v1616_v10 = vld [vmem:[%s15483_s5 + $0x4b8] sm:$0xff]  ;;  %v1779_v24 = vadd.f32 %v8861_v23, %v9009_v33 }
 0x26b   : > { %2476 = vmatpush.msrb.mxu0 %v1563_v60  ;;  %2224 = vmatpush.msrb.mxu3 %v1616_v10  ;;  %v9037_v4 = vpop.f32.mrf.mxu1 }
 0x26c   : > { %6422 = vmatmul.msk.f32.gmra.mxu0 %vm16080_vm12, %v8945_v48  ;;  %v9003_v48 = vsel %vm16134_vm2, %v1415_v6, %v1417_v37  ;;  %v1644_v6 = vld [vmem:[%s15483_s5 + $0x598] sm:$0xff]  ;;  %2514 = vmatpush.msra.mxu1 %v1647_v8 }
 0x26d   : > { %16155 = vst [vmem:[#allocation65_spill] sm:$0xff] %v9003_v48 }
 0x26e   : > { %6430 = vmatmul.msk.f32.gmra.mxu1 %vm16075_vm3, %v8964_v39  ;;  %vm16158_vm3 = vmmov %vm16134_vm2  ;;  %v1419_v39 = vrot.slane %v8197_v1, 1 }
 0x26f   : > { %6379 = vmatmul.msk.f32.gmra.mxu2 %vm16157_vm11, %v9003_v48  ;;  %v9018_v60 = vsel %vm16158_vm3, %v1410_v41, %v1412_v14  ;;  %v1641_v41 = vld [vmem:[%s15483_s5 + $0x580] sm:$0xff]  ;;  %2515 = vmatpush.msra.mxu1 %v1644_v6  ;;  %vm16160_vm3 = vmmov %vm16134_vm2  ;;  %v1635_v6 = vld [vmem:[%s15483_s5 + $0x550] sm:$0xff]  ;;  %vm16162_vm2 = vnez %v16054_v3 }
 0x270   : > { %16159 = vst [vmem:[#allocation67_spill] sm:$0xff] %v9018_v60  ;;  %v9053_v23 = vsel %vm16160_vm3, %v1417_v37, %v1419_v39  ;;  %vm16163_vm5 = vmmov %vm16160_vm3  ;;  %v1632_v37 = vld [vmem:[%s15483_s5 + $0x538] sm:$0xff] }
 0x271   : > { %6387 = vmatmul.msk.f32.gmra.mxu3 %vm16076_vm9, %v9018_v60  ;;  %2516 = vmatpush.msra.mxu1 %v1641_v41  ;;  %16161 = vst [vmem:[#allocation68_spill] sm:$0xff] %v9053_v23  ;;  %v9066_v10 = vsel %vm16163_vm5, %v1412_v14, %v1414_v26  ;;  %v9071_v41 = vpop.f32.mrf.mxu0  ;;  %v1782_v14 = vadd.f32 %v8919_v36, %v9009_v33  ;;  %v16166_v36 = vrot.slane %v7920_v25, 1  ;;  %vm16167_vm5 = vmmov %vm16160_vm3  ;;  %vm16169_vm3 = vnez %v16046_v57 }
 0x272   : > { %v9026_v0 = vpop.f32.mrf.mxu2  ;;  %16164 = vst [vmem:[#allocation69_spill] sm:$0xff] %v9066_v10 }
 0x273   : > { %2517 = vmatpush.msra.mxu1 %v1638_v27  ;;  %16165 = vst [vmem:[#allocation70_spill] sm:$0xff] %v9071_v41  ;;  %v9092_v35 = vpop.f32.mrf.mxu1 }
 0x274   : > { %v1828_v8 = vpop.f32.mrf.mxu3  ;;  %6423 = vmatmul.msk.f32.gmra.mxu0 %vm16157_vm11, %v9003_v48 }
 0x275   : > { %v9046_v53 = vadd.f32 %v1828_v8, %v1779_v24  ;;  %v1613_v24 = vld [vmem:[%s15483_s5 + $0x4a0] sm:$0xff]  ;;  %2518 = vmatpush.msra.mxu1 %v1635_v6  ;;  %v1626_v6 = vld [vmem:[%s15483_s5 + $0x508] sm:$0xff] }
 0x276   : > { %6431 = vmatmul.msk.f32.gmra.mxu1 %vm16076_vm9, %v9018_v60  ;;  %2225 = vmatpush.msrb.mxu3 %v1613_v24  ;;  %v1629_v8 = vld [vmem:[%s15483_s5 + $0x520] sm:$0xff]  ;;  %v1416_v60 = vrot.slane %v8235_v42, 1 }
 0x277   : > { %6380 = vmatmul.msk.f32.gmra.mxu2 %vm16162_vm2, %v9053_v23  ;;  %2519 = vmatpush.msra.mxu1 %v1632_v37  ;;  %v9101_v37 = vsel %vm16167_vm5, %v1419_v39, %v16166_v36  ;;  %v1560_v36 = vld [vmem:[%s15483_s5 + $0x2f8] sm:$0xff] }
 0x278   : > { %16168 = vst [vmem:[#allocation71_spill] sm:$0xff] %v9101_v37  ;;  %v9117_v39 = vsel %vm16167_vm5, %v1414_v26, %v1416_v60  ;;  %v1617_v26 = vld [vmem:[%s15483_s5 + $0x4c0] sm:$0xff] }
 0x279   : > { %6388 = vmatmul.msk.f32.gmra.mxu3 %vm16078_vm7, %v9066_v10  ;;  %2520 = vmatpush.msra.mxu1 %v1629_v8  ;;  %v1610_v8 = vld [vmem:[%s15483_s5 + $0x488] sm:$0xff]  ;;  %16170 = vst [vmem:[#allocation72_spill] sm:$0xff] %v9117_v39 }
 0x27a   : > { %v9076_v27 = vpop.f32.mrf.mxu2  ;;  %2226 = vmatpush.msrb.mxu3 %v1610_v8  ;;  %v1785_v8 = vadd.f32 %v8977_v38, %v9009_v33  ;;  %v1611_v38 = vld [vmem:[%s15483_s5 + $0x490] sm:$0xff] }
 0x27b   : > { %2521 = vmatpush.msra.mxu1 %v1626_v6 }
 0x27c   : > { %v1831_v24 = vpop.f32.mrf.mxu3  ;;  %6424 = vmatmul.msk.f32.gmra.mxu0 %vm16162_vm2, %v9053_v23  ;;  %v1623_v23 = vld [vmem:[%s15483_s5 + $0x4f0] sm:$0xff]  ;;  %2411 = vmatpush.msra.mxu3 %v1560_v36  ;;  %v9157_v36 = vpop.f32.mrf.mxu1 }
 0x27d   : > { %v9090_v48 = vadd.f32 %v1831_v24, %v1782_v14  ;;  %v1512_v14 = vld [vmem:[%s15483_s5 + $0x178] sm:$0xff]  ;;  %2522 = vmatpush.msra.mxu1 %v1623_v23  ;;  %v1418_v23 = vrot.slane %v8256_v15, 1 }
 0x27e   : > { %6432 = vmatmul.msk.f32.gmra.mxu1 %vm16078_vm7, %v9066_v10  ;;  %2361 = vmatpush.msrb.mxu2 %v1512_v14  ;;  %v1620_v24 = vld [vmem:[%s15483_s5 + $0x4d8] sm:$0xff]  ;;  %v9133_v14 = vpop.f32.mrf.mxu0  ;;  %vm16217_vm7 = vcmp.lt.s32.totalorder %v6954_v2, 1 }
 0x27f   : > { %6381 = vmatmul.msk.f32.gmra.mxu2 %vm16169_vm3, %v9101_v37  ;;  %2523 = vmatpush.msra.mxu1 %v1620_v24  ;;  %v1509_v24 = vld [vmem:[%s15483_s5 + $0x160] sm:$0xff] }
 0x280   : > { %2362 = vmatpush.msrb.mxu2 %v1509_v24 }
 0x281   : > { %6389 = vmatmul.msk.f32.gmra.mxu3 %vm16080_vm12, %v9117_v39  ;;  %2524 = vmatpush.msra.mxu1 %v1617_v26  ;;  %v9161_v26 = vsel %vm16167_vm5, %v1416_v60, %v1418_v23  ;;  %v1420_v60 = vrot.slane %v8279_v32, 1 }
 0x282   : > { %v1793_v6 = vpop.f32.mrf.mxu2  ;;  %16171 = vst [vmem:[#allocation73_spill] sm:$0xff] %v9161_v26 }
 0x283   : > { %2525 = vmatpush.msra.mxu1 %v1614_v46 }
 0x284   : > { %v1834_v10 = vpop.f32.mrf.mxu3  ;;  %6425 = vmatmul.msk.f32.gmra.mxu0 %vm16169_vm3, %v9101_v37 }
 0x285   : > { %v9142_v41 = vadd.f32 %v1834_v10, %v1785_v8  ;;  %v1557_v10 = vld [vmem:[%s15483_s5 + $0x2e0] sm:$0xff]  ;;  %2526 = vmatpush.msra.mxu1 %v1611_v38  ;;  %v1788_v8 = vadd.f32 %v9026_v0, %v9009_v33  ;;  %v1554_v0 = vld [vmem:[%s15483_s5 + $0x2c8] sm:$0xff] }
 0x286   : > { %6433 = vmatmul.msk.f32.gmra.mxu1 %vm16080_vm12, %v9117_v39  ;;  %2412 = vmatpush.msra.mxu3 %v1557_v10  ;;  %v1506_v39 = vld [vmem:[%s15483_s5 + $0x148] sm:$0xff]  ;;  %v9173_v24 = vpop.f32.mrf.mxu0 }
 0x287   : > { %2177 = vmatmul.f32.vlgmr.msra.gmra.mxu2 %v7920_v25 }
 0x288   : > { %2363 = vmatpush.msrb.mxu2 %v1506_v39  ;;  %v9189_v39 = vsel %vm16167_vm5, %v1418_v23, %v1420_v60  ;;  %2413 = vmatpush.msra.mxu3 %v1554_v0 }
 0x289   : > { %6390 = vmatmul.msk.f32.gmra.mxu3 %vm16157_vm11, %v9161_v26  ;;  %16172 = vst [vmem:[#allocation74_spill] sm:$0xff] %v9189_v39 }
 0x28a   : > { %v1796_v46 = vpop.f32.mrf.mxu2 }
 0x28c   : > { %v1837_v37 = vpop.f32.mrf.mxu3  ;;  %2477 = vmatmul.f32.vlgmr.msrb.gmra.mxu0 %v7920_v25  ;;  %v1503_v25 = vld [vmem:[%s15483_s5 + $0x130] sm:$0xff] }
 0x28d   : > { %v9175_v10 = vadd.f32 %v1837_v37, %v1788_v8  ;;  %2364 = vmatpush.msrb.mxu2 %v1503_v25  ;;  %v9194_v37 = vpop.f32.mrf.mxu1  ;;  %v1791_v8 = vadd.f32 %v9076_v27, %v9009_v33  ;;  %v1500_v27 = vld [vmem:[%s15483_s5 + $0x118] sm:$0xff] }
 0x28e   : > { %6434 = vmatmul.msk.f32.gmra.mxu1 %vm16157_vm11, %v9161_v26  ;;  %v1551_v26 = vld [vmem:[%s15483_s5 + $0x2b0] sm:$0xff]  ;;  %v9207_v0 = vpop.f32.mrf.mxu0  ;;  %v1548_v25 = vld [vmem:[%s15483_s5 + $0x298] sm:$0xff] }
 0x28f   : > { %2180 = vmatmul.f32.gmra.mxu2 %v7939_v63  ;;  %2414 = vmatpush.msra.mxu3 %v1551_v26 }
 0x290   : > { %2365 = vmatpush.msrb.mxu2 %v1500_v27 }
 0x291   : > { %6391 = vmatmul.msk.f32.gmra.mxu3 %vm16162_vm2, %v9189_v39 }
 0x292   : > { %v1799_v38 = vpop.f32.mrf.mxu2  ;;  %2415 = vmatpush.msra.mxu3 %v1548_v25  ;;  %2366 = vmatpush.msrb.mxu2 %v1497_v56  ;;  %v1542_v25 = vld [vmem:[%s15483_s5 + $0x268] sm:$0xff] }
 0x294   : > { %v1840_v61 = vpop.f32.mrf.mxu3  ;;  %2480 = vmatmul.f32.gmra.mxu0 %v7939_v63  ;;  %v16173_v63 = vrot.slane %v7977_v51, 1 }
 0x295   : > { %v9202_v23 = vadd.f32 %v1840_v61, %v1791_v8  ;;  %v1794_v8 = vadd.f32 %v1793_v6, %v9009_v33  ;;  %v1545_v6 = vld [vmem:[%s15483_s5 + $0x280] sm:$0xff] }
 0x296   : > { %6435 = vmatmul.msk.f32.gmra.mxu1 %vm16162_vm2, %v9189_v39  ;;  %v9220_v61 = vsel %vm16167_vm5, %v1420_v60, %v16173_v63  ;;  %v9226_v39 = vpop.f32.mrf.mxu1  ;;  %2416 = vmatpush.msra.mxu3 %v1545_v6  ;;  %v9244_v27 = vpop.f32.mrf.mxu0  ;;  %v1539_v6 = vld [vmem:[%s15483_s5 + $0x250] sm:$0xff]  ;;  %vm16176_vm5 = vnez %v16023_v16 }
 0x297   : > { %2183 = vmatmul.f32.gmra.mxu2 %v7954_v45  ;;  %16174 = vst [vmem:[#allocation75_spill] sm:$0xff] %v9220_v61 }
 0x298   : > { %2417 = vmatpush.msra.mxu3 %v1542_v25 }
 0x299   : > { %6392 = vmatmul.msk.f32.gmra.mxu3 %vm16169_vm3, %v9220_v61 }
 0x29a   : > { %v1802_v26 = vpop.f32.mrf.mxu2  ;;  %2418 = vmatpush.msra.mxu3 %v1539_v6 }
 0x29c   : > { %v1843_v3 = vpop.f32.mrf.mxu3  ;;  %2483 = vmatmul.f32.gmra.mxu0 %v7954_v45  ;;  %v1494_v45 = vld [vmem:[%s15483_s5 + $0xe8] sm:$0xff] }
 0x29d   : > { %v9232_v60 = vadd.f32 %v1843_v3, %v1794_v8  ;;  %2367 = vmatpush.msrb.mxu2 %v1494_v45  ;;  %v1797_v3 = vadd.f32 %v1796_v46, %v9009_v33  ;;  %v1491_v46 = vld [vmem:[%s15483_s5 + $0xd0] sm:$0xff]  ;;  %v1800_v45 = vadd.f32 %v1799_v38, %v9009_v33 }
 0x29e   : > { %6436 = vmatmul.msk.f32.gmra.mxu1 %vm16169_vm3, %v9220_v61  ;;  %v9254_v61 = vpop.f32.mrf.mxu1 }
 0x29f   : > { %2186 = vmatmul.f32.gmra.mxu2 %v7970_v18 }
 0x2a0   : > { %2368 = vmatpush.msrb.mxu2 %v1491_v46 }
 0x2a1   : > { %2227 = vmatmul.f32.vlgmr.msrb.gmra.mxu3 %v7977_v51 }
 0x2a2   : > { %v1805_v56 = vpop.f32.mrf.mxu2 }
 0x2a4   : > { %v1846_v63 = vpop.f32.mrf.mxu3  ;;  %2486 = vmatmul.f32.gmra.mxu0 %v7970_v18 }
 0x2a5   : > { %v9252_v8 = vadd.f32 %v1846_v63, %v1797_v3  ;;  %v9266_v3 = vpop.f32.mrf.mxu0  ;;  %v1879_v63 = vadd.f32 %v8386_v28, %v9046_v53  ;;  %v1485_v53 = vld [vmem:[%s15483_s5 + $0xa0] sm:$0xff] }
 0x2a6   : > { %2527 = vmatmul.f32.vlgmr.msra.gmra.mxu1 %v7977_v51  ;;  %v1488_v51 = vld [vmem:[%s15483_s5 + $0xb8] sm:$0xff]  ;;  %v9278_v38 = vpop.f32.mrf.mxu1 }
 0x2a7   : > { %2189 = vmatmul.f32.gmra.mxu2 %v7998_v29  ;;  %v1929_v6 = vadd.f32 %v8692_v11, %v1879_v63  ;;  %v1882_v63 = vadd.f32 %v8440_v9, %v9090_v48  ;;  %v1530_v48 = vld [vmem:[%s15483_s5 + $0x208] sm:$0xff] }
 0x2a8   : > { %2369 = vmatpush.msrb.mxu2 %v1488_v51  ;;  %v1533_v51 = vld [vmem:[%s15483_s5 + $0x220] sm:$0xff] }
 0x2a9   : > { %2230 = vmatmul.f32.gmra.mxu3 %v8008_v34  ;;  %v1932_v9 = vadd.f32 %v8737_v59, %v1882_v63  ;;  %v1470_v59 = vld [vmem:[%s15483_s5 + $0x28] sm:$0xff] }
 0x2aa   : > { %v1808_v18 = vpop.f32.mrf.mxu2  ;;  %2370 = vmatpush.msrb.mxu2 %v1485_v53 }
 0x2ac   : > { %v1849_v25 = vpop.f32.mrf.mxu3  ;;  %2489 = vmatmul.f32.gmra.mxu0 %v7998_v29  ;;  %v1536_v29 = vld [vmem:[%s15483_s5 + $0x238] sm:$0xff] }
 0x2ad   : > { %v9274_v46 = vadd.f32 %v1849_v25, %v1800_v45  ;;  %2419 = vmatpush.msra.mxu3 %v1536_v29  ;;  %v1482_v25 = vld [vmem:[%s15483_s5 + $0x88] sm:$0xff]  ;;  %v9300_v29 = vpop.f32.mrf.mxu0 }
 0x2ae   : > { %2530 = vmatmul.f32.gmra.mxu1 %v8008_v34  ;;  %v1803_v34 = vadd.f32 %v1802_v26, %v9009_v33  ;;  %16175 = vst [vmem:[#allocation76_spill] sm:$0xff] %v9300_v29  ;;  %2371 = vmatpush.msrb.mxu2 %v1482_v25  ;;  %v1885_v25 = vadd.f32 %v8491_v44, %v9142_v41  ;;  %v1527_v44 = vld [vmem:[%s15483_s5 + $0x1f0] sm:$0xff]  ;;  %v16214_v29 = vld [vmem:[#allocation38_spill] sm:$0xff] }
 0x2af   : > { %2192 = vmatmul.f32.gmra.mxu2 %v8026_v7  ;;  %2420 = vmatpush.msra.mxu3 %v1533_v51 }
 0x2b1   : > { %2233 = vmatmul.f32.gmra.mxu3 %v8039_v52 }
 0x2b2   : > { %v1978_v28 = vpop.f32.mrf.mxu2  ;;  %2421 = vmatpush.msra.mxu3 %v1530_v48 }
 0x2b3   : > { %v9289_v45 = vadd.f32 %v1978_v28, %v1929_v6  ;;  %v1479_v6 = vld [vmem:[%s15483_s5 + $0x70] sm:$0xff]  ;;  %v1473_v28 = vld [vmem:[%s15483_s5 + $0x40] sm:$0xff] }
 0x2b4   : > { %v1852_v11 = vpop.f32.mrf.mxu3  ;;  %2492 = vmatmul.f32.gmra.mxu0 %v8026_v7  ;;  %2372 = vmatpush.msrb.mxu2 %v1479_v6  ;;  %v1476_v7 = vld [vmem:[%s15483_s5 + $0x58] sm:$0xff] }
 0x2b5   : > { %v9302_v26 = vadd.f32 %v1852_v11, %v1803_v34  ;;  %v1806_v34 = vadd.f32 %v1805_v56, %v9009_v33  ;;  %v1467_v56 = vld [vmem:[%s15483_s5 + $0x10] sm:$0xff]  ;;  %v9335_v6 = vpop.f32.mrf.mxu0  ;;  %2422 = vmatpush.msra.mxu3 %v1527_v44 }
 0x2b6   : > { %2533 = vmatmul.f32.gmra.mxu1 %v8039_v52  ;;  %v9317_v52 = vpop.f32.mrf.mxu1  ;;  %2373 = vmatpush.msrb.mxu2 %v1476_v7 }
 0x2b7   : > { %2195 = vmatmul.f32.gmra.mxu2 %v8066_v21 }
 0x2b8   : > { %2374 = vmatpush.msrb.mxu2 %v1473_v28 }
 0x2b9   : > { %2236 = vmatmul.f32.gmra.mxu3 %v8076_v22 }
 0x2ba   : > { %v1981_v53 = vpop.f32.mrf.mxu2  ;;  %2375 = vmatpush.msrb.mxu2 %v1470_v59 }
 0x2bb   : > { %v1982_v51 = vadd.f32 %v1981_v53, %v1932_v9  ;;  %v1524_v9 = vld [vmem:[%s15483_s5 + $0x1d8] sm:$0xff] }
 0x2bc   : > { %v1855_v11 = vpop.f32.mrf.mxu3  ;;  %2495 = vmatmul.f32.gmra.mxu0 %v8066_v21  ;;  %2376 = vmatpush.msrb.mxu2 %v1467_v56  ;;  %v1935_v21 = vadd.f32 %v8779_v47, %v1885_v25  ;;  %v1888_v47 = vadd.f32 %v8536_v55, %v9175_v10 }
 0x2bd   : > { %v9329_v63 = vadd.f32 %v1855_v11, %v1806_v34  ;;  %2423 = vmatpush.msra.mxu3 %v1524_v9 }
 0x2be   : > { %2536 = vmatmul.f32.gmra.mxu1 %v8076_v22  ;;  %v1809_v22 = vadd.f32 %v1808_v18, %v9009_v33  ;;  %v9347_v48 = vpop.f32.mrf.mxu1  ;;  %v9356_v33 = vpop.f32.mrf.mxu0  ;;  %v1938_v18 = vadd.f32 %v8833_v5, %v1888_v47 }
 0x2bf   : > { %2198 = vmatmul.f32.gmra.mxu2 %v8109_v40 }
 0x2c1   : > { %2239 = vmatmul.f32.gmra.mxu3 %v8119_v12 }
 0x2c2   : > { %v1984_v41 = vpop.f32.mrf.mxu2 }
 0x2c3   : > { %v1985_v7 = vadd.f32 %v1984_v41, %v1935_v21  ;;  %v1515_v21 = vld [vmem:[%s15483_s5 + $0x190] sm:$0xff] }
 0x2c4   : > { %v1858_v53 = vpop.f32.mrf.mxu3  ;;  %2498 = vmatmul.f32.gmra.mxu0 %v8109_v40  ;;  %v1521_v40 = vld [vmem:[%s15483_s5 + $0x1c0] sm:$0xff] }
 0x2c5   : > { %v9352_v28 = vadd.f32 %v1858_v53, %v1809_v22  ;;  %2424 = vmatpush.msra.mxu3 %v1521_v40  ;;  %v1900_v53 = vadd.f32 %v8701_v20, %v9274_v46  ;;  %v16177_v40 = vld [vmem:[#allocation25_spill] sm:$0xff]  ;;  %v1746_v20 = vld [vmem:[%s15483_s5 + $0x8c8] sm:$0xff]  ;;  %v2967_v46 = vld [vmem:[%s15485_s7 + $0x150] sm:$0xff] }
 0x2c6   : > { %2539 = vmatmul.f32.gmra.mxu1 %v8119_v12  ;;  %v1891_v12 = vadd.f32 %v8578_v17, %v9202_v23  ;;  %v9369_v59 = vpop.f32.mrf.mxu1  ;;  %v9378_v17 = vpop.f32.mrf.mxu0 }
 0x2c7   : > { %2201 = vmatmul.f32.gmra.mxu2 %v8140_v62 }
 0x2c8   : > { %v1941_v5 = vadd.f32 %v8907_v58, %v1891_v12  ;;  %v1950_v12 = vadd.f32 %v9092_v35, %v1900_v53  ;;  %v1743_v35 = vld [vmem:[%s15483_s5 + $0x8b0] sm:$0xff] }
 0x2c9   : > { %2242 = vmatmul.f32.gmra.mxu3 %v8147_v31 }
 0x2ca   : > { %v1987_v34 = vpop.f32.mrf.mxu2 }
 0x2cb   : > { %v1988_v11 = vadd.f32 %v1987_v34, %v1938_v18  ;;  %v16307_v34 = vld [vmem:[#allocation74_spill] sm:$0xff] }
 0x2cc   : > { %v2028_v55 = vpop.f32.mrf.mxu3  ;;  %2501 = vmatmul.f32.gmra.mxu0 %v8140_v62  ;;  %v1518_v62 = vld [vmem:[%s15483_s5 + $0x1a8] sm:$0xff] }
 0x2cd   : > { %v9367_v10 = vadd.f32 %v2028_v55, %v9289_v45  ;;  %2425 = vmatpush.msra.mxu3 %v1518_v62  ;;  %v2970_v55 = vld [vmem:[%s15485_s7 + $0x168] sm:$0xff]  ;;  %v2964_v62 = vld [vmem:[%s15485_s7 + $0x138] sm:$0xff] }
 0x2ce   : > { %2542 = vmatmul.f32.gmra.mxu1 %v8147_v31  ;;  %v1894_v31 = vadd.f32 %v8621_v49, %v9232_v60  ;;  %v9387_v58 = vpop.f32.mrf.mxu1  ;;  %v9405_v41 = vpop.f32.mrf.mxu0  ;;  %3365 = vmatpush.msra.mxu0 %v2970_v55  ;;  %v2949_v55 = vld [vmem:[%s15485_s7 + $0xc0] sm:$0xff] }
 0x2cf   : > { %2204 = vmatmul.f32.gmra.mxu2 %v8168_v30  ;;  %2426 = vmatpush.msra.mxu3 %v1515_v21 }
 0x2d0   : > { %v1944_v44 = vadd.f32 %v8975_v13, %v1894_v31  ;;  %v1897_v13 = vadd.f32 %v8666_v50, %v9252_v8  ;;  %v1749_v50 = vld [vmem:[%s15483_s5 + $0x8e0] sm:$0xff]  ;;  %3366 = vmatpush.msra.mxu0 %v2967_v46  ;;  %v16179_v31 = vld [vmem:[#allocation49_spill] sm:$0xff] }
 0x2d1   : > { %2245 = vmatmul.f32.gmra.mxu3 %v8175_v19  ;;  %v1903_v21 = vadd.f32 %v16179_v31, %v9302_v26 }
 0x2d2   : > { %v1990_v25 = vpop.f32.mrf.mxu2  ;;  %v1947_v9 = vadd.f32 %v9037_v4, %v1897_v13  ;;  %3367 = vmatpush.msra.mxu0 %v2964_v62 }
 0x2d3   : > { %v1991_v23 = vadd.f32 %v1990_v25, %v1941_v5  ;;  %v1953_v26 = vadd.f32 %v9157_v36, %v1903_v21  ;;  %v1689_v36 = vld [vmem:[%s15483_s5 + $0x700] sm:$0xff]  ;;  %v2940_v21 = vld [vmem:[%s15485_s7 + $0x78] sm:$0xff] }
 0x2d4   : > { %v2031_v45 = vpop.f32.mrf.mxu3  ;;  %2504 = vmatmul.f32.gmra.mxu0 %v8168_v30  ;;  %v1704_v30 = vld [vmem:[%s15483_s5 + $0x778] sm:$0xff] }
 0x2d5   : > { %v9383_v56 = vadd.f32 %v2031_v45, %v1982_v51  ;;  %2561 = vmatpush.msra.mxu2 %v1704_v30  ;;  %v2961_v30 = vld [vmem:[%s15485_s7 + $0x120] sm:$0xff] }
 0x2d6   : > { %2545 = vmatmul.f32.gmra.mxu1 %v8175_v19  ;;  %v1752_v19 = vld [vmem:[%s15483_s5 + $0x8f8] sm:$0xff]  ;;  %v9421_v8 = vpop.f32.mrf.mxu1  ;;  %v9433_v18 = vpop.f32.mrf.mxu0  ;;  %3368 = vmatpush.msra.mxu0 %v2961_v30 }
 0x2d7   : > { %2207 = vmatmul.f32.gmra.mxu2 %v8197_v1  ;;  %2611 = vmatpush.msrb.mxu3 %v1752_v19  ;;  %v16180_v19 = vld [vmem:[#allocation26_spill] sm:$0xff] }
 0x2d9   : > { %2248 = vmatmul.f32.gmra.mxu3 %v8203_v43 }
 0x2da   : > { %v1993_v49 = vpop.f32.mrf.mxu2  ;;  %2612 = vmatpush.msrb.mxu3 %v1749_v50 }
 0x2db   : > { %v9400_v60 = vadd.f32 %v1993_v49, %v1944_v44 }
 0x2dc   : > { %v2034_v51 = vpop.f32.mrf.mxu3  ;;  %2507 = vmatmul.f32.gmra.mxu0 %v8197_v1  ;;  %v1701_v1 = vld [vmem:[%s15483_s5 + $0x760] sm:$0xff]  ;;  %2613 = vmatpush.msrb.mxu3 %v1746_v20  ;;  %v16183_v20 = vld [vmem:[#allocation27_spill] sm:$0xff] }
 0x2dd   : > { %v9407_v22 = vadd.f32 %v2034_v51, %v1985_v7  ;;  %2562 = vmatpush.msra.mxu2 %v1701_v1  ;;  %v2958_v51 = vld [vmem:[%s15485_s7 + $0x108] sm:$0xff] }
 0x2de   : > { %2548 = vmatmul.f32.gmra.mxu1 %v8203_v43  ;;  %v9460_v25 = vpop.f32.mrf.mxu1  ;;  %2614 = vmatpush.msrb.mxu3 %v1743_v35  ;;  %v9476_v13 = vpop.f32.mrf.mxu0  ;;  %v2943_v35 = vld [vmem:[%s15485_s7 + $0x90] sm:$0xff] }
 0x2df   : > { %6437 = vmatmul.msk.f32.vlgmr.msrb.gmra.mxu2 %vm16176_vm5, %v8219_v54  ;;  %v1698_v54 = vld [vmem:[%s15483_s5 + $0x748] sm:$0xff]  ;;  %3369 = vmatpush.msra.mxu0 %v2958_v51  ;;  %v2937_v51 = vld [vmem:[%s15485_s7 + $0x60] sm:$0xff] }
 0x2e0   : > { %2563 = vmatpush.msra.mxu2 %v1698_v54 }
 0x2e1   : > { %2251 = vmatmul.f32.gmra.mxu3 %v8235_v42 }
 0x2e2   : > { %v1996_v7 = vpop.f32.mrf.mxu2 }
 0x2e3   : > { %v9423_v43 = vadd.f32 %v1996_v7, %v1947_v9  ;;  %v2955_v9 = vld [vmem:[%s15485_s7 + $0xf0] sm:$0xff]  ;;  %v2952_v7 = vld [vmem:[%s15485_s7 + $0xd8] sm:$0xff] }
 0x2e4   : > { %v2037_v4 = vpop.f32.mrf.mxu3  ;;  %3370 = vmatpush.msra.mxu0 %v2955_v9 }
 0x2e5   : > { %v9430_v47 = vadd.f32 %v2037_v4, %v1988_v11  ;;  %v16182_v4 = vld [vmem:[#allocation52_spill] sm:$0xff] }
 0x2e6   : > { %2551 = vmatmul.f32.gmra.mxu1 %v8235_v42  ;;  %v1695_v42 = vld [vmem:[%s15483_s5 + $0x730] sm:$0xff]  ;;  %v1906_v53 = vadd.f32 %v16182_v4, %v9329_v63  ;;  %3371 = vmatpush.msra.mxu0 %v2952_v7  ;;  %v2946_v63 = vld [vmem:[%s15485_s7 + $0xa8] sm:$0xff]  ;;  %v1680_v4 = vld [vmem:[%s15483_s5 + $0x6b8] sm:$0xff] }
 0x2e7   : > { %6438 = vmatmul.msk.f32.gmra.mxu2 %vm7116_vm15, %v16177_v40  ;;  %v2931_v7 = vld [vmem:[%s15485_s7 + $0x30] sm:$0xff] }
 0x2e8   : > { %2564 = vmatpush.msra.mxu2 %v1695_v42  ;;  %v16184_v42 = vld [vmem:[#allocation4_spill] sm:$0xff]  ;;  %3372 = vmatpush.msra.mxu0 %v2949_v55  ;;  %v1956_v46 = vadd.f32 %v9194_v37, %v1906_v53  ;;  %v1734_v37 = vld [vmem:[%s15483_s5 + $0x868] sm:$0xff]  ;;  %v2928_v53 = vld [vmem:[%s15485_s7 + $0x18] sm:$0xff] }
 0x2e9   : > { %2254 = vmatmul.f32.gmra.mxu3 %v8256_v15  ;;  %vm16185_vm3 = vnez %v16184_v42 }
 0x2ea   : > { %v1999_v11 = vpop.f32.mrf.mxu2  ;;  %3373 = vmatpush.msra.mxu0 %v2946_v63 }
 0x2eb   : > { %v9452_v5 = vadd.f32 %v1999_v11, %v1950_v12  ;;  %v9505_v12 = vpop.f32.mrf.mxu1  ;;  %v1737_v11 = vld [vmem:[%s15483_s5 + $0x880] sm:$0xff] }
 0x2ec   : > { %v2040_v45 = vpop.f32.mrf.mxu3  ;;  %3374 = vmatpush.msra.mxu0 %v2943_v35 }
 0x2ed   : > { %v9464_v44 = vadd.f32 %v2040_v45, %v1991_v23  ;;  %v1692_v23 = vld [vmem:[%s15483_s5 + $0x718] sm:$0xff]  ;;  %v9527_v45 = vpop.f32.mrf.mxu0 }
 0x2ee   : > { %2554 = vmatmul.f32.gmra.mxu1 %v8256_v15  ;;  %v1740_v15 = vld [vmem:[%s15483_s5 + $0x898] sm:$0xff]  ;;  %2565 = vmatpush.msra.mxu2 %v1692_v23  ;;  %16187 = vst [vmem:[#allocation25_spill] sm:$0xff] %v9527_v45 }
 0x2ef   : > { %6439 = vmatmul.msk.f32.gmra.mxu2 %vm7136_vm10, %v16180_v19  ;;  %2615 = vmatpush.msrb.mxu3 %v1740_v15  ;;  %v2934_v15 = vld [vmem:[%s15485_s7 + $0x48] sm:$0xff] }
 0x2f0   : > { %2566 = vmatpush.msra.mxu2 %v1689_v36  ;;  %3375 = vmatpush.msra.mxu0 %v2940_v21  ;;  %v1731_v36 = vld [vmem:[%s15483_s5 + $0x850] sm:$0xff]  ;;  %v1674_v21 = vld [vmem:[%s15483_s5 + $0x688] sm:$0xff] }
 0x2f1   : > { %2257 = vmatmul.f32.gmra.mxu3 %v8279_v32 }
 0x2f2   : > { %v2002_v1 = vpop.f32.mrf.mxu2  ;;  %2616 = vmatpush.msrb.mxu3 %v1737_v11  ;;  %3376 = vmatpush.msra.mxu0 %v2937_v51  ;;  %v1728_v51 = vld [vmem:[%s15483_s5 + $0x838] sm:$0xff] }
 0x2f3   : > { %v9489_v50 = vadd.f32 %v2002_v1, %v1953_v26  ;;  %v16188_v26 = vld [vmem:[#allocation29_spill] sm:$0xff]  ;;  %v9547_v9 = vpop.f32.mrf.mxu1  ;;  %v16191_v1 = vld [vmem:[#allocation30_spill] sm:$0xff] }
 0x2f4   : > { %v2043_v54 = vpop.f32.mrf.mxu3  ;;  %2617 = vmatpush.msrb.mxu3 %v1734_v37  ;;  %16190 = vst [vmem:[#allocation49_spill] sm:$0xff] %v9547_v9  ;;  %3377 = vmatpush.msra.mxu0 %v2934_v15  ;;  %v1671_v15 = vld [vmem:[%s15483_s5 + $0x670] sm:$0xff] }
 0x2f5   : > { %v9500_v40 = vadd.f32 %v2043_v54, %v9400_v60  ;;  %v16186_v60 = vld [vmem:[#allocation28_spill] sm:$0xff] }
 0x2f6   : > { %2557 = vmatmul.f32.gmra.mxu1 %v8279_v32  ;;  %v1686_v32 = vld [vmem:[%s15483_s5 + $0x6e8] sm:$0xff]  ;;  %2618 = vmatpush.msrb.mxu3 %v1731_v36  ;;  %v16198_v36 = vld [vmem:[#allocation10_spill] sm:$0xff] }
 0x2f7   : > { %6440 = vmatmul.msk.f32.gmra.mxu2 %vm16185_vm3, %v16183_v20  ;;  %3378 = vmatpush.msra.mxu0 %v2931_v7  ;;  %v9567_v20 = vpop.f32.mrf.mxu0  ;;  %vm16199_vm2 = vnez %v16198_v36  ;;  %v16200_v7 = vld [vmem:[#allocation34_spill] sm:$0xff] }
 0x2f8   : > { %2567 = vmatpush.msra.mxu2 %v1686_v32  ;;  %16192 = vst [vmem:[#allocation26_spill] sm:$0xff] %v9567_v20  ;;  %v16195_v32 = vld [vmem:[#allocation32_spill] sm:$0xff]  ;;  %2619 = vmatpush.msrb.mxu3 %v1728_v51 }
 0x2f9   : > { %6448 = vmatmul.msk.f32.vlgmr.msra.gmra.mxu3 %vm16176_vm5, %v16186_v60  ;;  %3379 = vmatpush.msra.mxu0 %v2928_v53  ;;  %v2925_v60 = vld [vmem:[%s15485_s7] sm:$0xff]  ;;  %v1659_v51 = vld [vmem:[%s15483_s5 + $0x610] sm:$0xff] }
 0x2fa   : > { %v2005_v62 = vpop.f32.mrf.mxu2  ;;  %v1665_v53 = vld [vmem:[%s15483_s5 + $0x640] sm:$0xff] }
 0x2fb   : > { %v2006_v31 = vadd.f32 %v2005_v62, %v1956_v46  ;;  %v16193_v46 = vld [vmem:[#allocation31_spill] sm:$0xff]  ;;  %3380 = vmatpush.msra.mxu0 %v2925_v60  ;;  %v9581_v35 = vpop.f32.mrf.mxu1 }
 0x2fc   : > { %v2046_v30 = vpop.f32.mrf.mxu3 }
 0x2fd   : > { %v9536_v19 = vadd.f32 %v2046_v30, %v9423_v43  ;;  %v1683_v43 = vld [vmem:[%s15483_s5 + $0x6d0] sm:$0xff] }
 0x2fe   : > { %2568 = vmatpush.msra.mxu2 %v1683_v43  ;;  %v16197_v43 = vld [vmem:[#allocation33_spill] sm:$0xff] }
 0x2ff   : > { %6441 = vmatmul.msk.f32.gmra.mxu2 %vm16093_vm1, %v16188_v26  ;;  %v1725_v26 = vld [vmem:[%s15483_s5 + $0x820] sm:$0xff] }
 0x300   : > { %2569 = vmatpush.msra.mxu2 %v1680_v4  ;;  %2620 = vmatpush.msrb.mxu3 %v1725_v26  ;;  %v16202_v26 = vld [vmem:[#allocation35_spill] sm:$0xff] }
 0x301   : > { %6449 = vmatmul.msk.f32.gmra.mxu3 %vm7116_vm15, %v16191_v1  ;;  %v9601_v1 = vpop.f32.mrf.mxu0 }
 0x302   : > { %v2008_v54 = vpop.f32.mrf.mxu2  ;;  %16196 = vst [vmem:[#allocation52_spill] sm:$0xff] %v9601_v1 }
 0x304   : > { %v2049_v55 = vpop.f32.mrf.mxu3 }
 0x305   : > { %v9570_v63 = vadd.f32 %v2049_v55, %v9452_v5  ;;  %v1677_v5 = vld [vmem:[%s15483_s5 + $0x6a0] sm:$0xff]  ;;  %v9615_v55 = vpop.f32.mrf.mxu1 }
 0x306   : > { %2570 = vmatpush.msra.mxu2 %v1677_v5 }
 0x307   : > { %6442 = vmatmul.msk.f32.gmra.mxu2 %vm16097_vm8, %v16193_v46  ;;  %v1662_v46 = vld [vmem:[%s15483_s5 + $0x628] sm:$0xff] }
 0x308   : > { %2571 = vmatpush.msra.mxu2 %v1674_v21  ;;  %v1722_v21 = vld [vmem:[%s15483_s5 + $0x808] sm:$0xff] }
 0x309   : > { %6450 = vmatmul.msk.f32.gmra.mxu3 %vm7136_vm10, %v16195_v32  ;;  %v16201_v32 = vld [vmem:[#allocation55_spill] sm:$0xff] }
 0x30a   : > { %v2178_v62 = vpop.f32.mrf.mxu2  ;;  %2572 = vmatpush.msra.mxu2 %v1671_v15  ;;  %v1909_v5 = vadd.f32 %v16201_v32, %v9352_v28  ;;  %2621 = vmatpush.msrb.mxu3 %v1722_v21  ;;  %v16203_v15 = vld [vmem:[#allocation12_spill] sm:$0xff] }
 0x30b   : > { %vm16204_vm11 = vnez %v16203_v15 }
 0x30c   : > { %v2052_v37 = vpop.f32.mrf.mxu3  ;;  %v1959_v28 = vadd.f32 %v9226_v39, %v1909_v5  ;;  %v1716_v39 = vld [vmem:[%s15483_s5 + $0x7d8] sm:$0xff] }
 0x30d   : > { %v9590_v30 = vadd.f32 %v2052_v37, %v9489_v50  ;;  %v1668_v50 = vld [vmem:[%s15483_s5 + $0x658] sm:$0xff]  ;;  %v9649_v5 = vpop.f32.mrf.mxu1 }
 0x30e   : > { %2573 = vmatpush.msra.mxu2 %v1668_v50 }
 0x30f   : > { %6443 = vmatmul.msk.f32.gmra.mxu2 %vm16199_vm2, %v16197_v43  ;;  %v9633_v43 = vpop.f32.mrf.mxu0 }
 0x310   : > { %2574 = vmatpush.msra.mxu2 %v1665_v53  ;;  %16205 = vst [vmem:[#allocation27_spill] sm:$0xff] %v9633_v43  ;;  %v2664_v43 = vmul.f32 0.1, %v9383_v56 }
 0x311   : > { %6451 = vmatmul.msk.f32.gmra.mxu3 %vm16185_vm3, %v16200_v7  ;;  %v16207_v7 = vld [vmem:[#allocation64_spill] sm:$0xff] }
 0x312   : > { %v2181_v4 = vpop.f32.mrf.mxu2  ;;  %2575 = vmatpush.msra.mxu2 %v1662_v46  ;;  %v9640_v53 = vperm.slane %v16207_v7, 1  ;;  %v2009_v46 = vadd.f32 %v2008_v54, %v1959_v28  ;;  %v16210_v28 = vld [vmem:[#allocation37_spill] sm:$0xff] }
 0x314   : > { %v2055_v60 = vpop.f32.mrf.mxu3  ;;  %2576 = vmatpush.msra.mxu2 %v1659_v51  ;;  %v1719_v51 = vld [vmem:[%s15483_s5 + $0x7f0] sm:$0xff] }
 0x315   : > { %v9622_v37 = vadd.f32 %v2055_v60, %v2006_v31  ;;  %v16206_v31 = vld [vmem:[#allocation36_spill] sm:$0xff]  ;;  %v2661_v60 = vmul.f32 0.1, %v9367_v10  ;;  %2622 = vmatpush.msrb.mxu3 %v1719_v51 }
 0x317   : > { %6444 = vmatmul.msk.f32.gmra.mxu2 %vm16204_vm11, %v16202_v26  ;;  %v16208_v26 = vld [vmem:[#allocation58_spill] sm:$0xff]  ;;  %v9654_v7 = vmax.f32 %v9367_v10, %v2661_v60  ;;  %2623 = vmatpush.msrb.mxu3 %v1716_v39  ;;  %v9671_v39 = vmax.f32 %v9383_v56, %v2664_v43  ;;  %v16219_v56 = vld [vmem:[#allocation61_spill] sm:$0xff]  ;;  %v16220_v43 = vld [vmem:[#allocation39_spill] sm:$0xff] }
 0x319   : > { %6452 = vmatmul.msk.f32.gmra.mxu3 %vm16093_vm1, %v16206_v31  ;;  %v2079_v31 = vadd.f32 %v16208_v26, %v9640_v53  ;;  %16209 = vst [vmem:[#allocation28_spill] sm:$0xff] %v9654_v7  ;;  %v9666_v26 = vpop.f32.mrf.mxu0  ;;  %v2727_v60 = vrot.slane %v9654_v7, 7 }
 0x31a   : > { %v2184_v50 = vpop.f32.mrf.mxu2  ;;  %16215 = vst [vmem:[#allocation30_spill] sm:$0xff] %v9666_v26 }
 0x31b   : > { %16216 = vst [vmem:[#allocation31_spill] sm:$0xff] %v9671_v39 }
 0x31c   : > { %v2058_v32 = vpop.f32.mrf.mxu3 }
 0x31d   : > { %v2059_v21 = vadd.f32 %v2058_v32, %v2009_v46  ;;  %v16211_v46 = vld [vmem:[#allocation19_spill] sm:$0xff]  ;;  %v2129_v32 = vadd.f32 %v9254_v61, %v2079_v31 }
 0x31e   : > { %vm16212_vm12 = vnez %v16211_v46  ;;  %v3303_v46 = vld [vmem:[%s15485_s7 + $0xbd0] sm:$0xff] }
 0x31f   : > { %v2691_v54 = vmul.f32 0.1, %v2059_v21  ;;  %6445 = vmatmul.msk.f32.gmra.mxu2 %vm16212_vm12, %v16210_v28  ;;  %v2179_v10 = vadd.f32 %v2178_v62, %v2129_v32  ;;  %v2082_v62 = vadd.f32 %v16219_v56, %v9640_v53 }
 0x320   : > { %v16316_v23 = vld [vmem:[#allocation28_spill] sm:$0xff] }
 0x321   : > { %v9661_v9 = vmax.f32 %v2059_v21, %v2691_v54  ;;  %6453 = vmatmul.msk.f32.gmra.mxu3 %vm16097_vm8, %v16214_v29  ;;  %v1713_v29 = vld [vmem:[%s15483_s5 + $0x7c0] sm:$0xff]  ;;  %v9692_v54 = vpop.f32.mrf.mxu1  ;;  %v2132_v32 = vadd.f32 %v9278_v38, %v2082_v62  ;;  %v9703_v7 = vpop.f32.mrf.mxu0  ;;  %v1710_v62 = vld [vmem:[%s15483_s5 + $0x7a8] sm:$0xff] }
 0x322   : > { %v2187_v51 = vpop.f32.mrf.mxu2  ;;  %2624 = vmatpush.msrb.mxu3 %v1713_v29 }
 0x323   : > { %16213 = vst [vmem:[#allocation29_spill] sm:$0xff] %v9661_v9  ;;  %v15628_v1 = vrot.slane %v9661_v9, 7 }
 0x324   : > { %v2228_v28 = vpop.f32.mrf.mxu3  ;;  %2625 = vmatpush.msrb.mxu3 %v1710_v62 }
 0x325   : > { %v9673_v61 = vadd.f32 %v2228_v28, %v2179_v10  ;;  %v9679_v21 = vsel %vm16217_vm7, %v15628_v1, %v2727_v60  ;;  %v2667_v10 = vmul.f32 0.1, %v9407_v22  ;;  %v16222_v28 = vld [vmem:[#allocation40_spill] sm:$0xff]  ;;  %v2730_v1 = vrot.slane %v9671_v39, 7 }
 0x326   : > { %16218 = vst [vmem:[#allocation32_spill] sm:$0xff] %v9679_v21  ;;  %6481 = vmatmul.msk.f32.vlgmr.msra.gmra.mxu0 %vm16176_vm5, %v9679_v21  ;;  %v2182_v21 = vadd.f32 %v2181_v4, %v2132_v32  ;;  %v16226_v32 = vld [vmem:[#allocation41_spill] sm:$0xff] }
 0x327   : > { %6446 = vmatmul.msk.f32.gmra.mxu2 %vm7196_vm14, %v16220_v43  ;;  %v9701_v56 = vmax.f32 %v9407_v22, %v2667_v10  ;;  %v9709_v38 = vsel %vm16217_vm7, %v2727_v60, %v2730_v1  ;;  %v16225_v22 = vld [vmem:[#allocation66_spill] sm:$0xff] }
 0x328   : > { %16224 = vst [vmem:[#allocation34_spill] sm:$0xff] %v9709_v38  ;;  %v2085_v4 = vadd.f32 %v16225_v22, %v9640_v53 }
 0x329   : > { %6454 = vmatmul.msk.f32.gmra.mxu3 %vm16199_vm2, %v16222_v28  ;;  %16223 = vst [vmem:[#allocation33_spill] sm:$0xff] %v9701_v56  ;;  %v16228_v28 = vld [vmem:[#allocation42_spill] sm:$0xff]  ;;  %v2733_v62 = vrot.slane %v9701_v56, 7  ;;  %v9749_v56 = vpop.f32.mrf.mxu0 }
 0x32a   : > { %v2190_v29 = vpop.f32.mrf.mxu2  ;;  %v2135_v60 = vadd.f32 %v9317_v52, %v2085_v4  ;;  %v16231_v4 = vld [vmem:[#allocation70_spill] sm:$0xff]  ;;  %16232 = vst [vmem:[#allocation36_spill] sm:$0xff] %v9749_v56 }
 0x32b   : > { %v9742_v52 = vsel %vm16217_vm7, %v2730_v1, %v2733_v62 }
 0x32c   : > { %v2231_v26 = vpop.f32.mrf.mxu3  ;;  %16230 = vst [vmem:[#allocation35_spill] sm:$0xff] %v9742_v52 }
 0x32d   : > { %v9705_v43 = vadd.f32 %v2231_v26, %v2182_v21  ;;  %v1707_v26 = vld [vmem:[%s15483_s5 + $0x790] sm:$0xff]  ;;  %v2670_v21 = vmul.f32 0.1, %v9430_v47 }
 0x32e   : > { %6482 = vmatmul.msk.f32.gmra.mxu0 %vm7116_vm15, %v9709_v38  ;;  %v9731_v38 = vpop.f32.mrf.mxu1  ;;  %2626 = vmatpush.msrb.mxu3 %v1707_v26 }
 0x32f   : > { %6447 = vmatmul.msk.f32.gmra.mxu2 %vm7158_vm6, %v16226_v32  ;;  %v2185_v32 = vadd.f32 %v2184_v50, %v2135_v60  ;;  %v9736_v20 = vmax.f32 %v9430_v47, %v2670_v21  ;;  %v16233_v50 = vld [vmem:[#allocation43_spill] sm:$0xff]  ;;  %v16235_v60 = vld [vmem:[#allocation44_spill] sm:$0xff] }
 0x331   : > { %6455 = vmatmul.msk.f32.gmra.mxu3 %vm16204_vm11, %v16228_v28  ;;  %16229 = vst [vmem:[#allocation55_spill] sm:$0xff] %v9736_v20  ;;  %v2088_v28 = vadd.f32 %v16231_v4, %v9640_v53  ;;  %v2736_v1 = vrot.slane %v9736_v20, 7 }
 0x332   : > { %v9733_v22 = vpop.f32.mrf.mxu2 }
 0x333   : > { %v2138_v47 = vadd.f32 %v9347_v48, %v2088_v28  ;;  %v9771_v48 = vsel %vm16217_vm7, %v2733_v62, %v2736_v1  ;;  %v2091_v28 = vadd.f32 %v9133_v14, %v9640_v53  ;;  %v2676_v62 = vmul.f32 0.1, %v9500_v40 }
 0x334   : > { %v2234_v39 = vpop.f32.mrf.mxu3  ;;  %16237 = vst [vmem:[#allocation58_spill] sm:$0xff] %v9771_v48 }
 0x335   : > { %v9738_v45 = vadd.f32 %v2234_v39, %v2185_v32  ;;  %v2673_v39 = vmul.f32 0.1, %v9464_v44  ;;  %v2188_v32 = vadd.f32 %v2187_v51, %v2138_v47  ;;  %v16238_v51 = vld [vmem:[#allocation45_spill] sm:$0xff] }
 0x336   : > { %6483 = vmatmul.msk.f32.gmra.mxu0 %vm7136_vm10, %v9742_v52  ;;  %v9762_v4 = vpop.f32.mrf.mxu1 }
 0x337   : > { %6459 = vmatmul.msk.f32.vlgmr.msra.gmra.mxu2 %vm16119_vm13, %v16233_v50  ;;  %v9765_v56 = vmax.f32 %v9464_v44, %v2673_v39  ;;  %v3162_v44 = vld [vmem:[%s15485_s7 + $0x768] sm:$0xff]  ;;  %v9786_v39 = vpop.f32.mrf.mxu0 }
 0x338   : > { %3565 = vmatpush.msrb.mxu0 %v3162_v44  ;;  %16240 = vst [vmem:[#allocation37_spill] sm:$0xff] %v9786_v39  ;;  %v16332_v15 = vld [vmem:[#allocation55_spill] sm:$0xff] }
 0x339   : > { %6456 = vmatmul.msk.f32.gmra.mxu3 %vm16212_vm12, %v16235_v60  ;;  %16236 = vst [vmem:[#allocation64_spill] sm:$0xff] %v9765_v56  ;;  %v16241_v60 = vld [vmem:[#allocation46_spill] sm:$0xff]  ;;  %v2739_v14 = vrot.slane %v9765_v56, 7 }
 0x33a   : > { %v9760_v21 = vpop.f32.mrf.mxu2 }
 0x33c   : > { %v2237_v52 = vpop.f32.mrf.mxu3 }
 0x33d   : > { %v9767_v50 = vadd.f32 %v2237_v52, %v2188_v32  ;;  %v2141_v52 = vadd.f32 %v9369_v59, %v2091_v28  ;;  %v3159_v32 = vld [vmem:[%s15485_s7 + $0x750] sm:$0xff]  ;;  %v3018_v59 = vld [vmem:[%s15485_s7 + $0x2e8] sm:$0xff]  ;;  %v3156_v28 = vld [vmem:[%s15485_s7 + $0x738] sm:$0xff] }
 0x33e   : > { %6484 = vmatmul.msk.f32.gmra.mxu0 %vm16185_vm3, %v9771_v48  ;;  %3415 = vmatpush.msrb.mxu1 %v3018_v59  ;;  %v9818_v56 = vpop.f32.mrf.mxu1 }
 0x33f   : > { %6460 = vmatmul.msk.f32.gmra.mxu2 %vm16124_vm0, %v16238_v51  ;;  %3566 = vmatpush.msrb.mxu0 %v3159_v32  ;;  %v2191_v44 = vadd.f32 %v2190_v29, %v2141_v52  ;;  %v9810_v32 = vsel %vm16217_vm7, %v2736_v1, %v2739_v14  ;;  %v3015_v29 = vld [vmem:[%s15485_s7 + $0x2d0] sm:$0xff]  ;;  %v3153_v52 = vld [vmem:[%s15485_s7 + $0x720] sm:$0xff]  ;;  %v16244_v1 = vld [vmem:[#allocation47_spill] sm:$0xff] }
 0x340   : > { %16243 = vst [vmem:[#allocation61_spill] sm:$0xff] %v9810_v32  ;;  %3416 = vmatpush.msrb.mxu1 %v3015_v29  ;;  %v16246_v29 = vld [vmem:[#allocation48_spill] sm:$0xff] }
 0x341   : > { %6457 = vmatmul.msk.f32.gmra.mxu3 %vm7196_vm14, %v16241_v60  ;;  %3567 = vmatpush.msrb.mxu0 %v3156_v28  ;;  %v9804_v60 = vmax.f32 %v9500_v40, %v2676_v62  ;;  %v2094_v40 = vadd.f32 %v9173_v24, %v9640_v53  ;;  %v3012_v62 = vld [vmem:[%s15485_s7 + $0x2b8] sm:$0xff]  ;;  %v2679_v28 = vmul.f32 0.1, %v9536_v19 }
 0x342   : > { %v9795_v51 = vpop.f32.mrf.mxu2  ;;  %3417 = vmatpush.msrb.mxu1 %v3012_v62 }
 0x343   : > { %16242 = vst [vmem:[#allocation38_spill] sm:$0xff] %v9804_v60  ;;  %3568 = vmatpush.msrb.mxu0 %v3153_v52  ;;  %v2144_v59 = vadd.f32 %v9387_v58, %v2094_v40  ;;  %v2742_v24 = vrot.slane %v9804_v60, 7  ;;  %v3009_v52 = vld [vmem:[%s15485_s7 + $0x2a0] sm:$0xff]  ;;  %v9848_v58 = vpop.f32.mrf.mxu0  ;;  %v9858_v60 = vmax.f32 %v9536_v19, %v2679_v28  ;;  %v2097_v19 = vadd.f32 %v9207_v0, %v9640_v53  ;;  %v3000_v28 = vld [vmem:[%s15485_s7 + $0x258] sm:$0xff] }
 0x344   : > { %v2240_v48 = vpop.f32.mrf.mxu3  ;;  %3418 = vmatpush.msrb.mxu1 %v3009_v52  ;;  %16247 = vst [vmem:[#allocation39_spill] sm:$0xff] %v9848_v58  ;;  %v2682_v0 = vmul.f32 0.1, %v9570_v63 }
 0x345   : > { %v9806_v39 = vadd.f32 %v2240_v48, %v2191_v44  ;;  %v3150_v44 = vld [vmem:[%s15485_s7 + $0x708] sm:$0xff]  ;;  %v2194_v40 = vadd.f32 %v9733_v22, %v2144_v59  ;;  %16248 = vst [vmem:[#allocation40_spill] sm:$0xff] %v9858_v60  ;;  %v9864_v52 = vsel %vm16217_vm7, %v2739_v14, %v2742_v24  ;;  %v3003_v22 = vld [vmem:[%s15485_s7 + $0x270] sm:$0xff]  ;;  %v3141_v59 = vld [vmem:[%s15485_s7 + $0x6c0] sm:$0xff] }
 0x346   : > { %6485 = vmatmul.msk.f32.gmra.mxu0 %vm16093_vm1, %v9810_v32  ;;  %16249 = vst [vmem:[#allocation66_spill] sm:$0xff] %v9864_v52  ;;  %v16251_v14 = vld [vmem:[#allocation3_spill] sm:$0xff] }
 0x347   : > { %6461 = vmatmul.msk.f32.gmra.mxu2 %vm16129_vm4, %v16244_v1  ;;  %3569 = vmatpush.msrb.mxu0 %v3150_v44  ;;  %v3147_v1 = vld [vmem:[%s15485_s7 + $0x6f0] sm:$0xff]  ;;  %v3006_v44 = vld [vmem:[%s15485_s7 + $0x288] sm:$0xff]  ;;  %vm16252_vm7 = vnez %v16251_v14  ;;  %v2279_v14 = vadd.f32 %v9356_v33, %v9673_v61 }
 0x348   : > { %3419 = vmatpush.msrb.mxu1 %v3006_v44  ;;  %v2147_v44 = vadd.f32 %v9421_v8, %v2097_v19  ;;  %v2994_v19 = vld [vmem:[%s15485_s7 + $0x228] sm:$0xff] }
 0x349   : > { %6458 = vmatmul.msk.f32.gmra.mxu3 %vm7158_vm6, %v16246_v29  ;;  %3570 = vmatpush.msrb.mxu0 %v3147_v1  ;;  %v3144_v29 = vld [vmem:[%s15485_s7 + $0x6d8] sm:$0xff]  ;;  %v3138_v1 = vld [vmem:[%s15485_s7 + $0x6a8] sm:$0xff]  ;;  %v2329_v33 = vadd.f32 %v9615_v55, %v2279_v14 }
 0x34a   : > { %v9846_v62 = vpop.f32.mrf.mxu2  ;;  %3420 = vmatpush.msrb.mxu1 %v3003_v22  ;;  %v2745_v22 = vrot.slane %v9858_v60, 7  ;;  %v2197_v8 = vadd.f32 %v9760_v21, %v2147_v44  ;;  %v2991_v44 = vld [vmem:[%s15485_s7 + $0x210] sm:$0xff]  ;;  %v16270_v48 = vld [vmem:[#allocation59_spill] sm:$0xff]  ;;  %v3096_v55 = vld [vmem:[%s15485_s7 + $0x558] sm:$0xff] }
 0x34b   : > { %3571 = vmatpush.msrb.mxu0 %v3144_v29  ;;  %v16253_v29 = vld [vmem:[#allocation51_spill] sm:$0xff]  ;;  %v9912_v26 = vpop.f32.mrf.mxu0  ;;  %v2662_v14 = vmul.f32 0.1, %v2329_v33 }
 0x34c   : > { %v2243_v32 = vpop.f32.mrf.mxu3  ;;  %3421 = vmatpush.msrb.mxu1 %v3000_v28 }
 0x34d   : > { %v9860_v20 = vadd.f32 %v2243_v32, %v2194_v40  ;;  %v16250_v32 = vld [vmem:[#allocation50_spill] sm:$0xff]  ;;  %3572 = vmatpush.msrb.mxu0 %v3141_v59  ;;  %v9886_v40 = vpop.f32.mrf.mxu1 }
 0x34e   : > { %6486 = vmatmul.msk.f32.gmra.mxu0 %vm16097_vm8, %v9864_v52  ;;  %v2997_v59 = vld [vmem:[%s15485_s7 + $0x240] sm:$0xff]  ;;  %v9910_v52 = vmax.f32 %v9570_v63, %v2682_v0  ;;  %v2100_v63 = vadd.f32 %v9244_v27, %v9640_v53  ;;  %v16257_v0 = vld [vmem:[#allocation53_spill] sm:$0xff] }
 0x34f   : > { %6462 = vmatmul.msk.f32.gmra.mxu2 %vm16252_vm7, %v16250_v32  ;;  %3573 = vmatpush.msrb.mxu0 %v3138_v1  ;;  %v3135_v32 = vld [vmem:[%s15485_s7 + $0x690] sm:$0xff]  ;;  %v3132_v1 = vld [vmem:[%s15485_s7 + $0x678] sm:$0xff] }
 0x350   : > { %3422 = vmatpush.msrb.mxu1 %v2997_v59  ;;  %16254 = vst [vmem:[#allocation41_spill] sm:$0xff] %v9910_v52  ;;  %v3129_v59 = vld [vmem:[%s15485_s7 + $0x660] sm:$0xff]  ;;  %v2748_v27 = vrot.slane %v9910_v52, 7 }
 0x351   : > { %6470 = vmatmul.msk.f32.vlgmr.msrb.gmra.mxu3 %vm16119_vm13, %v16253_v29  ;;  %3574 = vmatpush.msrb.mxu0 %v3135_v32  ;;  %vm16255_vm13 = vcmp.lt.s32.totalorder %v6954_v2, 1  ;;  %v2988_v32 = vld [vmem:[%s15485_s7 + $0x1f8] sm:$0xff] }
 0x352   : > { %v9900_v28 = vpop.f32.mrf.mxu2  ;;  %3423 = vmatpush.msrb.mxu1 %v2994_v19  ;;  %v9918_v21 = vsel %vm16255_vm13, %v2742_v24, %v2745_v22  ;;  %v16258_v24 = vld [vmem:[#allocation5_spill] sm:$0xff]  ;;  %v2150_v19 = vadd.f32 %v9460_v25, %v2100_v63 }
 0x353   : > { %16256 = vst [vmem:[#allocation42_spill] sm:$0xff] %v9918_v21  ;;  %3575 = vmatpush.msrb.mxu0 %v3132_v1  ;;  %vm16259_vm13 = vnez %v16258_v24  ;;  %v2685_v1 = vmul.f32 0.1, %v9590_v30 }
 0x354   : > { %v2246_v29 = vpop.f32.mrf.mxu3  ;;  %3424 = vmatpush.msrb.mxu1 %v2991_v44  ;;  %v2985_v44 = vld [vmem:[%s15485_s7 + $0x1e0] sm:$0xff]  ;;  %v2200_v63 = vadd.f32 %v9795_v51, %v2150_v19  ;;  %v2979_v51 = vld [vmem:[%s15485_s7 + $0x1b0] sm:$0xff] }
 0x355   : > { %v9914_v58 = vadd.f32 %v2246_v29, %v2197_v8  ;;  %3576 = vmatpush.msrb.mxu0 %v3129_v59  ;;  %v3126_v8 = vld [vmem:[%s15485_s7 + $0x648] sm:$0xff]  ;;  %v16260_v29 = vld [vmem:[#allocation54_spill] sm:$0xff]  ;;  %v3123_v59 = vld [vmem:[%s15485_s7 + $0x630] sm:$0xff] }
 0x356   : > { %6487 = vmatmul.msk.f32.gmra.mxu0 %vm16199_vm2, %v9918_v21  ;;  %3425 = vmatpush.msrb.mxu1 %v2988_v32  ;;  %v2982_v32 = vld [vmem:[%s15485_s7 + $0x1c8] sm:$0xff]  ;;  %v9962_v21 = vmax.f32 %v9590_v30, %v2685_v1  ;;  %v3117_v19 = vld [vmem:[%s15485_s7 + $0x600] sm:$0xff]  ;;  %v2103_v30 = vadd.f32 %v9266_v3, %v9640_v53  ;;  %v9981_v1 = vpop.f32.mrf.mxu0 }
 0x357   : > { %6463 = vmatmul.msk.f32.gmra.mxu2 %vm16259_vm13, %v16257_v0  ;;  %3577 = vmatpush.msrb.mxu0 %v3126_v8  ;;  %v9952_v0 = vpop.f32.mrf.mxu1  ;;  %v3120_v8 = vld [vmem:[%s15485_s7 + $0x618] sm:$0xff]  ;;  %16264 = vst [vmem:[#allocation44_spill] sm:$0xff] %v9981_v1 }
 0x358   : > { %3426 = vmatpush.msrb.mxu1 %v2985_v44  ;;  %16261 = vst [vmem:[#allocation70_spill] sm:$0xff] %v9962_v21  ;;  %v2751_v3 = vrot.slane %v9962_v21, 7 }
 0x359   : > { %6471 = vmatmul.msk.f32.gmra.mxu3 %vm16124_vm0, %v16260_v29  ;;  %3578 = vmatpush.msrb.mxu0 %v3123_v59  ;;  %vm16262_vm0 = vcmp.lt.s32.totalorder %v6954_v2, 1  ;;  %v16266_v59 = vld [vmem:[#allocation7_spill] sm:$0xff] }
 0x35a   : > { %v2208_v25 = vpop.f32.mrf.mxu2  ;;  %3427 = vmatpush.msrb.mxu1 %v2982_v32  ;;  %v9968_v44 = vsel %vm16262_vm0, %v2745_v22, %v2748_v27  ;;  %v16265_v22 = vld [vmem:[#allocation56_spill] sm:$0xff]  ;;  %v2153_v32 = vadd.f32 %v9505_v12, %v2103_v30 }
 0x35b   : > { %16263 = vst [vmem:[#allocation43_spill] sm:$0xff] %v9968_v44  ;;  %3579 = vmatpush.msrb.mxu0 %v3120_v8  ;;  %v2688_v8 = vmul.f32 0.1, %v9622_v37 }
 0x35c   : > { %v2249_v29 = vpop.f32.mrf.mxu3  ;;  %3428 = vmatpush.msrb.mxu1 %v2979_v51  ;;  %v2973_v51 = vld [vmem:[%s15485_s7 + $0x180] sm:$0xff] }
 0x35d   : > { %v9964_v47 = vadd.f32 %v2249_v29, %v2200_v63  ;;  %3580 = vmatpush.msrb.mxu0 %v3117_v19  ;;  %v2976_v63 = vld [vmem:[%s15485_s7 + $0x198] sm:$0xff]  ;;  %v10004_v30 = vmax.f32 %v9622_v37, %v2688_v8 }
 0x35e   : > { %6488 = vmatmul.msk.f32.gmra.mxu0 %vm16204_vm11, %v9968_v44  ;;  %3429 = vmatpush.msrb.mxu1 %v2976_v63  ;;  %v16267_v29 = vld [vmem:[#allocation57_spill] sm:$0xff] }
 0x35f   : > { %6464 = vmatmul.msk.f32.gmra.mxu2 %vm16076_vm9, %v16265_v22  ;;  %v2203_v22 = vadd.f32 %v9846_v62, %v2153_v32  ;;  %v10001_v63 = vpop.f32.mrf.mxu1  ;;  %16268 = vst [vmem:[#allocation45_spill] sm:$0xff] %v10004_v30  ;;  %v10018_v62 = vpop.f32.mrf.mxu0  ;;  %v16274_v32 = vld [vmem:[#allocation60_spill] sm:$0xff]  ;;  %v2754_v37 = vrot.slane %v10004_v30, 7  ;;  %v16279_v30 = vld [vmem:[#allocation63_spill] sm:$0xff] }
 0x360   : > { %3430 = vmatpush.msrb.mxu1 %v2973_v51  ;;  %v16271_v51 = vld [vmem:[#allocation9_spill] sm:$0xff]  ;;  %16273 = vst [vmem:[#allocation47_spill] sm:$0xff] %v10018_v62  ;;  %v16276_v62 = vld [vmem:[#allocation62_spill] sm:$0xff] }
 0x361   : > { %6472 = vmatmul.msk.f32.gmra.mxu3 %vm16129_vm4, %v16267_v29  ;;  %v10010_v29 = vsel %vm16262_vm0, %v2748_v27, %v2751_v3  ;;  %vm16272_vm4 = vnez %v16271_v51  ;;  %v3114_v27 = vld [vmem:[%s15485_s7 + $0x5e8] sm:$0xff] }
 0x362   : > { %v9998_v19 = vpop.f32.mrf.mxu2  ;;  %16269 = vst [vmem:[#allocation46_spill] sm:$0xff] %v10010_v29  ;;  %3515 = vmatpush.msra.mxu3 %v3114_v27  ;;  %v3108_v27 = vld [vmem:[%s15485_s7 + $0x5b8] sm:$0xff] }
 0x364   : > { %v2252_v12 = vpop.f32.mrf.mxu3 }
 0x365   : > { %v10006_v44 = vadd.f32 %v2252_v12, %v2203_v22  ;;  %v10036_v12 = vsel %vm16262_vm0, %v2751_v3, %v2754_v37  ;;  %v16277_v3 = vld [vmem:[#allocation11_spill] sm:$0xff] }
 0x366   : > { %6489 = vmatmul.msk.f32.gmra.mxu0 %vm16212_vm12, %v10010_v29  ;;  %16275 = vst [vmem:[#allocation48_spill] sm:$0xff] %v10036_v12  ;;  %v2109_v29 = vadd.f32 %v9335_v6, %v9640_v53  ;;  %vm16278_vm0 = vnez %v16277_v3  ;;  %v3102_v6 = vld [vmem:[%s15485_s7 + $0x588] sm:$0xff] }
 0x367   : > { %6465 = vmatmul.msk.f32.gmra.mxu2 %vm16272_vm4, %v16270_v48  ;;  %v3111_v48 = vld [vmem:[%s15485_s7 + $0x5d0] sm:$0xff]  ;;  %v10066_v61 = vpop.f32.mrf.mxu0 }
 0x368   : > { %3516 = vmatpush.msra.mxu3 %v3111_v48  ;;  %v3105_v48 = vld [vmem:[%s15485_s7 + $0x5a0] sm:$0xff] }
 0x369   : > { %6473 = vmatmul.msk.f32.gmra.mxu3 %vm16252_vm7, %v16274_v32  ;;  %v10038_v32 = vpop.f32.mrf.mxu1 }
 0x36a   : > { %v10024_v8 = vpop.f32.mrf.mxu2  ;;  %3517 = vmatpush.msra.mxu3 %v3108_v27 }
 0x36c   : > { %v10029_v22 = vpop.f32.mrf.mxu3  ;;  %3518 = vmatpush.msra.mxu3 %v3105_v48  ;;  %v16280_v48 = vrot.slane %v9661_v9, 7 }
 0x36e   : > { %6490 = vmatmul.msk.f32.gmra.mxu0 %vm7196_vm14, %v10036_v12  ;;  %v2159_v12 = vadd.f32 %v9581_v35, %v2109_v29  ;;  %3519 = vmatpush.msra.mxu3 %v3102_v6  ;;  %v3099_v35 = vld [vmem:[%s15485_s7 + $0x570] sm:$0xff] }
 0x36f   : > { %6466 = vmatmul.msk.f32.gmra.mxu2 %vm16278_vm0, %v16276_v62 }
 0x370   : > { %v2209_v62 = vadd.f32 %v2208_v25, %v2159_v12  ;;  %3520 = vmatpush.msra.mxu3 %v3099_v35 }
 0x371   : > { %6474 = vmatmul.msk.f32.gmra.mxu3 %vm16259_vm13, %v16279_v30  ;;  %v2282_v30 = vadd.f32 %v9378_v17, %v9705_v43  ;;  %vm16281_vm13 = vcmp.lt.s32.totalorder %v6954_v2, 1  ;;  %v16283_v17 = vld [vmem:[#allocation65_spill] sm:$0xff]  ;;  %v16284_v43 = vld [vmem:[#allocation22_spill] sm:$0xff]  ;;  %v2358_v12 = vpop.f32.mrf.mxu1 }
 0x372   : > { %v10060_v1 = vpop.f32.mrf.mxu2  ;;  %v10077_v24 = vsel %vm16281_vm13, %v2754_v37, %v16280_v48  ;;  %vm16285_vm7 = vnez %v16284_v43  ;;  %v3093_v37 = vld [vmem:[%s15485_s7 + $0x540] sm:$0xff]  ;;  %3521 = vmatpush.msra.mxu3 %v3096_v55  ;;  %v2285_v55 = vadd.f32 %v9405_v41, %v9738_v45 }
 0x373   : > { %16282 = vst [vmem:[#allocation50_spill] sm:$0xff] %v10077_v24  ;;  %v2332_v6 = vadd.f32 %v9649_v5, %v2282_v30  ;;  %v3087_v5 = vld [vmem:[%s15485_s7 + $0x510] sm:$0xff]  ;;  %v3081_v41 = vld [vmem:[%s15485_s7 + $0x4e0] sm:$0xff] }
 0x374   : > { %v2258_v27 = vpop.f32.mrf.mxu3  ;;  %3522 = vmatpush.msra.mxu3 %v3093_v37 }
 0x375   : > { %v2259_v29 = vadd.f32 %v2258_v27, %v2209_v62  ;;  %v16286_v27 = vld [vmem:[#allocation67_spill] sm:$0xff]  ;;  %v2665_v30 = vmul.f32 0.1, %v2332_v6 }
 0x376   : > { %6491 = vmatmul.msk.f32.gmra.mxu0 %vm7158_vm6, %v10077_v24 }
 0x377   : > { %v2309_v25 = vadd.f32 %v9703_v7, %v2259_v29  ;;  %6467 = vmatmul.msk.f32.gmra.mxu2 %vm16285_vm7, %v16283_v17  ;;  %v3090_v7 = vld [vmem:[%s15485_s7 + $0x528] sm:$0xff]  ;;  %v10101_v29 = vmax.f32 %v2329_v33, %v2662_v14  ;;  %v3084_v33 = vld [vmem:[%s15485_s7 + $0x4f8] sm:$0xff]  ;;  %v16289_v14 = vld [vmem:[#allocation68_spill] sm:$0xff]  ;;  %v10126_v45 = vmax.f32 %v2332_v6, %v2665_v30 }
 0x378   : > { %3523 = vmatpush.msra.mxu3 %v3090_v7  ;;  %v3075_v30 = vld [vmem:[%s15485_s7 + $0x4b0] sm:$0xff] }
 0x379   : > { %v2359_v62 = vadd.f32 %v2358_v12, %v2309_v25  ;;  %6475 = vmatmul.msk.f32.gmra.mxu3 %vm16076_vm9, %v16286_v27  ;;  %16287 = vst [vmem:[#allocation51_spill] sm:$0xff] %v10101_v29  ;;  %v10110_v25 = vpop.f32.mrf.mxu0  ;;  %v16290_v12 = vld [vmem:[#allocation23_spill] sm:$0xff]  ;;  %v2728_v27 = vrot.slane %v10101_v29, 7  ;;  %vm16294_vm9 = vcmp.lt.s32.totalorder %v6954_v2, 1 }
 0x37a   : > { %v10096_v35 = vpop.f32.mrf.mxu2  ;;  %3524 = vmatpush.msra.mxu3 %v3087_v5  ;;  %vm16291_vm13 = vnez %v16290_v12  ;;  %16292 = vst [vmem:[#allocation54_spill] sm:$0xff] %v10126_v45  ;;  %v16311_v12 = vld [vmem:[#allocation75_spill] sm:$0xff] }
 0x37b   : > { %v2692_v48 = vmul.f32 0.1, %v2359_v62 }
 0x37c   : > { %v10103_v17 = vpop.f32.mrf.mxu3  ;;  %3525 = vmatpush.msra.mxu3 %v3084_v33  ;;  %v2288_v33 = vadd.f32 %v9433_v18, %v9767_v50 }
 0x37d   : > { %v10112_v37 = vmax.f32 %v2359_v62, %v2692_v48  ;;  %v2335_v62 = vadd.f32 %v9692_v54, %v2285_v55  ;;  %v16293_v48 = vld [vmem:[#allocation69_spill] sm:$0xff]  ;;  %v3078_v54 = vld [vmem:[%s15485_s7 + $0x4c8] sm:$0xff] }
 0x37e   : > { %3581 = vmatmul.f32.vlgmr.msrb.gmra.mxu0 %v10101_v29  ;;  %3526 = vmatpush.msra.mxu3 %v3081_v41  ;;  %v3072_v41 = vld [vmem:[%s15485_s7 + $0x498] sm:$0xff]  ;;  %v2338_v50 = vadd.f32 %v9731_v38, %v2288_v33  ;;  %v2291_v38 = vadd.f32 %v9476_v13, %v9806_v39  ;;  %v10204_v13 = vpop.f32.mrf.mxu1 }
 0x37f   : > { %16288 = vst [vmem:[#allocation53_spill] sm:$0xff] %v10112_v37  ;;  %6468 = vmatmul.msk.f32.gmra.mxu2 %vm16291_vm13, %v16289_v14  ;;  %v15674_v7 = vrot.slane %v10112_v37, 7  ;;  %v2668_v55 = vmul.f32 0.1, %v2335_v62 }
 0x380   : > { %3527 = vmatpush.msra.mxu3 %v3078_v54  ;;  %v16296_v54 = vld [vmem:[#allocation71_spill] sm:$0xff] }
 0x381   : > { %6476 = vmatmul.msk.f32.gmra.mxu3 %vm16272_vm4, %v16293_v48  ;;  %v10136_v5 = vsel %vm16294_vm9, %v15674_v7, %v2728_v27  ;;  %v2731_v48 = vrot.slane %v10126_v45, 7  ;;  %v10158_v7 = vpop.f32.mrf.mxu0  ;;  %vm16297_vm9 = vnez %v16046_v57  ;;  %v10166_v18 = vmax.f32 %v2335_v62, %v2668_v55 }
 0x382   : > { %16295 = vst [vmem:[#allocation56_spill] sm:$0xff] %v10136_v5  ;;  %v10138_v14 = vpop.f32.mrf.mxu2  ;;  %6492 = vmatmul.msk.f32.vlgmr.msrb.gmra.mxu1 %vm16176_vm5, %v10136_v5  ;;  %3528 = vmatpush.msra.mxu3 %v3075_v30  ;;  %v3069_v5 = vld [vmem:[%s15485_s7 + $0x480] sm:$0xff]  ;;  %v16299_v30 = vld [vmem:[#allocation72_spill] sm:$0xff]  ;;  %vm16300_vm5 = vcmp.lt.s32.totalorder %v6954_v2, 1  ;;  %v2671_v62 = vmul.f32 0.1, %v2338_v50 }
 0x383   : > { %16298 = vst [vmem:[#allocation57_spill] sm:$0xff] %v10166_v18  ;;  %v10174_v24 = vsel %vm16300_vm5, %v2728_v27, %v2731_v48  ;;  %v2734_v55 = vrot.slane %v10166_v18, 7  ;;  %v2341_v27 = vadd.f32 %v9762_v4, %v2291_v38 }
 0x384   : > { %v10146_v6 = vpop.f32.mrf.mxu3  ;;  %3529 = vmatpush.msra.mxu3 %v3072_v41  ;;  %16301 = vst [vmem:[#allocation59_spill] sm:$0xff] %v10174_v24  ;;  %v10187_v33 = vmax.f32 %v2338_v50, %v2671_v62  ;;  %v16305_v50 = vld [vmem:[#allocation25_spill] sm:$0xff] }
 0x385   : > { %v2674_v4 = vmul.f32 0.1, %v2341_v27  ;;  %v2294_v62 = vadd.f32 %v16305_v50, %v9860_v20 }
 0x386   : > { %3584 = vmatmul.f32.gmra.mxu0 %v10126_v45  ;;  %3530 = vmatpush.msra.mxu3 %v3069_v5  ;;  %16302 = vst [vmem:[#allocation9_spill] sm:$0xff] %v10187_v33  ;;  %v10197_v5 = vsel %vm16300_vm5, %v2731_v48, %v2734_v55  ;;  %v2737_v38 = vrot.slane %v10187_v33, 7  ;;  %v10236_v50 = vpop.f32.mrf.mxu1 }
 0x387   : > { %6469 = vmatmul.msk.f32.gmra.mxu2 %vm16297_vm9, %v16296_v54  ;;  %16304 = vst [vmem:[#allocation60_spill] sm:$0xff] %v10197_v5  ;;  %v10212_v48 = vmax.f32 %v2341_v27, %v2674_v4  ;;  %v16309_v27 = vld [vmem:[#allocation26_spill] sm:$0xff] }
 0x388   : > { %v2297_v4 = vadd.f32 %v16309_v27, %v9914_v58  ;;  %v3204_v58 = vld [vmem:[%s15485_s7 + $0x8b8] sm:$0xff] }
 0x389   : > { %6477 = vmatmul.msk.f32.gmra.mxu3 %vm16278_vm0, %v16299_v30  ;;  %v10190_v54 = vpop.f32.mrf.mxu0  ;;  %v16303_v30 = vld [vmem:[#allocation73_spill] sm:$0xff]  ;;  %16306 = vst [vmem:[#allocation62_spill] sm:$0xff] %v10212_v48 }
 0x38a   : > { %v10176_v16 = vpop.f32.mrf.mxu2  ;;  %6493 = vmatmul.msk.f32.gmra.mxu1 %vm7116_vm15, %v10174_v24  ;;  %v2347_v27 = vadd.f32 %v9886_v40, %v2297_v4  ;;  %v3201_v40 = vld [vmem:[%s15485_s7 + $0x8a0] sm:$0xff]  ;;  %v16314_v4 = vld [vmem:[#allocation52_spill] sm:$0xff] }
 0x38c   : > { %v10181_v41 = vpop.f32.mrf.mxu3 }
 0x38e   : > { %3587 = vmatmul.f32.gmra.mxu0 %v10166_v18 }
 0x391   : > { %6478 = vmatmul.msk.f32.gmra.mxu3 %vm16285_vm7, %v16303_v30  ;;  %v2344_v30 = vadd.f32 %v9818_v56, %v2294_v62  ;;  %v10227_v20 = vpop.f32.mrf.mxu0  ;;  %v2740_v62 = vrot.slane %v10212_v48, 7 }
 0x392   : > { %v10199_v24 = vpop.f32.mrf.mxu2  ;;  %6494 = vmatmul.msk.f32.gmra.mxu1 %vm7136_vm10, %v10197_v5  ;;  %v10220_v5 = vsel %vm16300_vm5, %v2734_v55, %v2737_v38 }
 0x393   : > { %16308 = vst [vmem:[#allocation63_spill] sm:$0xff] %v10220_v5  ;;  %v2677_v55 = vmul.f32 0.1, %v2344_v30 }
 0x394   : > { %v10206_v39 = vpop.f32.mrf.mxu3 }
 0x395   : > { %v10247_v42 = vmax.f32 %v2344_v30, %v2677_v55  ;;  %v2680_v30 = vmul.f32 0.1, %v2347_v27  ;;  %v2300_v55 = vadd.f32 %v16314_v4, %v9964_v47  ;;  %v3192_v47 = vld [vmem:[%s15485_s7 + $0x858] sm:$0xff] }
 0x396   : > { %3590 = vmatmul.f32.gmra.mxu0 %v10187_v33 }
 0x397   : > { %16310 = vst [vmem:[#allocation65_spill] sm:$0xff] %v10247_v42  ;;  %v10286_v4 = vmax.f32 %v2347_v27, %v2680_v30  ;;  %v16318_v27 = vld [vmem:[#allocation76_spill] sm:$0xff]  ;;  %v3348_v30 = vld [vmem:[%s15485_s7 + $0xd38] sm:$0xff] }
 0x399   : > { %6479 = vmatmul.msk.f32.gmra.mxu3 %vm16291_vm13, %v16307_v34  ;;  %v3210_v34 = vld [vmem:[%s15485_s7 + $0x8e8] sm:$0xff]  ;;  %16315 = vst [vmem:[#allocation69_spill] sm:$0xff] %v10286_v4 }
 0x39a   : > { %v10222_v49 = vpop.f32.mrf.mxu2  ;;  %6495 = vmatmul.msk.f32.gmra.mxu1 %vm16185_vm3, %v10220_v5  ;;  %v3207_v5 = vld [vmem:[%s15485_s7 + $0x8d0] sm:$0xff] }
 0x39b   : > { %3615 = vmatpush.msra.mxu1 %v3210_v34  ;;  %v10254_v34 = vsel %vm16300_vm5, %v2737_v38, %v2740_v62  ;;  %v3198_v38 = vld [vmem:[%s15485_s7 + $0x888] sm:$0xff] }
 0x39c   : > { %v10231_v56 = vpop.f32.mrf.mxu3  ;;  %16312 = vst [vmem:[#allocation67_spill] sm:$0xff] %v10254_v34 }
 0x39d   : > { %3616 = vmatpush.msra.mxu1 %v3207_v5 }
 0x39e   : > { %3593 = vmatmul.f32.gmra.mxu0 %v10212_v48 }
 0x39f   : > { %3617 = vmatpush.msra.mxu1 %v3204_v58  ;;  %v2743_v58 = vrot.slane %v10247_v42, 7 }
 0x3a1   : > { %6480 = vmatmul.msk.f32.gmra.mxu3 %vm16297_vm9, %v16311_v12  ;;  %3618 = vmatpush.msra.mxu1 %v3201_v40  ;;  %v10278_v40 = vpop.f32.mrf.mxu1  ;;  %v10292_v57 = vsel %vm16300_vm5, %v2740_v62, %v2743_v58  ;;  %v2106_v62 = vadd.f32 %v16318_v27, %v9640_v53  ;;  %v16321_v53 = vld [vmem:[#allocation27_spill] sm:$0xff] }
 0x3a2   : > { %v10256_v43 = vpop.f32.mrf.mxu2  ;;  %6496 = vmatmul.msk.f32.gmra.mxu1 %vm16093_vm1, %v10254_v34  ;;  %v3195_v34 = vld [vmem:[%s15485_s7 + $0x870] sm:$0xff]  ;;  %16317 = vst [vmem:[#allocation71_spill] sm:$0xff] %v10292_v57  ;;  %v2303_v27 = vadd.f32 %v16321_v53, %v10006_v44 }
 0x3a3   : > { %v10264_v5 = vpop.f32.mrf.mxu0  ;;  %3619 = vmatpush.msra.mxu1 %v3198_v38  ;;  %v2350_v38 = vadd.f32 %v9952_v0, %v2300_v55  ;;  %v3189_v0 = vld [vmem:[%s15485_s7 + $0x840] sm:$0xff] }
 0x3a4   : > { %16313 = vst [vmem:[#allocation68_spill] sm:$0xff] %v10264_v5  ;;  %v10266_v12 = vpop.f32.mrf.mxu3  ;;  %v3354_v5 = vld [vmem:[%s15485_s7 + $0xd68] sm:$0xff] }
 0x3a5   : > { %3620 = vmatpush.msra.mxu1 %v3195_v34  ;;  %3765 = vmatpush.msra.mxu0 %v3354_v5  ;;  %v3351_v34 = vld [vmem:[%s15485_s7 + $0xd50] sm:$0xff] }
 0x3a6   : > { %3596 = vmatmul.f32.gmra.mxu0 %v10247_v42 }
 0x3a7   : > { %3621 = vmatpush.msra.mxu1 %v3192_v47  ;;  %3766 = vmatpush.msra.mxu0 %v3351_v34  ;;  %v2746_v47 = vrot.slane %v10286_v4, 7  ;;  %v3186_v34 = vld [vmem:[%s15485_s7 + $0x828] sm:$0xff] }
 0x3a9   : > { %3531 = vmatmul.f32.vlgmr.msra.gmra.mxu3 %v16316_v23  ;;  %3622 = vmatpush.msra.mxu1 %v3189_v0  ;;  %v2683_v23 = vmul.f32 0.1, %v2350_v38  ;;  %v3345_v0 = vld [vmem:[%s15485_s7 + $0xd20] sm:$0xff]  ;;  %v10334_v44 = vsel %vm16300_vm5, %v2743_v58, %v2746_v47  ;;  %v3339_v58 = vld [vmem:[%s15485_s7 + $0xcf0] sm:$0xff] }
 0x3aa   : > { %v10297_v3 = vpop.f32.mrf.mxu2  ;;  %6497 = vmatmul.msk.f32.gmra.mxu1 %vm16097_vm8, %v10292_v57  ;;  %3767 = vmatpush.msra.mxu0 %v3348_v30  ;;  %v16320_v57 = vld [vmem:[#allocation49_spill] sm:$0xff]  ;;  %v3183_v30 = vld [vmem:[%s15485_s7 + $0x810] sm:$0xff]  ;;  %16322 = vst [vmem:[#allocation73_spill] sm:$0xff] %v10334_v44 }
 0x3ab   : > { %v10307_v5 = vpop.f32.mrf.mxu0  ;;  %v2156_v11 = vadd.f32 %v16320_v57, %v2106_v62  ;;  %3623 = vmatpush.msra.mxu1 %v3186_v34  ;;  %v3342_v57 = vld [vmem:[%s15485_s7 + $0xd08] sm:$0xff]  ;;  %v3180_v62 = vld [vmem:[%s15485_s7 + $0x7f8] sm:$0xff]  ;;  %v10339_v34 = vpop.f32.mrf.mxu1  ;;  %v10341_v53 = vmax.f32 %v2350_v38, %v2683_v23  ;;  %v3177_v23 = vld [vmem:[%s15485_s7 + $0x7e0] sm:$0xff] }
 0x3ac   : > { %16319 = vst [vmem:[#allocation72_spill] sm:$0xff] %v10307_v5  ;;  %v10312_v55 = vpop.f32.mrf.mxu3  ;;  %3768 = vmatpush.msra.mxu0 %v3345_v0  ;;  %v16324_v0 = vld [vmem:[#allocation31_spill] sm:$0xff] }
 0x3ad   : > { %v2206_v5 = vadd.f32 %v9900_v28, %v2156_v11  ;;  %3624 = vmatpush.msra.mxu1 %v3183_v30  ;;  %16323 = vst [vmem:[#allocation25_spill] sm:$0xff] %v10341_v53  ;;  %v2353_v11 = vadd.f32 %v10001_v63, %v2303_v27  ;;  %v2749_v36 = vrot.slane %v10341_v53, 7 }
 0x3ae   : > { %3599 = vmatmul.f32.gmra.mxu0 %v10286_v4 }
 0x3af   : > { %v2256_v28 = vadd.f32 %v10029_v22, %v2206_v5  ;;  %3769 = vmatpush.msra.mxu0 %v3342_v57  ;;  %3625 = vmatpush.msra.mxu1 %v3180_v62  ;;  %v3336_v22 = vld [vmem:[%s15485_s7 + $0xcd8] sm:$0xff]  ;;  %v3174_v5 = vld [vmem:[%s15485_s7 + $0x7c8] sm:$0xff]  ;;  %v2686_v27 = vmul.f32 0.1, %v2353_v11  ;;  %v16326_v57 = vld [vmem:[#allocation30_spill] sm:$0xff] }
 0x3b0   : > { %v3333_v62 = vld [vmem:[%s15485_s7 + $0xcc0] sm:$0xff] }
 0x3b1   : > { %3534 = vmatmul.f32.gmra.mxu3 %v16324_v0  ;;  %3770 = vmatpush.msra.mxu0 %v3339_v58  ;;  %v3171_v58 = vld [vmem:[%s15485_s7 + $0x7b0] sm:$0xff]  ;;  %v10388_v0 = vsel %vm16300_vm5, %v2746_v47, %v2749_v36 }
 0x3b2   : > { %v10349_v30 = vpop.f32.mrf.mxu2  ;;  %6498 = vmatmul.msk.f32.gmra.mxu1 %vm16199_vm2, %v10334_v44  ;;  %v2306_v44 = vadd.f32 %v16326_v57, %v2256_v28  ;;  %v3330_v28 = vld [vmem:[%s15485_s7 + $0xca8] sm:$0xff]  ;;  %16329 = vst [vmem:[#allocation75_spill] sm:$0xff] %v10388_v0 }
 0x3b3   : > { %v10357_v63 = vpop.f32.mrf.mxu0  ;;  %3626 = vmatpush.msra.mxu1 %v3177_v23  ;;  %3771 = vmatpush.msra.mxu0 %v3336_v22  ;;  %v3168_v23 = vld [vmem:[%s15485_s7 + $0x798] sm:$0xff]  ;;  %v10382_v22 = vmax.f32 %v2353_v11, %v2686_v27  ;;  %v10402_v47 = vpop.f32.mrf.mxu1 }
 0x3b4   : > { %16325 = vst [vmem:[#allocation74_spill] sm:$0xff] %v10357_v63  ;;  %v10362_v38 = vpop.f32.mrf.mxu3  ;;  %v2356_v57 = vadd.f32 %v10038_v32, %v2306_v44  ;;  %v16328_v63 = vld [vmem:[#allocation33_spill] sm:$0xff]  ;;  %v3327_v32 = vld [vmem:[%s15485_s7 + $0xc90] sm:$0xff]  ;;  %v3165_v44 = vld [vmem:[%s15485_s7 + $0x780] sm:$0xff] }
 0x3b5   : > { %3627 = vmatpush.msra.mxu1 %v3174_v5  ;;  %3772 = vmatpush.msra.mxu0 %v3333_v62  ;;  %16327 = vst [vmem:[#allocation26_spill] sm:$0xff] %v10382_v22  ;;  %v3066_v5 = vld [vmem:[%s15485_s7 + $0x468] sm:$0xff] }
 0x3b6   : > { %3602 = vmatmul.f32.gmra.mxu0 %v10341_v53  ;;  %3465 = vmatpush.msrb.mxu2 %v3066_v5  ;;  %v2689_v5 = vmul.f32 0.1, %v2356_v57  ;;  %v3057_v53 = vld [vmem:[%s15485_s7 + $0x420] sm:$0xff] }
 0x3b7   : > { %3628 = vmatpush.msra.mxu1 %v3171_v58  ;;  %3773 = vmatpush.msra.mxu0 %v3330_v28  ;;  %v3324_v58 = vld [vmem:[%s15485_s7 + $0xc78] sm:$0xff]  ;;  %v3321_v28 = vld [vmem:[%s15485_s7 + $0xc60] sm:$0xff] }
 0x3b9   : > { %3537 = vmatmul.f32.gmra.mxu3 %v16328_v63  ;;  %3629 = vmatpush.msra.mxu1 %v3168_v23  ;;  %v3318_v23 = vld [vmem:[%s15485_s7 + $0xc48] sm:$0xff] }
 0x3ba   : > { %6499 = vmatmul.msk.f32.gmra.mxu1 %vm16204_vm11, %v10388_v0  ;;  %v10406_v27 = vpop.f32.mrf.mxu2  ;;  %v2752_v0 = vrot.slane %v10382_v22, 7  ;;  %3774 = vmatpush.msra.mxu0 %v3327_v32  ;;  %v3063_v32 = vld [vmem:[%s15485_s7 + $0x450] sm:$0xff] }
 0x3bb   : > { %v10404_v11 = vpop.f32.mrf.mxu0  ;;  %3630 = vmatpush.msra.mxu1 %v3165_v44  ;;  %v3060_v44 = vld [vmem:[%s15485_s7 + $0x438] sm:$0xff]  ;;  %3466 = vmatpush.msrb.mxu2 %v3063_v32 }
 0x3bc   : > { %16330 = vst [vmem:[#allocation52_spill] sm:$0xff] %v10404_v11  ;;  %v10408_v62 = vpop.f32.mrf.mxu3  ;;  %3775 = vmatpush.msra.mxu0 %v3324_v58  ;;  %v10421_v11 = vmax.f32 %v2356_v57, %v2689_v5  ;;  %v10426_v63 = vsel %vm16300_vm5, %v2749_v36, %v2752_v0  ;;  %v3315_v57 = vld [vmem:[%s15485_s7 + $0xc30] sm:$0xff]  ;;  %v3306_v36 = vld [vmem:[%s15485_s7 + $0xbe8] sm:$0xff]  ;;  %v6875_v58 = vld [vmem:[%s15484_s6] sm:$0x7] }
 0x3bd   : > { %16333 = vst [vmem:[#allocation49_spill] sm:$0xff] %v10426_v63  ;;  %v10446_v5 = vperm.slane %v6875_v58, 2  ;;  %3715 = vmatpush.msrb.mxu3 %v3306_v36  ;;  %3467 = vmatpush.msrb.mxu2 %v3060_v44  ;;  %v3312_v32 = vld [vmem:[%s15485_s7 + $0xc18] sm:$0xff] }
 0x3be   : > { %3605 = vmatmul.f32.gmra.mxu0 %v10382_v22  ;;  %16331 = vst [vmem:[#allocation76_spill] sm:$0xff] %v10421_v11  ;;  %v2755_v58 = vrot.slane %v10421_v11, 7  ;;  %v3300_v44 = vld [vmem:[%s15485_s7 + $0xbb8] sm:$0xff] }
 0x3bf   : > { %3776 = vmatpush.msra.mxu0 %v3321_v28  ;;  %3716 = vmatpush.msrb.mxu3 %v3303_v46  ;;  %v2379_v36 = vadd.f32 %v9998_v19, %v10446_v5  ;;  %v3297_v46 = vld [vmem:[%s15485_s7 + $0xba0] sm:$0xff]  ;;  %v3294_v19 = vld [vmem:[%s15485_s7 + $0xb88] sm:$0xff] }
 0x3c0   : > { %v10477_v22 = vsel %vm16300_vm5, %v2752_v0, %v2755_v58  ;;  %3468 = vmatpush.msrb.mxu2 %v3057_v53  ;;  %v3291_v0 = vld [vmem:[%s15485_s7 + $0xb70] sm:$0xff]  ;;  %v2382_v53 = vadd.f32 %v10024_v8, %v10446_v5  ;;  %v3054_v8 = vld [vmem:[%s15485_s7 + $0x408] sm:$0xff] }
 0x3c1   : > { %3540 = vmatmul.f32.gmra.mxu3 %v16332_v15  ;;  %3777 = vmatpush.msra.mxu0 %v3318_v23  ;;  %v10458_v15 = vpop.f32.mrf.mxu1  ;;  %v3309_v23 = vld [vmem:[%s15485_s7 + $0xc00] sm:$0xff]  ;;  %16336 = vst [vmem:[#allocation30_spill] sm:$0xff] %v10477_v22 }
 0x3c2   : > { %6500 = vmatmul.msk.f32.gmra.mxu1 %vm16212_vm12, %v10426_v63  ;;  %3717 = vmatpush.msrb.mxu3 %v3300_v44 }
 0x3c3   : > { %v10448_v28 = vpop.f32.mrf.mxu0  ;;  %3778 = vmatpush.msra.mxu0 %v3315_v57  ;;  %v2429_v57 = vadd.f32 %v10103_v17, %v2379_v36  ;;  %3469 = vmatpush.msrb.mxu2 %v3054_v8 }
 0x3c4   : > { %16334 = vst [vmem:[#allocation27_spill] sm:$0xff] %v10448_v28  ;;  %v10450_v63 = vpop.f32.mrf.mxu3  ;;  %v2581_v28 = vpop.f32.mrf.mxu2  ;;  %3718 = vmatpush.msrb.mxu3 %v3297_v46  ;;  %v3288_v46 = vld [vmem:[%s15485_s7 + $0xb58] sm:$0xff] }
 0x3c5   : > { %3779 = vmatpush.msra.mxu0 %v3312_v32 }
 0x3c6   : > { %3608 = vmatmul.f32.gmra.mxu0 %v10421_v11  ;;  %v16335_v11 = vld [vmem:[#allocation64_spill] sm:$0xff]  ;;  %3719 = vmatpush.msrb.mxu3 %v3294_v19 }
 0x3c7   : > { %3780 = vmatpush.msra.mxu0 %v3309_v23  ;;  %v16338_v23 = vld [vmem:[#allocation36_spill] sm:$0xff] }
 0x3c8   : > { %v2479_v44 = vadd.f32 %v16338_v23, %v2429_v57  ;;  %3720 = vmatpush.msrb.mxu3 %v3291_v0  ;;  %v16340_v57 = vrot.slane %v10112_v37, 7 }
 0x3c9   : > { %3543 = vmatmul.f32.gmra.mxu3 %v16335_v11  ;;  %v10497_v36 = vpop.f32.mrf.mxu1  ;;  %v16339_v11 = vld [vmem:[#allocation38_spill] sm:$0xff] }
 0x3ca   : > { %6501 = vmatmul.msk.f32.gmra.mxu1 %vm7196_vm14, %v10477_v22  ;;  %v2529_v31 = vadd.f32 %v10204_v13, %v2479_v44  ;;  %v10511_v19 = vsel %vm16300_vm5, %v2755_v58, %v16340_v57  ;;  %3721 = vmatpush.msrb.mxu3 %v3288_v46  ;;  %v3051_v58 = vld [vmem:[%s15485_s7 + $0x3f0] sm:$0xff]  ;;  %v3282_v44 = vld [vmem:[%s15485_s7 + $0xb28] sm:$0xff]  ;;  %vm16349_vm5 = vcmp.lt.s32.totalorder %v6954_v2, 7 }
 0x3cb   : > { %v10488_v17 = vpop.f32.mrf.mxu0  ;;  %16341 = vst [vmem:[#allocation36_spill] sm:$0xff] %v10511_v19  ;;  %3470 = vmatpush.msrb.mxu2 %v3051_v58  ;;  %v3279_v46 = vld [vmem:[%s15485_s7 + $0xb10] sm:$0xff] }
 0x3cc   : > { %16337 = vst [vmem:[#allocation77_spill] sm:$0xff] %v10488_v17  ;;  %v10490_v32 = vpop.f32.mrf.mxu3  ;;  %v2584_v22 = vpop.f32.mrf.mxu2  ;;  %v2432_v17 = vadd.f32 %v10146_v6, %v2382_v53  ;;  %v3285_v6 = vld [vmem:[%s15485_s7 + $0xb40] sm:$0xff]  ;;  %v2579_v13 = vadd.f32 %v10406_v27, %v2529_v31  ;;  %v16343_v53 = vld [vmem:[#allocation37_spill] sm:$0xff]  ;;  %v2385_v31 = vadd.f32 %v10060_v1, %v10446_v5 }
 0x3cd   : > { %3722 = vmatpush.msrb.mxu3 %v3285_v6  ;;  %v3276_v1 = vld [vmem:[%s15485_s7 + $0xaf8] sm:$0xff] }
 0x3ce   : > { %3611 = vmatmul.f32.gmra.mxu0 %v10112_v37  ;;  %v2482_v57 = vadd.f32 %v16343_v53, %v2432_v17  ;;  %v2435_v58 = vadd.f32 %v10181_v41, %v2385_v31  ;;  %v3048_v17 = vld [vmem:[%s15485_s7 + $0x3d8] sm:$0xff]  ;;  %v3273_v41 = vld [vmem:[%s15485_s7 + $0xae0] sm:$0xff]  ;;  %v3267_v31 = vld [vmem:[%s15485_s7 + $0xab0] sm:$0xff] }
 0x3cf   : > { %3723 = vmatpush.msrb.mxu3 %v3282_v44  ;;  %3471 = vmatpush.msrb.mxu2 %v3048_v17  ;;  %v16346_v44 = vld [vmem:[#allocation39_spill] sm:$0xff] }
 0x3d0   : > { %v2485_v53 = vadd.f32 %v16346_v44, %v2435_v58  ;;  %v3042_v44 = vld [vmem:[%s15485_s7 + $0x3a8] sm:$0xff] }
 0x3d1   : > { %3546 = vmatmul.f32.gmra.mxu3 %v16339_v11 }
 0x3d2   : > { %6502 = vmatmul.msk.f32.gmra.mxu1 %vm7158_vm6, %v10511_v19  ;;  %v10537_v19 = vpop.f32.mrf.mxu1  ;;  %3724 = vmatpush.msrb.mxu3 %v3279_v46  ;;  %v2535_v46 = vadd.f32 %v10278_v40, %v2485_v53 }
 0x3d3   : > { %v10523_v0 = vpop.f32.mrf.mxu0 }
 0x3d4   : > { %16342 = vst [vmem:[#allocation78_spill] sm:$0xff] %v10523_v0  ;;  %v2628_v23 = vpop.f32.mrf.mxu3  ;;  %v2532_v0 = vadd.f32 %v10236_v50, %v2482_v57  ;;  %v2587_v6 = vpop.f32.mrf.mxu2  ;;  %3725 = vmatpush.msrb.mxu3 %v3276_v1  ;;  %v3045_v1 = vld [vmem:[%s15485_s7 + $0x3c0] sm:$0xff] }
 0x3d5   : > { %v2629_v8 = vadd.f32 %v2628_v23, %v2579_v13  ;;  %3472 = vmatpush.msrb.mxu2 %v3045_v1 }
 0x3d6   : > { %v2582_v13 = vadd.f32 %v2581_v28, %v2532_v0  ;;  %3726 = vmatpush.msrb.mxu3 %v3273_v41  ;;  %v2388_v28 = vadd.f32 %v10096_v35, %v10446_v5  ;;  %v3264_v35 = vld [vmem:[%s15485_s7 + $0xa98] sm:$0xff] }
 0x3d7   : > { %v2663_v27 = vmul.f32 0.1, %v2629_v8  ;;  %3473 = vmatpush.msrb.mxu2 %v3042_v44 }
 0x3d9   : > { %v10541_v10 = vmax.f32 %v2629_v8, %v2663_v27  ;;  %3549 = vmatmul.f32.gmra.mxu3 %v9858_v60  ;;  %v3270_v8 = vld [vmem:[%s15485_s7 + $0xac8] sm:$0xff]  ;;  %v2438_v27 = vadd.f32 %v10206_v39, %v2388_v28 }
 0x3da   : > { %3727 = vmatpush.msrb.mxu3 %v3270_v8  ;;  %v10576_v17 = vpop.f32.mrf.mxu1 }
 0x3db   : > { %16344 = vst [vmem:[#allocation37_spill] sm:$0xff] %v10541_v10  ;;  %v10550_v23 = vpop.f32.mrf.mxu0  ;;  %3631 = vmatmul.f32.vlgmr.msra.gmra.mxu1 %v10541_v10  ;;  %v15727_v40 = vrot.slane %v10541_v10, 1 }
 0x3dc   : > { %16345 = vst [vmem:[#allocation79_spill] sm:$0xff] %v10550_v23  ;;  %v2631_v50 = vpop.f32.mrf.mxu3  ;;  %3728 = vmatpush.msrb.mxu3 %v3267_v31  ;;  %v2590_v53 = vpop.f32.mrf.mxu2  ;;  %v2391_v31 = vadd.f32 %v10138_v14, %v10446_v5 }
 0x3dd   : > { %v2632_v57 = vadd.f32 %v2631_v50, %v2582_v13  ;;  %v2585_v13 = vadd.f32 %v2584_v22, %v2535_v46  ;;  %v3261_v50 = vld [vmem:[%s15485_s7 + $0xa80] sm:$0xff]  ;;  %v2488_v22 = vadd.f32 %v9912_v26, %v2438_v27 }
 0x3de   : > { %3729 = vmatpush.msrb.mxu3 %v3264_v35  ;;  %v2441_v1 = vadd.f32 %v10231_v56, %v2391_v31  ;;  %v3039_v35 = vld [vmem:[%s15485_s7 + $0x390] sm:$0xff] }
 0x3df   : > { %v2666_v0 = vmul.f32 0.1, %v2632_v57  ;;  %v2538_v26 = vadd.f32 %v10339_v34, %v2488_v22  ;;  %3474 = vmatpush.msrb.mxu2 %v3039_v35  ;;  %v16355_v34 = vld [vmem:[#allocation44_spill] sm:$0xff] }
 0x3e0   : > { %3730 = vmatpush.msrb.mxu3 %v3261_v50 }
 0x3e1   : > { %v10567_v58 = vmax.f32 %v2632_v57, %v2666_v0  ;;  %3552 = vmatmul.f32.gmra.mxu3 %v9910_v52  ;;  %v16351_v0 = vld [vmem:[#allocation13_spill] sm:$0xff] }
 0x3e2   : > { %vm16352_vm6 = vnez %v16351_v0  ;;  %v10613_v56 = vpop.f32.mrf.mxu1 }
 0x3e3   : > { %16347 = vst [vmem:[#allocation39_spill] sm:$0xff] %v10567_v58  ;;  %v10578_v39 = vpop.f32.mrf.mxu0  ;;  %3634 = vmatmul.f32.gmra.mxu1 %v10567_v58  ;;  %v2831_v41 = vrot.slane %v10567_v58, 1 }
 0x3e4   : > { %16348 = vst [vmem:[#allocation80_spill] sm:$0xff] %v10578_v39  ;;  %v2634_v57 = vpop.f32.mrf.mxu3  ;;  %v2593_v31 = vpop.f32.mrf.mxu2 }
 0x3e5   : > { %v2635_v8 = vadd.f32 %v2634_v57, %v2585_v13  ;;  %v10594_v28 = vsel %vm16349_vm5, %v15727_v40, %v2831_v41  ;;  %v2588_v13 = vadd.f32 %v2587_v6, %v2538_v26  ;;  %v2491_v57 = vadd.f32 %v16355_v34, %v2441_v1  ;;  %v16360_v1 = vld [vmem:[#allocation45_spill] sm:$0xff]  ;;  %v2971_v34 = vld [vmem:[%s15485_s7 + $0x170] sm:$0xff] }
 0x3e6   : > { %16350 = vst [vmem:[#allocation81_spill] sm:$0xff] %v10594_v28  ;;  %6536 = vmatmul.msk.f32.vlgmr.msra.gmra.mxu0 %vm16352_vm6, %v10594_v28  ;;  %v2394_v6 = vadd.f32 %v10176_v16, %v10446_v5  ;;  %3815 = vmatpush.msrb.mxu1 %v2971_v34 }
 0x3e7   : > { %v2669_v46 = vmul.f32 0.1, %v2635_v8  ;;  %v2541_v40 = vadd.f32 %v10402_v47, %v2491_v57  ;;  %v16362_v57 = vld [vmem:[#allocation47_spill] sm:$0xff] }
 0x3e8   : > { %v2444_v35 = vadd.f32 %v10266_v12, %v2394_v6 }
 0x3e9   : > { %v10603_v27 = vmax.f32 %v2635_v8, %v2669_v46  ;;  %3555 = vmatmul.f32.gmra.mxu3 %v9962_v21  ;;  %v16357_v46 = vld [vmem:[#allocation15_spill] sm:$0xff] }
 0x3ea   : > { %vm16358_vm14 = vnez %v16357_v46 }
 0x3eb   : > { %16353 = vst [vmem:[#allocation82_spill] sm:$0xff] %v10603_v27  ;;  %v10609_v44 = vpop.f32.mrf.mxu0  ;;  %3637 = vmatmul.f32.gmra.mxu1 %v10603_v27  ;;  %v2834_v14 = vrot.slane %v10603_v27, 1 }
 0x3ec   : > { %16354 = vst [vmem:[#allocation83_spill] sm:$0xff] %v10609_v44  ;;  %v2637_v50 = vpop.f32.mrf.mxu3 }
 0x3ed   : > { %v2638_v22 = vadd.f32 %v2637_v50, %v2588_v13  ;;  %v10618_v8 = vsel %vm16349_vm5, %v2831_v41, %v2834_v14  ;;  %v3036_v41 = vld [vmem:[%s15485_s7 + $0x378] sm:$0xff]  ;;  %v3033_v13 = vld [vmem:[%s15485_s7 + $0x360] sm:$0xff]  ;;  %v2591_v50 = vadd.f32 %v2590_v53, %v2541_v40 }
 0x3ee   : > { %16356 = vst [vmem:[#allocation44_spill] sm:$0xff] %v10618_v8  ;;  %6537 = vmatmul.msk.f32.gmra.mxu0 %vm16358_vm14, %v10618_v8  ;;  %3475 = vmatpush.msrb.mxu2 %v3036_v41  ;;  %v16364_v40 = vld [vmem:[#allocation17_spill] sm:$0xff]  ;;  %v10654_v41 = vpop.f32.mrf.mxu1 }
 0x3ef   : > { %v2672_v26 = vmul.f32 0.1, %v2638_v22  ;;  %vm16365_vm12 = vnez %v16364_v40  ;;  %v2968_v53 = vld [vmem:[%s15485_s7 + $0x158] sm:$0xff] }
 0x3f0   : > { %3476 = vmatpush.msrb.mxu2 %v3033_v13  ;;  %v2397_v13 = vadd.f32 %v10199_v24, %v10446_v5  ;;  %3816 = vmatpush.msrb.mxu1 %v2968_v53  ;;  %v2962_v24 = vld [vmem:[%s15485_s7 + $0x128] sm:$0xff] }
 0x3f1   : > { %v10627_v44 = vmax.f32 %v2638_v22, %v2672_v26  ;;  %3558 = vmatmul.f32.gmra.mxu3 %v16360_v1  ;;  %v2494_v22 = vadd.f32 %v16362_v57, %v2444_v35 }
 0x3f3   : > { %16359 = vst [vmem:[#allocation84_spill] sm:$0xff] %v10627_v44  ;;  %3640 = vmatmul.f32.gmra.mxu1 %v10627_v44  ;;  %v2837_v16 = vrot.slane %v10627_v44, 1  ;;  %v10638_v12 = vpop.f32.mrf.mxu0  ;;  %v2544_v34 = vadd.f32 %v10458_v15, %v2494_v22  ;;  %v2830_v22 = vrot.slane %v10126_v45, 1 }
 0x3f4   : > { %16361 = vst [vmem:[#allocation85_spill] sm:$0xff] %v10638_v12  ;;  %v2640_v47 = vpop.f32.mrf.mxu3  ;;  %v3030_v12 = vld [vmem:[%s15485_s7 + $0x348] sm:$0xff] }
 0x3f5   : > { %v2641_v6 = vadd.f32 %v2640_v47, %v2591_v50  ;;  %v10646_v26 = vsel %vm16349_vm5, %v2834_v14, %v2837_v16  ;;  %v2596_v50 = vpop.f32.mrf.mxu2  ;;  %v2965_v14 = vld [vmem:[%s15485_s7 + $0x140] sm:$0xff]  ;;  %v2447_v47 = vadd.f32 %v10312_v55, %v2397_v13  ;;  %3477 = vmatpush.msrb.mxu2 %v3030_v12  ;;  %v2594_v53 = vadd.f32 %v2593_v31, %v2544_v34  ;;  %v16369_v12 = vld [vmem:[#allocation3_spill] sm:$0xff] }
 0x3f6   : > { %16363 = vst [vmem:[#allocation47_spill] sm:$0xff] %v10646_v26  ;;  %6538 = vmatmul.msk.f32.gmra.mxu0 %vm16365_vm12, %v10646_v26  ;;  %3817 = vmatpush.msrb.mxu1 %v2965_v14  ;;  %vm16370_vm11 = vnez %v16369_v12  ;;  %v15730_v34 = vrot.slane %v10101_v29, 1  ;;  %v3228_v26 = vld [vmem:[%s15485_s7 + $0x978] sm:$0xff] }
 0x3f7   : > { %v2675_v35 = vmul.f32 0.1, %v2641_v6  ;;  %v2497_v13 = vadd.f32 %v10066_v61, %v2447_v47  ;;  %v2400_v61 = vadd.f32 %v10222_v49, %v10446_v5 }
 0x3f8   : > { %3818 = vmatpush.msrb.mxu1 %v2962_v24  ;;  %v2956_v24 = vld [vmem:[%s15485_s7 + $0xf8] sm:$0xff] }
 0x3f9   : > { %v10663_v57 = vmax.f32 %v2641_v6, %v2675_v35  ;;  %3561 = vmatmul.f32.gmra.mxu3 %v9661_v9  ;;  %v2959_v6 = vld [vmem:[%s15485_s7 + $0x110] sm:$0xff]  ;;  %v2450_v49 = vadd.f32 %v10362_v38, %v2400_v61  ;;  %v2547_v39 = vadd.f32 %v10497_v36, %v2497_v13  ;;  %v2950_v38 = vld [vmem:[%s15485_s7 + $0xc8] sm:$0xff]  ;;  %v3024_v36 = vld [vmem:[%s15485_s7 + $0x318] sm:$0xff] }
 0x3fa   : > { %3819 = vmatpush.msrb.mxu1 %v2959_v6  ;;  %v2953_v6 = vld [vmem:[%s15485_s7 + $0xe0] sm:$0xff] }
 0x3fb   : > { %16366 = vst [vmem:[#allocation86_spill] sm:$0xff] %v10663_v57  ;;  %3643 = vmatmul.f32.gmra.mxu1 %v10663_v57  ;;  %v2840_v55 = vrot.slane %v10663_v57, 1  ;;  %v10683_v31 = vpop.f32.mrf.mxu0  ;;  %v2597_v13 = vadd.f32 %v2596_v50, %v2547_v39  ;;  %v2500_v39 = vadd.f32 %v10110_v25, %v2450_v49  ;;  %v2403_v25 = vadd.f32 %v10256_v43, %v10446_v5 }
 0x3fc   : > { %v2643_v15 = vpop.f32.mrf.mxu3  ;;  %16368 = vst [vmem:[#allocation88_spill] sm:$0xff] %v10683_v31  ;;  %3820 = vmatpush.msrb.mxu1 %v2956_v24  ;;  %v3112_v24 = vld [vmem:[%s15485_s7 + $0x5d8] sm:$0xff]  ;;  %v2833_v31 = vrot.slane %v10166_v18, 1 }
 0x3fd   : > { %v2644_v35 = vadd.f32 %v2643_v15, %v2594_v53  ;;  %v10681_v14 = vsel %vm16349_vm5, %v2837_v16, %v2840_v55  ;;  %v3115_v16 = vld [vmem:[%s15485_s7 + $0x5f0] sm:$0xff]  ;;  %v10703_v15 = vsel %vm16349_vm5, %v15730_v34, %v2830_v22  ;;  %v2599_v61 = vpop.f32.mrf.mxu2  ;;  %v2453_v43 = vadd.f32 %v10408_v62, %v2403_v25  ;;  %v2938_v62 = vld [vmem:[%s15485_s7 + $0x68] sm:$0xff] }
 0x3fe   : > { %16367 = vst [vmem:[#allocation87_spill] sm:$0xff] %v10681_v14  ;;  %6539 = vmatmul.msk.f32.gmra.mxu0 %vm16370_vm11, %v10681_v14  ;;  %v3027_v34 = vld [vmem:[%s15485_s7 + $0x330] sm:$0xff]  ;;  %3821 = vmatpush.msrb.mxu1 %v2953_v6  ;;  %v16375_v14 = vld [vmem:[#allocation5_spill] sm:$0xff] }
 0x3ff   : > { %v2678_v47 = vmul.f32 0.1, %v2644_v35  ;;  %v10694_v53 = vpop.f32.mrf.mxu1  ;;  %16372 = vst [vmem:[#allocation90_spill] sm:$0xff] %v10703_v15  ;;  %3965 = vmatpush.msrb.mxu0 %v3115_v16  ;;  %3478 = vmatpush.msrb.mxu2 %v3027_v34  ;;  %v2947_v34 = vld [vmem:[%s15485_s7 + $0xb0] sm:$0xff] }
 0x400   : > { %16371 = vst [vmem:[#allocation89_spill] sm:$0xff] %v10694_v53  ;;  %3822 = vmatpush.msrb.mxu1 %v2950_v38  ;;  %v2944_v38 = vld [vmem:[%s15485_s7 + $0x98] sm:$0xff] }
 0x401   : > { %v10710_v23 = vmax.f32 %v2644_v35, %v2678_v47  ;;  %6525 = vmatmul.msk.f32.vlgmr.msrb.gmra.mxu3 %vm16352_vm6, %v10703_v15  ;;  %3966 = vmatpush.msrb.mxu0 %v3112_v24  ;;  %v3109_v47 = vld [vmem:[%s15485_s7 + $0x5c0] sm:$0xff]  ;;  %v3106_v24 = vld [vmem:[%s15485_s7 + $0x5a8] sm:$0xff]  ;;  %vm16376_vm6 = vnez %v16375_v14 }
 0x402   : > { %3479 = vmatpush.msrb.mxu2 %v3024_v36  ;;  %3823 = vmatpush.msrb.mxu1 %v2947_v34  ;;  %v3103_v36 = vld [vmem:[%s15485_s7 + $0x590] sm:$0xff]  ;;  %v2550_v34 = vadd.f32 %v10537_v19, %v2500_v39 }
 0x403   : > { %16373 = vst [vmem:[#allocation91_spill] sm:$0xff] %v10710_v23  ;;  %3646 = vmatmul.f32.gmra.mxu1 %v10710_v23  ;;  %v2843_v35 = vrot.slane %v10710_v23, 1  ;;  %3967 = vmatpush.msrb.mxu0 %v3109_v47  ;;  %v10761_v47 = vsel %vm16349_vm5, %v2830_v22, %v2833_v31  ;;  %v3021_v22 = vld [vmem:[%s15485_s7 + $0x300] sm:$0xff] }
 0x404   : > { %v2646_v16 = vpop.f32.mrf.mxu3  ;;  %16379 = vst [vmem:[#allocation95_spill] sm:$0xff] %v10761_v47  ;;  %3824 = vmatpush.msrb.mxu1 %v2944_v38  ;;  %v3100_v38 = vld [vmem:[%s15485_s7 + $0x578] sm:$0xff]  ;;  %3480 = vmatpush.msrb.mxu2 %v3021_v22  ;;  %v2600_v19 = vadd.f32 %v2599_v61, %v2550_v34  ;;  %v3094_v61 = vld [vmem:[%s15485_s7 + $0x548] sm:$0xff]  ;;  %v2503_v34 = vadd.f32 %v10158_v7, %v2453_v43 }
 0x405   : > { %v2647_v50 = vadd.f32 %v2646_v16, %v2597_v13  ;;  %v10739_v6 = vsel %vm16349_vm5, %v2840_v55, %v2843_v35  ;;  %3968 = vmatpush.msrb.mxu0 %v3106_v24  ;;  %v10757_v13 = vpop.f32.mrf.mxu0  ;;  %v2941_v16 = vld [vmem:[%s15485_s7 + $0x80] sm:$0xff]  ;;  %v2602_v25 = vpop.f32.mrf.mxu2  ;;  %v2406_v7 = vadd.f32 %v10297_v3, %v10446_v5 }
 0x406   : > { %16374 = vst [vmem:[#allocation92_spill] sm:$0xff] %v10739_v6  ;;  %6540 = vmatmul.msk.f32.gmra.mxu0 %vm16376_vm6, %v10739_v6  ;;  %3825 = vmatpush.msrb.mxu1 %v2941_v16  ;;  %v2935_v16 = vld [vmem:[%s15485_s7 + $0x50] sm:$0xff] }
 0x407   : > { %v2681_v49 = vmul.f32 0.1, %v2647_v50  ;;  %v10752_v55 = vpop.f32.mrf.mxu1  ;;  %16378 = vst [vmem:[#allocation94_spill] sm:$0xff] %v10757_v13  ;;  %3969 = vmatpush.msrb.mxu0 %v3103_v36  ;;  %v2836_v36 = vrot.slane %v10187_v33, 1  ;;  %v2932_v13 = vld [vmem:[%s15485_s7 + $0x38] sm:$0xff]  ;;  %v2456_v3 = vadd.f32 %v10450_v63, %v2406_v7  ;;  %v3255_v7 = vld [vmem:[%s15485_s7 + $0xa50] sm:$0xff] }
 0x408   : > { %16377 = vst [vmem:[#allocation93_spill] sm:$0xff] %v10752_v55  ;;  %3826 = vmatpush.msrb.mxu1 %v2938_v62  ;;  %v3258_v62 = vld [vmem:[%s15485_s7 + $0xa68] sm:$0xff]  ;;  %v3031_v6 = vld [vmem:[%s15485_s7 + $0x350] sm:$0xff] }
 0x409   : > { %v10768_v24 = vmax.f32 %v2647_v50, %v2681_v49  ;;  %6526 = vmatmul.msk.f32.gmra.mxu3 %vm16358_vm14, %v10761_v47  ;;  %3970 = vmatpush.msrb.mxu0 %v3100_v38  ;;  %v3097_v50 = vld [vmem:[%s15485_s7 + $0x560] sm:$0xff]  ;;  %vm16382_vm14 = vnez %v16266_v59 }
 0x40a   : > { %3827 = vmatpush.msrb.mxu1 %v2935_v16  ;;  %3665 = vmatpush.msra.mxu2 %v3258_v62  ;;  %v2553_v16 = vadd.f32 %v10576_v17, %v2503_v34  ;;  %v3085_v34 = vld [vmem:[%s15485_s7 + $0x500] sm:$0xff]  ;;  %v2839_v62 = vrot.slane %v10212_v48, 1 }
 0x40b   : > { %16380 = vst [vmem:[#allocation96_spill] sm:$0xff] %v10768_v24  ;;  %3649 = vmatmul.f32.gmra.mxu1 %v10768_v24  ;;  %v2846_v39 = vrot.slane %v10768_v24, 1  ;;  %3971 = vmatpush.msrb.mxu0 %v3097_v50  ;;  %v10817_v50 = vsel %vm16349_vm5, %v2833_v31, %v2836_v36  ;;  %v3088_v31 = vld [vmem:[%s15485_s7 + $0x518] sm:$0xff] }
 0x40c   : > { %v2649_v49 = vpop.f32.mrf.mxu3  ;;  %16384 = vst [vmem:[#allocation99_spill] sm:$0xff] %v10817_v50  ;;  %3828 = vmatpush.msrb.mxu1 %v2932_v13  ;;  %v2926_v13 = vld [vmem:[%s15485_s7 + $0x8] sm:$0xff]  ;;  %v2603_v63 = vadd.f32 %v2602_v25, %v2553_v16  ;;  %3666 = vmatpush.msra.mxu2 %v3255_v7 }
 0x40d   : > { %v2650_v22 = vadd.f32 %v2649_v49, %v2600_v19  ;;  %v10797_v38 = vsel %vm16349_vm5, %v2843_v35, %v2846_v39  ;;  %3972 = vmatpush.msrb.mxu0 %v3094_v61  ;;  %v3091_v19 = vld [vmem:[%s15485_s7 + $0x530] sm:$0xff]  ;;  %v2929_v49 = vld [vmem:[%s15485_s7 + $0x20] sm:$0xff]  ;;  %v10835_v61 = vpop.f32.mrf.mxu0  ;;  %v3082_v25 = vld [vmem:[%s15485_s7 + $0x4e8] sm:$0xff]  ;;  %v2605_v16 = vpop.f32.mrf.mxu2 }
 0x40e   : > { %16381 = vst [vmem:[#allocation97_spill] sm:$0xff] %v10797_v38  ;;  %6541 = vmatmul.msk.f32.gmra.mxu0 %vm16382_vm14, %v10797_v38  ;;  %3829 = vmatpush.msrb.mxu1 %v2929_v49 }
 0x40f   : > { %v2684_v43 = vmul.f32 0.1, %v2650_v22  ;;  %v10810_v35 = vpop.f32.mrf.mxu1  ;;  %3973 = vmatpush.msrb.mxu0 %v3091_v19  ;;  %16386 = vst [vmem:[#allocation101_spill] sm:$0xff] %v10835_v61 }
 0x410   : > { %16383 = vst [vmem:[#allocation98_spill] sm:$0xff] %v10810_v35  ;;  %3830 = vmatpush.msrb.mxu1 %v2926_v13 }
 0x411   : > { %v10824_v38 = vmax.f32 %v2650_v22, %v2684_v43  ;;  %6527 = vmatmul.msk.f32.gmra.mxu3 %vm16365_vm12, %v10817_v50  ;;  %3974 = vmatpush.msrb.mxu0 %v3088_v31  ;;  %v2506_v43 = vadd.f32 %v10190_v54, %v2456_v3  ;;  %v2409_v31 = vadd.f32 %v10349_v30, %v10446_v5  ;;  %v3079_v54 = vld [vmem:[%s15485_s7 + $0x4d0] sm:$0xff]  ;;  %v3252_v3 = vld [vmem:[%s15485_s7 + $0xa38] sm:$0xff] }
 0x412   : > { %3667 = vmatpush.msra.mxu2 %v3252_v3  ;;  %v16393_v3 = vld [vmem:[#allocation11_spill] sm:$0xff] }
 0x413   : > { %16385 = vst [vmem:[#allocation100_spill] sm:$0xff] %v10824_v38  ;;  %3652 = vmatmul.f32.gmra.mxu1 %v10824_v38  ;;  %v2849_v17 = vrot.slane %v10824_v38, 1  ;;  %3975 = vmatpush.msrb.mxu0 %v3085_v34  ;;  %v2556_v30 = vadd.f32 %v10613_v56, %v2506_v43  ;;  %v3067_v34 = vld [vmem:[%s15485_s7 + $0x470] sm:$0xff]  ;;  %v2842_v43 = vrot.slane %v10247_v42, 1 }
 0x414   : > { %v2652_v22 = vpop.f32.mrf.mxu3  ;;  %3915 = vmatpush.msra.mxu3 %v3067_v34 }
 0x415   : > { %v2653_v19 = vadd.f32 %v2652_v22, %v2603_v63  ;;  %v10852_v49 = vsel %vm16349_vm5, %v2846_v39, %v2849_v17  ;;  %3976 = vmatpush.msrb.mxu0 %v3082_v25  ;;  %v10866_v39 = vsel %vm16349_vm5, %v2836_v36, %v2839_v62  ;;  %v2459_v63 = vadd.f32 %v10490_v32, %v2409_v31  ;;  %v3076_v36 = vld [vmem:[%s15485_s7 + $0x4b8] sm:$0xff]  ;;  %v3073_v22 = vld [vmem:[%s15485_s7 + $0x4a0] sm:$0xff]  ;;  %v10889_v7 = vpop.f32.mrf.mxu0 }
 0x416   : > { %16387 = vst [vmem:[#allocation102_spill] sm:$0xff] %v10852_v49  ;;  %6542 = vmatmul.msk.f32.gmra.mxu0 %vm16272_vm4, %v10852_v49  ;;  %v2606_v32 = vadd.f32 %v2605_v16, %v2556_v30  ;;  %v3070_v16 = vld [vmem:[%s15485_s7 + $0x488] sm:$0xff]  ;;  %v3061_v30 = vld [vmem:[%s15485_s7 + $0x440] sm:$0xff] }
 0x417   : > { %v2687_v13 = vmul.f32 0.1, %v2653_v19  ;;  %v10859_v61 = vpop.f32.mrf.mxu1  ;;  %16389 = vst [vmem:[#allocation104_spill] sm:$0xff] %v10866_v39  ;;  %3977 = vmatpush.msrb.mxu0 %v3079_v54  ;;  %v2509_v31 = vadd.f32 %v10227_v20, %v2459_v63  ;;  %v2608_v20 = vpop.f32.mrf.mxu2  ;;  %v3249_v63 = vld [vmem:[%s15485_s7 + $0xa20] sm:$0xff] }
 0x418   : > { %16388 = vst [vmem:[#allocation103_spill] sm:$0xff] %v10859_v61  ;;  %3668 = vmatpush.msra.mxu2 %v3249_v63  ;;  %v3240_v61 = vld [vmem:[%s15485_s7 + $0x9d8] sm:$0xff] }
 0x419   : > { %v10873_v5 = vmax.f32 %v2653_v19, %v2687_v13  ;;  %6528 = vmatmul.msk.f32.gmra.mxu3 %vm16370_vm11, %v10866_v39  ;;  %3978 = vmatpush.msrb.mxu0 %v3076_v36  ;;  %16391 = vst [vmem:[#allocation106_spill] sm:$0xff] %v10889_v7  ;;  %v3064_v19 = vld [vmem:[%s15485_s7 + $0x458] sm:$0xff]  ;;  %vm16395_vm11 = vmmov %vm16349_vm5 }
 0x41a   : > { %3916 = vmatpush.msra.mxu3 %v3064_v19 }
 0x41b   : > { %16390 = vst [vmem:[#allocation105_spill] sm:$0xff] %v10873_v5  ;;  %3655 = vmatmul.f32.gmra.mxu1 %v10873_v5  ;;  %v2852_v56 = vrot.slane %v10873_v5, 1  ;;  %3979 = vmatpush.msrb.mxu0 %v3073_v22  ;;  %v2559_v22 = vadd.f32 %v10654_v41, %v2509_v31  ;;  %v2845_v41 = vrot.slane %v10286_v4, 1  ;;  %v3246_v31 = vld [vmem:[%s15485_s7 + $0xa08] sm:$0xff] }
 0x41c   : > { %v2655_v25 = vpop.f32.mrf.mxu3  ;;  %3917 = vmatpush.msra.mxu3 %v3061_v30  ;;  %3669 = vmatpush.msra.mxu2 %v3246_v31  ;;  %v3243_v31 = vld [vmem:[%s15485_s7 + $0x9f0] sm:$0xff] }
 0x41d   : > { %v2656_v13 = vadd.f32 %v2655_v25, %v2606_v32  ;;  %v10901_v54 = vsel %vm16349_vm5, %v2849_v17, %v2852_v56  ;;  %3980 = vmatpush.msrb.mxu0 %v3070_v16  ;;  %v10913_v17 = vsel %vm16395_vm11, %v2839_v62, %v2842_v43  ;;  %v3058_v32 = vld [vmem:[%s15485_s7 + $0x428] sm:$0xff]  ;;  %v3055_v62 = vld [vmem:[%s15485_s7 + $0x410] sm:$0xff]  ;;  %v2609_v19 = vadd.f32 %v2608_v20, %v2559_v22  ;;  %vm16398_vm11 = vmmov %vm16349_vm5  ;;  %v10943_v63 = vpop.f32.mrf.mxu0 }
 0x41e   : > { %16392 = vst [vmem:[#allocation107_spill] sm:$0xff] %v10901_v54  ;;  %6543 = vmatmul.msk.f32.gmra.mxu0 %vm16278_vm0, %v10901_v54  ;;  %3918 = vmatpush.msra.mxu3 %v3058_v32  ;;  %v16401_v32 = vld [vmem:[#allocation22_spill] sm:$0xff] }
 0x41f   : > { %v2690_v36 = vmul.f32 0.1, %v2656_v13  ;;  %v10909_v34 = vpop.f32.mrf.mxu1  ;;  %16396 = vst [vmem:[#allocation108_spill] sm:$0xff] %v10913_v17  ;;  %v3049_v22 = vld [vmem:[%s15485_s7 + $0x3e0] sm:$0xff]  ;;  %3670 = vmatpush.msra.mxu2 %v3243_v31 }
 0x420   : > { %16394 = vst [vmem:[#allocation11_spill] sm:$0xff] %v10909_v34  ;;  %3919 = vmatpush.msra.mxu3 %v3055_v62  ;;  %v16410_v54 = vld [vmem:[#allocation14_spill] sm:$0xff] }
 0x421   : > { %v10922_v25 = vmax.f32 %v2656_v13, %v2690_v36  ;;  %6529 = vmatmul.msk.f32.gmra.mxu3 %vm16376_vm6, %v10913_v17  ;;  %v3052_v13 = vld [vmem:[%s15485_s7 + $0x3f8] sm:$0xff]  ;;  %16400 = vst [vmem:[#allocation111_spill] sm:$0xff] %v10943_v63  ;;  %3671 = vmatpush.msra.mxu2 %v3240_v61  ;;  %v3237_v61 = vld [vmem:[%s15485_s7 + $0x9c0] sm:$0xff] }
 0x422   : > { %3920 = vmatpush.msra.mxu3 %v3052_v13  ;;  %v2729_v13 = vrot.slane %v10541_v10, 7  ;;  %v16406_v63 = vld [vmem:[#allocation25_spill] sm:$0xff] }
 0x423   : > { %16397 = vst [vmem:[#allocation109_spill] sm:$0xff] %v10922_v25  ;;  %3658 = vmatmul.f32.gmra.mxu1 %v10922_v25  ;;  %v2855_v16 = vrot.slane %v10922_v25, 1  ;;  %3672 = vmatpush.msra.mxu2 %v3237_v61  ;;  %v3025_v61 = vld [vmem:[%s15485_s7 + $0x320] sm:$0xff] }
 0x424   : > { %v2658_v30 = vpop.f32.mrf.mxu3  ;;  %3921 = vmatpush.msra.mxu3 %v3049_v22 }
 0x425   : > { %v2659_v36 = vadd.f32 %v2658_v30, %v2609_v19  ;;  %v10941_v20 = vsel %vm16398_vm11, %v2852_v56, %v2855_v16  ;;  %v10955_v19 = vsel %vm16349_vm5, %v2842_v43, %v2845_v41  ;;  %v3046_v56 = vld [vmem:[%s15485_s7 + $0x3c8] sm:$0xff]  ;;  %v3043_v43 = vld [vmem:[%s15485_s7 + $0x3b0] sm:$0xff]  ;;  %vm16407_vm11 = vcmp.lt.s32.totalorder %v6954_v2, 1  ;;  %v11002_v49 = vpop.f32.mrf.mxu0 }
 0x426   : > { %16399 = vst [vmem:[#allocation110_spill] sm:$0xff] %v10941_v20  ;;  %6544 = vmatmul.msk.f32.gmra.mxu0 %vm16285_vm7, %v10941_v20  ;;  %3922 = vmatpush.msra.mxu3 %v3046_v56  ;;  %v2848_v20 = vrot.slane %v16406_v63, 1 }
 0x427   : > { %v2693_v62 = vmul.f32 0.1, %v2659_v36  ;;  %v10951_v7 = vpop.f32.mrf.mxu1  ;;  %16403 = vst [vmem:[#allocation112_spill] sm:$0xff] %v10955_v19 }
 0x428   : > { %16402 = vst [vmem:[#allocation22_spill] sm:$0xff] %v10951_v7  ;;  %3923 = vmatpush.msra.mxu3 %v3043_v43  ;;  %v3040_v7 = vld [vmem:[%s15485_s7 + $0x398] sm:$0xff]  ;;  %v16412_v43 = vld [vmem:[#allocation23_spill] sm:$0xff] }
 0x429   : > { %v10960_v30 = vmax.f32 %v2659_v36, %v2693_v62  ;;  %6530 = vmatmul.msk.f32.gmra.mxu3 %vm16382_vm14, %v10955_v19  ;;  %vm16411_vm14 = vnez %v16410_v54  ;;  %16414 = vst [vmem:[#allocation117_spill] sm:$0xff] %v11002_v49  ;;  %v16417_v49 = vld [vmem:[#allocation32_spill] sm:$0xff]  ;;  %v16469_v54 = vld [vmem:[#allocation42_spill] sm:$0xff] }
 0x42a   : > { %3924 = vmatpush.msra.mxu3 %v3040_v7  ;;  %v2732_v7 = vrot.slane %v10567_v58, 7  ;;  %v16422_v58 = vrot.slane %v10541_v10, 1 }
 0x42b   : > { %16404 = vst [vmem:[#allocation113_spill] sm:$0xff] %v10960_v30  ;;  %3661 = vmatmul.f32.gmra.mxu1 %v10960_v30  ;;  %v15743_v36 = vrot.slane %v10960_v30, 7  ;;  %v2858_v22 = vrot.slane %v10960_v30, 1 }
 0x42c   : > { %v10975_v62 = vpop.f32.mrf.mxu3 }
 0x42d   : > { %16405 = vst [vmem:[#allocation114_spill] sm:$0xff] %v10975_v62  ;;  %v10985_v56 = vsel %vm16407_vm11, %v15743_v36, %v2729_v13  ;;  %v10989_v31 = vsel %vm16349_vm5, %v2855_v16, %v2858_v22  ;;  %v3037_v36 = vld [vmem:[%s15485_s7 + $0x380] sm:$0xff]  ;;  %vm16415_vm11 = vmmov %vm16349_vm5  ;;  %vm16420_vm5 = vcmp.lt.s32.totalorder %v6954_v2, 1  ;;  %v11065_v10 = vpop.f32.mrf.mxu0  ;;  %v3022_v62 = vld [vmem:[%s15485_s7 + $0x308] sm:$0xff] }
 0x42e   : > { %16408 = vst [vmem:[#allocation115_spill] sm:$0xff] %v10985_v56  ;;  %6503 = vmatmul.msk.f32.vlgmr.msrb.gmra.mxu2 %vm16411_vm14, %v10985_v56  ;;  %6545 = vmatmul.msk.f32.gmra.mxu0 %vm16291_vm13, %v10989_v31  ;;  %v11006_v16 = vsel %vm16415_vm11, %v2845_v41, %v2848_v20 }
 0x42f   : > { %16409 = vst [vmem:[#allocation116_spill] sm:$0xff] %v10989_v31  ;;  %v10997_v34 = vpop.f32.mrf.mxu1  ;;  %v3034_v31 = vld [vmem:[%s15485_s7 + $0x368] sm:$0xff]  ;;  %3925 = vmatpush.msra.mxu3 %v3037_v36  ;;  %v11032_v36 = vsel %vm16420_vm5, %v2729_v13, %v2732_v7  ;;  %v3028_v13 = vld [vmem:[%s15485_s7 + $0x338] sm:$0xff]  ;;  %vm16427_vm5 = vmmov %vm16415_vm11 }
 0x430   : > { %16413 = vst [vmem:[#allocation23_spill] sm:$0xff] %v10997_v34  ;;  %v16419_v34 = vld [vmem:[#allocation26_spill] sm:$0xff] }
 0x431   : > { %16416 = vst [vmem:[#allocation118_spill] sm:$0xff] %v11006_v16  ;;  %6531 = vmatmul.msk.f32.gmra.mxu3 %vm16272_vm4, %v11006_v16  ;;  %v2851_v35 = vrot.slane %v16419_v34, 1 }
 0x432   : > { %3926 = vmatpush.msra.mxu3 %v3034_v31  ;;  %16421 = vst [vmem:[#allocation120_spill] sm:$0xff] %v11032_v36 }
 0x433   : > { %6547 = vmatmul.msk.f32.vlgmr.msrb.gmra.mxu1 %vm16411_vm14, %v16417_v49  ;;  %v11038_v49 = vsel %vm16415_vm11, %v2858_v22, %v16422_v58  ;;  %v11053_v58 = vsel %vm16427_vm5, %v2848_v20, %v2851_v35  ;;  %v2735_v22 = vrot.slane %v10603_v27, 7  ;;  %16429 = vst [vmem:[#allocation124_spill] sm:$0xff] %v11065_v10  ;;  %v16430_v20 = vld [vmem:[#allocation34_spill] sm:$0xff]  ;;  %vm16433_vm11 = vcmp.lt.s32.totalorder %v6954_v2, 1  ;;  %v3231_v10 = vld [vmem:[%s15485_s7 + $0x990] sm:$0xff] }
 0x434   : > { %v11021_v41 = vpop.f32.mrf.mxu3  ;;  %16423 = vst [vmem:[#allocation121_spill] sm:$0xff] %v11038_v49  ;;  %3927 = vmatpush.msra.mxu3 %v3031_v6  ;;  %v3234_v6 = vld [vmem:[%s15485_s7 + $0x9a8] sm:$0xff] }
 0x435   : > { %16418 = vst [vmem:[#allocation119_spill] sm:$0xff] %v11021_v41  ;;  %3673 = vmatpush.msra.mxu2 %v3234_v6  ;;  %v11078_v53 = vsel %vm16433_vm11, %v2732_v7, %v2735_v22  ;;  %v16436_v6 = vld [vmem:[#allocation28_spill] sm:$0xff]  ;;  %v2738_v7 = vrot.slane %v10627_v44, 7  ;;  %v2747_v41 = vrot.slane %v10768_v24, 7 }
 0x436   : > { %6504 = vmatmul.msk.f32.gmra.mxu2 %vm7116_vm15, %v11032_v36  ;;  %6546 = vmatmul.msk.f32.gmra.mxu0 %vm16297_vm9, %v11038_v49  ;;  %16428 = vst [vmem:[#allocation123_spill] sm:$0xff] %v11053_v58 }
 0x437   : > { %v11046_v55 = vpop.f32.mrf.mxu1  ;;  %3928 = vmatpush.msra.mxu3 %v3028_v13  ;;  %16434 = vst [vmem:[#allocation126_spill] sm:$0xff] %v11078_v53  ;;  %v16435_v13 = vld [vmem:[#allocation18_spill] sm:$0xff]  ;;  %3674 = vmatpush.msra.mxu2 %v3231_v10  ;;  %v11110_v8 = vsel %vm16433_vm11, %v2735_v22, %v2738_v7  ;;  %v16443_v10 = vld [vmem:[#allocation4_spill] sm:$0xff]  ;;  %v2741_v22 = vrot.slane %v10663_v57, 7 }
 0x438   : > { %16426 = vst [vmem:[#allocation122_spill] sm:$0xff] %v11046_v55  ;;  %v16432_v55 = vld [vmem:[#allocation76_spill] sm:$0xff] }
 0x439   : > { %6532 = vmatmul.msk.f32.gmra.mxu3 %vm16278_vm0, %v11053_v58  ;;  %v2854_v27 = vrot.slane %v16432_v55, 1  ;;  %16442 = vst [vmem:[#allocation130_spill] sm:$0xff] %v11110_v8  ;;  %3675 = vmatpush.msra.mxu2 %v3228_v26  ;;  %v3225_v26 = vld [vmem:[%s15485_s7 + $0x960] sm:$0xff]  ;;  %v11139_v28 = vsel %vm16433_vm11, %v2738_v7, %v2741_v22 }
 0x43a   : > { %3929 = vmatpush.msra.mxu3 %v3025_v61  ;;  %16449 = vst [vmem:[#allocation134_spill] sm:$0xff] %v11139_v28  ;;  %v3145_v55 = vld [vmem:[%s15485_s7 + $0x6e0] sm:$0xff] }
 0x43b   : > { %6548 = vmatmul.msk.f32.gmra.mxu1 %vm7116_vm15, %v16430_v20  ;;  %v11088_v61 = vsel %vm16427_vm5, %v2851_v35, %v2854_v27  ;;  %v2857_v35 = vrot.slane %v10112_v37, 1  ;;  %3676 = vmatpush.msra.mxu2 %v3225_v26  ;;  %v16452_v26 = vld [vmem:[#allocation33_spill] sm:$0xff]  ;;  %v16454_v37 = vrot.slane %v10101_v29, 1 }
 0x43c   : > { %v11070_v49 = vpop.f32.mrf.mxu3  ;;  %3930 = vmatpush.msra.mxu3 %v3022_v62  ;;  %16438 = vst [vmem:[#allocation127_spill] sm:$0xff] %v11088_v61  ;;  %v11100_v62 = vpop.f32.mrf.mxu0 }
 0x43d   : > { %16431 = vst [vmem:[#allocation125_spill] sm:$0xff] %v11070_v49  ;;  %v16439_v49 = vld [vmem:[#allocation35_spill] sm:$0xff]  ;;  %v11156_v7 = vsel %vm16427_vm5, %v2857_v35, %v16454_v37 }
 0x43e   : > { %6505 = vmatmul.msk.f32.gmra.mxu2 %vm7136_vm10, %v11078_v53  ;;  %3981 = vmatmul.f32.vlgmr.msrb.gmra.mxu0 %v16436_v6  ;;  %16440 = vst [vmem:[#allocation128_spill] sm:$0xff] %v11100_v62  ;;  %v11120_v62 = vsel %vm16427_vm5, %v2854_v27, %v2857_v35  ;;  %v3163_v27 = vld [vmem:[%s15485_s7 + $0x770] sm:$0xff]  ;;  %v3154_v37 = vld [vmem:[%s15485_s7 + $0x728] sm:$0xff]  ;;  %v16456_v35 = vld [vmem:[#allocation61_spill] sm:$0xff] }
 0x43f   : > { %v11084_v20 = vpop.f32.mrf.mxu1  ;;  %16446 = vst [vmem:[#allocation132_spill] sm:$0xff] %v11120_v62  ;;  %4015 = vmatpush.msra.mxu1 %v3163_v27  ;;  %v3222_v27 = vld [vmem:[%s15485_s7 + $0x948] sm:$0xff]  ;;  %vm16464_vm5 = vmmov %vm16433_vm11 }
 0x440   : > { %16437 = vst [vmem:[#allocation28_spill] sm:$0xff] %v11084_v20  ;;  %3677 = vmatpush.msra.mxu2 %v3222_v27  ;;  %v16458_v27 = vld [vmem:[#allocation8_spill] sm:$0xff] }
 0x441   : > { %6533 = vmatmul.msk.f32.gmra.mxu3 %vm16285_vm7, %v11088_v61  ;;  %16455 = vst [vmem:[#allocation137_spill] sm:$0xff] %v11156_v7  ;;  %v3151_v61 = vld [vmem:[%s15485_s7 + $0x710] sm:$0xff] }
 0x443   : > { %6549 = vmatmul.msk.f32.gmra.mxu1 %vm7136_vm10, %v16439_v49  ;;  %v16444_v49 = vld [vmem:[#allocation31_spill] sm:$0xff] }
 0x444   : > { %v11102_v20 = vpop.f32.mrf.mxu3  ;;  %v11141_v57 = vpop.f32.mrf.mxu0 }
 0x445   : > { %16441 = vst [vmem:[#allocation129_spill] sm:$0xff] %v11102_v20  ;;  %v16447_v20 = vld [vmem:[#allocation58_spill] sm:$0xff] }
 0x446   : > { %6506 = vmatmul.msk.f32.gmra.mxu2 %vm16185_vm3, %v11110_v8  ;;  %3984 = vmatmul.f32.gmra.mxu0 %v16444_v49  ;;  %16450 = vst [vmem:[#allocation135_spill] sm:$0xff] %v11141_v57  ;;  %v3157_v57 = vld [vmem:[%s15485_s7 + $0x740] sm:$0xff] }
 0x447   : > { %v11116_v44 = vpop.f32.mrf.mxu1 }
 0x448   : > { %16445 = vst [vmem:[#allocation131_spill] sm:$0xff] %v11116_v44 }
 0x449   : > { %6534 = vmatmul.msk.f32.gmra.mxu3 %vm16291_vm13, %v11120_v62  ;;  %v16451_v62 = vld [vmem:[#allocation6_spill] sm:$0xff] }
 0x44b   : > { %6550 = vmatmul.msk.f32.gmra.mxu1 %vm16185_vm3, %v16447_v20  ;;  %v3160_v20 = vld [vmem:[%s15485_s7 + $0x758] sm:$0xff] }
 0x44c   : > { %v11132_v44 = vpop.f32.mrf.mxu3  ;;  %4016 = vmatpush.msra.mxu1 %v3160_v20  ;;  %v2744_v20 = vrot.slane %v10710_v23, 7 }
 0x44d   : > { %16448 = vst [vmem:[#allocation133_spill] sm:$0xff] %v11132_v44 }
 0x44e   : > { %6507 = vmatmul.msk.f32.gmra.mxu2 %vm16093_vm1, %v11139_v28  ;;  %3987 = vmatmul.f32.gmra.mxu0 %v16452_v26  ;;  %v11181_v23 = vsel %vm16433_vm11, %v2741_v22, %v2744_v20  ;;  %v11196_v22 = vpop.f32.mrf.mxu0  ;;  %vm16471_vm11 = vmmov %vm16464_vm5 }
 0x44f   : > { %v11150_v44 = vpop.f32.mrf.mxu1  ;;  %4017 = vmatpush.msra.mxu1 %v3157_v57  ;;  %v16459_v57 = vld [vmem:[#allocation55_spill] sm:$0xff]  ;;  %16460 = vst [vmem:[#allocation139_spill] sm:$0xff] %v11196_v22 }
 0x450   : > { %16453 = vst [vmem:[#allocation136_spill] sm:$0xff] %v11150_v44  ;;  %v3142_v22 = vld [vmem:[%s15485_s7 + $0x6c8] sm:$0xff] }
 0x451   : > { %6535 = vmatmul.msk.f32.gmra.mxu3 %vm16297_vm9, %v11156_v7  ;;  %4018 = vmatpush.msra.mxu1 %v3154_v37  ;;  %v3148_v37 = vld [vmem:[%s15485_s7 + $0x6f8] sm:$0xff] }
 0x453   : > { %6551 = vmatmul.msk.f32.gmra.mxu1 %vm16093_vm1, %v16456_v35  ;;  %v3219_v35 = vld [vmem:[%s15485_s7 + $0x930] sm:$0xff] }
 0x454   : > { %v11174_v44 = vpop.f32.mrf.mxu3  ;;  %4019 = vmatpush.msra.mxu1 %v3151_v61  ;;  %3678 = vmatpush.msra.mxu2 %v3219_v35  ;;  %v3304_v61 = vld [vmem:[%s15485_s7 + $0xbd8] sm:$0xff] }
 0x455   : > { %16457 = vst [vmem:[#allocation138_spill] sm:$0xff] %v11174_v44  ;;  %v3307_v44 = vld [vmem:[%s15485_s7 + $0xbf0] sm:$0xff]  ;;  %v3216_v35 = vld [vmem:[%s15485_s7 + $0x918] sm:$0xff] }
 0x456   : > { %6508 = vmatmul.msk.f32.gmra.mxu2 %vm16097_vm8, %v11181_v23  ;;  %3990 = vmatmul.f32.gmra.mxu0 %v16459_v57 }
 0x457   : > { %4165 = vmatpush.msra.mxu0 %v3307_v44  ;;  %4020 = vmatpush.msra.mxu1 %v3148_v37  ;;  %v16462_v44 = vld [vmem:[#allocation66_spill] sm:$0xff] }
 0x458   : > { %v11198_v7 = vpop.f32.mrf.mxu1  ;;  %3679 = vmatpush.msra.mxu2 %v3216_v35  ;;  %v3301_v37 = vld [vmem:[%s15485_s7 + $0xbc0] sm:$0xff]  ;;  %v11229_v35 = vsel %vm16464_vm5, %v2744_v20, %v2747_v41 }
 0x459   : > { %16461 = vst [vmem:[#allocation140_spill] sm:$0xff] %v11198_v7  ;;  %6569 = vmatmul.msk.f32.vlgmr.msra.gmra.mxu3 %vm16411_vm14, %v10985_v56  ;;  %4166 = vmatpush.msra.mxu0 %v3304_v61  ;;  %v3298_v61 = vld [vmem:[%s15485_s7 + $0xba8] sm:$0xff]  ;;  %v16466_v7 = vld [vmem:[#allocation64_spill] sm:$0xff]  ;;  %v3213_v20 = vld [vmem:[%s15485_s7 + $0x900] sm:$0xff]  ;;  %v2750_v56 = vrot.slane %v10824_v38, 7 }
 0x45a   : > { %4021 = vmatpush.msra.mxu1 %v3145_v55  ;;  %v3139_v55 = vld [vmem:[%s15485_s7 + $0x6b0] sm:$0xff]  ;;  %3680 = vmatpush.msra.mxu2 %v3213_v20  ;;  %v3289_v38 = vld [vmem:[%s15485_s7 + $0xb60] sm:$0xff] }
 0x45b   : > { %6552 = vmatmul.msk.f32.gmra.mxu1 %vm16097_vm8, %v16462_v44  ;;  %4167 = vmatpush.msra.mxu0 %v3301_v37  ;;  %v16465_v44 = vld [vmem:[#allocation10_spill] sm:$0xff]  ;;  %v3295_v37 = vld [vmem:[%s15485_s7 + $0xb90] sm:$0xff] }
 0x45c   : > { %v11219_v24 = vpop.f32.mrf.mxu3  ;;  %4022 = vmatpush.msra.mxu1 %v3142_v22  ;;  %v3136_v22 = vld [vmem:[%s15485_s7 + $0x698] sm:$0xff]  ;;  %v16472_v20 = vld [vmem:[#allocation12_spill] sm:$0xff] }
 0x45d   : > { %16463 = vst [vmem:[#allocation141_spill] sm:$0xff] %v11219_v24  ;;  %4168 = vmatpush.msra.mxu0 %v3298_v61  ;;  %v3292_v61 = vld [vmem:[%s15485_s7 + $0xb78] sm:$0xff]  ;;  %vm16473_vm5 = vnez %v16472_v20 }
 0x45e   : > { %6509 = vmatmul.msk.f32.gmra.mxu2 %vm16199_vm2, %v11229_v35  ;;  %3993 = vmatmul.f32.gmra.mxu0 %v16466_v7 }
 0x45f   : > { %4023 = vmatpush.msra.mxu1 %v3139_v55  ;;  %4169 = vmatpush.msra.mxu0 %v3295_v37  ;;  %v3133_v55 = vld [vmem:[%s15485_s7 + $0x680] sm:$0xff]  ;;  %v11271_v37 = vsel %vm16471_vm11, %v2747_v41, %v2750_v56  ;;  %v3286_v41 = vld [vmem:[%s15485_s7 + $0xb48] sm:$0xff] }
 0x460   : > { %v11241_v24 = vpop.f32.mrf.mxu1 }
 0x461   : > { %16467 = vst [vmem:[#allocation142_spill] sm:$0xff] %v11241_v24  ;;  %6570 = vmatmul.msk.f32.gmra.mxu3 %vm7116_vm15, %v11032_v36  ;;  %v11256_v24 = vpop.f32.mrf.mxu0  ;;  %4024 = vmatpush.msra.mxu1 %v3136_v22  ;;  %v3130_v22 = vld [vmem:[%s15485_s7 + $0x668] sm:$0xff] }
 0x462   : > { %16468 = vst [vmem:[#allocation143_spill] sm:$0xff] %v11256_v24  ;;  %4170 = vmatpush.msra.mxu0 %v3292_v61  ;;  %v3019_v61 = vld [vmem:[%s15485_s7 + $0x2f0] sm:$0xff]  ;;  %v2753_v24 = vrot.slane %v10873_v5, 7  ;;  %v3280_v5 = vld [vmem:[%s15485_s7 + $0xb18] sm:$0xff] }
 0x463   : > { %6553 = vmatmul.msk.f32.gmra.mxu1 %vm16199_vm2, %v16469_v54  ;;  %3865 = vmatpush.msrb.mxu2 %v3019_v61 }
 0x464   : > { %v11261_v36 = vpop.f32.mrf.mxu3  ;;  %4025 = vmatpush.msra.mxu1 %v3133_v55  ;;  %4171 = vmatpush.msra.mxu0 %v3289_v38  ;;  %v3283_v38 = vld [vmem:[%s15485_s7 + $0xb30] sm:$0xff] }
 0x465   : > { %16470 = vst [vmem:[#allocation144_spill] sm:$0xff] %v11261_v36  ;;  %v3127_v36 = vld [vmem:[%s15485_s7 + $0x650] sm:$0xff] }
 0x466   : > { %6510 = vmatmul.msk.f32.gmra.mxu2 %vm16473_vm5, %v11271_v37  ;;  %3996 = vmatmul.f32.gmra.mxu0 %v16339_v11 }
 0x467   : > { %4026 = vmatpush.msra.mxu1 %v3130_v22  ;;  %4172 = vmatpush.msra.mxu0 %v3286_v41  ;;  %v3124_v22 = vld [vmem:[%s15485_s7 + $0x638] sm:$0xff] }
 0x468   : > { %v11286_v54 = vpop.f32.mrf.mxu1  ;;  %v3016_v41 = vld [vmem:[%s15485_s7 + $0x2d8] sm:$0xff] }
 0x469   : > { %16474 = vst [vmem:[#allocation145_spill] sm:$0xff] %v11286_v54  ;;  %6571 = vmatmul.msk.f32.gmra.mxu3 %vm7136_vm10, %v11078_v53  ;;  %v11298_v55 = vpop.f32.mrf.mxu0  ;;  %v16476_v54 = vld [vmem:[#allocation43_spill] sm:$0xff]  ;;  %4027 = vmatpush.msra.mxu1 %v3127_v36  ;;  %v16481_v53 = vld [vmem:[#allocation46_spill] sm:$0xff] }
 0x46a   : > { %16475 = vst [vmem:[#allocation146_spill] sm:$0xff] %v11298_v55  ;;  %4173 = vmatpush.msra.mxu0 %v3283_v38  ;;  %v11316_v55 = vsel %vm16471_vm11, %v2750_v56, %v2753_v24  ;;  %3866 = vmatpush.msrb.mxu2 %v3016_v41  ;;  %v16478_v36 = vld [vmem:[#allocation19_spill] sm:$0xff]  ;;  %v3121_v38 = vld [vmem:[%s15485_s7 + $0x620] sm:$0xff]  ;;  %v2756_v41 = vrot.slane %v10922_v25, 7 }
 0x46b   : > { %6554 = vmatmul.msk.f32.gmra.mxu1 %vm16473_vm5, %v16476_v54  ;;  %vm16479_vm10 = vnez %v16478_v36  ;;  %v3277_v54 = vld [vmem:[%s15485_s7 + $0xb00] sm:$0xff] }
 0x46c   : > { %v11303_v61 = vpop.f32.mrf.mxu3  ;;  %4028 = vmatpush.msra.mxu1 %v3124_v22  ;;  %4174 = vmatpush.msra.mxu0 %v3280_v5  ;;  %v3013_v56 = vld [vmem:[%s15485_s7 + $0x2c0] sm:$0xff]  ;;  %v3118_v5 = vld [vmem:[%s15485_s7 + $0x608] sm:$0xff] }
 0x46d   : > { %16477 = vst [vmem:[#allocation147_spill] sm:$0xff] %v11303_v61  ;;  %v3274_v22 = vld [vmem:[%s15485_s7 + $0xae8] sm:$0xff]  ;;  %3867 = vmatpush.msrb.mxu2 %v3013_v56  ;;  %v11361_v56 = vsel %vm16471_vm11, %v2753_v24, %v2756_v41 }
 0x46e   : > { %6511 = vmatmul.msk.f32.gmra.mxu2 %vm16479_vm10, %v11316_v55  ;;  %3999 = vmatmul.f32.gmra.mxu0 %v9858_v60  ;;  %v3010_v24 = vld [vmem:[%s15485_s7 + $0x2a8] sm:$0xff] }
 0x46f   : > { %4029 = vmatpush.msra.mxu1 %v3121_v38  ;;  %4175 = vmatpush.msra.mxu0 %v3277_v54  ;;  %v3256_v54 = vld [vmem:[%s15485_s7 + $0xa58] sm:$0xff] }
 0x470   : > { %v11328_v61 = vpop.f32.mrf.mxu1  ;;  %3868 = vmatpush.msrb.mxu2 %v3010_v24 }
 0x471   : > { %16480 = vst [vmem:[#allocation148_spill] sm:$0xff] %v11328_v61  ;;  %6572 = vmatmul.msk.f32.gmra.mxu3 %vm16185_vm3, %v11110_v8  ;;  %v3259_v61 = vld [vmem:[%s15485_s7 + $0xa70] sm:$0xff]  ;;  %v11349_v38 = vpop.f32.mrf.mxu0  ;;  %4030 = vmatpush.msra.mxu1 %v3118_v5  ;;  %v3268_v5 = vld [vmem:[%s15485_s7 + $0xab8] sm:$0xff] }
 0x472   : > { %4115 = vmatpush.msrb.mxu3 %v3259_v61  ;;  %16482 = vst [vmem:[#allocation149_spill] sm:$0xff] %v11349_v38  ;;  %4176 = vmatpush.msra.mxu0 %v3274_v22  ;;  %v3271_v8 = vld [vmem:[%s15485_s7 + $0xad0] sm:$0xff]  ;;  %v3253_v22 = vld [vmem:[%s15485_s7 + $0xa40] sm:$0xff]  ;;  %v3250_v38 = vld [vmem:[%s15485_s7 + $0xa28] sm:$0xff] }
 0x473   : > { %6555 = vmatmul.msk.f32.gmra.mxu1 %vm16479_vm10, %v16481_v53  ;;  %v16484_v61 = vld [vmem:[#allocation24_spill] sm:$0xff]  ;;  %v3265_v53 = vld [vmem:[%s15485_s7 + $0xaa0] sm:$0xff] }
 0x474   : > { %v11351_v25 = vpop.f32.mrf.mxu3  ;;  %4116 = vmatpush.msrb.mxu3 %v3256_v54  ;;  %vm16485_vm3 = vnez %v16484_v61  ;;  %4177 = vmatpush.msra.mxu0 %v3271_v8  ;;  %v3247_v8 = vld [vmem:[%s15485_s7 + $0xa10] sm:$0xff] }
 0x475   : > { %16483 = vst [vmem:[#allocation150_spill] sm:$0xff] %v11351_v25  ;;  %v16487_v25 = vld [vmem:[#allocation48_spill] sm:$0xff] }
 0x476   : > { %6512 = vmatmul.msk.f32.gmra.mxu2 %vm16485_vm3, %v11361_v56  ;;  %4002 = vmatmul.f32.gmra.mxu0 %v9910_v52 }
 0x477   : > { %4117 = vmatpush.msrb.mxu3 %v3253_v22  ;;  %4178 = vmatpush.msra.mxu0 %v3268_v5  ;;  %v3262_v22 = vld [vmem:[%s15485_s7 + $0xa88] sm:$0xff]  ;;  %v3007_v5 = vld [vmem:[%s15485_s7 + $0x290] sm:$0xff] }
 0x478   : > { %v11376_v54 = vpop.f32.mrf.mxu1  ;;  %3869 = vmatpush.msrb.mxu2 %v3007_v5  ;;  %v15801_v5 = vrot.slane %v16436_v6, 1 }
 0x479   : > { %16486 = vst [vmem:[#allocation151_spill] sm:$0xff] %v11376_v54  ;;  %6573 = vmatmul.msk.f32.gmra.mxu3 %vm16093_vm1, %v11139_v28  ;;  %4179 = vmatpush.msra.mxu0 %v3265_v53  ;;  %v3244_v54 = vld [vmem:[%s15485_s7 + $0x9f8] sm:$0xff]  ;;  %v16489_v28 = vrot.slane %v10960_v30, 7  ;;  %v11410_v53 = vpop.f32.mrf.mxu0 }
 0x47a   : > { %4118 = vmatpush.msrb.mxu3 %v3250_v38  ;;  %16490 = vst [vmem:[#allocation153_spill] sm:$0xff] %v11410_v53 }
 0x47b   : > { %6556 = vmatmul.msk.f32.gmra.mxu1 %vm16485_vm3, %v16487_v25  ;;  %v11408_v38 = vsel %vm16471_vm11, %v2756_v41, %v16489_v28  ;;  %4180 = vmatpush.msra.mxu0 %v3262_v22  ;;  %v3241_v25 = vld [vmem:[%s15485_s7 + $0x9e0] sm:$0xff]  ;;  %v2829_v28 = vrot.slane %v16444_v49, 1  ;;  %v3238_v41 = vld [vmem:[%s15485_s7 + $0x9c8] sm:$0xff]  ;;  %vm16495_vm11 = vcmp.lt.s32.totalorder %v6954_v2, 7 }
 0x47c   : > { %v11396_v24 = vpop.f32.mrf.mxu3  ;;  %4119 = vmatpush.msrb.mxu3 %v3247_v8  ;;  %v16491_v8 = vld [vmem:[#allocation20_spill] sm:$0xff]  ;;  %v16493_v22 = vld [vmem:[#allocation50_spill] sm:$0xff] }
 0x47d   : > { %16488 = vst [vmem:[#allocation152_spill] sm:$0xff] %v11396_v24  ;;  %vm16492_vm1 = vnez %v16491_v8  ;;  %v3235_v24 = vld [vmem:[%s15485_s7 + $0x9b0] sm:$0xff]  ;;  %v11444_v49 = vsel %vm16495_vm11, %v15801_v5, %v2829_v28 }
 0x47e   : > { %6513 = vmatmul.msk.f32.gmra.mxu2 %vm16492_vm1, %v11408_v38  ;;  %4005 = vmatmul.f32.gmra.mxu0 %v9962_v21 }
 0x47f   : > { %4120 = vmatpush.msrb.mxu3 %v3244_v54  ;;  %v3004_v54 = vld [vmem:[%s15485_s7 + $0x278] sm:$0xff] }
 0x480   : > { %v11419_v30 = vpop.f32.mrf.mxu1  ;;  %3870 = vmatpush.msrb.mxu2 %v3004_v54 }
 0x481   : > { %6574 = vmatmul.msk.f32.gmra.mxu3 %vm16097_vm8, %v11181_v23  ;;  %vm16496_vm8 = vnez %v16351_v0  ;;  %v11456_v54 = vpop.f32.mrf.mxu0 }
 0x482   : > { %4121 = vmatpush.msrb.mxu3 %v3241_v25  ;;  %v3001_v25 = vld [vmem:[%s15485_s7 + $0x260] sm:$0xff]  ;;  %16497 = vst [vmem:[#allocation154_spill] sm:$0xff] %v11456_v54  ;;  %v2998_v54 = vld [vmem:[%s15485_s7 + $0x248] sm:$0xff] }
 0x483   : > { %6557 = vmatmul.msk.f32.gmra.mxu1 %vm16492_vm1, %v16493_v22  ;;  %3871 = vmatpush.msrb.mxu2 %v3001_v25  ;;  %v2832_v22 = vrot.slane %v16452_v26, 1  ;;  %v3226_v25 = vld [vmem:[%s15485_s7 + $0x968] sm:$0xff] }
 0x484   : > { %v11435_v53 = vpop.f32.mrf.mxu3  ;;  %4122 = vmatpush.msrb.mxu3 %v3238_v41  ;;  %v3232_v41 = vld [vmem:[%s15485_s7 + $0x998] sm:$0xff] }
 0x485   : > { %16494 = vst [vmem:[#allocation20_spill] sm:$0xff] %v11435_v53  ;;  %v3229_v53 = vld [vmem:[%s15485_s7 + $0x980] sm:$0xff]  ;;  %v11478_v26 = vsel %vm16495_vm11, %v2829_v28, %v2832_v22  ;;  %3872 = vmatpush.msrb.mxu2 %v2998_v54  ;;  %v2835_v28 = vrot.slane %v16459_v57, 1  ;;  %v3220_v54 = vld [vmem:[%s15485_s7 + $0x938] sm:$0xff]  ;;  %v2995_v57 = vld [vmem:[%s15485_s7 + $0x230] sm:$0xff] }
 0x486   : > { %6514 = vmatmul.msk.f32.vlgmr.msra.gmra.mxu2 %vm16496_vm8, %v11444_v49  ;;  %4008 = vmatmul.f32.gmra.mxu0 %v16360_v1 }
 0x487   : > { %4123 = vmatpush.msrb.mxu3 %v3235_v24  ;;  %3873 = vmatpush.msrb.mxu2 %v2995_v57  ;;  %v2838_v57 = vrot.slane %v16466_v7, 1  ;;  %v16578_v7 = vld [vmem:[#allocation71_spill] sm:$0xff] }
 0x488   : > { %v11458_v5 = vpop.f32.mrf.mxu1 }
 0x489   : > { %6575 = vmatmul.msk.f32.gmra.mxu3 %vm16199_vm2, %v11229_v35  ;;  %vm16499_vm2 = vnez %v16357_v46 }
 0x48a   : > { %4124 = vmatpush.msrb.mxu3 %v3232_v41 }
 0x48b   : > { %4031 = vmatmul.f32.vlgmr.msra.gmra.mxu1 %v10101_v29  ;;  %v11496_v29 = vpop.f32.mrf.mxu0 }
 0x48c   : > { %v11468_v24 = vpop.f32.mrf.mxu3  ;;  %4125 = vmatpush.msrb.mxu3 %v3229_v53  ;;  %v3223_v53 = vld [vmem:[%s15485_s7 + $0x950] sm:$0xff]  ;;  %16501 = vst [vmem:[#allocation157_spill] sm:$0xff] %v11496_v29  ;;  %v2989_v29 = vld [vmem:[%s15485_s7 + $0x200] sm:$0xff] }
 0x48d   : > { %16498 = vst [vmem:[#allocation155_spill] sm:$0xff] %v11468_v24  ;;  %v3217_v24 = vld [vmem:[%s15485_s7 + $0x920] sm:$0xff] }
 0x48e   : > { %6515 = vmatmul.msk.f32.gmra.mxu2 %vm16499_vm2, %v11478_v26  ;;  %4011 = vmatmul.f32.gmra.mxu0 %v9661_v9 }
 0x48f   : > { %4126 = vmatpush.msrb.mxu3 %v3226_v25 }
 0x490   : > { %v11487_v41 = vpop.f32.mrf.mxu1 }
 0x491   : > { %16500 = vst [vmem:[#allocation156_spill] sm:$0xff] %v11487_v41  ;;  %6576 = vmatmul.msk.f32.gmra.mxu3 %vm16473_vm5, %v11271_v37  ;;  %v11509_v41 = vsel %vm16495_vm11, %v2832_v22, %v2835_v28  ;;  %v2992_v22 = vld [vmem:[%s15485_s7 + $0x218] sm:$0xff] }
 0x492   : > { %4127 = vmatpush.msrb.mxu3 %v3223_v53  ;;  %v3214_v53 = vld [vmem:[%s15485_s7 + $0x908] sm:$0xff]  ;;  %3874 = vmatpush.msrb.mxu2 %v2992_v22 }
 0x493   : > { %4034 = vmatmul.f32.gmra.mxu1 %v10126_v45 }
 0x494   : > { %v11499_v25 = vpop.f32.mrf.mxu3  ;;  %4128 = vmatpush.msrb.mxu3 %v3220_v54  ;;  %3875 = vmatpush.msrb.mxu2 %v2989_v29  ;;  %v2986_v29 = vld [vmem:[%s15485_s7 + $0x1e8] sm:$0xff] }
 0x495   : > { %16502 = vst [vmem:[#allocation158_spill] sm:$0xff] %v11499_v25  ;;  %v11539_v25 = vsel %vm16495_vm11, %v2835_v28, %v2838_v57 }
 0x496   : > { %6516 = vmatmul.msk.f32.gmra.mxu2 %vm16365_vm12, %v11509_v41  ;;  %6591 = vmatmul.msk.f32.vlgmr.msra.gmra.mxu0 %vm16496_vm8, %v10703_v15  ;;  %16505 = vst [vmem:[#allocation161_spill] sm:$0xff] %v11539_v25  ;;  %v2974_v15 = vld [vmem:[%s15485_s7 + $0x188] sm:$0xff] }
 0x497   : > { %4129 = vmatpush.msrb.mxu3 %v3217_v24  ;;  %v11530_v24 = vpop.f32.mrf.mxu0  ;;  %3876 = vmatpush.msrb.mxu2 %v2986_v29  ;;  %v2983_v29 = vld [vmem:[%s15485_s7 + $0x1d0] sm:$0xff] }
 0x498   : > { %v11520_v54 = vpop.f32.mrf.mxu1  ;;  %16503 = vst [vmem:[#allocation159_spill] sm:$0xff] %v11530_v24 }
 0x499   : > { %6577 = vmatmul.msk.f32.gmra.mxu3 %vm16479_vm10, %v11316_v55  ;;  %vm16506_vm10 = vnez %v16369_v12  ;;  %3877 = vmatpush.msrb.mxu2 %v2983_v29  ;;  %v3340_v29 = vld [vmem:[%s15485_s7 + $0xcf8] sm:$0xff] }
 0x49a   : > { %4130 = vmatpush.msrb.mxu3 %v3214_v53  ;;  %v2841_v53 = vrot.slane %v16339_v11, 1  ;;  %v3116_v11 = vld [vmem:[%s15485_s7 + $0x5f8] sm:$0xff] }
 0x49b   : > { %4037 = vmatmul.f32.gmra.mxu1 %v10166_v18  ;;  %v3355_v18 = vld [vmem:[%s15485_s7 + $0xd70] sm:$0xff] }
 0x49c   : > { %v11532_v45 = vpop.f32.mrf.mxu3  ;;  %v11564_v24 = vsel %vm16495_vm11, %v2838_v57, %v2841_v53  ;;  %4215 = vmatpush.msrb.mxu1 %v3355_v18  ;;  %v3349_v57 = vld [vmem:[%s15485_s7 + $0xd40] sm:$0xff]  ;;  %v2844_v18 = vrot.slane %v9858_v60, 1  ;;  %v16560_v60 = vld [vmem:[#allocation63_spill] sm:$0xff] }
 0x49d   : > { %16504 = vst [vmem:[#allocation160_spill] sm:$0xff] %v11532_v45 }
 0x49e   : > { %6517 = vmatmul.msk.f32.gmra.mxu2 %vm16506_vm10, %v11539_v25  ;;  %6592 = vmatmul.msk.f32.gmra.mxu0 %vm16499_vm2, %v10761_v47  ;;  %16508 = vst [vmem:[#allocation163_spill] sm:$0xff] %v11564_v24  ;;  %v11600_v47 = vsel %vm16495_vm11, %v2841_v53, %v2844_v18  ;;  %v3068_v53 = vld [vmem:[%s15485_s7 + $0x478] sm:$0xff] }
 0x49f   : > { %v11566_v45 = vpop.f32.mrf.mxu0  ;;  %16512 = vst [vmem:[#allocation167_spill] sm:$0xff] %v11600_v47  ;;  %4365 = vmatpush.msrb.mxu0 %v3068_v53 }
 0x4a0   : > { %v11551_v22 = vpop.f32.mrf.mxu1  ;;  %16509 = vst [vmem:[#allocation164_spill] sm:$0xff] %v11566_v45 }
 0x4a1   : > { %6578 = vmatmul.msk.f32.gmra.mxu3 %vm16485_vm3, %v11361_v56 }
 0x4a3   : > { %4040 = vmatmul.f32.gmra.mxu1 %v10187_v33  ;;  %v3352_v33 = vld [vmem:[%s15485_s7 + $0xd58] sm:$0xff] }
 0x4a4   : > { %v11554_v28 = vpop.f32.mrf.mxu3  ;;  %4216 = vmatpush.msrb.mxu1 %v3352_v33  ;;  %v3346_v33 = vld [vmem:[%s15485_s7 + $0xd28] sm:$0xff] }
 0x4a5   : > { %16507 = vst [vmem:[#allocation162_spill] sm:$0xff] %v11554_v28  ;;  %v3343_v28 = vld [vmem:[%s15485_s7 + $0xd10] sm:$0xff] }
 0x4a6   : > { %6518 = vmatmul.msk.f32.gmra.mxu2 %vm16376_vm6, %v11564_v24  ;;  %6593 = vmatmul.msk.f32.gmra.mxu0 %vm16365_vm12, %v10817_v50 }
 0x4a7   : > { %4217 = vmatpush.msrb.mxu1 %v3349_v57  ;;  %v2980_v57 = vld [vmem:[%s15485_s7 + $0x1b8] sm:$0xff] }
 0x4a8   : > { %v11596_v50 = vpop.f32.mrf.mxu1  ;;  %3878 = vmatpush.msrb.mxu2 %v2980_v57  ;;  %v3062_v57 = vld [vmem:[%s15485_s7 + $0x448] sm:$0xff] }
 0x4a9   : > { %6579 = vmatmul.msk.f32.gmra.mxu3 %vm16492_vm1, %v11408_v38  ;;  %4218 = vmatpush.msrb.mxu1 %v3346_v33  ;;  %16511 = vst [vmem:[#allocation166_spill] sm:$0xff] %v11596_v50  ;;  %vm16513_vm1 = vnez %v16266_v59  ;;  %v11617_v33 = vpop.f32.mrf.mxu0  ;;  %v16580_v50 = vld [vmem:[#allocation130_spill] sm:$0xff] }
 0x4aa   : > { %16514 = vst [vmem:[#allocation168_spill] sm:$0xff] %v11617_v33  ;;  %v2977_v33 = vld [vmem:[%s15485_s7 + $0x1a0] sm:$0xff] }
 0x4ab   : > { %4043 = vmatmul.f32.gmra.mxu1 %v10212_v48  ;;  %3879 = vmatpush.msrb.mxu2 %v2977_v33 }
 0x4ac   : > { %v11591_v45 = vpop.f32.mrf.mxu3  ;;  %4219 = vmatpush.msrb.mxu1 %v3343_v28  ;;  %v3065_v28 = vld [vmem:[%s15485_s7 + $0x460] sm:$0xff] }
 0x4ad   : > { %16510 = vst [vmem:[#allocation165_spill] sm:$0xff] %v11591_v45  ;;  %v2847_v45 = vrot.slane %v9910_v52, 1  ;;  %4366 = vmatpush.msrb.mxu0 %v3065_v28  ;;  %v3059_v28 = vld [vmem:[%s15485_s7 + $0x430] sm:$0xff]  ;;  %3880 = vmatpush.msrb.mxu2 %v2974_v15 }
 0x4ae   : > { %6519 = vmatmul.msk.f32.gmra.mxu2 %vm16513_vm1, %v11600_v47  ;;  %6594 = vmatmul.msk.f32.gmra.mxu0 %vm16506_vm10, %v10866_v39  ;;  %v3337_v39 = vld [vmem:[%s15485_s7 + $0xce0] sm:$0xff]  ;;  %v16552_v52 = vld [vmem:[#allocation60_spill] sm:$0xff] }
 0x4af   : > { %4220 = vmatpush.msrb.mxu1 %v3340_v29  ;;  %v3334_v29 = vld [vmem:[%s15485_s7 + $0xcc8] sm:$0xff]  ;;  %4367 = vmatpush.msrb.mxu0 %v3062_v57 }
 0x4b0   : > { %v11659_v57 = vpop.f32.mrf.mxu1 }
 0x4b1   : > { %v11619_v48 = vpop.f32.mrf.mxu2  ;;  %6580 = vmatmul.msk.f32.vlgmr.msrb.gmra.mxu3 %vm16496_vm8, %v11444_v49  ;;  %4221 = vmatpush.msrb.mxu1 %v3337_v39  ;;  %v3331_v39 = vld [vmem:[%s15485_s7 + $0xcb0] sm:$0xff]  ;;  %16517 = vst [vmem:[#allocation171_spill] sm:$0xff] %v11659_v57 }
 0x4b2   : > { %4368 = vmatpush.msrb.mxu0 %v3059_v28  ;;  %v11676_v28 = vpop.f32.mrf.mxu0 }
 0x4b3   : > { %4046 = vmatmul.f32.gmra.mxu1 %v10247_v42  ;;  %v11648_v42 = vsel %vm16495_vm11, %v2844_v18, %v2847_v45  ;;  %v3056_v18 = vld [vmem:[%s15485_s7 + $0x418] sm:$0xff]  ;;  %16518 = vst [vmem:[#allocation172_spill] sm:$0xff] %v11676_v28  ;;  %v2853_v28 = vrot.slane %v16360_v1, 1  ;;  %v3190_v1 = vld [vmem:[%s15485_s7 + $0x848] sm:$0xff] }
 0x4b4   : > { %v11635_v53 = vpop.f32.mrf.mxu3  ;;  %16516 = vst [vmem:[#allocation170_spill] sm:$0xff] %v11648_v42  ;;  %4222 = vmatpush.msrb.mxu1 %v3334_v29  ;;  %v3053_v29 = vld [vmem:[%s15485_s7 + $0x400] sm:$0xff]  ;;  %4369 = vmatpush.msrb.mxu0 %v3056_v18 }
 0x4b5   : > { %16515 = vst [vmem:[#allocation169_spill] sm:$0xff] %v11635_v53  ;;  %v2850_v53 = vrot.slane %v9962_v21, 1  ;;  %v3050_v21 = vld [vmem:[%s15485_s7 + $0x3e8] sm:$0xff] }
 0x4b6   : > { %6520 = vmatmul.msk.f32.gmra.mxu2 %vm16272_vm4, %v11648_v42  ;;  %6595 = vmatmul.msk.f32.gmra.mxu0 %vm16376_vm6, %v10913_v17  ;;  %v3328_v17 = vld [vmem:[%s15485_s7 + $0xc98] sm:$0xff] }
 0x4b7   : > { %4223 = vmatpush.msrb.mxu1 %v3331_v39  ;;  %v3325_v39 = vld [vmem:[%s15485_s7 + $0xc80] sm:$0xff]  ;;  %4370 = vmatpush.msrb.mxu0 %v3053_v29  ;;  %v11692_v18 = vsel %vm16495_vm11, %v2847_v45, %v2850_v53  ;;  %v3211_v29 = vld [vmem:[%s15485_s7 + $0x8f0] sm:$0xff] }
 0x4b8   : > { %16520 = vst [vmem:[#allocation174_spill] sm:$0xff] %v11692_v18  ;;  %v3047_v45 = vld [vmem:[%s15485_s7 + $0x3d0] sm:$0xff]  ;;  %4065 = vmatpush.msra.mxu2 %v3211_v29  ;;  %v11709_v15 = vpop.f32.mrf.mxu1 }
 0x4b9   : > { %v11664_v33 = vpop.f32.mrf.mxu2  ;;  %6581 = vmatmul.msk.f32.gmra.mxu3 %vm16499_vm2, %v11478_v26  ;;  %4224 = vmatpush.msrb.mxu1 %v3328_v17  ;;  %v3322_v17 = vld [vmem:[%s15485_s7 + $0xc68] sm:$0xff]  ;;  %16521 = vst [vmem:[#allocation175_spill] sm:$0xff] %v11709_v15  ;;  %v3017_v15 = vld [vmem:[%s15485_s7 + $0x2e0] sm:$0xff] }
 0x4ba   : > { %4371 = vmatpush.msrb.mxu0 %v3050_v21  ;;  %v3319_v21 = vld [vmem:[%s15485_s7 + $0xc50] sm:$0xff]  ;;  %v11724_v29 = vpop.f32.mrf.mxu0 }
 0x4bb   : > { %4049 = vmatmul.f32.gmra.mxu1 %v10286_v4  ;;  %16522 = vst [vmem:[#allocation176_spill] sm:$0xff] %v11724_v29  ;;  %v3310_v29 = vld [vmem:[%s15485_s7 + $0xc08] sm:$0xff] }
 0x4bc   : > { %v11679_v57 = vpop.f32.mrf.mxu3  ;;  %4225 = vmatpush.msrb.mxu1 %v3325_v39  ;;  %v3044_v39 = vld [vmem:[%s15485_s7 + $0x3b8] sm:$0xff]  ;;  %4372 = vmatpush.msrb.mxu0 %v3047_v45 }
 0x4bd   : > { %16519 = vst [vmem:[#allocation173_spill] sm:$0xff] %v11679_v57  ;;  %v3208_v45 = vld [vmem:[%s15485_s7 + $0x8d8] sm:$0xff] }
 0x4be   : > { %6521 = vmatmul.msk.f32.gmra.mxu2 %vm16278_vm0, %v11692_v18  ;;  %6596 = vmatmul.msk.f32.gmra.mxu0 %vm16513_vm1, %v10955_v19  ;;  %v3041_v19 = vld [vmem:[%s15485_s7 + $0x3a0] sm:$0xff] }
 0x4bf   : > { %4226 = vmatpush.msrb.mxu1 %v3322_v17  ;;  %v3316_v17 = vld [vmem:[%s15485_s7 + $0xc38] sm:$0xff]  ;;  %4373 = vmatpush.msrb.mxu0 %v3044_v39 }
 0x4c0   : > { %4066 = vmatpush.msra.mxu2 %v3208_v45  ;;  %v2856_v45 = vrot.slane %v9661_v9, 1 }
 0x4c1   : > { %v11711_v4 = vpop.f32.mrf.mxu2  ;;  %6582 = vmatmul.msk.f32.gmra.mxu3 %vm16365_vm12, %v11509_v41  ;;  %4227 = vmatpush.msrb.mxu1 %v3319_v21  ;;  %v3313_v21 = vld [vmem:[%s15485_s7 + $0xc20] sm:$0xff] }
 0x4c2   : > { %4374 = vmatpush.msrb.mxu0 %v3041_v19  ;;  %v3035_v19 = vld [vmem:[%s15485_s7 + $0x370] sm:$0xff] }
 0x4c3   : > { %4052 = vmatmul.f32.gmra.mxu1 %v16406_v63  ;;  %v11739_v63 = vsel %vm16495_vm11, %v2850_v53, %v2853_v28  ;;  %v3038_v53 = vld [vmem:[%s15485_s7 + $0x388] sm:$0xff] }
 0x4c4   : > { %v11726_v57 = vpop.f32.mrf.mxu3  ;;  %16524 = vst [vmem:[#allocation178_spill] sm:$0xff] %v11739_v63  ;;  %4228 = vmatpush.msrb.mxu1 %v3316_v17  ;;  %4375 = vmatpush.msrb.mxu0 %v3038_v53  ;;  %v3020_v17 = vld [vmem:[%s15485_s7 + $0x2f8] sm:$0xff]  ;;  %v3205_v53 = vld [vmem:[%s15485_s7 + $0x8c0] sm:$0xff] }
 0x4c5   : > { %16523 = vst [vmem:[#allocation177_spill] sm:$0xff] %v11726_v57  ;;  %v11768_v57 = vpop.f32.mrf.mxu1  ;;  %4315 = vmatpush.msra.mxu3 %v3020_v17  ;;  %4067 = vmatpush.msra.mxu2 %v3205_v53  ;;  %v3026_v17 = vld [vmem:[%s15485_s7 + $0x328] sm:$0xff]  ;;  %v3011_v53 = vld [vmem:[%s15485_s7 + $0x2b0] sm:$0xff] }
 0x4c6   : > { %6522 = vmatmul.msk.f32.gmra.mxu2 %vm16285_vm7, %v11739_v63  ;;  %6597 = vmatmul.msk.f32.gmra.mxu0 %vm16272_vm4, %v11006_v16  ;;  %16525 = vst [vmem:[#allocation179_spill] sm:$0xff] %v11768_v57  ;;  %v3199_v57 = vld [vmem:[%s15485_s7 + $0x890] sm:$0xff] }
 0x4c7   : > { %4229 = vmatpush.msrb.mxu1 %v3313_v21  ;;  %4376 = vmatpush.msrb.mxu0 %v3035_v19  ;;  %v3032_v21 = vld [vmem:[%s15485_s7 + $0x358] sm:$0xff]  ;;  %v3029_v19 = vld [vmem:[%s15485_s7 + $0x340] sm:$0xff] }
 0x4c8   : > { %4316 = vmatpush.msra.mxu3 %v3017_v15  ;;  %v3202_v15 = vld [vmem:[%s15485_s7 + $0x8a8] sm:$0xff] }
 0x4c9   : > { %v11753_v39 = vpop.f32.mrf.mxu2  ;;  %6583 = vmatmul.msk.f32.gmra.mxu3 %vm16506_vm10, %v11539_v25  ;;  %4230 = vmatpush.msrb.mxu1 %v3310_v29  ;;  %v11786_v29 = vpop.f32.mrf.mxu0  ;;  %v3104_v25 = vld [vmem:[%s15485_s7 + $0x598] sm:$0xff] }
 0x4ca   : > { %16528 = vst [vmem:[#allocation182_spill] sm:$0xff] %v11786_v29  ;;  %4377 = vmatpush.msrb.mxu0 %v3032_v21  ;;  %4068 = vmatpush.msra.mxu2 %v3202_v15  ;;  %v3023_v21 = vld [vmem:[%s15485_s7 + $0x310] sm:$0xff] }
 0x4cb   : > { %4055 = vmatmul.f32.gmra.mxu1 %v16419_v34  ;;  %v11784_v34 = vsel %vm16495_vm11, %v2853_v28, %v2856_v45  ;;  %v3014_v28 = vld [vmem:[%s15485_s7 + $0x2c8] sm:$0xff]  ;;  %v16529_v15 = vld [vmem:[#allocation76_spill] sm:$0xff] }
 0x4cc   : > { %v11771_v16 = vpop.f32.mrf.mxu3  ;;  %16527 = vst [vmem:[#allocation181_spill] sm:$0xff] %v11784_v34  ;;  %4317 = vmatpush.msra.mxu3 %v3014_v28  ;;  %4378 = vmatpush.msrb.mxu0 %v3029_v19  ;;  %v3008_v28 = vld [vmem:[%s15485_s7 + $0x298] sm:$0xff]  ;;  %v3005_v19 = vld [vmem:[%s15485_s7 + $0x280] sm:$0xff] }
 0x4cd   : > { %16526 = vst [vmem:[#allocation180_spill] sm:$0xff] %v11771_v16  ;;  %v11829_v29 = vpop.f32.mrf.mxu1  ;;  %4069 = vmatpush.msra.mxu2 %v3199_v57  ;;  %v2999_v57 = vld [vmem:[%s15485_s7 + $0x250] sm:$0xff]  ;;  %4415 = vmatpush.msra.mxu1 %v3116_v11  ;;  %v3110_v11 = vld [vmem:[%s15485_s7 + $0x5c8] sm:$0xff] }
 0x4ce   : > { %6523 = vmatmul.msk.f32.gmra.mxu2 %vm16291_vm13, %v11784_v34  ;;  %6598 = vmatmul.msk.f32.gmra.mxu0 %vm16278_vm0, %v11053_v58  ;;  %16531 = vst [vmem:[#allocation184_spill] sm:$0xff] %v11829_v29 }
 0x4cf   : > { %4318 = vmatpush.msra.mxu3 %v3011_v53  ;;  %4379 = vmatpush.msrb.mxu0 %v3026_v17  ;;  %v16532_v53 = vrot.slane %v16436_v6, 1  ;;  %v5232_v17 = vld [vmem:[%s15487_s9 + $0x7e8] sm:$0xff] }
 0x4d1   : > { %v11809_v16 = vpop.f32.mrf.mxu2  ;;  %6584 = vmatmul.msk.f32.gmra.mxu3 %vm16376_vm6, %v11564_v24  ;;  %v11835_v9 = vsel %vm16495_vm11, %v2856_v45, %v16532_v53  ;;  %4380 = vmatpush.msrb.mxu0 %v3023_v21  ;;  %v11846_v29 = vpop.f32.mrf.mxu0  ;;  %v16537_v45 = vld [vmem:[#allocation53_spill] sm:$0xff]  ;;  %vm16553_vm11 = vnez %v16435_v13  ;;  %v16562_v24 = vld [vmem:[#allocation120_spill] sm:$0xff] }
 0x4d2   : > { %4319 = vmatpush.msra.mxu3 %v3008_v28  ;;  %16533 = vst [vmem:[#allocation185_spill] sm:$0xff] %v11835_v9  ;;  %v16535_v28 = vld [vmem:[#allocation127_spill] sm:$0xff]  ;;  %v2996_v53 = vld [vmem:[%s15485_s7 + $0x238] sm:$0xff] }
 0x4d3   : > { %4058 = vmatmul.f32.gmra.mxu1 %v16529_v15  ;;  %v3002_v15 = vld [vmem:[%s15485_s7 + $0x268] sm:$0xff]  ;;  %16536 = vst [vmem:[#allocation186_spill] sm:$0xff] %v11846_v29  ;;  %v16540_v29 = vld [vmem:[#allocation14_spill] sm:$0xff] }
 0x4d4   : > { %v11821_v58 = vpop.f32.mrf.mxu3  ;;  %4320 = vmatpush.msra.mxu3 %v3005_v19  ;;  %v3196_v19 = vld [vmem:[%s15485_s7 + $0x878] sm:$0xff] }
 0x4d5   : > { %16530 = vst [vmem:[#allocation183_spill] sm:$0xff] %v11821_v58  ;;  %4070 = vmatpush.msra.mxu2 %v3196_v19  ;;  %v16541_v58 = vld [vmem:[#allocation132_spill] sm:$0xff] }
 0x4d6   : > { %6524 = vmatmul.msk.f32.gmra.mxu2 %vm16297_vm9, %v11835_v9  ;;  %6599 = vmatmul.msk.f32.gmra.mxu0 %vm16285_vm7, %v16535_v28  ;;  %v16539_v28 = vld [vmem:[#allocation56_spill] sm:$0xff] }
 0x4d7   : > { %4321 = vmatpush.msra.mxu3 %v3002_v15  ;;  %v3193_v15 = vld [vmem:[%s15485_s7 + $0x860] sm:$0xff] }
 0x4d8   : > { %4071 = vmatpush.msra.mxu2 %v3193_v15  ;;  %v2987_v15 = vld [vmem:[%s15485_s7 + $0x1f0] sm:$0xff] }
 0x4d9   : > { %v11848_v2 = vpop.f32.mrf.mxu2  ;;  %6585 = vmatmul.msk.f32.gmra.mxu3 %vm16513_vm1, %v11600_v47 }
 0x4da   : > { %4322 = vmatpush.msra.mxu3 %v2999_v57  ;;  %v11874_v57 = vpop.f32.mrf.mxu1  ;;  %4072 = vmatpush.msra.mxu2 %v3190_v1  ;;  %v2981_v1 = vld [vmem:[%s15485_s7 + $0x1c0] sm:$0xff] }
 0x4db   : > { %4061 = vmatmul.f32.gmra.mxu1 %v16537_v45  ;;  %16542 = vst [vmem:[#allocation56_spill] sm:$0xff] %v11874_v57  ;;  %v2993_v45 = vld [vmem:[%s15485_s7 + $0x220] sm:$0xff]  ;;  %v16544_v57 = vld [vmem:[#allocation81_spill] sm:$0xff] }
 0x4dc   : > { %v11857_v21 = vpop.f32.mrf.mxu3  ;;  %4323 = vmatpush.msra.mxu3 %v2996_v53 }
 0x4dd   : > { %16538 = vst [vmem:[#allocation187_spill] sm:$0xff] %v11857_v21  ;;  %v11887_v21 = vpop.f32.mrf.mxu0 }
 0x4de   : > { %6558 = vmatmul.msk.f32.vlgmr.msrb.gmra.mxu2 %vm16411_vm14, %v16539_v28  ;;  %6600 = vmatmul.msk.f32.gmra.mxu0 %vm16291_vm13, %v16541_v58  ;;  %v2990_v58 = vld [vmem:[%s15485_s7 + $0x208] sm:$0xff]  ;;  %16543 = vst [vmem:[#allocation188_spill] sm:$0xff] %v11887_v21 }
 0x4df   : > { %4324 = vmatpush.msra.mxu3 %v2993_v45  ;;  %v16547_v45 = vld [vmem:[#allocation137_spill] sm:$0xff] }
 0x4e1   : > { %v11879_v19 = vpop.f32.mrf.mxu2  ;;  %6586 = vmatmul.msk.f32.gmra.mxu3 %vm16272_vm4, %v11648_v42  ;;  %v16546_v42 = vld [vmem:[#allocation59_spill] sm:$0xff] }
 0x4e2   : > { %4325 = vmatpush.msra.mxu3 %v2990_v58  ;;  %v2984_v58 = vld [vmem:[%s15485_s7 + $0x1d8] sm:$0xff] }
 0x4e3   : > { %6602 = vmatmul.msk.f32.vlgmr.msrb.gmra.mxu1 %vm16496_vm8, %v16544_v57  ;;  %v11909_v57 = vpop.f32.mrf.mxu1 }
 0x4e4   : > { %v11892_v53 = vpop.f32.mrf.mxu3  ;;  %4326 = vmatpush.msra.mxu3 %v2987_v15  ;;  %16548 = vst [vmem:[#allocation59_spill] sm:$0xff] %v11909_v57  ;;  %v2978_v57 = vld [vmem:[%s15485_s7 + $0x1a8] sm:$0xff] }
 0x4e5   : > { %16545 = vst [vmem:[#allocation189_spill] sm:$0xff] %v11892_v53  ;;  %v16549_v53 = vld [vmem:[#allocation44_spill] sm:$0xff]  ;;  %v11922_v15 = vpop.f32.mrf.mxu0 }
 0x4e6   : > { %6559 = vmatmul.msk.f32.gmra.mxu2 %vm7116_vm15, %v16546_v42  ;;  %6601 = vmatmul.msk.f32.gmra.mxu0 %vm16297_vm9, %v16547_v45  ;;  %16550 = vst [vmem:[#allocation190_spill] sm:$0xff] %v11922_v15 }
 0x4e7   : > { %4327 = vmatpush.msra.mxu3 %v2984_v58  ;;  %v2975_v58 = vld [vmem:[%s15485_s7 + $0x190] sm:$0xff] }
 0x4e9   : > { %v11911_v21 = vpop.f32.mrf.mxu2  ;;  %6587 = vmatmul.msk.f32.gmra.mxu3 %vm16278_vm0, %v11692_v18  ;;  %v16554_v18 = vld [vmem:[#allocation115_spill] sm:$0xff] }
 0x4ea   : > { %4328 = vmatpush.msra.mxu3 %v2981_v1  ;;  %v11941_v1 = vld [vmem:[%s15486_s8] sm:$0x7] }
 0x4eb   : > { %6603 = vmatmul.msk.f32.gmra.mxu1 %vm16499_vm2, %v16549_v53  ;;  %16555 = vst [vmem:[#allocation60_spill] sm:$0xff] %v11941_v1  ;;  %v11954_v15 = vpop.f32.mrf.mxu1  ;;  %v11960_v47 = vperm.slane %v11941_v1, 0  ;;  %vm16561_vm2 = vnez %v16443_v10  ;;  %v16565_v1 = vld [vmem:[#allocation87_spill] sm:$0xff] }
 0x4ec   : > { %v11924_v45 = vpop.f32.mrf.mxu3  ;;  %4329 = vmatpush.msra.mxu3 %v2978_v57  ;;  %v3184_v57 = vld [vmem:[%s15485_s7 + $0x818] sm:$0xff]  ;;  %16556 = vst [vmem:[#allocation115_spill] sm:$0xff] %v11954_v15  ;;  %v16563_v15 = vld [vmem:[#allocation68_spill] sm:$0xff] }
 0x4ed   : > { %16551 = vst [vmem:[#allocation191_spill] sm:$0xff] %v11924_v45  ;;  %v16557_v45 = vld [vmem:[#allocation47_spill] sm:$0xff] }
 0x4ee   : > { %6560 = vmatmul.msk.f32.gmra.mxu2 %vm16553_vm11, %v16552_v52  ;;  %6635 = vmatmul.msk.f32.vlgmr.msrb.gmra.mxu0 %vm16411_vm14, %v16554_v18  ;;  %v3187_v18 = vld [vmem:[%s15485_s7 + $0x830] sm:$0xff] }
 0x4ef   : > { %4330 = vmatpush.msra.mxu3 %v2975_v58  ;;  %4073 = vmatpush.msra.mxu2 %v3187_v18  ;;  %v11964_v58 = vpop.f32.mrf.mxu0 }
 0x4f0   : > { %16559 = vst [vmem:[#allocation193_spill] sm:$0xff] %v11964_v58  ;;  %v3181_v58 = vld [vmem:[%s15485_s7 + $0x800] sm:$0xff] }
 0x4f1   : > { %v11943_v53 = vpop.f32.mrf.mxu2  ;;  %6588 = vmatmul.msk.f32.gmra.mxu3 %vm16285_vm7, %v11739_v63  ;;  %4074 = vmatpush.msra.mxu2 %v3184_v57  ;;  %v16564_v57 = vld [vmem:[#allocation89_spill] sm:$0xff] }
 0x4f3   : > { %6604 = vmatmul.msk.f32.gmra.mxu1 %vm16365_vm12, %v16557_v45  ;;  %v3383_v45 = vadd.f32 %v16563_v15, %v11960_v47  ;;  %4075 = vmatpush.msra.mxu2 %v3181_v58  ;;  %vm16569_vm12 = vnez %v16451_v62 }
 0x4f4   : > { %v11962_v63 = vpop.f32.mrf.mxu3 }
 0x4f5   : > { %16558 = vst [vmem:[#allocation192_spill] sm:$0xff] %v11962_v63  ;;  %v3433_v63 = vadd.f32 %v16564_v57, %v3383_v45  ;;  %v16568_v45 = vld [vmem:[#allocation67_spill] sm:$0xff]  ;;  %v16570_v57 = vld [vmem:[#allocation126_spill] sm:$0xff] }
 0x4f6   : > { %6561 = vmatmul.msk.f32.gmra.mxu2 %vm16561_vm2, %v16560_v60  ;;  %6636 = vmatmul.msk.f32.gmra.mxu0 %vm7116_vm15, %v16562_v24 }
 0x4f7   : > { %v3483_v24 = vadd.f32 %v11619_v48, %v3433_v63  ;;  %v3113_v48 = vld [vmem:[%s15485_s7 + $0x5e0] sm:$0xff]  ;;  %v16571_v63 = vld [vmem:[#allocation72_spill] sm:$0xff] }
 0x4f8   : > { %4416 = vmatpush.msra.mxu1 %v3113_v48  ;;  %v3386_v58 = vadd.f32 %v16571_v63, %v11960_v47  ;;  %v3178_v63 = vld [vmem:[%s15485_s7 + $0x7e8] sm:$0xff] }
 0x4f9   : > { %v11974_v18 = vpop.f32.mrf.mxu2  ;;  %6589 = vmatmul.msk.f32.gmra.mxu3 %vm16291_vm13, %v11784_v34  ;;  %v11992_v34 = vpop.f32.mrf.mxu1  ;;  %4076 = vmatpush.msra.mxu2 %v3178_v63  ;;  %v16582_v63 = vld [vmem:[#allocation74_spill] sm:$0xff] }
 0x4fa   : > { %16567 = vst [vmem:[#allocation120_spill] sm:$0xff] %v11992_v34  ;;  %v12006_v34 = vpop.f32.mrf.mxu0  ;;  %4417 = vmatpush.msra.mxu1 %v3110_v11 }
 0x4fb   : > { %6605 = vmatmul.msk.f32.gmra.mxu1 %vm16506_vm10, %v16565_v1  ;;  %v16572_v1 = vld [vmem:[#allocation114_spill] sm:$0xff]  ;;  %16573 = vst [vmem:[#allocation68_spill] sm:$0xff] %v12006_v34  ;;  %v16575_v34 = vld [vmem:[#allocation92_spill] sm:$0xff]  ;;  %vm16579_vm10 = vnez %v16458_v27 }
 0x4fc   : > { %v11987_v15 = vpop.f32.mrf.mxu3 }
 0x4fd   : > { %16566 = vst [vmem:[#allocation63_spill] sm:$0xff] %v11987_v15  ;;  %v3533_v15 = vadd.f32 %v16572_v1, %v3483_v24  ;;  %v3175_v1 = vld [vmem:[%s15485_s7 + $0x7d0] sm:$0xff] }
 0x4fe   : > { %6562 = vmatmul.msk.f32.gmra.mxu2 %vm16569_vm12, %v16568_v45  ;;  %6637 = vmatmul.msk.f32.gmra.mxu0 %vm16553_vm11, %v16570_v57  ;;  %v16574_v57 = vld [vmem:[#allocation93_spill] sm:$0xff]  ;;  %v3107_v24 = vld [vmem:[%s15485_s7 + $0x5b0] sm:$0xff] }
 0x4ff   : > { %v3436_v48 = vadd.f32 %v16574_v57, %v3386_v58  ;;  %v16577_v57 = vld [vmem:[#allocation88_spill] sm:$0xff]  ;;  %4418 = vmatpush.msra.mxu1 %v3107_v24  ;;  %4077 = vmatpush.msra.mxu2 %v3175_v1  ;;  %v3389_v1 = vadd.f32 %v16582_v63, %v11960_v47  ;;  %v16583_v24 = vld [vmem:[#allocation119_spill] sm:$0xff]  ;;  %v16585_v63 = vld [vmem:[#allocation98_spill] sm:$0xff] }
 0x501   : > { %v12011_v12 = vpop.f32.mrf.mxu2  ;;  %6590 = vmatmul.msk.f32.gmra.mxu3 %vm16297_vm9, %v11835_v9  ;;  %v3486_v11 = vadd.f32 %v11664_v33, %v3436_v48  ;;  %v3583_v9 = vadd.f32 %v16577_v57, %v3533_v15  ;;  %v3101_v33 = vld [vmem:[%s15485_s7 + $0x580] sm:$0xff]  ;;  %v12045_v48 = vpop.f32.mrf.mxu1  ;;  %4419 = vmatpush.msra.mxu1 %v3104_v25  ;;  %v3260_v15 = vld [vmem:[%s15485_s7 + $0xa78] sm:$0xff]  ;;  %v3098_v25 = vld [vmem:[%s15485_s7 + $0x568] sm:$0xff]  ;;  %v3439_v14 = vadd.f32 %v16585_v63, %v3389_v1 }
 0x502   : > { %16581 = vst [vmem:[#allocation67_spill] sm:$0xff] %v12045_v48  ;;  %4565 = vmatpush.msra.mxu0 %v3260_v15  ;;  %v3257_v48 = vld [vmem:[%s15485_s7 + $0xa60] sm:$0xff]  ;;  %v16591_v63 = vld [vmem:[#allocation73_spill] sm:$0xff] }
 0x503   : > { %6606 = vmatmul.msk.f32.gmra.mxu1 %vm16376_vm6, %v16575_v34  ;;  %v3536_v57 = vadd.f32 %v16583_v24, %v3486_v11  ;;  %v16584_v34 = vld [vmem:[#allocation140_spill] sm:$0xff]  ;;  %v12064_v11 = vpop.f32.mrf.mxu0  ;;  %v3489_v15 = vadd.f32 %v11711_v4, %v3439_v14  ;;  %v3092_v4 = vld [vmem:[%s15485_s7 + $0x538] sm:$0xff] }
 0x504   : > { %v12030_v58 = vpop.f32.mrf.mxu3  ;;  %4420 = vmatpush.msra.mxu1 %v3101_v33  ;;  %16586 = vst [vmem:[#allocation126_spill] sm:$0xff] %v12064_v11  ;;  %4566 = vmatpush.msra.mxu0 %v3257_v48  ;;  %v3254_v33 = vld [vmem:[%s15485_s7 + $0xa48] sm:$0xff]  ;;  %v3095_v48 = vld [vmem:[%s15485_s7 + $0x550] sm:$0xff]  ;;  %v3248_v14 = vld [vmem:[%s15485_s7 + $0xa18] sm:$0xff] }
 0x505   : > { %16576 = vst [vmem:[#allocation89_spill] sm:$0xff] %v12030_v58  ;;  %v3633_v58 = vadd.f32 %v16584_v34, %v3583_v9  ;;  %v3172_v34 = vld [vmem:[%s15485_s7 + $0x7b8] sm:$0xff] }
 0x506   : > { %6563 = vmatmul.msk.f32.gmra.mxu2 %vm16579_vm10, %v16578_v7  ;;  %6638 = vmatmul.msk.f32.gmra.mxu0 %vm16561_vm2, %v16580_v50 }
 0x507   : > { %4078 = vmatpush.msra.mxu2 %v3172_v34  ;;  %4421 = vmatpush.msra.mxu1 %v3098_v25  ;;  %v16593_v34 = vld [vmem:[#allocation134_spill] sm:$0xff] }
 0x508   : > { %4567 = vmatpush.msra.mxu0 %v3254_v33  ;;  %v16595_v33 = vld [vmem:[#allocation125_spill] sm:$0xff] }
 0x509   : > { %v3682_v50 = vpop.f32.mrf.mxu2  ;;  %6624 = vmatmul.msk.f32.vlgmr.msra.gmra.mxu3 %vm16411_vm14, %v16539_v28  ;;  %v16588_v28 = vld [vmem:[#allocation97_spill] sm:$0xff]  ;;  %vm16592_vm14 = vnez %v16465_v44  ;;  %4422 = vmatpush.msra.mxu1 %v3095_v48  ;;  %v12103_v11 = vpop.f32.mrf.mxu1  ;;  %v3089_v48 = vld [vmem:[%s15485_s7 + $0x520] sm:$0xff] }
 0x50a   : > { %v12066_v9 = vadd.f32 %v3682_v50, %v3633_v58  ;;  %v16590_v58 = vld [vmem:[#allocation94_spill] sm:$0xff]  ;;  %v3251_v50 = vld [vmem:[%s15485_s7 + $0xa30] sm:$0xff]  ;;  %16597 = vst [vmem:[#allocation93_spill] sm:$0xff] %v12103_v11 }
 0x50b   : > { %6607 = vmatmul.msk.f32.gmra.mxu1 %vm16513_vm1, %v16588_v28  ;;  %v3586_v24 = vadd.f32 %v16590_v58, %v3536_v57  ;;  %4568 = vmatpush.msra.mxu0 %v3251_v50  ;;  %v16594_v57 = vld [vmem:[#allocation52_spill] sm:$0xff]  ;;  %v3539_v58 = vadd.f32 %v16595_v33, %v3489_v15  ;;  %v16596_v28 = vld [vmem:[#allocation142_spill] sm:$0xff] }
 0x50c   : > { %16587 = vst [vmem:[#allocation72_spill] sm:$0xff] %v12066_v9  ;;  %v12078_v1 = vpop.f32.mrf.mxu3  ;;  %v3392_v25 = vadd.f32 %v16594_v57, %v11960_v47  ;;  %4423 = vmatpush.msra.mxu1 %v3092_v4  ;;  %v3245_v50 = vld [vmem:[%s15485_s7 + $0xa00] sm:$0xff]  ;;  %v16598_v57 = vld [vmem:[#allocation103_spill] sm:$0xff]  ;;  %v12124_v4 = vpop.f32.mrf.mxu0  ;;  %v16601_v9 = vld [vmem:[#allocation101_spill] sm:$0xff] }
 0x50d   : > { %16589 = vst [vmem:[#allocation114_spill] sm:$0xff] %v12078_v1  ;;  %v3636_v1 = vadd.f32 %v16596_v28, %v3586_v24  ;;  %v3169_v28 = vld [vmem:[%s15485_s7 + $0x7a0] sm:$0xff]  ;;  %4569 = vmatpush.msra.mxu0 %v3248_v14  ;;  %v3166_v14 = vld [vmem:[%s15485_s7 + $0x788] sm:$0xff] }
 0x50e   : > { %6564 = vmatmul.msk.f32.gmra.mxu2 %vm16592_vm14, %v16591_v63  ;;  %6639 = vmatmul.msk.f32.gmra.mxu0 %vm16569_vm12, %v16593_v34  ;;  %v3442_v15 = vadd.f32 %v16598_v57, %v3392_v25  ;;  %v16599_v24 = vld [vmem:[#allocation102_spill] sm:$0xff]  ;;  %v3589_v25 = vadd.f32 %v16601_v9, %v3539_v58  ;;  %v3083_v9 = vld [vmem:[%s15485_s7 + $0x4f0] sm:$0xff]  ;;  %v16604_v57 = vld [vmem:[#allocation129_spill] sm:$0xff] }
 0x50f   : > { %4079 = vmatpush.msra.mxu2 %v3169_v28  ;;  %4424 = vmatpush.msra.mxu1 %v3089_v48  ;;  %v3239_v58 = vld [vmem:[%s15485_s7 + $0x9d0] sm:$0xff]  ;;  %v16603_v48 = vld [vmem:[#allocation27_spill] sm:$0xff]  ;;  %v16605_v28 = vld [vmem:[#allocation145_spill] sm:$0xff] }
 0x510   : > { %4570 = vmatpush.msra.mxu0 %v3245_v50  ;;  %v3395_v50 = vadd.f32 %v16603_v48, %v11960_v47 }
 0x511   : > { %v3685_v34 = vpop.f32.mrf.mxu2  ;;  %6625 = vmatmul.msk.f32.gmra.mxu3 %vm7116_vm15, %v16546_v42  ;;  %v3492_v42 = vadd.f32 %v11753_v39, %v3442_v15  ;;  %v3242_v39 = vld [vmem:[%s15485_s7 + $0x9e8] sm:$0xff]  ;;  %4080 = vmatpush.msra.mxu2 %v3166_v14 }
 0x512   : > { %v12115_v33 = vadd.f32 %v3685_v34, %v3636_v1  ;;  %v3086_v1 = vld [vmem:[%s15485_s7 + $0x508] sm:$0xff]  ;;  %4571 = vmatpush.msra.mxu0 %v3242_v39  ;;  %v12169_v39 = vpop.f32.mrf.mxu1 }
 0x513   : > { %6608 = vmatmul.msk.f32.gmra.mxu1 %vm16272_vm4, %v16599_v24  ;;  %v16602_v34 = vld [vmem:[#allocation75_spill] sm:$0xff]  ;;  %v3542_v15 = vadd.f32 %v16604_v57, %v3492_v42  ;;  %v3639_v24 = vadd.f32 %v16605_v28, %v3589_v25  ;;  %v2972_v25 = vld [vmem:[%s15485_s7 + $0x178] sm:$0xff]  ;;  %16607 = vst [vmem:[#allocation71_spill] sm:$0xff] %v12169_v39  ;;  %v16610_v28 = vld [vmem:[#allocation106_spill] sm:$0xff] }
 0x514   : > { %v12126_v11 = vpop.f32.mrf.mxu3  ;;  %4425 = vmatpush.msra.mxu1 %v3086_v1  ;;  %v3236_v1 = vld [vmem:[%s15485_s7 + $0x9b8] sm:$0xff]  ;;  %v16606_v14 = vld [vmem:[#allocation11_spill] sm:$0xff]  ;;  %4572 = vmatpush.msra.mxu0 %v3239_v58  ;;  %v12184_v58 = vpop.f32.mrf.mxu0 }
 0x515   : > { %16600 = vst [vmem:[#allocation88_spill] sm:$0xff] %v12126_v11  ;;  %v3445_v48 = vadd.f32 %v16606_v14, %v3395_v50  ;;  %4265 = vmatpush.msrb.mxu2 %v2972_v25  ;;  %v3592_v50 = vadd.f32 %v16610_v28, %v3542_v15  ;;  %v16611_v14 = vld [vmem:[#allocation49_spill] sm:$0xff]  ;;  %v3230_v15 = vld [vmem:[%s15485_s7 + $0x988] sm:$0xff]  ;;  %v16615_v28 = vld [vmem:[#allocation148_spill] sm:$0xff] }
 0x516   : > { %6565 = vmatmul.msk.f32.gmra.mxu2 %vm16473_vm5, %v16602_v34  ;;  %6640 = vmatmul.msk.f32.gmra.mxu0 %vm16579_vm10, %v11181_v23  ;;  %v3080_v23 = vld [vmem:[%s15485_s7 + $0x4d8] sm:$0xff] }
 0x517   : > { %4426 = vmatpush.msra.mxu1 %v3083_v9  ;;  %v3495_v9 = vadd.f32 %v11809_v16, %v3445_v48  ;;  %4573 = vmatpush.msra.mxu0 %v3236_v1  ;;  %v3074_v16 = vld [vmem:[%s15485_s7 + $0x4a8] sm:$0xff]  ;;  %v16614_v48 = vld [vmem:[#allocation133_spill] sm:$0xff] }
 0x519   : > { %v3688_v11 = vpop.f32.mrf.mxu2  ;;  %6626 = vmatmul.msk.f32.gmra.mxu3 %vm16553_vm11, %v16552_v52  ;;  %v16608_v52 = vld [vmem:[#allocation107_spill] sm:$0xff]  ;;  %4427 = vmatpush.msra.mxu1 %v3080_v23  ;;  %vm16612_vm11 = vnez %v16478_v36  ;;  %v16613_v23 = vld [vmem:[#allocation77_spill] sm:$0xff]  ;;  %v3545_v25 = vadd.f32 %v16614_v48, %v3495_v9  ;;  %v2969_v9 = vld [vmem:[%s15485_s7 + $0x160] sm:$0xff] }
 0x51a   : > { %v12164_v42 = vadd.f32 %v3688_v11, %v3639_v24  ;;  %v3077_v11 = vld [vmem:[%s15485_s7 + $0x4c0] sm:$0xff]  ;;  %v3398_v1 = vadd.f32 %v16613_v23, %v11960_v47  ;;  %4266 = vmatpush.msrb.mxu2 %v2969_v9 }
 0x51b   : > { %6609 = vmatmul.msk.f32.gmra.mxu1 %vm16278_vm0, %v16608_v52  ;;  %v3233_v24 = vld [vmem:[%s15485_s7 + $0x9a0] sm:$0xff]  ;;  %v3642_v52 = vadd.f32 %v16615_v28, %v3592_v50  ;;  %v12233_v28 = vpop.f32.mrf.mxu1 }
 0x51c   : > { %v12175_v57 = vpop.f32.mrf.mxu3  ;;  %4428 = vmatpush.msra.mxu1 %v3077_v11  ;;  %4574 = vmatpush.msra.mxu0 %v3233_v24  ;;  %v3227_v11 = vld [vmem:[%s15485_s7 + $0x970] sm:$0xff]  ;;  %v16616_v24 = vld [vmem:[#allocation22_spill] sm:$0xff] }
 0x51d   : > { %16609 = vst [vmem:[#allocation130_spill] sm:$0xff] %v12175_v57  ;;  %v3448_v23 = vadd.f32 %v16616_v24, %v3398_v1  ;;  %v16617_v50 = vld [vmem:[#allocation110_spill] sm:$0xff] }
 0x51e   : > { %6566 = vmatmul.msk.f32.gmra.mxu2 %vm16612_vm11, %v16611_v14  ;;  %6641 = vmatmul.msk.f32.gmra.mxu0 %vm16592_vm14, %v11229_v35  ;;  %v3071_v35 = vld [vmem:[%s15485_s7 + $0x490] sm:$0xff]  ;;  %v3209_v1 = vld [vmem:[%s15485_s7 + $0x8e0] sm:$0xff] }
 0x51f   : > { %4429 = vmatpush.msra.mxu1 %v3074_v16  ;;  %4575 = vmatpush.msra.mxu0 %v3230_v15  ;;  %v3498_v16 = vadd.f32 %v11848_v2, %v3448_v23  ;;  %v3224_v15 = vld [vmem:[%s15485_s7 + $0x958] sm:$0xff]  ;;  %v16620_v24 = vld [vmem:[#allocation30_spill] sm:$0xff] }
 0x520   : > { %v3221_v2 = vld [vmem:[%s15485_s7 + $0x940] sm:$0xff] }
 0x521   : > { %v3691_v39 = vpop.f32.mrf.mxu2  ;;  %6627 = vmatmul.msk.f32.gmra.mxu3 %vm16561_vm2, %v16560_v60  ;;  %v3212_v60 = vld [vmem:[%s15485_s7 + $0x8f8] sm:$0xff]  ;;  %4430 = vmatpush.msra.mxu1 %v3071_v35  ;;  %v16621_v35 = vld [vmem:[#allocation78_spill] sm:$0xff] }
 0x522   : > { %v12212_v57 = vadd.f32 %v3691_v39, %v3642_v52  ;;  %v16619_v39 = vld [vmem:[#allocation111_spill] sm:$0xff]  ;;  %4576 = vmatpush.msra.mxu0 %v3227_v11  ;;  %4515 = vmatpush.msrb.mxu3 %v3212_v60  ;;  %v3401_v11 = vadd.f32 %v16621_v35, %v11960_v47  ;;  %v16622_v23 = vld [vmem:[#allocation138_spill] sm:$0xff]  ;;  %v12250_v60 = vpop.f32.mrf.mxu0 }
 0x523   : > { %6610 = vmatmul.msk.f32.gmra.mxu1 %vm16285_vm7, %v16617_v50  ;;  %v3595_v52 = vadd.f32 %v16619_v39, %v3545_v25  ;;  %v3206_v25 = vld [vmem:[%s15485_s7 + $0x8c8] sm:$0xff]  ;;  %v3548_v9 = vadd.f32 %v16622_v23, %v3498_v16  ;;  %16623 = vst [vmem:[#allocation119_spill] sm:$0xff] %v12250_v60 }
 0x524   : > { %v12224_v48 = vpop.f32.mrf.mxu3  ;;  %4577 = vmatpush.msra.mxu0 %v3224_v15  ;;  %4516 = vmatpush.msrb.mxu3 %v3209_v1  ;;  %v16624_v39 = vld [vmem:[#allocation151_spill] sm:$0xff]  ;;  %v3203_v1 = vld [vmem:[%s15485_s7 + $0x8b0] sm:$0xff] }
 0x525   : > { %16618 = vst [vmem:[#allocation74_spill] sm:$0xff] %v12224_v48  ;;  %v3645_v50 = vadd.f32 %v16624_v39, %v3595_v52  ;;  %v3218_v15 = vld [vmem:[%s15485_s7 + $0x928] sm:$0xff] }
 0x526   : > { %6567 = vmatmul.msk.f32.gmra.mxu2 %vm16485_vm3, %v16620_v24  ;;  %6642 = vmatmul.msk.f32.gmra.mxu0 %vm16473_vm5, %v11271_v37  ;;  %v16625_v35 = vld [vmem:[#allocation23_spill] sm:$0xff] }
 0x527   : > { %4578 = vmatpush.msra.mxu0 %v3221_v2  ;;  %v3451_v16 = vadd.f32 %v16625_v35, %v3401_v11  ;;  %v2966_v52 = vld [vmem:[%s15485_s7 + $0x148] sm:$0xff]  ;;  %4517 = vmatpush.msrb.mxu3 %v3206_v25  ;;  %v16626_v2 = vld [vmem:[#allocation116_spill] sm:$0xff] }
 0x528   : > { %4267 = vmatpush.msrb.mxu2 %v2966_v52  ;;  %v3215_v25 = vld [vmem:[%s15485_s7 + $0x910] sm:$0xff] }
 0x529   : > { %v3694_v37 = vpop.f32.mrf.mxu2  ;;  %6628 = vmatmul.msk.f32.gmra.mxu3 %vm16569_vm12, %v16568_v45  ;;  %v2963_v45 = vld [vmem:[%s15485_s7 + $0x130] sm:$0xff]  ;;  %v3501_v39 = vadd.f32 %v11879_v19, %v3451_v16  ;;  %4579 = vmatpush.msra.mxu0 %v3218_v15  ;;  %vm16630_vm12 = vnez %v16491_v8  ;;  %v12290_v19 = vpop.f32.mrf.mxu1  ;;  %v16631_v15 = vld [vmem:[#allocation79_spill] sm:$0xff]  ;;  %v16632_v16 = vld [vmem:[#allocation141_spill] sm:$0xff] }
 0x52a   : > { %v12263_v23 = vadd.f32 %v3694_v37, %v3645_v50  ;;  %v16628_v50 = vld [vmem:[#allocation117_spill] sm:$0xff]  ;;  %4518 = vmatpush.msrb.mxu3 %v3203_v1  ;;  %4268 = vmatpush.msrb.mxu2 %v2963_v45  ;;  %v16629_v35 = vld [vmem:[#allocation36_spill] sm:$0xff]  ;;  %v3404_v1 = vadd.f32 %v16631_v15, %v11960_v47 }
 0x52b   : > { %6611 = vmatmul.msk.f32.gmra.mxu1 %vm16291_vm13, %v16626_v2  ;;  %v3598_v11 = vadd.f32 %v16628_v50, %v3548_v9  ;;  %v3200_v37 = vld [vmem:[%s15485_s7 + $0x898] sm:$0xff]  ;;  %4580 = vmatpush.msra.mxu0 %v3215_v25  ;;  %v3197_v9 = vld [vmem:[%s15485_s7 + $0x880] sm:$0xff]  ;;  %v3551_v52 = vadd.f32 %v16632_v16, %v3501_v39  ;;  %v12306_v2 = vpop.f32.mrf.mxu0 }
 0x52c   : > { %v12275_v48 = vpop.f32.mrf.mxu3  ;;  %4519 = vmatpush.msrb.mxu3 %v3200_v37  ;;  %v16633_v25 = vld [vmem:[#allocation122_spill] sm:$0xff]  ;;  %16634 = vst [vmem:[#allocation98_spill] sm:$0xff] %v12306_v2  ;;  %v2960_v39 = vld [vmem:[%s15485_s7 + $0x118] sm:$0xff]  ;;  %v3134_v2 = vld [vmem:[%s15485_s7 + $0x688] sm:$0xff] }
 0x52d   : > { %16627 = vst [vmem:[#allocation140_spill] sm:$0xff] %v12275_v48  ;;  %v3648_v45 = vadd.f32 %v11419_v30, %v3598_v11  ;;  %v3454_v37 = vadd.f32 %v16633_v25, %v3404_v1  ;;  %v16635_v30 = vld [vmem:[#allocation121_spill] sm:$0xff]  ;;  %4269 = vmatpush.msrb.mxu2 %v2960_v39  ;;  %v16636_v11 = vld [vmem:[#allocation124_spill] sm:$0xff] }
 0x52e   : > { %6568 = vmatmul.msk.f32.gmra.mxu2 %vm16630_vm12, %v16629_v35  ;;  %6643 = vmatmul.msk.f32.gmra.mxu0 %vm16612_vm11, %v11316_v55  ;;  %v3194_v55 = vld [vmem:[%s15485_s7 + $0x868] sm:$0xff]  ;;  %v3601_v15 = vadd.f32 %v16636_v11, %v3551_v52  ;;  %v3191_v1 = vld [vmem:[%s15485_s7 + $0x850] sm:$0xff] }
 0x52f   : > { %4520 = vmatpush.msrb.mxu3 %v3197_v9  ;;  %v16639_v9 = vld [vmem:[#allocation80_spill] sm:$0xff] }
 0x530   : > { %v3407_v52 = vadd.f32 %v16639_v9, %v11960_v47  ;;  %v3651_v25 = vadd.f32 %v11458_v5, %v3601_v15  ;;  %v16641_v11 = vld [vmem:[#allocation28_spill] sm:$0xff]  ;;  %v2954_v5 = vld [vmem:[%s15485_s7 + $0xe8] sm:$0xff] }
 0x531   : > { %v3697_v50 = vpop.f32.mrf.mxu2  ;;  %6629 = vmatmul.msk.f32.gmra.mxu3 %vm16579_vm10, %v16578_v7  ;;  %v3504_v7 = vadd.f32 %v11911_v21, %v3454_v37  ;;  %v3188_v21 = vld [vmem:[%s15485_s7 + $0x838] sm:$0xff]  ;;  %v12334_v37 = vpop.f32.mrf.mxu1  ;;  %v16643_v9 = vld [vmem:[#allocation128_spill] sm:$0xff] }
 0x532   : > { %v12308_v48 = vadd.f32 %v3697_v50, %v3648_v45  ;;  %4521 = vmatpush.msrb.mxu3 %v3194_v55  ;;  %v16638_v45 = vld [vmem:[#allocation37_spill] sm:$0xff]  ;;  %v16640_v50 = vld [vmem:[#allocation144_spill] sm:$0xff] }
 0x533   : > { %6612 = vmatmul.msk.f32.gmra.mxu1 %vm16297_vm9, %v16635_v30  ;;  %v3554_v55 = vadd.f32 %v16640_v50, %v3504_v7  ;;  %v2957_v7 = vld [vmem:[%s15485_s7 + $0x100] sm:$0xff]  ;;  %v12353_v15 = vpop.f32.mrf.mxu0  ;;  %v3182_v50 = vld [vmem:[%s15485_s7 + $0x808] sm:$0xff] }
 0x534   : > { %v12321_v16 = vpop.f32.mrf.mxu3  ;;  %4522 = vmatpush.msrb.mxu3 %v3191_v1  ;;  %v3457_v1 = vadd.f32 %v16641_v11, %v3407_v52  ;;  %4270 = vmatpush.msrb.mxu2 %v2957_v7  ;;  %16642 = vst [vmem:[#allocation73_spill] sm:$0xff] %v12353_v15  ;;  %v16648_v11 = vld [vmem:[#allocation156_spill] sm:$0xff]  ;;  %v16694_v15 = vld [vmem:[#allocation70_spill] sm:$0xff] }
 0x535   : > { %16637 = vst [vmem:[#allocation94_spill] sm:$0xff] %v12321_v16  ;;  %v3604_v52 = vadd.f32 %v16643_v9, %v3554_v55  ;;  %v16646_v55 = vld [vmem:[#allocation83_spill] sm:$0xff] }
 0x536   : > { %4081 = vmatmul.f32.vlgmr.msra.gmra.mxu2 %v16638_v45  ;;  %6644 = vmatmul.msk.f32.gmra.mxu0 %vm16485_vm3, %v11361_v56  ;;  %v3185_v56 = vld [vmem:[%s15485_s7 + $0x820] sm:$0xff] }
 0x537   : > { %4523 = vmatpush.msrb.mxu3 %v3188_v21  ;;  %4271 = vmatpush.msrb.mxu2 %v2954_v5  ;;  %v16644_v21 = vld [vmem:[#allocation39_spill] sm:$0xff] }
 0x538   : > { %v16649_v5 = vld [vmem:[#allocation131_spill] sm:$0xff] }
 0x539   : > { %v3700_v39 = vpop.f32.mrf.mxu2  ;;  %6630 = vmatmul.msk.f32.gmra.mxu3 %vm16592_vm14, %v16591_v63  ;;  %v3507_v63 = vadd.f32 %v11943_v53, %v3457_v1  ;;  %v3179_v53 = vld [vmem:[%s15485_s7 + $0x7f0] sm:$0xff]  ;;  %v3654_v1 = vadd.f32 %v16648_v11, %v3604_v52  ;;  %v16650_v52 = vld [vmem:[#allocation31_spill] sm:$0xff] }
 0x53a   : > { %v12343_v30 = vadd.f32 %v3700_v39, %v3651_v25  ;;  %4524 = vmatpush.msrb.mxu3 %v3185_v56  ;;  %v3410_v25 = vadd.f32 %v16646_v55, %v11960_v47  ;;  %v16647_v39 = vld [vmem:[#allocation147_spill] sm:$0xff]  ;;  %v12384_v55 = vpop.f32.mrf.mxu1 }
 0x53b   : > { %4431 = vmatmul.f32.vlgmr.msra.gmra.mxu1 %v16436_v6  ;;  %v3557_v56 = vadd.f32 %v16647_v39, %v3507_v63  ;;  %v2951_v63 = vld [vmem:[%s15485_s7 + $0xd0] sm:$0xff]  ;;  %v16651_v39 = vld [vmem:[#allocation135_spill] sm:$0xff] }
 0x53c   : > { %v12363_v6 = vpop.f32.mrf.mxu3  ;;  %4525 = vmatpush.msrb.mxu3 %v3182_v50  ;;  %v3460_v9 = vadd.f32 %v16649_v5, %v3410_v25  ;;  %4272 = vmatpush.msrb.mxu2 %v2951_v63  ;;  %v3173_v25 = vld [vmem:[%s15485_s7 + $0x7c0] sm:$0xff] }
 0x53d   : > { %16645 = vst [vmem:[#allocation134_spill] sm:$0xff] %v12363_v6  ;;  %v3607_v11 = vadd.f32 %v16651_v39, %v3557_v56  ;;  %v16654_v56 = vld [vmem:[#allocation85_spill] sm:$0xff]  ;;  %v16655_v5 = vld [vmem:[#allocation150_spill] sm:$0xff] }
 0x53e   : > { %4084 = vmatmul.f32.gmra.mxu2 %v16644_v21  ;;  %6645 = vmatmul.msk.f32.gmra.mxu0 %vm16630_vm12, %v11408_v38  ;;  %v3176_v38 = vld [vmem:[%s15485_s7 + $0x7d8] sm:$0xff] }
 0x53f   : > { %4526 = vmatpush.msrb.mxu3 %v3179_v53  ;;  %v2948_v53 = vld [vmem:[%s15485_s7 + $0xb8] sm:$0xff]  ;;  %v3657_v63 = vadd.f32 %v11520_v54, %v3607_v11 }
 0x540   : > { %4273 = vmatpush.msrb.mxu2 %v2948_v53  ;;  %v16658_v54 = vld [vmem:[#allocation33_spill] sm:$0xff] }
 0x541   : > { %v3703_v7 = vpop.f32.mrf.mxu2  ;;  %6631 = vmatmul.msk.f32.gmra.mxu3 %vm16473_vm5, %v16602_v34  ;;  %v3510_v34 = vadd.f32 %v11974_v18, %v3460_v9  ;;  %v3170_v18 = vld [vmem:[%s15485_s7 + $0x7a8] sm:$0xff] }
 0x542   : > { %v12379_v50 = vadd.f32 %v3703_v7, %v3654_v1  ;;  %4527 = vmatpush.msrb.mxu3 %v3176_v38  ;;  %v12395_v1 = vpop.f32.mrf.mxu0  ;;  %v16653_v7 = vld [vmem:[#allocation82_spill] sm:$0xff]  ;;  %v3413_v38 = vadd.f32 %v16654_v56, %v11960_v47  ;;  %v16657_v47 = vld [vmem:[#allocation136_spill] sm:$0xff]  ;;  %v16659_v56 = vld [vmem:[#allocation139_spill] sm:$0xff] }
 0x543   : > { %4434 = vmatmul.f32.gmra.mxu1 %v16650_v52  ;;  %16652 = vst [vmem:[#allocation52_spill] sm:$0xff] %v12395_v1  ;;  %v3560_v9 = vadd.f32 %v16655_v5, %v3510_v34  ;;  %v2945_v52 = vld [vmem:[%s15485_s7 + $0xa0] sm:$0xff]  ;;  %v16699_v1 = vld [vmem:[#allocation45_spill] sm:$0xff] }
 0x544   : > { %4528 = vmatpush.msrb.mxu3 %v3173_v25  ;;  %v12411_v39 = vpop.f32.mrf.mxu3  ;;  %4274 = vmatpush.msrb.mxu2 %v2945_v52  ;;  %v3463_v34 = vadd.f32 %v16657_v47, %v3413_v38  ;;  %v16660_v52 = vld [vmem:[#allocation84_spill] sm:$0xff]  ;;  %v16665_v47 = vld [vmem:[#allocation55_spill] sm:$0xff] }
 0x545   : > { %16656 = vst [vmem:[#allocation125_spill] sm:$0xff] %v12411_v39  ;;  %v3610_v5 = vadd.f32 %v16659_v56, %v3560_v9  ;;  %v12428_v39 = vpop.f32.mrf.mxu1 }
 0x546   : > { %4087 = vmatmul.f32.gmra.mxu2 %v16653_v7  ;;  %6646 = vmatmul.msk.f32.vlgmr.msra.gmra.mxu0 %vm16496_vm8, %v11444_v49  ;;  %v3167_v49 = vld [vmem:[%s15485_s7 + $0x790] sm:$0xff]  ;;  %v3513_v11 = vadd.f32 %v12011_v12, %v3463_v34  ;;  %v16666_v34 = vld [vmem:[#allocation143_spill] sm:$0xff] }
 0x547   : > { %4529 = vmatpush.msrb.mxu3 %v3170_v18  ;;  %v16662_v18 = vld [vmem:[#allocation152_spill] sm:$0xff]  ;;  %v3660_v12 = vadd.f32 %v11551_v22, %v3610_v5  ;;  %v3308_v22 = vld [vmem:[%s15485_s7 + $0xbf8] sm:$0xff]  ;;  %v16669_v5 = vld [vmem:[#allocation166_spill] sm:$0xff] }
 0x548   : > { %v3563_v38 = vadd.f32 %v16662_v18, %v3513_v11  ;;  %4615 = vmatpush.msrb.mxu1 %v3308_v22  ;;  %v16667_v11 = vld [vmem:[#allocation86_spill] sm:$0xff]  ;;  %v2936_v18 = vld [vmem:[%s15485_s7 + $0x58] sm:$0xff] }
 0x549   : > { %v3706_v53 = vpop.f32.mrf.mxu2  ;;  %6632 = vmatmul.msk.f32.gmra.mxu3 %vm16612_vm11, %v16611_v14  ;;  %v2942_v14 = vld [vmem:[%s15485_s7 + $0x88] sm:$0xff]  ;;  %vm16661_vm11 = vnez %v16357_v46  ;;  %v16674_v22 = vld [vmem:[#allocation161_spill] sm:$0xff] }
 0x54a   : > { %v12420_v25 = vadd.f32 %v3706_v53, %v3657_v63  ;;  %4530 = vmatpush.msrb.mxu3 %v3167_v49  ;;  %4275 = vmatpush.msrb.mxu2 %v2942_v14  ;;  %v12435_v63 = vpop.f32.mrf.mxu0  ;;  %v16721_v46 = vld [vmem:[#allocation99_spill] sm:$0xff] }
 0x54b   : > { %4437 = vmatmul.f32.gmra.mxu1 %v16658_v54  ;;  %16663 = vst [vmem:[#allocation142_spill] sm:$0xff] %v12435_v63  ;;  %v3613_v54 = vadd.f32 %v16666_v34, %v3563_v38  ;;  %v3302_v38 = vld [vmem:[%s15485_s7 + $0xbc8] sm:$0xff]  ;;  %v16671_v34 = vld [vmem:[#allocation64_spill] sm:$0xff]  ;;  %v3269_v63 = vld [vmem:[%s15485_s7 + $0xac0] sm:$0xff] }
 0x54c   : > { %v12443_v49 = vpop.f32.mrf.mxu3 }
 0x54d   : > { %16664 = vst [vmem:[#allocation103_spill] sm:$0xff] %v12443_v49  ;;  %v12460_v56 = vpop.f32.mrf.mxu1  ;;  %v3663_v14 = vadd.f32 %v16669_v5, %v3613_v54  ;;  %v3296_v54 = vld [vmem:[%s15485_s7 + $0xb98] sm:$0xff]  ;;  %v2933_v5 = vld [vmem:[%s15485_s7 + $0x40] sm:$0xff]  ;;  %v16683_v49 = vld [vmem:[#allocation40_spill] sm:$0xff] }
 0x54e   : > { %4090 = vmatmul.f32.gmra.mxu2 %v16660_v52  ;;  %6647 = vmatmul.msk.f32.gmra.mxu0 %vm16661_vm11, %v11478_v26  ;;  %v2939_v26 = vld [vmem:[%s15485_s7 + $0x70] sm:$0xff] }
 0x54f   : > { %4276 = vmatpush.msrb.mxu2 %v2939_v26 }
 0x551   : > { %v3709_v9 = vpop.f32.mrf.mxu2  ;;  %6633 = vmatmul.msk.f32.gmra.mxu3 %vm16485_vm3, %v16620_v24  ;;  %vm16668_vm3 = vnez %v16364_v40  ;;  %v3305_v24 = vld [vmem:[%s15485_s7 + $0xbe0] sm:$0xff]  ;;  %4277 = vmatpush.msrb.mxu2 %v2936_v18 }
 0x552   : > { %v12441_v53 = vadd.f32 %v3709_v9, %v3660_v12  ;;  %4616 = vmatpush.msrb.mxu1 %v3305_v24  ;;  %v16675_v24 = vld [vmem:[#allocation3_spill] sm:$0xff]  ;;  %v16726_v40 = vld [vmem:[#allocation58_spill] sm:$0xff] }
 0x553   : > { %4440 = vmatmul.f32.gmra.mxu1 %v16665_v47  ;;  %v3299_v47 = vld [vmem:[%s15485_s7 + $0xbb0] sm:$0xff]  ;;  %4278 = vmatpush.msrb.mxu2 %v2933_v5  ;;  %v16680_v5 = vld [vmem:[#allocation163_spill] sm:$0xff] }
 0x554   : > { %4617 = vmatpush.msrb.mxu1 %v3302_v38  ;;  %v12483_v26 = vpop.f32.mrf.mxu3 }
 0x555   : > { %16672 = vst [vmem:[#allocation75_spill] sm:$0xff] %v12483_v26  ;;  %v12495_v18 = vpop.f32.mrf.mxu1 }
 0x556   : > { %4093 = vmatmul.f32.gmra.mxu2 %v16667_v11  ;;  %6648 = vmatmul.msk.f32.gmra.mxu0 %vm16668_vm3, %v11509_v41  ;;  %v12472_v41 = vpop.f32.mrf.mxu0 }
 0x557   : > { %16670 = vst [vmem:[#allocation101_spill] sm:$0xff] %v12472_v41  ;;  %4618 = vmatpush.msrb.mxu1 %v3299_v47  ;;  %v16677_v47 = vld [vmem:[#allocation38_spill] sm:$0xff] }
 0x559   : > { %v3712_v12 = vpop.f32.mrf.mxu2  ;;  %6634 = vmatmul.msk.f32.gmra.mxu3 %vm16630_vm12, %v16629_v35  ;;  %v16673_v35 = vld [vmem:[#allocation91_spill] sm:$0xff]  ;;  %vm16676_vm12 = vnez %v16675_v24  ;;  %4619 = vmatpush.msrb.mxu1 %v3296_v54  ;;  %v3287_v54 = vld [vmem:[%s15485_s7 + $0xb50] sm:$0xff]  ;;  %v16745_v24 = vld [vmem:[#allocation186_spill] sm:$0xff] }
 0x55a   : > { %v12474_v9 = vadd.f32 %v3712_v12, %v3663_v14  ;;  %v3293_v14 = vld [vmem:[%s15485_s7 + $0xb80] sm:$0xff]  ;;  %v3290_v12 = vld [vmem:[%s15485_s7 + $0xb68] sm:$0xff] }
 0x55b   : > { %4443 = vmatmul.f32.gmra.mxu1 %v16671_v34 }
 0x55c   : > { %4620 = vmatpush.msrb.mxu1 %v3293_v14  ;;  %v16750_v14 = vld [vmem:[#allocation189_spill] sm:$0xff] }
 0x55e   : > { %4096 = vmatmul.f32.gmra.mxu2 %v16673_v35  ;;  %6649 = vmatmul.msk.f32.gmra.mxu0 %vm16676_vm12, %v16674_v22  ;;  %v12504_v34 = vpop.f32.mrf.mxu0  ;;  %v2930_v22 = vld [vmem:[%s15485_s7 + $0x28] sm:$0xff] }
 0x55f   : > { %16678 = vst [vmem:[#allocation27_spill] sm:$0xff] %v12504_v34  ;;  %4621 = vmatpush.msrb.mxu1 %v3290_v12  ;;  %4279 = vmatpush.msrb.mxu2 %v2930_v22  ;;  %v12519_v12 = vpop.f32.mrf.mxu3  ;;  %v3281_v22 = vld [vmem:[%s15485_s7 + $0xb20] sm:$0xff]  ;;  %v12527_v34 = vpop.f32.mrf.mxu1 }
 0x560   : > { %16682 = vst [vmem:[#allocation129_spill] sm:$0xff] %v12519_v12  ;;  %v16686_v12 = vld [vmem:[#allocation167_spill] sm:$0xff] }
 0x561   : > { %v12497_v38 = vpop.f32.mrf.mxu2  ;;  %4531 = vmatmul.f32.vlgmr.msrb.gmra.mxu3 %v16638_v45  ;;  %v16679_v45 = vld [vmem:[#allocation96_spill] sm:$0xff]  ;;  %4622 = vmatpush.msrb.mxu1 %v3287_v54 }
 0x562   : > { %v2927_v54 = vld [vmem:[%s15485_s7 + $0x10] sm:$0xff] }
 0x563   : > { %4446 = vmatmul.f32.gmra.mxu1 %v16677_v47  ;;  %v3284_v47 = vld [vmem:[%s15485_s7 + $0xb38] sm:$0xff]  ;;  %4280 = vmatpush.msrb.mxu2 %v2927_v54 }
 0x564   : > { %4623 = vmatpush.msrb.mxu1 %v3284_v47  ;;  %v16685_v47 = vld [vmem:[#allocation100_spill] sm:$0xff] }
 0x566   : > { %4099 = vmatmul.f32.gmra.mxu2 %v16679_v45  ;;  %6650 = vmatmul.msk.f32.gmra.mxu0 %vm16376_vm6, %v16680_v5  ;;  %v3278_v5 = vld [vmem:[%s15485_s7 + $0xb08] sm:$0xff] }
 0x567   : > { %4624 = vmatpush.msrb.mxu1 %v3281_v22  ;;  %v3164_v22 = vld [vmem:[%s15485_s7 + $0x778] sm:$0xff]  ;;  %v12548_v41 = vpop.f32.mrf.mxu3 }
 0x568   : > { %4465 = vmatpush.msra.mxu2 %v3164_v22  ;;  %16687 = vst [vmem:[#allocation11_spill] sm:$0xff] %v12548_v41  ;;  %v12563_v22 = vpop.f32.mrf.mxu1 }
 0x569   : > { %v12521_v26 = vpop.f32.mrf.mxu2  ;;  %4534 = vmatmul.f32.gmra.mxu3 %v16644_v21  ;;  %v12536_v21 = vpop.f32.mrf.mxu0  ;;  %4625 = vmatpush.msrb.mxu1 %v3278_v5  ;;  %v3161_v5 = vld [vmem:[%s15485_s7 + $0x760] sm:$0xff]  ;;  %16689 = vst [vmem:[#allocation106_spill] sm:$0xff] %v12563_v22 }
 0x56a   : > { %16684 = vst [vmem:[#allocation145_spill] sm:$0xff] %v12536_v21  ;;  %v16688_v21 = vld [vmem:[#allocation41_spill] sm:$0xff]  ;;  %4466 = vmatpush.msra.mxu2 %v3161_v5  ;;  %v3263_v5 = vld [vmem:[%s15485_s7 + $0xa90] sm:$0xff] }
 0x56b   : > { %4449 = vmatmul.f32.gmra.mxu1 %v16683_v49  ;;  %v3275_v49 = vld [vmem:[%s15485_s7 + $0xaf0] sm:$0xff] }
 0x56c   : > { %4626 = vmatpush.msrb.mxu1 %v3275_v49  ;;  %v16691_v49 = vld [vmem:[#allocation170_spill] sm:$0xff] }
 0x56e   : > { %4102 = vmatmul.f32.gmra.mxu2 %v16685_v47  ;;  %6651 = vmatmul.msk.f32.gmra.mxu0 %vm16513_vm1, %v16686_v12  ;;  %v3272_v12 = vld [vmem:[%s15485_s7 + $0xad8] sm:$0xff] }
 0x56f   : > { %4627 = vmatpush.msrb.mxu1 %v3272_v12  ;;  %v12583_v6 = vpop.f32.mrf.mxu3 }
 0x570   : > { %16693 = vst [vmem:[#allocation77_spill] sm:$0xff] %v12583_v6  ;;  %v5001_v6 = vld [vmem:[%s15487_s9 + $0xb0] sm:$0xff] }
 0x571   : > { %v12550_v54 = vpop.f32.mrf.mxu2  ;;  %4537 = vmatmul.f32.gmra.mxu3 %v16653_v7  ;;  %v16690_v7 = vld [vmem:[#allocation105_spill] sm:$0xff]  ;;  %4628 = vmatpush.msrb.mxu1 %v3269_v63  ;;  %v12572_v12 = vpop.f32.mrf.mxu0  ;;  %v3158_v63 = vld [vmem:[%s15485_s7 + $0x748] sm:$0xff] }
 0x572   : > { %16692 = vst [vmem:[#allocation49_spill] sm:$0xff] %v12572_v12  ;;  %4467 = vmatpush.msra.mxu2 %v3158_v63  ;;  %v16696_v12 = vld [vmem:[#allocation174_spill] sm:$0xff] }
 0x573   : > { %4452 = vmatmul.f32.gmra.mxu1 %v16688_v21  ;;  %v3266_v21 = vld [vmem:[%s15485_s7 + $0xaa8] sm:$0xff]  ;;  %v5003_v63 = vld [vmem:[%s15487_s9 + $0xc0] sm:$0xff] }
 0x574   : > { %4629 = vmatpush.msrb.mxu1 %v3266_v21  ;;  %v16695_v21 = vld [vmem:[#allocation109_spill] sm:$0xff] }
 0x576   : > { %4105 = vmatmul.f32.gmra.mxu2 %v16690_v7  ;;  %6652 = vmatmul.msk.f32.gmra.mxu0 %vm16272_vm4, %v16691_v49  ;;  %v5009_v49 = vld [vmem:[%s15487_s9 + $0xf0] sm:$0xff] }
 0x577   : > { %5273 = vmatpush.msra.mxu3 %v5009_v49  ;;  %4630 = vmatpush.msrb.mxu1 %v3263_v5  ;;  %v3155_v5 = vld [vmem:[%s15485_s7 + $0x730] sm:$0xff]  ;;  %v12602_v49 = vpop.f32.mrf.mxu1 }
 0x578   : > { %16697 = vst [vmem:[#allocation133_spill] sm:$0xff] %v12602_v49  ;;  %4468 = vmatpush.msra.mxu2 %v3155_v5  ;;  %v4999_v5 = vld [vmem:[%s15487_s9 + $0xa0] sm:$0xff]  ;;  %v12622_v49 = vpop.f32.mrf.mxu3 }
 0x579   : > { %v12574_v41 = vpop.f32.mrf.mxu2  ;;  %4540 = vmatmul.f32.gmra.mxu3 %v16660_v52  ;;  %v5007_v52 = vld [vmem:[%s15487_s9 + $0xe0] sm:$0xff]  ;;  %16700 = vst [vmem:[#allocation22_spill] sm:$0xff] %v12622_v49  ;;  %v16704_v49 = vld [vmem:[#allocation29_spill] sm:$0xff] }
 0x57a   : > { %5274 = vmatpush.msra.mxu3 %v5007_v52 }
 0x57b   : > { %4455 = vmatmul.f32.gmra.mxu1 %v16694_v15  ;;  %v5005_v15 = vld [vmem:[%s15487_s9 + $0xd0] sm:$0xff] }
 0x57c   : > { %5275 = vmatpush.msra.mxu3 %v5005_v15  ;;  %v3152_v15 = vld [vmem:[%s15485_s7 + $0x718] sm:$0xff] }
 0x57d   : > { %4469 = vmatpush.msra.mxu2 %v3152_v15  ;;  %v4995_v15 = vld [vmem:[%s15487_s9 + $0x80] sm:$0xff] }
 0x57e   : > { %4108 = vmatmul.f32.gmra.mxu2 %v16695_v21  ;;  %6653 = vmatmul.msk.f32.gmra.mxu0 %vm16278_vm0, %v16696_v12  ;;  %v12610_v12 = vpop.f32.mrf.mxu0 }
 0x57f   : > { %16698 = vst [vmem:[#allocation148_spill] sm:$0xff] %v12610_v12  ;;  %5276 = vmatpush.msra.mxu3 %v5003_v63  ;;  %v16702_v63 = vld [vmem:[#allocation178_spill] sm:$0xff] }
 0x581   : > { %v12607_v52 = vpop.f32.mrf.mxu2  ;;  %4543 = vmatmul.f32.gmra.mxu3 %v16667_v11  ;;  %v16701_v11 = vld [vmem:[#allocation113_spill] sm:$0xff] }
 0x582   : > { %5277 = vmatpush.msra.mxu3 %v5001_v6  ;;  %v4997_v6 = vld [vmem:[%s15487_s9 + $0x90] sm:$0xff] }
 0x583   : > { %4458 = vmatmul.f32.gmra.mxu1 %v16699_v1  ;;  %v12631_v1 = vpop.f32.mrf.mxu1 }
 0x584   : > { %5278 = vmatpush.msra.mxu3 %v4999_v5  ;;  %16703 = vst [vmem:[#allocation111_spill] sm:$0xff] %v12631_v1  ;;  %v3149_v5 = vld [vmem:[%s15485_s7 + $0x700] sm:$0xff]  ;;  %v16708_v1 = vld [vmem:[#allocation181_spill] sm:$0xff] }
 0x585   : > { %4470 = vmatpush.msra.mxu2 %v3149_v5 }
 0x586   : > { %4111 = vmatmul.f32.gmra.mxu2 %v16701_v11  ;;  %6654 = vmatmul.msk.f32.gmra.mxu0 %vm16285_vm7, %v16702_v63  ;;  %v12640_v16 = vpop.f32.mrf.mxu0  ;;  %v4993_v63 = vld [vmem:[%s15487_s9 + $0x70] sm:$0xff]  ;;  %vm16707_vm7 = vnez %v16540_v29 }
 0x587   : > { %5279 = vmatpush.msra.mxu3 %v4997_v6  ;;  %16705 = vst [vmem:[#allocation30_spill] sm:$0xff] %v12640_v16  ;;  %v12657_v6 = vpop.f32.mrf.mxu3  ;;  %v16711_v16 = vld [vmem:[#allocation90_spill] sm:$0xff] }
 0x588   : > { %16709 = vst [vmem:[#allocation78_spill] sm:$0xff] %v12657_v6  ;;  %v16713_v6 = vld [vmem:[#allocation34_spill] sm:$0xff] }
 0x589   : > { %v12633_v12 = vpop.f32.mrf.mxu2  ;;  %4546 = vmatmul.f32.gmra.mxu3 %v16673_v35  ;;  %v16706_v35 = vld [vmem:[#allocation32_spill] sm:$0xff] }
 0x58a   : > { %5280 = vmatpush.msra.mxu3 %v4995_v15  ;;  %v4991_v15 = vld [vmem:[%s15487_s9 + $0x60] sm:$0xff] }
 0x58b   : > { %4461 = vmatmul.f32.gmra.mxu1 %v16704_v49  ;;  %v3146_v49 = vld [vmem:[%s15485_s7 + $0x6e8] sm:$0xff] }
 0x58c   : > { %5281 = vmatpush.msra.mxu3 %v4993_v63  ;;  %4471 = vmatpush.msra.mxu2 %v3146_v49  ;;  %v4987_v63 = vld [vmem:[%s15487_s9 + $0x40] sm:$0xff] }
 0x58e   : > { %6613 = vmatmul.msk.f32.vlgmr.msrb.gmra.mxu2 %vm16707_vm7, %v16706_v35  ;;  %6655 = vmatmul.msk.f32.gmra.mxu0 %vm16291_vm13, %v16708_v1  ;;  %v4989_v1 = vld [vmem:[%s15487_s9 + $0x50] sm:$0xff]  ;;  %v12668_v35 = vpop.f32.mrf.mxu1  ;;  %v12679_v49 = vpop.f32.mrf.mxu0 }
 0x58f   : > { %5282 = vmatpush.msra.mxu3 %v4991_v15  ;;  %16710 = vst [vmem:[#allocation138_spill] sm:$0xff] %v12668_v35  ;;  %v16714_v15 = vld [vmem:[#allocation185_spill] sm:$0xff]  ;;  %v16887_v27 = vld [vmem:[#allocation78_spill] sm:$0xff] }
 0x590   : > { %16712 = vst [vmem:[#allocation151_spill] sm:$0xff] %v12679_v49  ;;  %v16718_v49 = vld [vmem:[#allocation35_spill] sm:$0xff] }
 0x591   : > { %v12662_v5 = vpop.f32.mrf.mxu2  ;;  %4549 = vmatmul.f32.gmra.mxu3 %v16679_v45  ;;  %v3143_v45 = vld [vmem:[%s15485_s7 + $0x6d0] sm:$0xff] }
 0x592   : > { %5283 = vmatpush.msra.mxu3 %v4989_v1  ;;  %4472 = vmatpush.msra.mxu2 %v3143_v45  ;;  %v12690_v1 = vpop.f32.mrf.mxu3  ;;  %v4983_v45 = vld [vmem:[%s15487_s9 + $0x20] sm:$0xff] }
 0x593   : > { %6657 = vmatmul.msk.f32.vlgmr.msrb.gmra.mxu1 %vm16496_vm8, %v16711_v16  ;;  %v4985_v16 = vld [vmem:[%s15487_s9 + $0x30] sm:$0xff]  ;;  %16715 = vst [vmem:[#allocation23_spill] sm:$0xff] %v12690_v1  ;;  %vm16719_vm8 = vnez %v16435_v13  ;;  %v3140_v1 = vld [vmem:[%s15485_s7 + $0x6b8] sm:$0xff] }
 0x594   : > { %5284 = vmatpush.msra.mxu3 %v4987_v63  ;;  %v4981_v63 = vld [vmem:[%s15487_s9 + $0x10] sm:$0xff]  ;;  %4473 = vmatpush.msra.mxu2 %v3140_v1 }
 0x596   : > { %6614 = vmatmul.msk.f32.gmra.mxu2 %vm7116_vm15, %v16713_v6  ;;  %6656 = vmatmul.msk.f32.gmra.mxu0 %vm16297_vm9, %v16714_v15  ;;  %v16716_v6 = vld [vmem:[#allocation95_spill] sm:$0xff]  ;;  %v12704_v15 = vpop.f32.mrf.mxu1 }
 0x597   : > { %5285 = vmatpush.msra.mxu3 %v4985_v16  ;;  %16717 = vst [vmem:[#allocation117_spill] sm:$0xff] %v12704_v15 }
 0x599   : > { %v12692_v0 = vpop.f32.mrf.mxu2  ;;  %4552 = vmatmul.f32.gmra.mxu3 %v16685_v47  ;;  %v4979_v47 = vld [vmem:[%s15487_s9] sm:$0xff] }
 0x59a   : > { %5286 = vmatpush.msra.mxu3 %v4983_v45  ;;  %v16722_v45 = vld [vmem:[#allocation183_spill] sm:$0xff] }
 0x59b   : > { %6658 = vmatmul.msk.f32.gmra.mxu1 %vm16661_vm11, %v16716_v6  ;;  %v12715_v6 = vpop.f32.mrf.mxu3  ;;  %v3763_v15 = vadd.f32 %v16722_v45, %v12474_v9  ;;  %v16728_v9 = vld [vmem:[#allocation182_spill] sm:$0xff] }
 0x59c   : > { %5287 = vmatpush.msra.mxu3 %v4981_v63  ;;  %16720 = vst [vmem:[#allocation36_spill] sm:$0xff] %v12715_v6  ;;  %v16723_v63 = vld [vmem:[#allocation60_spill] sm:$0xff] }
 0x59d   : > { %v16725_v6 = vld [vmem:[#allocation20_spill] sm:$0xff]  ;;  %v3813_v45 = vadd.f32 %v16728_v9, %v3763_v15 }
 0x59e   : > { %6615 = vmatmul.msk.f32.gmra.mxu2 %vm16719_vm8, %v16718_v49  ;;  %5288 = vmatpush.msra.mxu3 %v4979_v47  ;;  %v3137_v49 = vld [vmem:[%s15485_s7 + $0x6a0] sm:$0xff]  ;;  %v16724_v47 = vld [vmem:[#allocation72_spill] sm:$0xff] }
 0x59f   : > { %v3733_v35 = vadd.f32 %v16725_v6, %v16724_v47  ;;  %4474 = vmatpush.msra.mxu2 %v3137_v49  ;;  %v16730_v6 = vld [vmem:[#allocation171_spill] sm:$0xff]  ;;  %v16731_v47 = vld [vmem:[#allocation146_spill] sm:$0xff]  ;;  %v16733_v49 = vld [vmem:[#allocation104_spill] sm:$0xff]  ;;  %v4745_v15 = vmul.f32 0.1, %v3813_v45 }
 0x5a1   : > { %v12712_v16 = vpop.f32.mrf.mxu2  ;;  %4555 = vmatmul.f32.gmra.mxu3 %v16690_v7  ;;  %v12729_v7 = vperm.slane %v16723_v63, 1  ;;  %4475 = vmatpush.msra.mxu2 %v3134_v2  ;;  %v3783_v22 = vadd.f32 %v16731_v47, %v3733_v35  ;;  %v16737_v2 = vld [vmem:[#allocation149_spill] sm:$0xff]  ;;  %v12760_v35 = vmax.f32 %v3813_v45, %v4745_v15  ;;  %v16739_v47 = vld [vmem:[#allocation187_spill] sm:$0xff] }
 0x5a3   : > { %6659 = vmatmul.msk.f32.gmra.mxu1 %vm16668_vm3, %v16721_v46  ;;  %v12736_v46 = vpop.f32.mrf.mxu1  ;;  %v3833_v63 = vadd.f32 %v16730_v6, %v12729_v7  ;;  %v12754_v60 = vpop.f32.mrf.mxu3  ;;  %vm16736_vm3 = vnez %v16451_v62  ;;  %16738 = vst [vmem:[#allocation124_spill] sm:$0xff] %v12760_v35 }
 0x5a4   : > { %16727 = vst [vmem:[#allocation79_spill] sm:$0xff] %v12736_v46 }
 0x5a5   : > { %v3883_v9 = vadd.f32 %v12497_v38, %v3833_v63  ;;  %16734 = vst [vmem:[#allocation122_spill] sm:$0xff] %v12754_v60  ;;  %v3128_v38 = vld [vmem:[%s15485_s7 + $0x658] sm:$0xff] }
 0x5a6   : > { %6616 = vmatmul.msk.f32.gmra.mxu2 %vm16561_vm2, %v16726_v40  ;;  %v16732_v40 = vld [vmem:[#allocation155_spill] sm:$0xff] }
 0x5a7   : > { %v3736_v46 = vadd.f32 %v16732_v40, %v12115_v33  ;;  %v3933_v33 = vadd.f32 %v16739_v47, %v3883_v9  ;;  %v3131_v40 = vld [vmem:[%s15485_s7 + $0x670] sm:$0xff] }
 0x5a8   : > { %4476 = vmatpush.msra.mxu2 %v3131_v40  ;;  %v16746_v40 = vld [vmem:[#allocation66_spill] sm:$0xff] }
 0x5a9   : > { %v12742_v1 = vpop.f32.mrf.mxu2  ;;  %4558 = vmatmul.f32.gmra.mxu3 %v16695_v21  ;;  %v16735_v21 = vld [vmem:[#allocation61_spill] sm:$0xff]  ;;  %v3786_v6 = vadd.f32 %v16737_v2, %v3736_v46  ;;  %v16741_v46 = vld [vmem:[#allocation175_spill] sm:$0xff]  ;;  %v16744_v2 = vld [vmem:[#allocation158_spill] sm:$0xff] }
 0x5aa   : > { %16729 = vst [vmem:[#allocation141_spill] sm:$0xff] %v12742_v1  ;;  %v4715_v1 = vmul.f32 0.1, %v3783_v22  ;;  %v3836_v45 = vadd.f32 %v16741_v46, %v12729_v7  ;;  %4477 = vmatpush.msra.mxu2 %v3128_v38  ;;  %v3739_v47 = vadd.f32 %v16744_v2, %v12164_v42  ;;  %v16749_v38 = vld [vmem:[#allocation153_spill] sm:$0xff] }
 0x5ab   : > { %6660 = vmatmul.msk.f32.gmra.mxu1 %vm16676_vm12, %v16733_v49  ;;  %v12769_v63 = vpop.f32.mrf.mxu1  ;;  %v4718_v9 = vmul.f32 0.1, %v3786_v6  ;;  %v12792_v46 = vpop.f32.mrf.mxu3 }
 0x5ac   : > { %16740 = vst [vmem:[#allocation37_spill] sm:$0xff] %v12769_v63  ;;  %v12776_v15 = vmax.f32 %v3783_v22, %v4715_v1  ;;  %v3886_v60 = vadd.f32 %v12521_v26, %v3836_v45  ;;  %v3983_v63 = vadd.f32 %v16745_v24, %v3933_v33  ;;  %v16751_v24 = vld [vmem:[#allocation2_spill] sm:$0xff] }
 0x5ad   : > { %v12790_v1 = vmax.f32 %v3786_v6, %v4718_v9  ;;  %16748 = vst [vmem:[#allocation28_spill] sm:$0xff] %v12792_v46  ;;  %v3125_v45 = vld [vmem:[%s15485_s7 + $0x640] sm:$0xff]  ;;  %v16755_v9 = vld [vmem:[#allocation112_spill] sm:$0xff] }
 0x5ae   : > { %6617 = vmatmul.msk.f32.gmra.mxu2 %vm16736_vm3, %v16735_v21  ;;  %16742 = vst [vmem:[#allocation80_spill] sm:$0xff] %v12776_v15  ;;  %v16743_v21 = vld [vmem:[#allocation108_spill] sm:$0xff]  ;;  %v4781_v22 = vrot.slane %v12776_v15, 7  ;;  %v3936_v42 = vadd.f32 %v16750_v14, %v3886_v60  ;;  %v4033_v26 = vadd.f32 %v12233_v28, %v3983_v63  ;;  %v16754_v60 = vld [vmem:[#allocation179_spill] sm:$0xff]  ;;  %v16758_v15 = vld [vmem:[#allocation42_spill] sm:$0xff] }
 0x5af   : > { %16747 = vst [vmem:[#allocation144_spill] sm:$0xff] %v12790_v1  ;;  %4478 = vmatpush.msra.mxu2 %v3125_v45  ;;  %v3839_v14 = vadd.f32 %v16754_v60, %v12729_v7  ;;  %v4784_v2 = vrot.slane %v12790_v1, 7  ;;  %v16757_v45 = vld [vmem:[#allocation188_spill] sm:$0xff]  ;;  %v16761_v60 = vld [vmem:[#allocation154_spill] sm:$0xff]  ;;  %v16762_v1 = vld [vmem:[#allocation191_spill] sm:$0xff] }
 0x5b1   : > { %v12771_v49 = vpop.f32.mrf.mxu2  ;;  %4561 = vmatmul.f32.gmra.mxu3 %v16701_v11  ;;  %v15862_v11 = vrot.slane %v12760_v35, 7 }
 0x5b3   : > { %6661 = vmatmul.msk.f32.gmra.mxu1 %vm16376_vm6, %v16743_v21  ;;  %v3789_v21 = vadd.f32 %v16749_v38, %v3739_v47  ;;  %vm16752_vm6 = vcmp.lt.s32.totalorder %v16751_v24, 1  ;;  %v12813_v63 = vpop.f32.mrf.mxu1 }
 0x5b4   : > { %v12801_v33 = vsel %vm16752_vm6, %v15862_v11, %v4781_v22  ;;  %v3889_v11 = vadd.f32 %v12550_v54, %v3839_v14  ;;  %v3122_v54 = vld [vmem:[%s15485_s7 + $0x628] sm:$0xff] }
 0x5b5   : > { %16753 = vst [vmem:[#allocation128_spill] sm:$0xff] %v12801_v33  ;;  %v4721_v47 = vmul.f32 0.1, %v3789_v21  ;;  %4479 = vmatpush.msra.mxu2 %v3122_v54  ;;  %v16767_v54 = vld [vmem:[#allocation43_spill] sm:$0xff] }
 0x5b6   : > { %6618 = vmatmul.msk.f32.gmra.mxu2 %vm16579_vm10, %v16746_v40  ;;  %v16756_v40 = vld [vmem:[#allocation160_spill] sm:$0xff]  ;;  %v3939_v46 = vadd.f32 %v16762_v1, %v3889_v11  ;;  %v16764_v11 = vld [vmem:[#allocation162_spill] sm:$0xff] }
 0x5b7   : > { %v3742_v38 = vadd.f32 %v16756_v40, %v12212_v57  ;;  %v16765_v1 = vld [vmem:[#allocation118_spill] sm:$0xff] }
 0x5b8   : > { %v16766_v40 = vld [vmem:[#allocation190_spill] sm:$0xff] }
 0x5b9   : > { %v4082_v6 = vpop.f32.mrf.mxu2  ;;  %6679 = vmatmul.msk.f32.vlgmr.msra.gmra.mxu3 %vm16707_vm7, %v12801_v33  ;;  %v3986_v33 = vadd.f32 %v16757_v45, %v3936_v42  ;;  %v12838_v42 = vpop.f32.mrf.mxu3 }
 0x5ba   : > { %v12811_v28 = vadd.f32 %v4082_v6, %v4033_v26  ;;  %v12828_v26 = vsel %vm16752_vm6, %v4781_v22, %v4784_v2  ;;  %v12830_v6 = vmax.f32 %v3789_v21, %v4721_v47 }
 0x5bb   : > { %6662 = vmatmul.msk.f32.gmra.mxu1 %vm16513_vm1, %v16755_v9  ;;  %16759 = vst [vmem:[#allocation39_spill] sm:$0xff] %v12828_v26  ;;  %v3792_v9 = vadd.f32 %v16761_v60, %v3742_v38  ;;  %v4036_v57 = vadd.f32 %v12290_v19, %v3986_v33  ;;  %v3745_v19 = vadd.f32 %v16764_v11, %v12263_v23  ;;  %v12855_v60 = vpop.f32.mrf.mxu1  ;;  %v16768_v23 = vld [vmem:[#allocation157_spill] sm:$0xff] }
 0x5bc   : > { %16760 = vst [vmem:[#allocation83_spill] sm:$0xff] %v12830_v6  ;;  %v3989_v38 = vadd.f32 %v16766_v40, %v3939_v46  ;;  %v4787_v45 = vrot.slane %v12830_v6, 7 }
 0x5bd   : > { %v4724_v33 = vmul.f32 0.1, %v3792_v9 }
 0x5be   : > { %6619 = vmatmul.msk.f32.gmra.mxu2 %vm16592_vm14, %v16758_v15  ;;  %v16763_v15 = vld [vmem:[#allocation184_spill] sm:$0xff]  ;;  %v4039_v46 = vadd.f32 %v12334_v37, %v3989_v38  ;;  %v12870_v11 = vsel %vm16752_vm6, %v4784_v2, %v4787_v45  ;;  %v16772_v2 = vld [vmem:[#allocation123_spill] sm:$0xff]  ;;  %v16773_v38 = vld [vmem:[#allocation165_spill] sm:$0xff]  ;;  %vm16776_vm6 = vnez %v16478_v36 }
 0x5bf   : > { %v3842_v22 = vadd.f32 %v16763_v15, %v12729_v7  ;;  %v12864_v15 = vmax.f32 %v3792_v9, %v4724_v33  ;;  %16770 = vst [vmem:[#allocation147_spill] sm:$0xff] %v12870_v11  ;;  %v16771_v9 = vld [vmem:[#allocation56_spill] sm:$0xff] }
 0x5c1   : > { %v4085_v14 = vpop.f32.mrf.mxu2  ;;  %6680 = vmatmul.msk.f32.gmra.mxu3 %vm7116_vm15, %v12828_v26  ;;  %v3892_v47 = vadd.f32 %v12574_v41, %v3842_v22  ;;  %v16769_v41 = vld [vmem:[#allocation192_spill] sm:$0xff] }
 0x5c2   : > { %v12845_v21 = vadd.f32 %v4085_v14, %v4036_v57  ;;  %v3119_v57 = vld [vmem:[%s15485_s7 + $0x610] sm:$0xff]  ;;  %v3795_v14 = vadd.f32 %v16768_v23, %v3745_v19  ;;  %v3845_v19 = vadd.f32 %v16771_v9, %v12729_v7  ;;  %v16774_v23 = vld [vmem:[#allocation193_spill] sm:$0xff]  ;;  %v16777_v9 = vld [vmem:[#allocation159_spill] sm:$0xff] }
 0x5c3   : > { %6663 = vmatmul.msk.f32.gmra.mxu1 %vm16272_vm4, %v16765_v1  ;;  %4480 = vmatpush.msra.mxu2 %v3119_v57  ;;  %v3942_v22 = vadd.f32 %v16769_v41, %v3892_v47  ;;  %v3356_v1 = vld [vmem:[%s15485_s7 + $0xd78] sm:$0xff]  ;;  %v12882_v47 = vpop.f32.mrf.mxu3  ;;  %v3748_v57 = vadd.f32 %v16773_v38, %v12308_v48  ;;  %vm16788_vm4 = vcmp.lt.s32.totalorder %v16751_v24, 1 }
 0x5c4   : > { %v4727_v37 = vmul.f32 0.1, %v3795_v14 }
 0x5c5   : > { %4665 = vmatpush.msrb.mxu2 %v3356_v1  ;;  %v3992_v41 = vadd.f32 %v16774_v23, %v3942_v22  ;;  %v4790_v1 = vrot.slane %v12864_v15, 7  ;;  %v3798_v26 = vadd.f32 %v16777_v9, %v3748_v57  ;;  %v3353_v22 = vld [vmem:[%s15485_s7 + $0xd60] sm:$0xff]  ;;  %v16785_v9 = vld [vmem:[#allocation68_spill] sm:$0xff] }
 0x5c6   : > { %6620 = vmatmul.msk.f32.gmra.mxu2 %vm16473_vm5, %v16767_v54  ;;  %v3895_v54 = vadd.f32 %v12607_v52, %v3845_v19 }
 0x5c7   : > { %v4042_v48 = vadd.f32 %v12384_v55, %v3992_v41  ;;  %4666 = vmatpush.msrb.mxu2 %v3353_v22  ;;  %v5137_v55 = vld [vmem:[%s15487_s9 + $0x4f0] sm:$0xff]  ;;  %v4730_v57 = vmul.f32 0.1, %v3798_v26 }
 0x5c8   : > { %5473 = vmatpush.msrb.mxu3 %v5137_v55  ;;  %v16792_v55 = vld [vmem:[#allocation89_spill] sm:$0xff] }
 0x5c9   : > { %v4088_v40 = vpop.f32.mrf.mxu2  ;;  %6681 = vmatmul.msk.f32.gmra.mxu3 %vm16719_vm8, %v12870_v11  ;;  %v16775_v11 = vld [vmem:[#allocation46_spill] sm:$0xff] }
 0x5ca   : > { %v12880_v33 = vadd.f32 %v4088_v40, %v4039_v46  ;;  %v12895_v46 = vmax.f32 %v3795_v14, %v4727_v37  ;;  %v12897_v40 = vpop.f32.mrf.mxu1  ;;  %v16781_v14 = vld [vmem:[#allocation59_spill] sm:$0xff] }
 0x5cb   : > { %6664 = vmatmul.msk.f32.gmra.mxu1 %vm16278_vm0, %v16772_v2  ;;  %v16778_v2 = vld [vmem:[#allocation63_spill] sm:$0xff]  ;;  %vm16779_vm0 = vcmp.lt.s32.totalorder %v16751_v24, 1  ;;  %v12930_v22 = vpop.f32.mrf.mxu3 }
 0x5cc   : > { %v3945_v6 = vadd.f32 %v16778_v2, %v3895_v54  ;;  %v12904_v52 = vsel %vm16779_vm0, %v4787_v45, %v4790_v1  ;;  %v16782_v45 = vld [vmem:[#allocation127_spill] sm:$0xff]  ;;  %vm16783_vm0 = vnez %v16401_v32  ;;  %v4793_v38 = vrot.slane %v12895_v46, 7  ;;  %v16784_v54 = vld [vmem:[#allocation169_spill] sm:$0xff] }
 0x5cd   : > { %16780 = vst [vmem:[#allocation156_spill] sm:$0xff] %v12904_v52  ;;  %v3751_v23 = vadd.f32 %v16784_v54, %v12343_v30 }
 0x5ce   : > { %6621 = vmatmul.msk.f32.gmra.mxu2 %vm16776_vm6, %v16775_v11  ;;  %v3848_v11 = vadd.f32 %v16781_v14, %v12729_v7  ;;  %v3995_v2 = vadd.f32 %v16785_v9, %v3945_v6  ;;  %v5133_v14 = vld [vmem:[%s15487_s9 + $0x4d0] sm:$0xff]  ;;  %v12940_v30 = vsel %vm16788_vm4, %v4790_v1, %v4793_v38  ;;  %v3350_v9 = vld [vmem:[%s15485_s7 + $0xd48] sm:$0xff]  ;;  %v5131_v1 = vld [vmem:[%s15487_s9 + $0x4c0] sm:$0xff]  ;;  %vm16798_vm4 = vnez %v16491_v8 }
 0x5cf   : > { %16789 = vst [vmem:[#allocation131_spill] sm:$0xff] %v12940_v30  ;;  %v16791_v6 = vld [vmem:[#allocation164_spill] sm:$0xff]  ;;  %4667 = vmatpush.msrb.mxu2 %v3350_v9 }
 0x5d0   : > { %v3898_v41 = vadd.f32 %v12633_v12, %v3848_v11  ;;  %v12942_v12 = vmax.f32 %v3798_v26, %v4730_v57  ;;  %v3801_v11 = vadd.f32 %v16791_v6, %v3751_v23  ;;  %v4045_v54 = vadd.f32 %v12428_v39, %v3995_v2  ;;  %v16793_v39 = vld [vmem:[#allocation115_spill] sm:$0xff]  ;;  %v5041_v2 = vld [vmem:[%s15487_s9 + $0x1f0] sm:$0xff] }
 0x5d1   : > { %v4091_v19 = vpop.f32.mrf.mxu2  ;;  %6682 = vmatmul.msk.f32.gmra.mxu3 %vm16561_vm2, %v12904_v52  ;;  %v3851_v23 = vadd.f32 %v16793_v39, %v12729_v7  ;;  %5323 = vmatpush.msrb.mxu0 %v5041_v2  ;;  %v5125_v2 = vld [vmem:[%s15487_s9 + $0x490] sm:$0xff]  ;;  %v16807_v52 = vld [vmem:[#allocation51_spill] sm:$0xff] }
 0x5d2   : > { %v12914_v37 = vadd.f32 %v4091_v19, %v4042_v48  ;;  %v5135_v48 = vld [vmem:[%s15487_s9 + $0x4e0] sm:$0xff]  ;;  %v16786_v19 = vld [vmem:[#allocation48_spill] sm:$0xff]  ;;  %16790 = vst [vmem:[#allocation31_spill] sm:$0xff] %v12942_v12  ;;  %v12956_v26 = vpop.f32.mrf.mxu1  ;;  %v4733_v9 = vmul.f32 0.1, %v3801_v11  ;;  %v4796_v39 = vrot.slane %v12942_v12, 7 }
 0x5d3   : > { %6665 = vmatmul.msk.f32.gmra.mxu1 %vm16783_vm0, %v16782_v45  ;;  %5474 = vmatpush.msrb.mxu3 %v5135_v48  ;;  %vm16787_vm0 = vnez %v16484_v61  ;;  %v3948_v45 = vadd.f32 %v16792_v55, %v3898_v41  ;;  %v3347_v48 = vld [vmem:[%s15485_s7 + $0xd30] sm:$0xff]  ;;  %v16909_v61 = vld [vmem:[#allocation97_spill] sm:$0xff] }
 0x5d4   : > { %v16795_v55 = vld [vmem:[#allocation132_spill] sm:$0xff]  ;;  %4668 = vmatpush.msrb.mxu2 %v3347_v48 }
 0x5d5   : > { %5475 = vmatpush.msrb.mxu3 %v5133_v14  ;;  %v16794_v14 = vld [vmem:[#allocation173_spill] sm:$0xff] }
 0x5d6   : > { %6622 = vmatmul.msk.f32.gmra.mxu2 %vm16787_vm0, %v16786_v19  ;;  %v5129_v19 = vld [vmem:[%s15487_s9 + $0x4b0] sm:$0xff]  ;;  %v3754_v6 = vadd.f32 %v16794_v14, %v12379_v50  ;;  %v5127_v50 = vld [vmem:[%s15487_s9 + $0x4a0] sm:$0xff] }
 0x5d7   : > { %5476 = vmatpush.msrb.mxu3 %v5131_v1  ;;  %v16796_v1 = vld [vmem:[#allocation126_spill] sm:$0xff] }
 0x5d8   : > { %v16797_v14 = vld [vmem:[#allocation50_spill] sm:$0xff] }
 0x5d9   : > { %v4094_v57 = vpop.f32.mrf.mxu2  ;;  %6683 = vmatmul.msk.f32.gmra.mxu3 %vm16736_vm3, %v12940_v30  ;;  %v5039_v30 = vld [vmem:[%s15487_s9 + $0x1e0] sm:$0xff] }
 0x5da   : > { %v12963_v41 = vadd.f32 %v4094_v57, %v4045_v54  ;;  %v3901_v54 = vadd.f32 %v12662_v5, %v3851_v23  ;;  %v3998_v57 = vadd.f32 %v16796_v1, %v3948_v45  ;;  %5477 = vmatpush.msrb.mxu3 %v5129_v19  ;;  %5324 = vmatpush.msrb.mxu0 %v5039_v30  ;;  %v5037_v5 = vld [vmem:[%s15487_s9 + $0x1d0] sm:$0xff]  ;;  %v12992_v23 = vpop.f32.mrf.mxu3 }
 0x5db   : > { %6666 = vmatmul.msk.f32.gmra.mxu1 %vm16291_vm13, %v16795_v55  ;;  %v16799_v45 = vld [vmem:[#allocation168_spill] sm:$0xff]  ;;  %v12997_v19 = vmax.f32 %v3801_v11, %v4733_v9  ;;  %v16801_v55 = vld [vmem:[#allocation114_spill] sm:$0xff]  ;;  %vm16802_vm13 = vcmp.lt.s32.totalorder %v16751_v24, 1 }
 0x5dc   : > { %v3804_v48 = vadd.f32 %v16799_v45, %v3754_v6  ;;  %5478 = vmatpush.msrb.mxu3 %v5127_v50  ;;  %v3951_v1 = vadd.f32 %v16801_v55, %v3901_v54  ;;  %v13003_v30 = vsel %vm16802_vm13, %v4793_v38, %v4796_v39  ;;  %v3344_v6 = vld [vmem:[%s15485_s7 + $0xd18] sm:$0xff]  ;;  %5325 = vmatpush.msrb.mxu0 %v5037_v5  ;;  %v5035_v50 = vld [vmem:[%s15487_s9 + $0x1c0] sm:$0xff]  ;;  %v16804_v38 = vld [vmem:[#allocation120_spill] sm:$0xff]  ;;  %v13024_v5 = vpop.f32.mrf.mxu1 }
 0x5dd   : > { %16800 = vst [vmem:[#allocation135_spill] sm:$0xff] %v12997_v19  ;;  %4669 = vmatpush.msrb.mxu2 %v3344_v6  ;;  %v3854_v11 = vadd.f32 %v16804_v38, %v12729_v7  ;;  %v5033_v54 = vld [vmem:[%s15487_s9 + $0x1b0] sm:$0xff]  ;;  %v16805_v55 = vld [vmem:[#allocation137_spill] sm:$0xff]  ;;  %v4799_v38 = vrot.slane %v12997_v19, 7 }
 0x5de   : > { %6623 = vmatmul.msk.f32.gmra.mxu2 %vm16798_vm4, %v16797_v14  ;;  %v4048_v14 = vadd.f32 %v12460_v56, %v3998_v57  ;;  %16803 = vst [vmem:[#allocation82_spill] sm:$0xff] %v13003_v30  ;;  %v5123_v56 = vld [vmem:[%s15487_s9 + $0x480] sm:$0xff]  ;;  %5479 = vmatpush.msrb.mxu3 %v5125_v2  ;;  %v4736_v57 = vmul.f32 0.1, %v3804_v48  ;;  %v5121_v6 = vld [vmem:[%s15487_s9 + $0x470] sm:$0xff] }
 0x5df   : > { %5326 = vmatpush.msrb.mxu0 %v5035_v50  ;;  %v3904_v2 = vadd.f32 %v12692_v0, %v3854_v11  ;;  %v4001_v50 = vadd.f32 %v12124_v4, %v3951_v1  ;;  %v5029_v0 = vld [vmem:[%s15487_s9 + $0x190] sm:$0xff] }
 0x5e0   : > { %5480 = vmatpush.msrb.mxu3 %v5123_v56  ;;  %v5117_v4 = vld [vmem:[%s15487_s9 + $0x450] sm:$0xff] }
 0x5e1   : > { %v4097_v45 = vpop.f32.mrf.mxu2  ;;  %6684 = vmatmul.msk.f32.gmra.mxu3 %vm16579_vm10, %v13003_v30  ;;  %5327 = vmatpush.msrb.mxu0 %v5033_v54  ;;  %v5031_v30 = vld [vmem:[%s15487_s9 + $0x1a0] sm:$0xff]  ;;  %v16809_v1 = vld [vmem:[#allocation172_spill] sm:$0xff] }
 0x5e2   : > { %v13019_v9 = vadd.f32 %v4097_v45, %v4048_v14  ;;  %v16806_v14 = vld [vmem:[#allocation177_spill] sm:$0xff]  ;;  %5481 = vmatpush.msrb.mxu3 %v5121_v6  ;;  %v16810_v11 = vld [vmem:[#allocation88_spill] sm:$0xff] }
 0x5e3   : > { %6667 = vmatmul.msk.f32.gmra.mxu1 %vm16297_vm9, %v16805_v55  ;;  %v3757_v45 = vadd.f32 %v16806_v14, %v12420_v25  ;;  %v5119_v55 = vld [vmem:[%s15487_s9 + $0x460] sm:$0xff]  ;;  %v13044_v25 = vmax.f32 %v3804_v48, %v4736_v57  ;;  %5328 = vmatpush.msrb.mxu0 %v5031_v30  ;;  %v3954_v54 = vadd.f32 %v16810_v11, %v3904_v2  ;;  %v3338_v30 = vld [vmem:[%s15485_s7 + $0xce8] sm:$0xff]  ;;  %v13065_v57 = vpop.f32.mrf.mxu3 }
 0x5e4   : > { %v4051_v14 = vadd.f32 %v12495_v18, %v4001_v50  ;;  %v3341_v48 = vld [vmem:[%s15485_s7 + $0xd00] sm:$0xff]  ;;  %5482 = vmatpush.msrb.mxu3 %v5119_v55 }
 0x5e5   : > { %16808 = vst [vmem:[#allocation85_spill] sm:$0xff] %v13044_v25  ;;  %v3807_v56 = vadd.f32 %v16809_v1, %v3757_v45  ;;  %4670 = vmatpush.msrb.mxu2 %v3341_v48  ;;  %v5027_v18 = vld [vmem:[%s15487_s9 + $0x180] sm:$0xff]  ;;  %v16812_v45 = vld [vmem:[#allocation67_spill] sm:$0xff]  ;;  %5329 = vmatpush.msrb.mxu0 %v5029_v0  ;;  %v4802_v55 = vrot.slane %v13044_v25, 7  ;;  %v5025_v1 = vld [vmem:[%s15487_s9 + $0x170] sm:$0xff]  ;;  %v4004_v12 = vadd.f32 %v12184_v58, %v3954_v54 }
 0x5e6   : > { %4481 = vmatmul.f32.vlgmr.msra.gmra.mxu2 %v16807_v52  ;;  %v13057_v52 = vsel %vm16802_vm13, %v4796_v39, %v4799_v38  ;;  %v5115_v39 = vld [vmem:[%s15487_s9 + $0x440] sm:$0xff]  ;;  %v3857_v2 = vadd.f32 %v16812_v45, %v12729_v7  ;;  %5483 = vmatpush.msrb.mxu3 %v5117_v4  ;;  %v16813_v48 = vld [vmem:[#allocation180_spill] sm:$0xff] }
 0x5e7   : > { %16811 = vst [vmem:[#allocation150_spill] sm:$0xff] %v13057_v52  ;;  %4671 = vmatpush.msrb.mxu2 %v3338_v30  ;;  %v4739_v11 = vmul.f32 0.1, %v3807_v56  ;;  %5330 = vmatpush.msrb.mxu0 %v5027_v18  ;;  %v5113_v0 = vld [vmem:[%s15487_s9 + $0x430] sm:$0xff]  ;;  %v5023_v4 = vld [vmem:[%s15487_s9 + $0x160] sm:$0xff]  ;;  %v13108_v18 = vpop.f32.mrf.mxu0 }
 0x5e8   : > { %v3907_v19 = vadd.f32 %v12712_v16, %v3857_v2  ;;  %5484 = vmatpush.msrb.mxu3 %v5115_v39  ;;  %v5111_v58 = vld [vmem:[%s15487_s9 + $0x420] sm:$0xff]  ;;  %v5021_v16 = vld [vmem:[%s15487_s9 + $0x150] sm:$0xff] }
 0x5e9   : > { %v4100_v6 = vpop.f32.mrf.mxu2  ;;  %6685 = vmatmul.msk.f32.gmra.mxu3 %vm16592_vm14, %v13057_v52  ;;  %v3760_v52 = vadd.f32 %v16813_v48, %v12441_v53  ;;  %5331 = vmatpush.msrb.mxu0 %v5025_v1  ;;  %v13097_v53 = vsel %vm16802_vm13, %v4799_v38, %v4802_v55  ;;  %v13105_v54 = vmax.f32 %v3807_v56, %v4739_v11  ;;  %v16817_v30 = vld [vmem:[#allocation176_spill] sm:$0xff]  ;;  %v16818_v39 = vld [vmem:[#allocation130_spill] sm:$0xff] }
 0x5ea   : > { %v13078_v50 = vadd.f32 %v4100_v6, %v4051_v14  ;;  %v16814_v14 = vld [vmem:[#allocation54_spill] sm:$0xff]  ;;  %16815 = vst [vmem:[#allocation136_spill] sm:$0xff] %v13097_v53  ;;  %5485 = vmatpush.msrb.mxu3 %v5113_v0  ;;  %v3957_v45 = vadd.f32 %v16818_v39, %v3907_v19  ;;  %v4054_v38 = vadd.f32 %v12527_v34, %v4004_v12  ;;  %v5109_v1 = vld [vmem:[%s15487_s9 + $0x410] sm:$0xff]  ;;  %v16820_v0 = vld [vmem:[#allocation141_spill] sm:$0xff] }
 0x5eb   : > { %16816 = vst [vmem:[#allocation33_spill] sm:$0xff] %v13105_v54  ;;  %v3810_v6 = vadd.f32 %v16817_v30, %v3760_v52  ;;  %5332 = vmatpush.msrb.mxu0 %v5023_v4  ;;  %v5019_v56 = vld [vmem:[%s15487_s9 + $0x140] sm:$0xff]  ;;  %v16819_v52 = vld [vmem:[#allocation93_spill] sm:$0xff]  ;;  %v13125_v34 = vpop.f32.mrf.mxu3  ;;  %v4805_v39 = vrot.slane %v13105_v54, 7 }
 0x5ec   : > { %v3860_v11 = vadd.f32 %v16819_v52, %v12729_v7  ;;  %5486 = vmatpush.msrb.mxu3 %v5111_v58  ;;  %v5107_v12 = vld [vmem:[%s15487_s9 + $0x400] sm:$0xff]  ;;  %v3332_v58 = vld [vmem:[%s15485_s7 + $0xcb8] sm:$0xff] }
 0x5ed   : > { %5333 = vmatpush.msrb.mxu0 %v5021_v16  ;;  %v4742_v48 = vmul.f32 0.1, %v3810_v6  ;;  %v5017_v16 = vld [vmem:[%s15487_s9 + $0x130] sm:$0xff] }
 0x5ee   : > { %4484 = vmatmul.f32.gmra.mxu2 %v16814_v14  ;;  %v3910_v4 = vadd.f32 %v16820_v0, %v3860_v11  ;;  %v16821_v14 = vld [vmem:[#allocation119_spill] sm:$0xff]  ;;  %5487 = vmatpush.msrb.mxu3 %v5109_v1  ;;  %v16825_v11 = vld [vmem:[#allocation106_spill] sm:$0xff] }
 0x5ef   : > { %v4007_v30 = vadd.f32 %v16821_v14, %v3957_v45  ;;  %5334 = vmatpush.msrb.mxu0 %v5019_v56  ;;  %v5015_v45 = vld [vmem:[%s15487_s9 + $0x120] sm:$0xff]  ;;  %v13146_v1 = vmax.f32 %v3810_v6, %v4742_v48  ;;  %v13152_v14 = vsel %vm16802_vm13, %v4802_v55, %v4805_v39  ;;  %v16827_v6 = vld [vmem:[#allocation71_spill] sm:$0xff] }
 0x5f0   : > { %5488 = vmatpush.msrb.mxu3 %v5107_v12  ;;  %v16824_v56 = vld [vmem:[#allocation74_spill] sm:$0xff]  ;;  %16826 = vst [vmem:[#allocation84_spill] sm:$0xff] %v13152_v14  ;;  %v5013_v12 = vld [vmem:[%s15487_s9 + $0x110] sm:$0xff]  ;;  %v3863_v48 = vadd.f32 %v16827_v6, %v12729_v7 }
 0x5f1   : > { %v4103_v2 = vpop.f32.mrf.mxu2  ;;  %6686 = vmatmul.msk.f32.gmra.mxu3 %vm16473_vm5, %v13097_v53  ;;  %5335 = vmatpush.msrb.mxu0 %v5017_v16  ;;  %16823 = vst [vmem:[#allocation139_spill] sm:$0xff] %v13146_v1  ;;  %v3960_v52 = vadd.f32 %v16824_v56, %v3910_v4  ;;  %v4057_v0 = vadd.f32 %v16825_v11, %v4007_v30  ;;  %v4212_v4 = vpop.f32.mrf.mxu0  ;;  %v5011_v30 = vld [vmem:[%s15487_s9 + $0x100] sm:$0xff]  ;;  %v4808_v11 = vrot.slane %v13146_v1, 7 }
 0x5f2   : > { %v13123_v19 = vadd.f32 %v4103_v2, %v4054_v38  ;;  %v3335_v38 = vld [vmem:[%s15485_s7 + $0xcd0] sm:$0xff]  ;;  %v16822_v2 = vld [vmem:[#allocation57_spill] sm:$0xff]  ;;  %v3913_v16 = vadd.f32 %v12771_v49, %v3863_v48 }
 0x5f3   : > { %4672 = vmatpush.msrb.mxu2 %v3335_v38  ;;  %v3329_v38 = vld [vmem:[%s15485_s7 + $0xca0] sm:$0xff]  ;;  %5336 = vmatpush.msrb.mxu0 %v5015_v45  ;;  %v3326_v45 = vld [vmem:[%s15485_s7 + $0xc88] sm:$0xff]  ;;  %v13176_v7 = vpop.f32.mrf.mxu3  ;;  %v16832_v49 = vld [vmem:[#allocation133_spill] sm:$0xff] }
 0x5f5   : > { %4673 = vmatpush.msrb.mxu2 %v3332_v58  ;;  %5337 = vmatpush.msrb.mxu0 %v5013_v12  ;;  %v16831_v12 = vld [vmem:[#allocation140_spill] sm:$0xff] }
 0x5f6   : > { %4487 = vmatmul.f32.gmra.mxu2 %v16822_v2  ;;  %v16828_v2 = vld [vmem:[#allocation98_spill] sm:$0xff]  ;;  %v3963_v6 = vadd.f32 %v16831_v12, %v3913_v16  ;;  %v3323_v16 = vld [vmem:[%s15485_s7 + $0xc70] sm:$0xff] }
 0x5f7   : > { %4674 = vmatpush.msrb.mxu2 %v3329_v38  ;;  %v4010_v56 = vadd.f32 %v16828_v2, %v3960_v52  ;;  %5338 = vmatpush.msrb.mxu0 %v5011_v30  ;;  %v16830_v38 = vld [vmem:[#allocation94_spill] sm:$0xff]  ;;  %v13185_v52 = vsel %vm16802_vm13, %v4805_v39, %v4808_v11 }
 0x5f8   : > { %16833 = vst [vmem:[#allocation152_spill] sm:$0xff] %v13185_v52  ;;  %v16836_v39 = vld [vmem:[#allocation62_spill] sm:$0xff] }
 0x5f9   : > { %v4106_v58 = vpop.f32.mrf.mxu2  ;;  %6687 = vmatmul.msk.f32.gmra.mxu3 %vm16776_vm6, %v13152_v14  ;;  %4675 = vmatpush.msrb.mxu2 %v3326_v45  ;;  %v4060_v48 = vadd.f32 %v16832_v49, %v4010_v56  ;;  %v16834_v45 = vld [vmem:[#allocation52_spill] sm:$0xff]  ;;  %v13193_v14 = vpop.f32.mrf.mxu0  ;;  %v16837_v12 = vld [vmem:[#allocation138_spill] sm:$0xff] }
 0x5fa   : > { %v13165_v55 = vadd.f32 %v4106_v58, %v4057_v0  ;;  %v16829_v0 = vld [vmem:[#allocation9_spill] sm:$0xff]  ;;  %v4133_v58 = vadd.f32 %v16830_v38, %v12811_v28  ;;  %v13199_v56 = vpop.f32.mrf.mxu1 }
 0x5fb   : > { %v16835_v28 = vld [vmem:[#allocation73_spill] sm:$0xff]  ;;  %4676 = vmatpush.msrb.mxu2 %v3323_v16 }
 0x5fc   : > { %v4013_v38 = vadd.f32 %v16835_v28, %v3963_v6  ;;  %v16840_v6 = vrot.slane %v12760_v35, 7  ;;  %v3320_v16 = vld [vmem:[%s15485_s7 + $0xc58] sm:$0xff]  ;;  %v3317_v35 = vld [vmem:[%s15485_s7 + $0xc40] sm:$0xff] }
 0x5fd   : > { %4677 = vmatpush.msrb.mxu2 %v3320_v16 }
 0x5fe   : > { %4490 = vmatmul.f32.gmra.mxu2 %v16829_v0  ;;  %v4183_v0 = vadd.f32 %v16834_v45, %v4133_v58  ;;  %v16839_v58 = vld [vmem:[#allocation111_spill] sm:$0xff]  ;;  %v13212_v28 = vsel %vm16802_vm13, %v4808_v11, %v16840_v6  ;;  %v16844_v6 = vld [vmem:[#allocation65_spill] sm:$0xff] }
 0x5ff   : > { %v4063_v45 = vadd.f32 %v16839_v58, %v4013_v38  ;;  %16841 = vst [vmem:[#allocation55_spill] sm:$0xff] %v13212_v28  ;;  %4678 = vmatpush.msrb.mxu2 %v3317_v35 }
 0x600   : > { %v4233_v49 = vadd.f32 %v16837_v12, %v4183_v0  ;;  %v16842_v12 = vld [vmem:[#allocation142_spill] sm:$0xff] }
 0x601   : > { %v4109_v2 = vpop.f32.mrf.mxu2  ;;  %6688 = vmatmul.msk.f32.gmra.mxu3 %vm16787_vm0, %v13185_v52  ;;  %v13205_v52 = vpop.f32.mrf.mxu3 }
 0x602   : > { %v13190_v30 = vadd.f32 %v4109_v2, %v4060_v48  ;;  %v16838_v48 = vld [vmem:[#allocation134_spill] sm:$0xff]  ;;  %v4716_v0 = vmul.f32 0.1, %v4233_v49  ;;  %v13222_v53 = vpop.f32.mrf.mxu0  ;;  %v4262_v1 = vpop.f32.mrf.mxu1 }
 0x603   : > { %v4136_v2 = vadd.f32 %v16838_v48, %v12845_v21  ;;  %v16843_v48 = vld [vmem:[#allocation23_spill] sm:$0xff] }
 0x604   : > { %v13228_v54 = vmax.f32 %v4233_v49, %v4716_v0  ;;  %v3314_v49 = vld [vmem:[%s15485_s7 + $0xc28] sm:$0xff] }
 0x605   : > { %v4186_v38 = vadd.f32 %v16842_v12, %v4136_v2  ;;  %4679 = vmatpush.msrb.mxu2 %v3314_v49  ;;  %v3311_v49 = vld [vmem:[%s15485_s7 + $0xc10] sm:$0xff] }
 0x606   : > { %4493 = vmatmul.f32.gmra.mxu2 %v16836_v39  ;;  %16845 = vst [vmem:[#allocation143_spill] sm:$0xff] %v13228_v54  ;;  %v4782_v35 = vrot.slane %v13228_v54, 7 }
 0x607   : > { %4680 = vmatpush.msrb.mxu2 %v3311_v49 }
 0x609   : > { %v4112_v39 = vpop.f32.mrf.mxu2  ;;  %6689 = vmatmul.msk.f32.gmra.mxu3 %vm16798_vm4, %v13212_v28  ;;  %v16846_v28 = vld [vmem:[#allocation117_spill] sm:$0xff] }
 0x60a   : > { %v4113_v21 = vadd.f32 %v4112_v39, %v4063_v45  ;;  %v4236_v16 = vadd.f32 %v16846_v28, %v4186_v38  ;;  %v16847_v45 = vld [vmem:[#allocation125_spill] sm:$0xff]  ;;  %v16851_v28 = vld [vmem:[#allocation79_spill] sm:$0xff] }
 0x60b   : > { %v4139_v39 = vadd.f32 %v16847_v45, %v12880_v33  ;;  %v16850_v33 = vld [vmem:[#allocation69_spill] sm:$0xff]  ;;  %v16852_v38 = vld [vmem:[#allocation103_spill] sm:$0xff] }
 0x60c   : > { %v4163_v58 = vadd.f32 %v16843_v48, %v4113_v21  ;;  %v13233_v21 = vpop.f32.mrf.mxu3  ;;  %v16848_v48 = vld [vmem:[#allocation101_spill] sm:$0xff] }
 0x60e   : > { %v4213_v11 = vadd.f32 %v4212_v4, %v4163_v58  ;;  %4496 = vmatmul.f32.gmra.mxu2 %v16844_v6  ;;  %v4189_v58 = vadd.f32 %v16848_v48, %v4139_v39  ;;  %v4719_v6 = vmul.f32 0.1, %v4236_v16  ;;  %v13252_v39 = vpop.f32.mrf.mxu0  ;;  %v16855_v48 = vld [vmem:[#allocation27_spill] sm:$0xff] }
 0x610   : > { %v4263_v2 = vadd.f32 %v4262_v1, %v4213_v11  ;;  %v4239_v0 = vadd.f32 %v16851_v28, %v4189_v58  ;;  %v4142_v11 = vadd.f32 %v16852_v38, %v12914_v37  ;;  %v13250_v45 = vmax.f32 %v4236_v16, %v4719_v6  ;;  %v16857_v28 = vld [vmem:[#allocation37_spill] sm:$0xff] }
 0x611   : > { %v13235_v12 = vpop.f32.mrf.mxu2  ;;  %5489 = vmatmul.f32.vlgmr.msrb.gmra.mxu3 %v13228_v54 }
 0x612   : > { %v4746_v4 = vmul.f32 0.1, %v4263_v2  ;;  %16853 = vst [vmem:[#allocation166_spill] sm:$0xff] %v13250_v45  ;;  %v4192_v37 = vadd.f32 %v16855_v48, %v4142_v11  ;;  %v4722_v58 = vmul.f32 0.1, %v4239_v0  ;;  %v4785_v6 = vrot.slane %v13250_v45, 7 }
 0x614   : > { %v13239_v25 = vmax.f32 %v4263_v2, %v4746_v4  ;;  %v13267_v16 = vpop.f32.mrf.mxu3  ;;  %v4242_v38 = vadd.f32 %v16857_v28, %v4192_v37  ;;  %v13277_v29 = vmax.f32 %v4239_v0, %v4722_v58  ;;  %v13281_v11 = vsel %vm16802_vm13, %v4782_v35, %v4785_v6  ;;  %v16861_v37 = vld [vmem:[#allocation145_spill] sm:$0xff]  ;;  %v16862_v0 = vld [vmem:[#allocation26_spill] sm:$0xff] }
 0x615   : > { %16860 = vst [vmem:[#allocation161_spill] sm:$0xff] %v13281_v11  ;;  %v16863_v58 = vld [vmem:[#allocation129_spill] sm:$0xff] }
 0x616   : > { %16849 = vst [vmem:[#allocation86_spill] sm:$0xff] %v13239_v25  ;;  %4499 = vmatmul.f32.gmra.mxu2 %v16850_v33  ;;  %v15895_v1 = vrot.slane %v13239_v25, 7  ;;  %v16856_v33 = vld [vmem:[#allocation25_spill] sm:$0xff]  ;;  %v13289_v49 = vpop.f32.mrf.mxu0  ;;  %v4725_v28 = vmul.f32 0.1, %v4242_v38  ;;  %v4148_v54 = vadd.f32 %v16863_v58, %v13019_v9 }
 0x617   : > { %16859 = vst [vmem:[#allocation91_spill] sm:$0xff] %v13277_v29 }
 0x618   : > { %v13258_v2 = vsel %vm16802_vm13, %v15895_v1, %v4782_v35  ;;  %v16858_v1 = vld [vmem:[#allocation75_spill] sm:$0xff]  ;;  %v13299_v31 = vmax.f32 %v4242_v38, %v4725_v28  ;;  %v16867_v38 = vld [vmem:[#allocation76_spill] sm:$0xff] }
 0x619   : > { %16854 = vst [vmem:[#allocation64_spill] sm:$0xff] %v13258_v2  ;;  %v13260_v4 = vpop.f32.mrf.mxu2  ;;  %6690 = vmatmul.msk.f32.vlgmr.msrb.gmra.mxu0 %vm16707_vm7, %v13258_v2  ;;  %5492 = vmatmul.f32.gmra.mxu3 %v13250_v45  ;;  %v4145_v2 = vadd.f32 %v16858_v1, %v12963_v41  ;;  %v4788_v41 = vrot.slane %v13277_v29, 7  ;;  %v16868_v28 = vld [vmem:[#allocation11_spill] sm:$0xff] }
 0x61a   : > { %16864 = vst [vmem:[#allocation38_spill] sm:$0xff] %v13299_v31  ;;  %v4791_v9 = vrot.slane %v13299_v31, 7 }
 0x61c   : > { %v13293_v1 = vpop.f32.mrf.mxu3 }
 0x61e   : > { %4502 = vmatmul.f32.gmra.mxu2 %v16856_v33  ;;  %v4195_v33 = vadd.f32 %v16861_v37, %v4145_v2  ;;  %v16866_v2 = vld [vmem:[#allocation49_spill] sm:$0xff] }
 0x61f   : > { %v4198_v37 = vadd.f32 %v16866_v2, %v4148_v54 }
 0x620   : > { %v4245_v35 = vadd.f32 %v12813_v63, %v4195_v33  ;;  %v13312_v33 = vpop.f32.mrf.mxu0 }
 0x621   : > { %v13283_v48 = vpop.f32.mrf.mxu2  ;;  %6691 = vmatmul.msk.f32.gmra.mxu0 %vm7116_vm15, %v13281_v11  ;;  %5495 = vmatmul.f32.gmra.mxu3 %v13277_v29  ;;  %v13303_v11 = vsel %vm16802_vm13, %v4785_v6, %v4788_v41  ;;  %v4248_v6 = vadd.f32 %v12855_v60, %v4198_v37  ;;  %v16871_v60 = vld [vmem:[#allocation148_spill] sm:$0xff] }
 0x622   : > { %16865 = vst [vmem:[#allocation96_spill] sm:$0xff] %v13303_v11  ;;  %v4728_v63 = vmul.f32 0.1, %v4245_v35 }
 0x623   : > { %v4731_v37 = vmul.f32 0.1, %v4248_v6 }
 0x624   : > { %v13319_v58 = vpop.f32.mrf.mxu3  ;;  %v13321_v13 = vmax.f32 %v4245_v35, %v4728_v63  ;;  %v16872_v35 = vld [vmem:[#allocation53_spill] sm:$0xff] }
 0x625   : > { %v16873_v63 = vld [vmem:[#allocation77_spill] sm:$0xff] }
 0x626   : > { %4505 = vmatmul.f32.gmra.mxu2 %v16862_v0  ;;  %v4151_v0 = vadd.f32 %v16868_v28, %v13078_v50  ;;  %16869 = vst [vmem:[#allocation163_spill] sm:$0xff] %v13321_v13  ;;  %v4794_v50 = vrot.slane %v13321_v13, 7  ;;  %v4154_v28 = vadd.f32 %v16873_v63, %v13123_v19  ;;  %v16880_v63 = vld [vmem:[#allocation22_spill] sm:$0xff] }
 0x628   : > { %v4201_v2 = vadd.f32 %v16871_v60, %v4151_v0 }
 0x629   : > { %v13305_v45 = vpop.f32.mrf.mxu2  ;;  %6692 = vmatmul.msk.f32.gmra.mxu0 %vm16719_vm8, %v13303_v11  ;;  %5498 = vmatmul.f32.gmra.mxu3 %v13299_v31  ;;  %v13325_v11 = vsel %vm16802_vm13, %v4788_v41, %v4791_v9  ;;  %v13341_v31 = vmax.f32 %v4248_v6, %v4731_v37  ;;  %v13357_v6 = vpop.f32.mrf.mxu1  ;;  %v16877_v37 = vld [vmem:[#allocation81_spill] sm:$0xff] }
 0x62a   : > { %16870 = vst [vmem:[#allocation40_spill] sm:$0xff] %v13325_v11  ;;  %v4251_v41 = vadd.f32 %v12897_v40, %v4201_v2  ;;  %v16876_v40 = vld [vmem:[#allocation30_spill] sm:$0xff] }
 0x62b   : > { %16874 = vst [vmem:[#allocation100_spill] sm:$0xff] %v13341_v31  ;;  %v4204_v60 = vadd.f32 %v16876_v40, %v4154_v28  ;;  %v4797_v19 = vrot.slane %v13341_v31, 7 }
 0x62c   : > { %v13347_v10 = vpop.f32.mrf.mxu3  ;;  %v4734_v2 = vmul.f32 0.1, %v4251_v41 }
 0x62e   : > { %4508 = vmatmul.f32.gmra.mxu2 %v16867_v38  ;;  %v13335_v38 = vpop.f32.mrf.mxu0  ;;  %v13365_v62 = vmax.f32 %v4251_v41, %v4734_v2  ;;  %v16885_v2 = vld [vmem:[#allocation44_spill] sm:$0xff] }
 0x630   : > { %16881 = vst [vmem:[#allocation41_spill] sm:$0xff] %v13365_v62  ;;  %v4800_v41 = vrot.slane %v13365_v62, 7 }
 0x631   : > { %v13327_v54 = vpop.f32.mrf.mxu2  ;;  %6693 = vmatmul.msk.f32.gmra.mxu0 %vm16561_vm2, %v13325_v11  ;;  %5501 = vmatmul.f32.gmra.mxu3 %v13321_v13  ;;  %v13345_v11 = vsel %vm16802_vm13, %v4791_v9, %v4794_v50  ;;  %v16878_v9 = vld [vmem:[#allocation13_spill] sm:$0xff]  ;;  %v4157_v13 = vadd.f32 %v16880_v63, %v13165_v55  ;;  %v5156_v63 = vld [vmem:[%s15487_s9 + $0x588] sm:$0xff] }
 0x632   : > { %16875 = vst [vmem:[#allocation167_spill] sm:$0xff] %v13345_v11  ;;  %vm16879_vm13 = vnez %v16878_v9  ;;  %v15062_v9 = vld [vmem:[%s15488_s10] sm:$0x3] }
 0x633   : > { %17081 = vst [vmem:[#allocation71_spill] sm:$0xff] %v15062_v9 }
 0x636   : > { %4511 = vmatmul.f32.gmra.mxu2 %v16872_v35  ;;  %v4254_v35 = vadd.f32 %v12956_v26, %v4204_v60  ;;  %v16884_v26 = vld [vmem:[#allocation151_spill] sm:$0xff] }
 0x637   : > { %v4207_v60 = vadd.f32 %v16884_v26, %v4157_v13 }
 0x638   : > { %v4737_v55 = vmul.f32 0.1, %v4254_v35 }
 0x639   : > { %v13349_v0 = vpop.f32.mrf.mxu2  ;;  %6694 = vmatmul.msk.f32.gmra.mxu0 %vm16736_vm3, %v13345_v11  ;;  %5504 = vmatmul.f32.gmra.mxu3 %v13341_v31  ;;  %v13367_v11 = vpop.f32.mrf.mxu0  ;;  %vm16882_vm3 = vcmp.lt.s32.totalorder %v16751_v24, 1  ;;  %v4257_v31 = vadd.f32 %v13024_v5, %v4207_v60 }
 0x63a   : > { %v13371_v28 = vsel %vm16882_vm3, %v4794_v50, %v4797_v19  ;;  %v13386_v50 = vpop.f32.mrf.mxu1  ;;  %v13391_v29 = vmax.f32 %v4254_v35, %v4737_v55  ;;  %v13395_v13 = vsel %vm16882_vm3, %v4797_v19, %v4800_v41  ;;  %v16891_v35 = vld [vmem:[#allocation47_spill] sm:$0xff]  ;;  %v16892_v19 = vld [vmem:[#allocation17_spill] sm:$0xff] }
 0x63b   : > { %16883 = vst [vmem:[#allocation105_spill] sm:$0xff] %v13371_v28  ;;  %v4740_v60 = vmul.f32 0.1, %v4257_v31  ;;  %vm16893_vm3 = vnez %v16892_v19 }
 0x63c   : > { %16888 = vst [vmem:[#allocation170_spill] sm:$0xff] %v13391_v29 }
 0x63d   : > { %16889 = vst [vmem:[#allocation70_spill] sm:$0xff] %v13395_v13 }
 0x63e   : > { %6668 = vmatmul.msk.f32.vlgmr.msrb.gmra.mxu2 %vm16879_vm13, %v16877_v37  ;;  %v13380_v37 = vpop.f32.mrf.mxu3 }
 0x641   : > { %v13373_v40 = vpop.f32.mrf.mxu2  ;;  %6695 = vmatmul.msk.f32.gmra.mxu0 %vm16579_vm10, %v13371_v28  ;;  %5507 = vmatmul.f32.gmra.mxu3 %v13365_v62  ;;  %v4160_v28 = vadd.f32 %v16887_v27, %v13190_v30  ;;  %v4803_v27 = vrot.slane %v13391_v29, 7  ;;  %v13413_v62 = vmax.f32 %v4257_v31, %v4740_v60  ;;  %vm16936_vm10 = vcmp.lt.s32.totalorder %v16751_v24, 7 }
 0x642   : > { %v13419_v44 = vpop.f32.mrf.mxu1 }
 0x643   : > { %v4210_v5 = vadd.f32 %v13108_v18, %v4160_v28  ;;  %16894 = vst [vmem:[#allocation174_spill] sm:$0xff] %v13413_v62  ;;  %v4806_v31 = vrot.slane %v13413_v62, 7 }
 0x645   : > { %v4260_v55 = vadd.f32 %v13199_v56, %v4210_v5  ;;  %v16897_v56 = vld [vmem:[#allocation87_spill] sm:$0xff]  ;;  %v5097_v5 = vld [vmem:[%s15487_s9 + $0x3b0] sm:$0xff] }
 0x646   : > { %6669 = vmatmul.msk.f32.gmra.mxu2 %vm16661_vm11, %v16885_v2  ;;  %v13403_v2 = vpop.f32.mrf.mxu0  ;;  %v13407_v30 = vpop.f32.mrf.mxu3 }
 0x647   : > { %16890 = vst [vmem:[#allocation109_spill] sm:$0xff] %v13407_v30  ;;  %v4743_v28 = vmul.f32 0.1, %v4260_v55  ;;  %v16905_v30 = vld [vmem:[#allocation36_spill] sm:$0xff] }
 0x649   : > { %v13397_v26 = vpop.f32.mrf.mxu2  ;;  %6696 = vmatmul.msk.f32.gmra.mxu0 %vm16592_vm14, %v13395_v13  ;;  %5510 = vmatmul.f32.gmra.mxu3 %v13391_v29  ;;  %vm16895_vm14 = vcmp.lt.s32.totalorder %v16751_v24, 1  ;;  %v13438_v29 = vmax.f32 %v4260_v55, %v4743_v28  ;;  %v5103_v55 = vld [vmem:[%s15487_s9 + $0x3e0] sm:$0xff] }
 0x64a   : > { %v13417_v13 = vsel %vm16895_vm14, %v4800_v41, %v4803_v27  ;;  %v5105_v41 = vld [vmem:[%s15487_s9 + $0x3f0] sm:$0xff]  ;;  %v13458_v28 = vpop.f32.mrf.mxu1 }
 0x64b   : > { %16896 = vst [vmem:[#allocation45_spill] sm:$0xff] %v13417_v13  ;;  %5423 = vmatpush.msra.mxu2 %v5105_v41  ;;  %v4809_v41 = vrot.slane %v13438_v29, 7 }
 0x64c   : > { %16900 = vst [vmem:[#allocation178_spill] sm:$0xff] %v13438_v29 }
 0x64d   : > { %5424 = vmatpush.msra.mxu2 %v5103_v55  ;;  %v16903_v55 = vld [vmem:[#allocation5_spill] sm:$0xff] }
 0x64e   : > { %6670 = vmatmul.msk.f32.gmra.mxu2 %vm16893_vm3, %v16891_v35  ;;  %v13427_v35 = vpop.f32.mrf.mxu0  ;;  %v13436_v60 = vpop.f32.mrf.mxu3 }
 0x64f   : > { %16899 = vst [vmem:[#allocation113_spill] sm:$0xff] %v13436_v60  ;;  %v16902_v60 = vld [vmem:[#allocation92_spill] sm:$0xff] }
 0x651   : > { %v13421_v18 = vpop.f32.mrf.mxu2  ;;  %6697 = vmatmul.msk.f32.gmra.mxu0 %vm16473_vm5, %v13417_v13  ;;  %5513 = vmatmul.f32.gmra.mxu3 %v13413_v62  ;;  %v6876_v13 = vld [vmem:[%s15486_s8] sm:$0x7]  ;;  %v13447_v62 = vsel %vm16895_vm14, %v4803_v27, %v4806_v31  ;;  %vm16904_vm14 = vnez %v16903_v55  ;;  %vm16921_vm5 = vnez %v16412_v43  ;;  %v5146_v55 = vld [vmem:[%s15487_s9 + $0x538] sm:$0xff] }
 0x652   : > { %v13443_v20 = vperm.slane %v6876_v13, 2  ;;  %16901 = vst [vmem:[#allocation29_spill] sm:$0xff] %v13447_v62  ;;  %v5101_v13 = vld [vmem:[%s15487_s9 + $0x3d0] sm:$0xff] }
 0x653   : > { %5425 = vmatpush.msra.mxu2 %v5101_v13 }
 0x654   : > { %v4283_v27 = vadd.f32 %v13235_v12, %v13443_v20 }
 0x656   : > { %6671 = vmatmul.msk.f32.gmra.mxu2 %vm16676_vm12, %v16897_v56  ;;  %v13469_v36 = vpop.f32.mrf.mxu0  ;;  %v4333_v12 = vadd.f32 %v16905_v30, %v4283_v27  ;;  %v4286_v30 = vadd.f32 %v13260_v4, %v13443_v20  ;;  %v4444_v27 = vpop.f32.mrf.mxu1  ;;  %v16910_v4 = vld [vmem:[#allocation122_spill] sm:$0xff] }
 0x659   : > { %v13449_v56 = vpop.f32.mrf.mxu2  ;;  %6698 = vmatmul.msk.f32.gmra.mxu0 %vm16776_vm6, %v13447_v62  ;;  %5516 = vmatmul.f32.gmra.mxu3 %v13438_v29  ;;  %v5099_v62 = vld [vmem:[%s15487_s9 + $0x3c0] sm:$0xff]  ;;  %vm16906_vm6 = vcmp.lt.s32.totalorder %v16751_v24, 1  ;;  %v13482_v29 = vpop.f32.mrf.mxu3 }
 0x65a   : > { %5426 = vmatpush.msra.mxu2 %v5099_v62  ;;  %v13480_v13 = vsel %vm16906_vm6, %v4806_v31, %v4809_v41  ;;  %16908 = vst [vmem:[#allocation181_spill] sm:$0xff] %v13482_v29  ;;  %v5095_v62 = vld [vmem:[%s15487_s9 + $0x3a0] sm:$0xff]  ;;  %v4383_v31 = vadd.f32 %v13193_v14, %v4333_v12  ;;  %v4336_v29 = vadd.f32 %v16910_v4, %v4286_v30  ;;  %v16911_v12 = vrot.slane %v13239_v25, 7 }
 0x65b   : > { %16907 = vst [vmem:[#allocation32_spill] sm:$0xff] %v13480_v13  ;;  %v16913_v4 = vld [vmem:[#allocation102_spill] sm:$0xff] }
 0x65c   : > { %5427 = vmatpush.msra.mxu2 %v5097_v5  ;;  %v4433_v14 = vadd.f32 %v13357_v6, %v4383_v31  ;;  %v5087_v6 = vld [vmem:[%s15487_s9 + $0x360] sm:$0xff]  ;;  %v4386_v30 = vadd.f32 %v13222_v53, %v4336_v29  ;;  %v5085_v31 = vld [vmem:[%s15487_s9 + $0x350] sm:$0xff] }
 0x65d   : > { %v5081_v29 = vld [vmem:[%s15487_s9 + $0x330] sm:$0xff] }
 0x65e   : > { %6672 = vmatmul.msk.f32.gmra.mxu2 %vm16904_vm14, %v16902_v60  ;;  %v5093_v60 = vld [vmem:[%s15487_s9 + $0x390] sm:$0xff]  ;;  %v13505_v5 = vpop.f32.mrf.mxu0 }
 0x65f   : > { %5428 = vmatpush.msra.mxu2 %v5095_v62  ;;  %v13513_v62 = vsel %vm16906_vm6, %v4809_v41, %v16911_v12  ;;  %v4289_v41 = vadd.f32 %v13283_v48, %v13443_v20  ;;  %vm16914_vm6 = vnez %v16271_v51  ;;  %v4436_v48 = vadd.f32 %v13386_v50, %v4386_v30  ;;  %v5077_v30 = vld [vmem:[%s15487_s9 + $0x310] sm:$0xff]  ;;  %v17120_v51 = vld [vmem:[#allocation45_spill] sm:$0xff] }
 0x660   : > { %16912 = vst [vmem:[#allocation90_spill] sm:$0xff] %v13513_v62 }
 0x661   : > { %v13484_v19 = vpop.f32.mrf.mxu2  ;;  %6699 = vmatmul.msk.f32.gmra.mxu0 %vm16787_vm0, %v13480_v13  ;;  %5519 = vmatmul.f32.gmra.mxu3 %v13239_v25  ;;  %v5091_v13 = vld [vmem:[%s15487_s9 + $0x380] sm:$0xff]  ;;  %vm16919_vm0 = vnez %v16401_v32 }
 0x662   : > { %5429 = vmatpush.msra.mxu2 %v5093_v60 }
 0x664   : > { %5430 = vmatpush.msra.mxu2 %v5091_v13  ;;  %v4447_v13 = vpop.f32.mrf.mxu1 }
 0x666   : > { %6673 = vmatmul.msk.f32.gmra.mxu2 %vm16513_vm1, %v16909_v61  ;;  %v5089_v61 = vld [vmem:[%s15487_s9 + $0x370] sm:$0xff] }
 0x667   : > { %5431 = vmatpush.msra.mxu2 %v5089_v61  ;;  %v13543_v61 = vpop.f32.mrf.mxu0 }
 0x669   : > { %v4482_v59 = vpop.f32.mrf.mxu2  ;;  %6700 = vmatmul.msk.f32.gmra.mxu0 %vm16798_vm4, %v13513_v62  ;;  %5432 = vmatpush.msra.mxu2 %v5087_v6  ;;  %vm16917_vm4 = vnez %v16393_v3 }
 0x66a   : > { %v13521_v60 = vadd.f32 %v4482_v59, %v4433_v14  ;;  %v5083_v59 = vld [vmem:[%s15487_s9 + $0x340] sm:$0xff]  ;;  %v16915_v14 = vld [vmem:[#allocation28_spill] sm:$0xff] }
 0x66b   : > { %5433 = vmatpush.msra.mxu2 %v5085_v31  ;;  %v4339_v12 = vadd.f32 %v16915_v14, %v4289_v41  ;;  %v4292_v41 = vadd.f32 %v13305_v45, %v13443_v20  ;;  %v16916_v31 = vld [vmem:[#allocation107_spill] sm:$0xff] }
 0x66d   : > { %5434 = vmatpush.msra.mxu2 %v5083_v59  ;;  %v4389_v50 = vadd.f32 %v13252_v39, %v4339_v12  ;;  %v5075_v59 = vld [vmem:[%s15487_s9 + $0x300] sm:$0xff]  ;;  %v4342_v14 = vadd.f32 %v12838_v42, %v4292_v41 }
 0x66e   : > { %6674 = vmatmul.msk.f32.gmra.mxu2 %vm16914_vm6, %v16913_v4  ;;  %v5079_v4 = vld [vmem:[%s15487_s9 + $0x320] sm:$0xff] }
 0x66f   : > { %5435 = vmatpush.msra.mxu2 %v5081_v29  ;;  %v4439_v45 = vadd.f32 %v13419_v44, %v4389_v50  ;;  %v13566_v29 = vpop.f32.mrf.mxu0 }
 0x671   : > { %v4485_v53 = vpop.f32.mrf.mxu2  ;;  %5436 = vmatpush.msra.mxu2 %v5079_v4  ;;  %v4392_v4 = vadd.f32 %v13289_v49, %v4342_v14  ;;  %v16920_v49 = vld [vmem:[#allocation116_spill] sm:$0xff] }
 0x672   : > { %v13545_v6 = vadd.f32 %v4485_v53, %v4436_v48  ;;  %v4450_v48 = vpop.f32.mrf.mxu1  ;;  %v4295_v53 = vadd.f32 %v13327_v54, %v13443_v20 }
 0x673   : > { %5437 = vmatpush.msra.mxu2 %v5077_v30  ;;  %v4442_v44 = vadd.f32 %v13458_v28, %v4392_v4 }
 0x674   : > { %v4345_v42 = vadd.f32 %v12882_v47, %v4295_v53 }
 0x675   : > { %5438 = vmatpush.msra.mxu2 %v5075_v59  ;;  %v4298_v59 = vadd.f32 %v13349_v0, %v13443_v20  ;;  %v4301_v0 = vadd.f32 %v13373_v40, %v13443_v20 }
 0x676   : > { %6675 = vmatmul.msk.f32.gmra.mxu2 %vm16917_vm4, %v16916_v31  ;;  %v16918_v31 = vld [vmem:[#allocation110_spill] sm:$0xff]  ;;  %v4395_v54 = vadd.f32 %v13312_v33, %v4345_v42 }
 0x677   : > { %v4348_v47 = vadd.f32 %v12930_v22, %v4298_v59  ;;  %v5167_v33 = vld [vmem:[%s15487_s9 + $0x5e0] sm:$0xff]  ;;  %v5165_v22 = vld [vmem:[%s15487_s9 + $0x5d0] sm:$0xff] }
 0x678   : > { %v4445_v14 = vadd.f32 %v4444_v27, %v4395_v54  ;;  %v5163_v42 = vld [vmem:[%s15487_s9 + $0x5c0] sm:$0xff]  ;;  %v5161_v59 = vld [vmem:[%s15487_s9 + $0x5b0] sm:$0xff] }
 0x679   : > { %v4488_v39 = vpop.f32.mrf.mxu2  ;;  %v4398_v4 = vadd.f32 %v13335_v38, %v4348_v47  ;;  %v4351_v38 = vadd.f32 %v12992_v23, %v4301_v0  ;;  %v5159_v47 = vld [vmem:[%s15487_s9 + $0x5a0] sm:$0xff]  ;;  %v5261_v0 = vld [vmem:[%s15487_s9 + $0x8d0] sm:$0xff] }
 0x67a   : > { %v13564_v12 = vadd.f32 %v4488_v39, %v4439_v45  ;;  %v13578_v30 = vpop.f32.mrf.mxu1  ;;  %v13583_v45 = vpop.f32.mrf.mxu0  ;;  %v5169_v39 = vld [vmem:[%s15487_s9 + $0x5f0] sm:$0xff] }
 0x67b   : > { %5523 = vmatpush.msra.mxu0 %v5169_v39  ;;  %v4448_v40 = vadd.f32 %v4447_v13, %v4398_v4  ;;  %v4401_v23 = vadd.f32 %v13367_v11, %v4351_v38  ;;  %v5265_v13 = vld [vmem:[%s15487_s9 + $0x8f0] sm:$0xff]  ;;  %v5155_v11 = vld [vmem:[%s15487_s9 + $0x580] sm:$0xff] }
 0x67c   : > { %5673 = vmatpush.msra.mxu3 %v5265_v13  ;;  %v16923_v39 = vld [vmem:[#allocation80_spill] sm:$0xff] }
 0x67d   : > { %5524 = vmatpush.msra.mxu0 %v5167_v33  ;;  %v5263_v33 = vld [vmem:[%s15487_s9 + $0x8e0] sm:$0xff]  ;;  %v16924_v13 = vld [vmem:[#allocation144_spill] sm:$0xff] }
 0x67e   : > { %6676 = vmatmul.msk.f32.gmra.mxu2 %vm16919_vm0, %v16918_v31  ;;  %v16922_v31 = vld [vmem:[#allocation121_spill] sm:$0xff]  ;;  %5674 = vmatpush.msra.mxu3 %v5263_v33 }
 0x67f   : > { %5525 = vmatpush.msra.mxu0 %v5165_v22  ;;  %v4451_v22 = vadd.f32 %v4450_v48, %v4401_v23  ;;  %v4307_v48 = vadd.f32 %v13421_v18, %v13443_v20  ;;  %v5255_v18 = vld [vmem:[%s15487_s9 + $0x8a0] sm:$0xff] }
 0x680   : > { %5675 = vmatpush.msra.mxu3 %v5261_v0 }
 0x681   : > { %v4491_v41 = vpop.f32.mrf.mxu2  ;;  %5526 = vmatpush.msra.mxu0 %v5163_v42  ;;  %v5153_v42 = vld [vmem:[%s15487_s9 + $0x570] sm:$0xff]  ;;  %v4357_v33 = vadd.f32 %v13125_v34, %v4307_v48  ;;  %v5143_v34 = vld [vmem:[%s15487_s9 + $0x520] sm:$0xff] }
 0x682   : > { %v13576_v50 = vadd.f32 %v4491_v41, %v4442_v44  ;;  %v13603_v27 = vpop.f32.mrf.mxu1  ;;  %v13611_v44 = vpop.f32.mrf.mxu0  ;;  %v5249_v48 = vld [vmem:[%s15487_s9 + $0x870] sm:$0xff] }
 0x683   : > { %5527 = vmatpush.msra.mxu0 %v5161_v59 }
 0x685   : > { %5528 = vmatpush.msra.mxu0 %v5159_v47  ;;  %v5257_v47 = vld [vmem:[%s15487_s9 + $0x8b0] sm:$0xff] }
 0x686   : > { %6677 = vmatmul.msk.f32.gmra.mxu2 %vm16921_vm5, %v16920_v49  ;;  %v13619_v49 = vpop.f32.mrf.mxu3 }
 0x689   : > { %v4494_v28 = vpop.f32.mrf.mxu2 }
 0x68a   : > { %v13592_v53 = vadd.f32 %v4494_v28, %v4445_v14  ;;  %v4304_v14 = vadd.f32 %v13397_v26, %v13443_v20  ;;  %v5157_v28 = vld [vmem:[%s15487_s9 + $0x590] sm:$0xff]  ;;  %v13637_v26 = vpop.f32.mrf.mxu1  ;;  %v13649_v38 = vpop.f32.mrf.mxu0 }
 0x68b   : > { %5529 = vmatpush.msra.mxu0 %v5157_v28  ;;  %v5253_v28 = vld [vmem:[%s15487_s9 + $0x890] sm:$0xff] }
 0x68c   : > { %v4354_v4 = vadd.f32 %v13065_v57, %v4304_v14  ;;  %v5151_v57 = vld [vmem:[%s15487_s9 + $0x560] sm:$0xff]  ;;  %v5149_v14 = vld [vmem:[%s15487_s9 + $0x550] sm:$0xff] }
 0x68d   : > { %5530 = vmatpush.msra.mxu0 %v5155_v11 }
 0x68e   : > { %6678 = vmatmul.msk.f32.gmra.mxu2 %vm16297_vm9, %v16922_v31  ;;  %v4404_v59 = vadd.f32 %v13403_v2, %v4354_v4  ;;  %v13668_v23 = vpop.f32.mrf.mxu3  ;;  %v5147_v2 = vld [vmem:[%s15487_s9 + $0x540] sm:$0xff] }
 0x68f   : > { %5531 = vmatpush.msra.mxu0 %v5153_v42  ;;  %v5251_v42 = vld [vmem:[%s15487_s9 + $0x880] sm:$0xff] }
 0x690   : > { %v4454_v11 = vadd.f32 %v13578_v30, %v4404_v59  ;;  %v5141_v59 = vld [vmem:[%s15487_s9 + $0x510] sm:$0xff] }
 0x691   : > { %v4497_v41 = vpop.f32.mrf.mxu2  ;;  %5532 = vmatpush.msra.mxu0 %v5151_v57  ;;  %v4407_v57 = vadd.f32 %v13427_v35, %v4357_v33  ;;  %v5139_v35 = vld [vmem:[%s15487_s9 + $0x500] sm:$0xff]  ;;  %v5245_v33 = vld [vmem:[%s15487_s9 + $0x850] sm:$0xff] }
 0x692   : > { %v13617_v54 = vadd.f32 %v4497_v41, %v4448_v40  ;;  %v5259_v41 = vld [vmem:[%s15487_s9 + $0x8c0] sm:$0xff]  ;;  %v13682_v0 = vpop.f32.mrf.mxu1  ;;  %v13695_v30 = vpop.f32.mrf.mxu0 }
 0x693   : > { %5676 = vmatpush.msra.mxu3 %v5259_v41  ;;  %5533 = vmatpush.msra.mxu0 %v5149_v14  ;;  %v4310_v41 = vadd.f32 %v13449_v56, %v13443_v20  ;;  %v5247_v14 = vld [vmem:[%s15487_s9 + $0x860] sm:$0xff] }
 0x695   : > { %5677 = vmatpush.msra.mxu3 %v5257_v47  ;;  %5534 = vmatpush.msra.mxu0 %v5147_v2  ;;  %v16925_v47 = vld [vmem:[#allocation83_spill] sm:$0xff]  ;;  %v4457_v2 = vadd.f32 %v13603_v27, %v4407_v57  ;;  %v4313_v27 = vadd.f32 %v13484_v19, %v13443_v20  ;;  %v5239_v57 = vld [vmem:[%s15487_s9 + $0x820] sm:$0xff]  ;;  %v5233_v20 = vld [vmem:[%s15487_s9 + $0x7f0] sm:$0xff] }
 0x696   : > { %5439 = vmatmul.f32.vlgmr.msra.gmra.mxu2 %v16923_v39  ;;  %v13710_v56 = vpop.f32.mrf.mxu3 }
 0x697   : > { %5678 = vmatpush.msra.mxu3 %v5255_v18  ;;  %16926 = vst [vmem:[#allocation34_spill] sm:$0xff] %v13710_v56  ;;  %v4360_v18 = vadd.f32 %v13176_v7, %v4310_v41  ;;  %v5243_v7 = vld [vmem:[%s15487_s9 + $0x840] sm:$0xff]  ;;  %5623 = vmatpush.msrb.mxu2 %v5233_v20 }
 0x698   : > { %v16989_v56 = vld [vmem:[#allocation14_spill] sm:$0xff] }
 0x699   : > { %v4500_v31 = vpop.f32.mrf.mxu2  ;;  %5679 = vmatpush.msra.mxu3 %v5253_v28  ;;  %v5073_v28 = vld [vmem:[%s15487_s9 + $0x2f0] sm:$0xff] }
 0x69a   : > { %v13651_v40 = vadd.f32 %v4500_v31, %v4451_v22  ;;  %v5145_v22 = vld [vmem:[%s15487_s9 + $0x530] sm:$0xff]  ;;  %5373 = vmatpush.msra.mxu1 %v5073_v28  ;;  %v13734_v41 = vpop.f32.mrf.mxu0 }
 0x69b   : > { %5535 = vmatpush.msra.mxu0 %v5145_v22  ;;  %5680 = vmatpush.msra.mxu3 %v5251_v42  ;;  %v4632_v22 = vpop.f32.mrf.mxu1  ;;  %v4410_v42 = vadd.f32 %v13469_v36, %v4360_v18  ;;  %v4363_v36 = vadd.f32 %v13205_v52, %v4313_v27  ;;  %v5231_v52 = vld [vmem:[%s15487_s9 + $0x7e0] sm:$0xff]  ;;  %v5229_v28 = vld [vmem:[%s15487_s9 + $0x7d0] sm:$0xff] }
 0x69c   : > { %5624 = vmatpush.msrb.mxu2 %v5231_v52  ;;  %v5067_v27 = vld [vmem:[%s15487_s9 + $0x2c0] sm:$0xff] }
 0x69d   : > { %5536 = vmatpush.msra.mxu0 %v5143_v34  ;;  %5681 = vmatpush.msra.mxu3 %v5249_v48  ;;  %v5241_v34 = vld [vmem:[%s15487_s9 + $0x830] sm:$0xff]  ;;  %v4460_v19 = vadd.f32 %v13637_v26, %v4410_v42  ;;  %v5071_v48 = vld [vmem:[%s15487_s9 + $0x2e0] sm:$0xff] }
 0x69e   : > { %5442 = vmatmul.f32.gmra.mxu2 %v16924_v13  ;;  %5374 = vmatpush.msra.mxu1 %v5071_v48  ;;  %v5225_v42 = vld [vmem:[%s15487_s9 + $0x7b0] sm:$0xff]  ;;  %v5063_v52 = vld [vmem:[%s15487_s9 + $0x2a0] sm:$0xff] }
 0x69f   : > { %5537 = vmatpush.msra.mxu0 %v5141_v59  ;;  %5682 = vmatpush.msra.mxu3 %v5247_v14  ;;  %v5069_v59 = vld [vmem:[%s15487_s9 + $0x2d0] sm:$0xff] }
 0x6a0   : > { %v5237_v14 = vld [vmem:[%s15487_s9 + $0x810] sm:$0xff]  ;;  %5375 = vmatpush.msra.mxu1 %v5069_v59  ;;  %5625 = vmatpush.msrb.mxu2 %v5229_v28 }
 0x6a1   : > { %v4503_v4 = vpop.f32.mrf.mxu2  ;;  %5538 = vmatpush.msra.mxu0 %v5139_v35  ;;  %5683 = vmatpush.msra.mxu3 %v5245_v33  ;;  %v13754_v35 = vpop.f32.mrf.mxu3  ;;  %v4413_v33 = vadd.f32 %v13505_v5, %v4363_v36  ;;  %v4533_v5 = vadd.f32 %v13233_v21, %v13521_v60  ;;  %v5223_v36 = vld [vmem:[%s15487_s9 + $0x7a0] sm:$0xff]  ;;  %v5221_v59 = vld [vmem:[%s15487_s9 + $0x790] sm:$0xff]  ;;  %v16929_v60 = vld [vmem:[#allocation31_spill] sm:$0xff] }
 0x6a2   : > { %v13687_v31 = vadd.f32 %v4503_v4, %v4454_v11  ;;  %16927 = vst [vmem:[#allocation185_spill] sm:$0xff] %v13754_v35  ;;  %5376 = vmatpush.msra.mxu1 %v5067_v27  ;;  %v5219_v21 = vld [vmem:[%s15487_s9 + $0x780] sm:$0xff] }
 0x6a3   : > { %5684 = vmatpush.msra.mxu3 %v5243_v7  ;;  %v5227_v7 = vld [vmem:[%s15487_s9 + $0x7c0] sm:$0xff] }
 0x6a4   : > { %5626 = vmatpush.msrb.mxu2 %v5227_v7  ;;  %v5215_v7 = vld [vmem:[%s15487_s9 + $0x760] sm:$0xff] }
 0x6a5   : > { %5685 = vmatpush.msra.mxu3 %v5241_v34  ;;  %v13778_v34 = vpop.f32.mrf.mxu0 }
 0x6a6   : > { %5445 = vmatmul.f32.gmra.mxu2 %v16925_v47 }
 0x6a7   : > { %5686 = vmatpush.msra.mxu3 %v5239_v57  ;;  %v4463_v57 = vadd.f32 %v13682_v0, %v4413_v33  ;;  %5627 = vmatpush.msrb.mxu2 %v5225_v42  ;;  %v5065_v0 = vld [vmem:[%s15487_s9 + $0x2b0] sm:$0xff] }
 0x6a8   : > { %5377 = vmatpush.msra.mxu1 %v5065_v0 }
 0x6a9   : > { %v4506_v11 = vpop.f32.mrf.mxu2  ;;  %5687 = vmatpush.msra.mxu3 %v5237_v14  ;;  %v13788_v48 = vpop.f32.mrf.mxu3  ;;  %5628 = vmatpush.msrb.mxu2 %v5223_v36  ;;  %v4583_v14 = vadd.f32 %v13543_v61, %v4533_v5  ;;  %v5217_v61 = vld [vmem:[%s15487_s9 + $0x770] sm:$0xff]  ;;  %v16932_v36 = vld [vmem:[#allocation135_spill] sm:$0xff] }
 0x6aa   : > { %v13723_v4 = vadd.f32 %v4506_v11, %v4457_v2  ;;  %v5235_v2 = vld [vmem:[%s15487_s9 + $0x800] sm:$0xff]  ;;  %v4635_v11 = vpop.f32.mrf.mxu1  ;;  %16928 = vst [vmem:[#allocation95_spill] sm:$0xff] %v13788_v48  ;;  %5378 = vmatpush.msra.mxu1 %v5063_v52  ;;  %v5213_v5 = vld [vmem:[%s15487_s9 + $0x750] sm:$0xff] }
 0x6ab   : > { %5688 = vmatpush.msra.mxu3 %v5235_v2  ;;  %5629 = vmatpush.msrb.mxu2 %v5221_v59  ;;  %v4536_v2 = vadd.f32 %v13267_v16, %v13545_v6  ;;  %v4633_v28 = vadd.f32 %v4632_v22, %v4583_v14  ;;  %v5211_v6 = vld [vmem:[%s15487_s9 + $0x740] sm:$0xff]  ;;  %v5061_v59 = vld [vmem:[%s15487_s9 + $0x290] sm:$0xff]  ;;  %v4539_v14 = vadd.f32 %v13293_v1, %v13564_v12 }
 0x6ac   : > { %5379 = vmatpush.msra.mxu1 %v5061_v59  ;;  %v5203_v12 = vld [vmem:[%s15487_s9 + $0x700] sm:$0xff] }
 0x6ad   : > { %5630 = vmatpush.msrb.mxu2 %v5219_v21  ;;  %v13812_v27 = vpop.f32.mrf.mxu0  ;;  %v4589_v1 = vadd.f32 %v13583_v45, %v4539_v14  ;;  %v4542_v45 = vadd.f32 %v13319_v58, %v13576_v50 }
 0x6ae   : > { %5448 = vmatmul.f32.gmra.mxu2 %v12864_v15 }
 0x6af   : > { %5631 = vmatpush.msrb.mxu2 %v5217_v61  ;;  %v5207_v61 = vld [vmem:[%s15487_s9 + $0x720] sm:$0xff]  ;;  %v4592_v50 = vadd.f32 %v13611_v44, %v4542_v45 }
 0x6b1   : > { %v4509_v18 = vpop.f32.mrf.mxu2  ;;  %5632 = vmatpush.msrb.mxu2 %v5215_v7  ;;  %v13818_v16 = vpop.f32.mrf.mxu3 }
 0x6b2   : > { %v13759_v26 = vadd.f32 %v4509_v18, %v4460_v19  ;;  %v4638_v18 = vpop.f32.mrf.mxu1  ;;  %16930 = vst [vmem:[#allocation35_spill] sm:$0xff] %v13818_v16 }
 0x6b3   : > { %5633 = vmatpush.msrb.mxu2 %v5213_v5  ;;  %v5059_v5 = vld [vmem:[%s15487_s9 + $0x280] sm:$0xff] }
 0x6b4   : > { %5380 = vmatpush.msra.mxu1 %v5059_v5 }
 0x6b5   : > { %5634 = vmatpush.msrb.mxu2 %v5211_v6 }
 0x6b6   : > { %5451 = vmatmul.f32.gmra.mxu2 %v12895_v46 }
 0x6b9   : > { %v4512_v20 = vpop.f32.mrf.mxu2 }
 0x6ba   : > { %v13786_v19 = vadd.f32 %v4512_v20, %v4463_v57  ;;  %v4586_v20 = vadd.f32 %v13566_v29, %v4536_v2  ;;  %v5209_v29 = vld [vmem:[%s15487_s9 + $0x730] sm:$0xff]  ;;  %v4641_v0 = vpop.f32.mrf.mxu1 }
 0x6bb   : > { %5635 = vmatpush.msrb.mxu2 %v5209_v29  ;;  %v4639_v29 = vadd.f32 %v4638_v18, %v4589_v1  ;;  %v4545_v1 = vadd.f32 %v13347_v10, %v13592_v53 }
 0x6bc   : > { %v4636_v21 = vadd.f32 %v4635_v11, %v4586_v20  ;;  %v13856_v20 = vpop.f32.mrf.mxu3 }
 0x6bd   : > { %5636 = vmatpush.msrb.mxu2 %v5207_v61  ;;  %16935 = vst [vmem:[#allocation60_spill] sm:$0xff] %v13856_v20  ;;  %v4595_v10 = vadd.f32 %v13649_v38, %v4545_v1 }
 0x6be   : > { %5454 = vmatmul.f32.gmra.mxu2 %v16929_v60 }
 0x6c1   : > { %v4682_v33 = vpop.f32.mrf.mxu2 }
 0x6c2   : > { %v4683_v42 = vadd.f32 %v4682_v33, %v4633_v28  ;;  %v5205_v28 = vld [vmem:[%s15487_s9 + $0x710] sm:$0xff]  ;;  %v13841_v33 = vpop.f32.mrf.mxu0  ;;  %v4644_v61 = vpop.f32.mrf.mxu1 }
 0x6c3   : > { %5637 = vmatpush.msrb.mxu2 %v5205_v28  ;;  %v16939_v28 = vld [vmem:[#allocation33_spill] sm:$0xff]  ;;  %v4645_v38 = vadd.f32 %v4644_v61, %v4595_v10 }
 0x6c4   : > { %v4717_v57 = vmul.f32 0.1, %v4683_v42  ;;  %v13885_v44 = vpop.f32.mrf.mxu3 }
 0x6c5   : > { %5638 = vmatpush.msrb.mxu2 %v5203_v12  ;;  %v4642_v12 = vadd.f32 %v4641_v0, %v4592_v50  ;;  %16940 = vst [vmem:[#allocation58_spill] sm:$0xff] %v13885_v44  ;;  %v5053_v50 = vld [vmem:[%s15487_s9 + $0x250] sm:$0xff] }
 0x6c6   : > { %v13823_v22 = vmax.f32 %v4683_v42, %v4717_v57  ;;  %5457 = vmatmul.f32.gmra.mxu2 %v16932_v36  ;;  %v16934_v42 = vld [vmem:[#allocation85_spill] sm:$0xff]  ;;  %v5057_v57 = vld [vmem:[%s15487_s9 + $0x270] sm:$0xff] }
 0x6c7   : > { %5381 = vmatpush.msra.mxu1 %v5057_v57 }
 0x6c8   : > { %16931 = vst [vmem:[#allocation99_spill] sm:$0xff] %v13823_v22  ;;  %5539 = vmatmul.f32.vlgmr.msra.gmra.mxu0 %v13823_v22  ;;  %v15944_v6 = vrot.slane %v13823_v22, 1 }
 0x6c9   : > { %v4685_v52 = vpop.f32.mrf.mxu2 }
 0x6ca   : > { %v4686_v2 = vadd.f32 %v4685_v52, %v4636_v21  ;;  %v4647_v53 = vpop.f32.mrf.mxu1 }
 0x6cc   : > { %v4720_v7 = vmul.f32 0.1, %v4686_v2 }
 0x6ce   : > { %v13847_v11 = vmax.f32 %v4686_v2, %v4720_v7  ;;  %5460 = vmatmul.f32.gmra.mxu2 %v16934_v42  ;;  %v13873_v2 = vpop.f32.mrf.mxu0  ;;  %v5055_v7 = vld [vmem:[%s15487_s9 + $0x260] sm:$0xff] }
 0x6cf   : > { %5382 = vmatpush.msra.mxu1 %v5055_v7  ;;  %v4548_v7 = vadd.f32 %v13380_v37, %v13617_v54  ;;  %v5008_v54 = vld [vmem:[%s15487_s9 + $0xe8] sm:$0xff]  ;;  %v17093_v37 = vld [vmem:[#allocation185_spill] sm:$0xff] }
 0x6d0   : > { %16933 = vst [vmem:[#allocation183_spill] sm:$0xff] %v13847_v11  ;;  %v4885_v59 = vrot.slane %v13847_v11, 1  ;;  %5542 = vmatmul.f32.gmra.mxu0 %v13847_v11 }
 0x6d1   : > { %v4688_v14 = vpop.f32.mrf.mxu2  ;;  %5383 = vmatpush.msra.mxu1 %v5053_v50  ;;  %v13917_v50 = vpop.f32.mrf.mxu3  ;;  %v4598_v10 = vadd.f32 %v13695_v30, %v4548_v7  ;;  %v16950_v30 = vld [vmem:[#allocation109_spill] sm:$0xff] }
 0x6d2   : > { %v4689_v21 = vadd.f32 %v4688_v14, %v4639_v29  ;;  %v13867_v52 = vsel %vm16936_vm10, %v15944_v6, %v4885_v59  ;;  %16946 = vst [vmem:[#allocation104_spill] sm:$0xff] %v13917_v50  ;;  %v4650_v6 = vpop.f32.mrf.mxu1  ;;  %v4551_v7 = vadd.f32 %v16950_v30, %v13651_v40  ;;  %v16952_v50 = vld [vmem:[#allocation166_spill] sm:$0xff]  ;;  %v17101_v40 = vld [vmem:[#allocation95_spill] sm:$0xff] }
 0x6d3   : > { %16937 = vst [vmem:[#allocation72_spill] sm:$0xff] %v13867_v52  ;;  %6734 = vmatmul.msk.f32.vlgmr.msra.gmra.mxu3 %vm16879_vm13, %v13867_v52  ;;  %v4884_v44 = vrot.slane %v16952_v50, 1  ;;  %v5050_v52 = vld [vmem:[%s15487_s9 + $0x238] sm:$0xff] }
 0x6d4   : > { %v4723_v58 = vmul.f32 0.1, %v4689_v21  ;;  %v4601_v16 = vadd.f32 %v13734_v41, %v4551_v7  ;;  %v5047_v41 = vld [vmem:[%s15487_s9 + $0x220] sm:$0xff]  ;;  %v5104_v7 = vld [vmem:[%s15487_s9 + $0x3e8] sm:$0xff] }
 0x6d6   : > { %v13875_v18 = vmax.f32 %v4689_v21, %v4723_v58  ;;  %5463 = vmatmul.f32.gmra.mxu2 %v16939_v28  ;;  %v13895_v21 = vpop.f32.mrf.mxu0  ;;  %v16944_v58 = vld [vmem:[#allocation139_spill] sm:$0xff] }
 0x6d7   : > { %16942 = vst [vmem:[#allocation171_spill] sm:$0xff] %v13895_v21  ;;  %v16967_v21 = vld [vmem:[#allocation7_spill] sm:$0xff] }
 0x6d8   : > { %16938 = vst [vmem:[#allocation20_spill] sm:$0xff] %v13875_v18  ;;  %5545 = vmatmul.f32.gmra.mxu0 %v13875_v18  ;;  %v4888_v5 = vrot.slane %v13875_v18, 1 }
 0x6d9   : > { %v4691_v57 = vpop.f32.mrf.mxu2 }
 0x6da   : > { %v4692_v45 = vadd.f32 %v4691_v57, %v4642_v12  ;;  %v13889_v29 = vsel %vm16936_vm10, %v4885_v59, %v4888_v5  ;;  %v5051_v59 = vld [vmem:[%s15487_s9 + $0x240] sm:$0xff]  ;;  %v5010_v57 = vld [vmem:[%s15487_s9 + $0xf8] sm:$0xff] }
 0x6db   : > { %16941 = vst [vmem:[#allocation182_spill] sm:$0xff] %v13889_v29  ;;  %6735 = vmatmul.msk.f32.gmra.mxu3 %vm16661_vm11, %v13889_v29  ;;  %5384 = vmatpush.msra.mxu1 %v5051_v59  ;;  %v16992_v29 = vld [vmem:[#allocation128_spill] sm:$0xff] }
 0x6dc   : > { %v4726_v14 = vmul.f32 0.1, %v4692_v45  ;;  %5723 = vmatpush.msrb.mxu0 %v5010_v57  ;;  %v5004_v57 = vld [vmem:[%s15487_s9 + $0xc8] sm:$0xff] }
 0x6de   : > { %v13897_v0 = vmax.f32 %v4692_v45, %v4726_v14  ;;  %5466 = vmatmul.f32.gmra.mxu2 %v16944_v58  ;;  %5724 = vmatpush.msrb.mxu0 %v5008_v54  ;;  %v13940_v54 = vpop.f32.mrf.mxu0 }
 0x6df   : > { %16951 = vst [vmem:[#allocation149_spill] sm:$0xff] %v13940_v54  ;;  %v5102_v54 = vld [vmem:[%s15487_s9 + $0x3d8] sm:$0xff] }
 0x6e0   : > { %16943 = vst [vmem:[#allocation146_spill] sm:$0xff] %v13897_v0  ;;  %5548 = vmatmul.f32.gmra.mxu0 %v13897_v0  ;;  %v4891_v1 = vrot.slane %v13897_v0, 1 }
 0x6e1   : > { %v4694_v12 = vpop.f32.mrf.mxu2 }
 0x6e2   : > { %v4695_v45 = vadd.f32 %v4694_v12, %v4645_v38  ;;  %v13915_v14 = vsel %vm16936_vm10, %v4888_v5, %v4891_v1  ;;  %v5006_v5 = vld [vmem:[%s15487_s9 + $0xd8] sm:$0xff]  ;;  %v16949_v38 = vld [vmem:[#allocation124_spill] sm:$0xff] }
 0x6e3   : > { %16945 = vst [vmem:[#allocation155_spill] sm:$0xff] %v13915_v14  ;;  %6736 = vmatmul.msk.f32.gmra.mxu3 %vm16893_vm3, %v13915_v14  ;;  %v5049_v12 = vld [vmem:[%s15487_s9 + $0x230] sm:$0xff]  ;;  %5725 = vmatpush.msrb.mxu0 %v5006_v5  ;;  %v5002_v5 = vld [vmem:[%s15487_s9 + $0xb8] sm:$0xff] }
 0x6e4   : > { %v4729_v61 = vmul.f32 0.1, %v4695_v45  ;;  %5385 = vmatpush.msra.mxu1 %v5049_v12 }
 0x6e5   : > { %5726 = vmatpush.msrb.mxu0 %v5004_v57  ;;  %v5000_v57 = vld [vmem:[%s15487_s9 + $0xa8] sm:$0xff] }
 0x6e6   : > { %v13929_v59 = vmax.f32 %v4695_v45, %v4729_v61  ;;  %5469 = vmatmul.f32.gmra.mxu2 %v16949_v38  ;;  %v4648_v45 = vadd.f32 %v4647_v53, %v4598_v10  ;;  %v16955_v53 = vld [vmem:[#allocation143_spill] sm:$0xff]  ;;  %5386 = vmatpush.msra.mxu1 %v5047_v41 }
 0x6e7   : > { %v15946_v10 = vrot.slane %v16955_v53, 1  ;;  %5727 = vmatpush.msrb.mxu0 %v5002_v5  ;;  %v4998_v5 = vld [vmem:[%s15487_s9 + $0x98] sm:$0xff] }
 0x6e8   : > { %16948 = vst [vmem:[#allocation61_spill] sm:$0xff] %v13929_v59  ;;  %5551 = vmatmul.f32.gmra.mxu0 %v13929_v59  ;;  %v4894_v61 = vrot.slane %v13929_v59, 1 }
 0x6e9   : > { %v4697_v62 = vpop.f32.mrf.mxu2  ;;  %5728 = vmatpush.msrb.mxu0 %v5000_v57  ;;  %v4996_v57 = vld [vmem:[%s15487_s9 + $0x88] sm:$0xff] }
 0x6ea   : > { %v4698_v20 = vadd.f32 %v4697_v62, %v4648_v45  ;;  %v13950_v12 = vsel %vm16936_vm10, %v4891_v1, %v4894_v61  ;;  %v5106_v62 = vld [vmem:[%s15487_s9 + $0x3f8] sm:$0xff]  ;;  %v13963_v1 = vpop.f32.mrf.mxu3  ;;  %v13969_v45 = vsel %vm16936_vm10, %v15946_v10, %v4884_v44  ;;  %v4651_v10 = vadd.f32 %v4650_v6, %v4601_v16 }
 0x6eb   : > { %16953 = vst [vmem:[#allocation187_spill] sm:$0xff] %v13950_v12  ;;  %6737 = vmatmul.msk.f32.gmra.mxu3 %vm16676_vm12, %v13950_v12  ;;  %5729 = vmatpush.msrb.mxu0 %v4998_v5  ;;  %v4653_v12 = vpop.f32.mrf.mxu1  ;;  %v16959_v5 = vld [vmem:[#allocation91_spill] sm:$0xff] }
 0x6ec   : > { %v4732_v30 = vmul.f32 0.1, %v4698_v20  ;;  %16956 = vst [vmem:[#allocation175_spill] sm:$0xff] %v13963_v1  ;;  %5873 = vmatpush.msrb.mxu3 %v5106_v62  ;;  %v4887_v35 = vrot.slane %v16959_v5, 1 }
 0x6ed   : > { %5730 = vmatpush.msrb.mxu0 %v4996_v57  ;;  %v4992_v57 = vld [vmem:[%s15487_s9 + $0x68] sm:$0xff] }
 0x6ee   : > { %v13974_v48 = vmax.f32 %v4698_v20, %v4732_v30  ;;  %6723 = vmatmul.msk.f32.vlgmr.msrb.gmra.mxu2 %vm16879_vm13, %v13969_v45  ;;  %v5045_v20 = vld [vmem:[%s15487_s9 + $0x210] sm:$0xff]  ;;  %v16958_v30 = vld [vmem:[#allocation113_spill] sm:$0xff]  ;;  %5874 = vmatpush.msrb.mxu3 %v5104_v7  ;;  %v5100_v7 = vld [vmem:[%s15487_s9 + $0x3c8] sm:$0xff] }
 0x6ef   : > { %v4554_v62 = vadd.f32 %v16958_v30, %v13687_v31  ;;  %5387 = vmatpush.msra.mxu1 %v5045_v20  ;;  %v4994_v31 = vld [vmem:[%s15487_s9 + $0x78] sm:$0xff]  ;;  %v14002_v30 = vpop.f32.mrf.mxu0 }
 0x6f0   : > { %16957 = vst [vmem:[#allocation108_spill] sm:$0xff] %v13974_v48  ;;  %5554 = vmatmul.f32.gmra.mxu0 %v13974_v48  ;;  %v4897_v1 = vrot.slane %v13974_v48, 1  ;;  %5875 = vmatpush.msrb.mxu3 %v5102_v54  ;;  %v5098_v54 = vld [vmem:[%s15487_s9 + $0x3b8] sm:$0xff] }
 0x6f1   : > { %v4700_v41 = vpop.f32.mrf.mxu2  ;;  %16960 = vst [vmem:[#allocation158_spill] sm:$0xff] %v14002_v30  ;;  %5731 = vmatpush.msrb.mxu0 %v4994_v31  ;;  %v16965_v30 = vld [vmem:[#allocation38_spill] sm:$0xff] }
 0x6f2   : > { %v4701_v16 = vadd.f32 %v4700_v41, %v4651_v10  ;;  %v14006_v6 = vsel %vm16936_vm10, %v4894_v61, %v4897_v1  ;;  %v4604_v10 = vadd.f32 %v13778_v34, %v4554_v62  ;;  %5876 = vmatpush.msrb.mxu3 %v5100_v7  ;;  %v14023_v61 = vsel %vm16936_vm10, %v4884_v44, %v4887_v35  ;;  %v4990_v41 = vld [vmem:[%s15487_s9 + $0x58] sm:$0xff]  ;;  %v5096_v34 = vld [vmem:[%s15487_s9 + $0x3a8] sm:$0xff]  ;;  %v14036_v62 = vpop.f32.mrf.mxu3 }
 0x6f3   : > { %16961 = vst [vmem:[#allocation186_spill] sm:$0xff] %v14006_v6  ;;  %6738 = vmatmul.msk.f32.gmra.mxu3 %vm16904_vm14, %v14006_v6  ;;  %5732 = vmatpush.msrb.mxu0 %v4992_v57  ;;  %v4988_v44 = vld [vmem:[%s15487_s9 + $0x48] sm:$0xff]  ;;  %v16964_v7 = vld [vmem:[#allocation181_spill] sm:$0xff]  ;;  %v4890_v6 = vrot.slane %v16965_v30, 1 }
 0x6f4   : > { %v4735_v20 = vmul.f32 0.1, %v4701_v16  ;;  %5877 = vmatpush.msrb.mxu3 %v5098_v54  ;;  %16963 = vst [vmem:[#allocation153_spill] sm:$0xff] %v14036_v62  ;;  %v4654_v57 = vadd.f32 %v4653_v12, %v4604_v10  ;;  %v5043_v54 = vld [vmem:[%s15487_s9 + $0x200] sm:$0xff]  ;;  %v5092_v12 = vld [vmem:[%s15487_s9 + $0x388] sm:$0xff] }
 0x6f5   : > { %5733 = vmatpush.msrb.mxu0 %v4990_v41  ;;  %v5094_v41 = vld [vmem:[%s15487_s9 + $0x398] sm:$0xff]  ;;  %5388 = vmatpush.msra.mxu1 %v5043_v54  ;;  %v4984_v54 = vld [vmem:[%s15487_s9 + $0x28] sm:$0xff] }
 0x6f6   : > { %v14028_v31 = vmax.f32 %v4701_v16, %v4735_v20  ;;  %6724 = vmatmul.msk.f32.gmra.mxu2 %vm16661_vm11, %v14023_v61  ;;  %v4557_v16 = vadd.f32 %v16964_v7, %v13723_v4  ;;  %5878 = vmatpush.msrb.mxu3 %v5096_v34  ;;  %v4986_v4 = vld [vmem:[%s15487_s9 + $0x38] sm:$0xff]  ;;  %v4656_v7 = vpop.f32.mrf.mxu1 }
 0x6f7   : > { %5734 = vmatpush.msrb.mxu0 %v4988_v44  ;;  %v5201_v44 = vld [vmem:[%s15487_s9 + $0x6f0] sm:$0xff] }
 0x6f8   : > { %16962 = vst [vmem:[#allocation66_spill] sm:$0xff] %v14028_v31  ;;  %5557 = vmatmul.f32.gmra.mxu0 %v14028_v31  ;;  %v4900_v20 = vrot.slane %v14028_v31, 1  ;;  %5879 = vmatpush.msrb.mxu3 %v5094_v41  ;;  %v4607_v41 = vadd.f32 %v13812_v27, %v4557_v16  ;;  %v5088_v27 = vld [vmem:[%s15487_s9 + $0x368] sm:$0xff] }
 0x6f9   : > { %v4703_v62 = vpop.f32.mrf.mxu2  ;;  %5735 = vmatpush.msrb.mxu0 %v4986_v4  ;;  %5573 = vmatpush.msrb.mxu1 %v5201_v44  ;;  %v4982_v4 = vld [vmem:[%s15487_s9 + $0x18] sm:$0xff]  ;;  %v4980_v16 = vld [vmem:[%s15487_s9 + $0x8] sm:$0xff] }
 0x6fa   : > { %v4704_v10 = vadd.f32 %v4703_v62, %v4654_v57  ;;  %v14060_v34 = vsel %vm16936_vm10, %v4897_v1, %v4900_v20  ;;  %v5090_v1 = vld [vmem:[%s15487_s9 + $0x378] sm:$0xff]  ;;  %v14074_v62 = vpop.f32.mrf.mxu0  ;;  %5880 = vmatpush.msrb.mxu3 %v5092_v12  ;;  %v4657_v12 = vadd.f32 %v4656_v7, %v4607_v41 }
 0x6fb   : > { %16966 = vst [vmem:[#allocation189_spill] sm:$0xff] %v14060_v34  ;;  %6739 = vmatmul.msk.f32.gmra.mxu3 %vm16513_vm1, %v14060_v34  ;;  %v14082_v34 = vsel %vm16936_vm10, %v4887_v35, %v4890_v6  ;;  %5736 = vmatpush.msrb.mxu0 %v4984_v54  ;;  %v4560_v35 = vadd.f32 %v13619_v49, %v13759_v26  ;;  %v5086_v44 = vld [vmem:[%s15487_s9 + $0x358] sm:$0xff]  ;;  %v14102_v54 = vpop.f32.mrf.mxu3  ;;  %v5199_v49 = vld [vmem:[%s15487_s9 + $0x6e0] sm:$0xff]  ;;  %v5084_v26 = vld [vmem:[%s15487_s9 + $0x348] sm:$0xff] }
 0x6fc   : > { %16968 = vst [vmem:[#allocation2_spill] sm:$0xff] %v14074_v62  ;;  %v4738_v57 = vmul.f32 0.1, %v4704_v10  ;;  %5881 = vmatpush.msrb.mxu3 %v5090_v1  ;;  %5574 = vmatpush.msrb.mxu1 %v5199_v49 }
 0x6fd   : > { %5737 = vmatpush.msrb.mxu0 %v4982_v4  ;;  %16970 = vst [vmem:[#allocation112_spill] sm:$0xff] %v14102_v54  ;;  %v5082_v4 = vld [vmem:[%s15487_s9 + $0x338] sm:$0xff] }
 0x6fe   : > { %v14084_v14 = vmax.f32 %v4704_v10, %v4738_v57  ;;  %6725 = vmatmul.msk.f32.gmra.mxu2 %vm16893_vm3, %v14082_v34  ;;  %5882 = vmatpush.msrb.mxu3 %v5088_v27  ;;  %v16971_v57 = vld [vmem:[#allocation163_spill] sm:$0xff]  ;;  %v5197_v27 = vld [vmem:[%s15487_s9 + $0x6d0] sm:$0xff] }
 0x6ff   : > { %v4893_v62 = vrot.slane %v16971_v57, 1  ;;  %5738 = vmatpush.msrb.mxu0 %v4980_v16  ;;  %5575 = vmatpush.msrb.mxu1 %v5197_v27 }
 0x700   : > { %16969 = vst [vmem:[#allocation179_spill] sm:$0xff] %v14084_v14  ;;  %5560 = vmatmul.f32.gmra.mxu0 %v14084_v14  ;;  %v4903_v10 = vrot.slane %v14084_v14, 1  ;;  %5883 = vmatpush.msrb.mxu3 %v5086_v44 }
 0x701   : > { %v4706_v1 = vpop.f32.mrf.mxu2  ;;  %v14127_v44 = vsel %vm16936_vm10, %v4890_v6, %v4893_v62  ;;  %v4563_v6 = vadd.f32 %v13668_v23, %v13786_v19  ;;  %v5076_v23 = vld [vmem:[%s15487_s9 + $0x308] sm:$0xff] }
 0x702   : > { %v4707_v7 = vadd.f32 %v4706_v1, %v4657_v12  ;;  %v14113_v41 = vsel %vm16936_vm10, %v4900_v20, %v4903_v10  ;;  %v4610_v12 = vadd.f32 %v13841_v33, %v4560_v35  ;;  %5884 = vmatpush.msrb.mxu3 %v5084_v26  ;;  %v4659_v20 = vpop.f32.mrf.mxu1  ;;  %v14129_v1 = vpop.f32.mrf.mxu0  ;;  %v5080_v33 = vld [vmem:[%s15487_s9 + $0x328] sm:$0xff]  ;;  %v5074_v35 = vld [vmem:[%s15487_s9 + $0x2f8] sm:$0xff] }
 0x703   : > { %16972 = vst [vmem:[#allocation160_spill] sm:$0xff] %v14113_v41  ;;  %6740 = vmatmul.msk.f32.gmra.mxu3 %vm16914_vm6, %v14113_v41  ;;  %5823 = vmatpush.msra.mxu2 %v5074_v35  ;;  %v5072_v35 = vld [vmem:[%s15487_s9 + $0x2e8] sm:$0xff] }
 0x704   : > { %v4741_v16 = vmul.f32 0.1, %v4707_v7  ;;  %16973 = vst [vmem:[#allocation188_spill] sm:$0xff] %v14129_v1  ;;  %5885 = vmatpush.msrb.mxu3 %v5082_v4  ;;  %v4660_v26 = vadd.f32 %v4659_v20, %v4610_v12  ;;  %v5078_v4 = vld [vmem:[%s15487_s9 + $0x318] sm:$0xff]  ;;  %v14160_v20 = vpop.f32.mrf.mxu3  ;;  %v5064_v1 = vld [vmem:[%s15487_s9 + $0x2a8] sm:$0xff] }
 0x705   : > { %5824 = vmatpush.msra.mxu2 %v5072_v35  ;;  %16977 = vst [vmem:[#allocation191_spill] sm:$0xff] %v14160_v20  ;;  %v5056_v41 = vld [vmem:[%s15487_s9 + $0x268] sm:$0xff] }
 0x706   : > { %v14131_v49 = vmax.f32 %v4707_v7, %v4741_v16  ;;  %6726 = vmatmul.msk.f32.gmra.mxu2 %vm16676_vm12, %v14127_v44  ;;  %5886 = vmatpush.msrb.mxu3 %v5080_v33  ;;  %v16975_v16 = vld [vmem:[#allocation100_spill] sm:$0xff]  ;;  %v5070_v33 = vld [vmem:[%s15487_s9 + $0x2d8] sm:$0xff] }
 0x707   : > { %v4896_v54 = vrot.slane %v16975_v16, 1  ;;  %5825 = vmatpush.msra.mxu2 %v5070_v33 }
 0x708   : > { %16974 = vst [vmem:[#allocation42_spill] sm:$0xff] %v14131_v49  ;;  %5563 = vmatmul.f32.gmra.mxu0 %v14131_v49  ;;  %v4906_v7 = vrot.slane %v14131_v49, 1  ;;  %5887 = vmatpush.msrb.mxu3 %v5078_v4  ;;  %v5068_v4 = vld [vmem:[%s15487_s9 + $0x2c8] sm:$0xff] }
 0x709   : > { %v4709_v27 = vpop.f32.mrf.mxu2  ;;  %v14177_v35 = vsel %vm16936_vm10, %v4893_v62, %v4896_v54  ;;  %5826 = vmatpush.msra.mxu2 %v5068_v4 }
 0x70a   : > { %v4710_v19 = vadd.f32 %v4709_v27, %v4660_v26  ;;  %v14158_v12 = vsel %vm16936_vm10, %v4903_v10, %v4906_v7  ;;  %v5195_v26 = vld [vmem:[%s15487_s9 + $0x6c0] sm:$0xff]  ;;  %v4613_v10 = vadd.f32 %v13873_v2, %v4563_v6  ;;  %5888 = vmatpush.msrb.mxu3 %v5076_v23  ;;  %v5066_v2 = vld [vmem:[%s15487_s9 + $0x2b8] sm:$0xff]  ;;  %v4662_v6 = vpop.f32.mrf.mxu1  ;;  %v14187_v23 = vpop.f32.mrf.mxu0 }
 0x70b   : > { %16976 = vst [vmem:[#allocation154_spill] sm:$0xff] %v14158_v12  ;;  %6741 = vmatmul.msk.f32.gmra.mxu3 %vm16917_vm4, %v14158_v12  ;;  %5576 = vmatpush.msrb.mxu1 %v5195_v26  ;;  %v5193_v12 = vld [vmem:[%s15487_s9 + $0x6b0] sm:$0xff] }
 0x70c   : > { %v4744_v27 = vmul.f32 0.1, %v4710_v19  ;;  %16979 = vst [vmem:[#allocation162_spill] sm:$0xff] %v14187_v23  ;;  %v4663_v33 = vadd.f32 %v4662_v6, %v4613_v10  ;;  %5827 = vmatpush.msra.mxu2 %v5066_v2  ;;  %v5062_v10 = vld [vmem:[%s15487_s9 + $0x298] sm:$0xff]  ;;  %v5060_v6 = vld [vmem:[%s15487_s9 + $0x288] sm:$0xff] }
 0x70d   : > { %5577 = vmatpush.msrb.mxu1 %v5193_v12 }
 0x70e   : > { %v14179_v20 = vmax.f32 %v4710_v19, %v4744_v27  ;;  %6727 = vmatmul.msk.f32.gmra.mxu2 %vm16904_vm14, %v14177_v35  ;;  %v16980_v19 = vld [vmem:[#allocation41_spill] sm:$0xff] }
 0x70f   : > { %v4899_v27 = vrot.slane %v16980_v19, 1  ;;  %5828 = vmatpush.msra.mxu2 %v5064_v1  ;;  %v5191_v1 = vld [vmem:[%s15487_s9 + $0x6a0] sm:$0xff] }
 0x710   : > { %16978 = vst [vmem:[#allocation184_spill] sm:$0xff] %v14179_v20  ;;  %5566 = vmatmul.f32.gmra.mxu0 %v14179_v20  ;;  %v4909_v62 = vrot.slane %v14179_v20, 1  ;;  %5578 = vmatpush.msrb.mxu1 %v5191_v1 }
 0x711   : > { %v4712_v26 = vpop.f32.mrf.mxu2  ;;  %5829 = vmatpush.msra.mxu2 %v5062_v10 }
 0x712   : > { %v4713_v4 = vadd.f32 %v4712_v26, %v4663_v33  ;;  %v14200_v23 = vsel %vm16936_vm10, %v4906_v7, %v4909_v62  ;;  %v14211_v33 = vpop.f32.mrf.mxu3  ;;  %v14215_v7 = vsel %vm16936_vm10, %v4896_v54, %v4899_v27  ;;  %v5058_v26 = vld [vmem:[%s15487_s9 + $0x278] sm:$0xff]  ;;  %v4783_v54 = vrot.slane %v13823_v22, 7 }
 0x713   : > { %16981 = vst [vmem:[#allocation118_spill] sm:$0xff] %v14200_v23  ;;  %6742 = vmatmul.msk.f32.gmra.mxu3 %vm16919_vm0, %v14200_v23  ;;  %5830 = vmatpush.msra.mxu2 %v5060_v6  ;;  %vm16986_vm10 = vcmp.lt.s32.totalorder %v16751_v24, 1 }
 0x714   : > { %v4747_v2 = vmul.f32 0.1, %v4713_v4  ;;  %16982 = vst [vmem:[#allocation190_spill] sm:$0xff] %v14211_v33  ;;  %v14236_v33 = vpop.f32.mrf.mxu0 }
 0x715   : > { %5831 = vmatpush.msra.mxu2 %v5058_v26  ;;  %16985 = vst [vmem:[#allocation157_spill] sm:$0xff] %v14236_v33  ;;  %v5189_v26 = vld [vmem:[%s15487_s9 + $0x690] sm:$0xff]  ;;  %v5052_v33 = vld [vmem:[%s15487_s9 + $0x248] sm:$0xff] }
 0x716   : > { %v14217_v12 = vmax.f32 %v4713_v4, %v4747_v2  ;;  %6728 = vmatmul.msk.f32.gmra.mxu2 %vm16513_vm1, %v14215_v7  ;;  %v16984_v2 = vld [vmem:[#allocation170_spill] sm:$0xff]  ;;  %vm16987_vm1 = vcmp.lt.s32.totalorder %v16751_v24, 7  ;;  %5579 = vmatpush.msrb.mxu1 %v5189_v26 }
 0x717   : > { %v4902_v23 = vrot.slane %v16984_v2, 1  ;;  %5832 = vmatpush.msra.mxu2 %v5056_v41  ;;  %v16993_v26 = vld [vmem:[#allocation174_spill] sm:$0xff] }
 0x718   : > { %16983 = vst [vmem:[#allocation43_spill] sm:$0xff] %v14217_v12  ;;  %v15955_v10 = vrot.slane %v14217_v12, 7  ;;  %5569 = vmatmul.f32.gmra.mxu0 %v14217_v12  ;;  %v4912_v4 = vrot.slane %v14217_v12, 1 }
 0x71a   : > { %v14242_v6 = vsel %vm16986_vm10, %v15955_v10, %v4783_v54  ;;  %v14246_v1 = vsel %vm16987_vm1, %v4909_v62, %v4912_v4  ;;  %v5054_v10 = vld [vmem:[%s15487_s9 + $0x258] sm:$0xff]  ;;  %v14262_v62 = vsel %vm16987_vm1, %v4899_v27, %v4902_v23  ;;  %v14271_v41 = vpop.f32.mrf.mxu3  ;;  %v4905_v27 = vrot.slane %v16993_v26, 1 }
 0x71b   : > { %16988 = vst [vmem:[#allocation192_spill] sm:$0xff] %v14246_v1  ;;  %6701 = vmatmul.msk.f32.vlgmr.msra.gmra.mxu1 %vm16707_vm7, %v14242_v6  ;;  %6743 = vmatmul.msk.f32.gmra.mxu3 %vm16921_vm5, %v14246_v1  ;;  %v4786_v1 = vrot.slane %v13847_v11, 7  ;;  %v5187_v11 = vld [vmem:[%s15487_s9 + $0x680] sm:$0xff] }
 0x71c   : > { %16990 = vst [vmem:[#allocation56_spill] sm:$0xff] %v14262_v62  ;;  %5833 = vmatpush.msra.mxu2 %v5054_v10  ;;  %v16994_v10 = vrot.slane %v13823_v22, 1  ;;  %5580 = vmatpush.msrb.mxu1 %v5187_v11  ;;  %v4789_v11 = vrot.slane %v13875_v18, 7  ;;  %v17000_v22 = vld [vmem:[#allocation39_spill] sm:$0xff] }
 0x71d   : > { %16991 = vst [vmem:[#allocation123_spill] sm:$0xff] %v14271_v41  ;;  %v14299_v41 = vpop.f32.mrf.mxu0  ;;  %v5044_v18 = vld [vmem:[%s15487_s9 + $0x208] sm:$0xff] }
 0x71e   : > { %6729 = vmatmul.msk.f32.gmra.mxu2 %vm16914_vm6, %v14262_v62  ;;  %v14285_v62 = vsel %vm16986_vm10, %v4783_v54, %v4786_v1  ;;  %16997 = vst [vmem:[#allocation193_spill] sm:$0xff] %v14299_v41  ;;  %v5048_v54 = vld [vmem:[%s15487_s9 + $0x228] sm:$0xff]  ;;  %vm16998_vm10 = vmmov %vm16987_vm1  ;;  %v17002_v41 = vld [vmem:[#allocation178_spill] sm:$0xff] }
 0x71f   : > { %5834 = vmatpush.msra.mxu2 %v5052_v33  ;;  %v16996_v33 = vld [vmem:[#allocation16_spill] sm:$0xff] }
 0x720   : > { %6745 = vmatmul.msk.f32.vlgmr.msrb.gmra.mxu0 %vm16707_vm7, %v16992_v29  ;;  %v14291_v29 = vsel %vm16987_vm1, %v4912_v4, %v16994_v10  ;;  %v14306_v4 = vsel %vm16998_vm10, %v4902_v23, %v4905_v27  ;;  %v5046_v10 = vld [vmem:[%s15487_s9 + $0x218] sm:$0xff]  ;;  %vm17003_vm1 = vcmp.lt.s32.totalorder %v16751_v24, 1 }
 0x721   : > { %16995 = vst [vmem:[#allocation165_spill] sm:$0xff] %v14291_v29  ;;  %5835 = vmatpush.msra.mxu2 %v5050_v52  ;;  %v5185_v52 = vld [vmem:[%s15487_s9 + $0x670] sm:$0xff] }
 0x722   : > { %16999 = vst [vmem:[#allocation46_spill] sm:$0xff] %v14306_v4  ;;  %5581 = vmatpush.msrb.mxu1 %v5185_v52  ;;  %v14321_v23 = vpop.f32.mrf.mxu3 }
 0x723   : > { %6702 = vmatmul.msk.f32.gmra.mxu1 %vm7116_vm15, %v14285_v62  ;;  %6744 = vmatmul.msk.f32.gmra.mxu3 %vm16297_vm9, %v14291_v29  ;;  %17001 = vst [vmem:[#allocation159_spill] sm:$0xff] %v14321_v23  ;;  %v4908_v29 = vrot.slane %v17002_v41, 1  ;;  %v14348_v23 = vpop.f32.mrf.mxu2  ;;  %v5181_v41 = vld [vmem:[%s15487_s9 + $0x650] sm:$0xff] }
 0x724   : > { %5836 = vmatpush.msra.mxu2 %v5048_v54  ;;  %v17004_v54 = vld [vmem:[#allocation18_spill] sm:$0xff]  ;;  %17007 = vst [vmem:[#allocation127_spill] sm:$0xff] %v14348_v23 }
 0x725   : > { %v14342_v52 = vpop.f32.mrf.mxu0 }
 0x726   : > { %6730 = vmatmul.msk.f32.gmra.mxu2 %vm16917_vm4, %v14306_v4  ;;  %v14329_v4 = vsel %vm17003_vm1, %v4786_v1, %v4789_v11  ;;  %17006 = vst [vmem:[#allocation59_spill] sm:$0xff] %v14342_v52  ;;  %v4792_v1 = vrot.slane %v13897_v0, 7 }
 0x727   : > { %5837 = vmatpush.msra.mxu2 %v5046_v10  ;;  %v5183_v10 = vld [vmem:[%s15487_s9 + $0x660] sm:$0xff] }
 0x728   : > { %6746 = vmatmul.msk.f32.gmra.mxu0 %vm7116_vm15, %v17000_v22  ;;  %v14337_v22 = vsel %vm16998_vm10, %v4905_v27, %v4908_v29  ;;  %5582 = vmatpush.msrb.mxu1 %v5183_v10  ;;  %v4911_v27 = vrot.slane %v13239_v25, 1  ;;  %v14359_v52 = vsel %vm17003_vm1, %v4789_v11, %v4792_v1  ;;  %v17010_v10 = vld [vmem:[#allocation4_spill] sm:$0xff]  ;;  %v4795_v11 = vrot.slane %v13929_v59, 7 }
 0x729   : > { %5838 = vmatpush.msra.mxu2 %v5044_v18  ;;  %17005 = vst [vmem:[#allocation63_spill] sm:$0xff] %v14337_v22  ;;  %v17008_v18 = vld [vmem:[#allocation147_spill] sm:$0xff] }
 0x72a   : > { %5583 = vmatpush.msrb.mxu1 %v5181_v41  ;;  %v5179_v41 = vld [vmem:[%s15487_s9 + $0x640] sm:$0xff]  ;;  %v14390_v59 = vsel %vm17003_vm1, %v4792_v1, %v4795_v11 }
 0x72b   : > { %6703 = vmatmul.msk.f32.gmra.mxu1 %vm16719_vm8, %v14329_v4  ;;  %5889 = vmatmul.f32.vlgmr.msrb.gmra.mxu3 %v16923_v39  ;;  %v14386_v23 = vpop.f32.mrf.mxu2 }
 0x72c   : > { %5584 = vmatpush.msrb.mxu1 %v5179_v41  ;;  %17014 = vst [vmem:[#allocation164_spill] sm:$0xff] %v14386_v23  ;;  %v5134_v23 = vld [vmem:[%s15487_s9 + $0x4d8] sm:$0xff] }
 0x72d   : > { %v14378_v0 = vpop.f32.mrf.mxu0 }
 0x72e   : > { %6731 = vmatmul.msk.f32.gmra.mxu2 %vm16919_vm0, %v14337_v22  ;;  %v14361_v22 = vpop.f32.mrf.mxu3  ;;  %17012 = vst [vmem:[#allocation48_spill] sm:$0xff] %v14378_v0  ;;  %v17018_v0 = vrot.slane %v16955_v53, 1 }
 0x72f   : > { %17009 = vst [vmem:[#allocation169_spill] sm:$0xff] %v14361_v22  ;;  %v17013_v22 = vld [vmem:[#allocation156_spill] sm:$0xff] }
 0x730   : > { %6747 = vmatmul.msk.f32.gmra.mxu0 %vm16719_vm8, %v17008_v18  ;;  %v14369_v18 = vsel %vm16998_vm10, %v4908_v29, %v4911_v27  ;;  %v5138_v29 = vld [vmem:[%s15487_s9 + $0x4f8] sm:$0xff] }
 0x731   : > { %17011 = vst [vmem:[#allocation68_spill] sm:$0xff] %v14369_v18  ;;  %5923 = vmatpush.msra.mxu0 %v5138_v29  ;;  %v5177_v29 = vld [vmem:[%s15487_s9 + $0x630] sm:$0xff] }
 0x732   : > { %5585 = vmatpush.msrb.mxu1 %v5177_v29  ;;  %v17024_v29 = vld [vmem:[#allocation8_spill] sm:$0xff] }
 0x733   : > { %6704 = vmatmul.msk.f32.gmra.mxu1 %vm16561_vm2, %v14359_v52  ;;  %5892 = vmatmul.f32.gmra.mxu3 %v16924_v13 }
 0x735   : > { %v14426_v25 = vpop.f32.mrf.mxu0 }
 0x736   : > { %6732 = vmatmul.msk.f32.gmra.mxu2 %vm16921_vm5, %v14369_v18  ;;  %v17015_v18 = vld [vmem:[#allocation6_spill] sm:$0xff]  ;;  %v14399_v41 = vpop.f32.mrf.mxu3  ;;  %vm17019_vm5 = vcmp.lt.s32.totalorder %v16751_v24, 7  ;;  %17022 = vst [vmem:[#allocation173_spill] sm:$0xff] %v14426_v25  ;;  %v4801_v25 = vrot.slane %v14028_v31, 7  ;;  %v5228_v31 = vld [vmem:[%s15487_s9 + $0x7c8] sm:$0xff] }
 0x737   : > { %vm17016_vm10 = vnez %v17015_v18  ;;  %17017 = vst [vmem:[#allocation89_spill] sm:$0xff] %v14399_v41  ;;  %v14405_v1 = vsel %vm17019_vm5, %v4911_v27, %v17018_v0  ;;  %v5132_v0 = vld [vmem:[%s15487_s9 + $0x4c8] sm:$0xff]  ;;  %v5130_v41 = vld [vmem:[%s15487_s9 + $0x4b8] sm:$0xff]  ;;  %vm17023_vm5 = vmmov %vm17003_vm1  ;;  %vm17025_vm1 = vnez %v17024_v29 }
 0x738   : > { %6748 = vmatmul.msk.f32.gmra.mxu0 %vm16561_vm2, %v17013_v22  ;;  %v5136_v22 = vld [vmem:[%s15487_s9 + $0x4e8] sm:$0xff]  ;;  %17020 = vst [vmem:[#allocation115_spill] sm:$0xff] %v14405_v1 }
 0x739   : > { %5924 = vmatpush.msra.mxu0 %v5136_v22  ;;  %v4798_v22 = vrot.slane %v13974_v48, 7  ;;  %v17021_v27 = vld [vmem:[#allocation131_spill] sm:$0xff] }
 0x73a   : > { %v17108_v29 = vld [vmem:[#allocation35_spill] sm:$0xff] }
 0x73b   : > { %6705 = vmatmul.msk.f32.gmra.mxu1 %vm17016_vm10, %v14390_v59  ;;  %5895 = vmatmul.f32.gmra.mxu3 %v16925_v47  ;;  %v14430_v48 = vsel %vm17023_vm5, %v4795_v11, %v4798_v22  ;;  %v14445_v11 = vpop.f32.mrf.mxu2 }
 0x73c   : > { %5925 = vmatpush.msra.mxu0 %v5134_v23  ;;  %v5175_v23 = vld [vmem:[%s15487_s9 + $0x620] sm:$0xff]  ;;  %17026 = vst [vmem:[#allocation132_spill] sm:$0xff] %v14445_v11  ;;  %v4804_v11 = vrot.slane %v14084_v14, 7  ;;  %v4807_v14 = vrot.slane %v14131_v49, 7 }
 0x73d   : > { %5586 = vmatpush.msrb.mxu1 %v5175_v23 }
 0x73e   : > { %6733 = vmatmul.msk.f32.gmra.mxu2 %vm16297_vm9, %v14405_v1  ;;  %5926 = vmatpush.msra.mxu0 %v5132_v0  ;;  %v5128_v0 = vld [vmem:[%s15487_s9 + $0x4a8] sm:$0xff]  ;;  %v5126_v1 = vld [vmem:[%s15487_s9 + $0x498] sm:$0xff]  ;;  %v14460_v23 = vpop.f32.mrf.mxu3 }
 0x73f   : > { %17027 = vst [vmem:[#allocation126_spill] sm:$0xff] %v14460_v23 }
 0x740   : > { %6749 = vmatmul.msk.f32.gmra.mxu0 %vm17016_vm10, %v17021_v27  ;;  %v5234_v27 = vld [vmem:[%s15487_s9 + $0x7f8] sm:$0xff] }
 0x741   : > { %5927 = vmatpush.msra.mxu0 %v5130_v41  ;;  %6073 = vmatpush.msra.mxu3 %v5234_v27  ;;  %v5173_v41 = vld [vmem:[%s15487_s9 + $0x610] sm:$0xff]  ;;  %v5124_v27 = vld [vmem:[%s15487_s9 + $0x488] sm:$0xff] }
 0x742   : > { %5587 = vmatpush.msrb.mxu1 %v5173_v41  ;;  %v14478_v41 = vsel %vm17023_vm5, %v4798_v22, %v4801_v25  ;;  %v5171_v22 = vld [vmem:[%s15487_s9 + $0x600] sm:$0xff] }
 0x743   : > { %6706 = vmatmul.msk.f32.gmra.mxu1 %vm17025_vm1, %v14430_v48  ;;  %5898 = vmatmul.f32.gmra.mxu3 %v12864_v15  ;;  %v14493_v23 = vpop.f32.mrf.mxu2 }
 0x744   : > { %5928 = vmatpush.msra.mxu0 %v5128_v0  ;;  %6074 = vmatpush.msra.mxu3 %v5232_v17  ;;  %v5230_v0 = vld [vmem:[%s15487_s9 + $0x7d8] sm:$0xff]  ;;  %17032 = vst [vmem:[#allocation168_spill] sm:$0xff] %v14493_v23 }
 0x745   : > { %v14474_v17 = vpop.f32.mrf.mxu0  ;;  %5588 = vmatpush.msrb.mxu1 %v5171_v22  ;;  %v17035_v22 = vld [vmem:[#allocation12_spill] sm:$0xff] }
 0x746   : > { %6767 = vmatmul.msk.f32.vlgmr.msra.gmra.mxu2 %vm16707_vm7, %v14242_v6  ;;  %v17028_v6 = vld [vmem:[#allocation82_spill] sm:$0xff]  ;;  %5929 = vmatpush.msra.mxu0 %v5126_v1  ;;  %17029 = vst [vmem:[#allocation50_spill] sm:$0xff] %v14474_v17  ;;  %v5122_v1 = vld [vmem:[%s15487_s9 + $0x478] sm:$0xff]  ;;  %v14508_v23 = vpop.f32.mrf.mxu3 }
 0x747   : > { %6075 = vmatpush.msra.mxu3 %v5230_v0  ;;  %v5226_v0 = vld [vmem:[%s15487_s9 + $0x7b8] sm:$0xff]  ;;  %v17033_v17 = vld [vmem:[#allocation150_spill] sm:$0xff]  ;;  %17034 = vst [vmem:[#allocation114_spill] sm:$0xff] %v14508_v23 }
 0x748   : > { %6750 = vmatmul.msk.f32.gmra.mxu0 %vm17025_vm1, %v17028_v6  ;;  %v17030_v6 = vld [vmem:[#allocation10_spill] sm:$0xff]  ;;  %v5114_v23 = vld [vmem:[%s15487_s9 + $0x438] sm:$0xff] }
 0x749   : > { %vm17031_vm7 = vnez %v17030_v6  ;;  %5930 = vmatpush.msra.mxu0 %v5124_v27  ;;  %6076 = vmatpush.msra.mxu3 %v5228_v31  ;;  %v5120_v31 = vld [vmem:[%s15487_s9 + $0x468] sm:$0xff] }
 0x74a   : > { %v5224_v27 = vld [vmem:[%s15487_s9 + $0x7a8] sm:$0xff] }
 0x74b   : > { %6707 = vmatmul.msk.f32.gmra.mxu1 %vm17031_vm7, %v14478_v41  ;;  %5901 = vmatmul.f32.gmra.mxu3 %v12895_v46 }
 0x74c   : > { %5931 = vmatpush.msra.mxu0 %v5122_v1  ;;  %6077 = vmatpush.msra.mxu3 %v5226_v0  ;;  %v5222_v1 = vld [vmem:[%s15487_s9 + $0x798] sm:$0xff]  ;;  %v14518_v0 = vsel %vm17023_vm5, %v4801_v25, %v4804_v11  ;;  %v5220_v25 = vld [vmem:[%s15487_s9 + $0x788] sm:$0xff] }
 0x74e   : > { %6768 = vmatmul.msk.f32.gmra.mxu2 %vm7116_vm15, %v14285_v62  ;;  %5932 = vmatpush.msra.mxu0 %v5120_v31  ;;  %v5118_v62 = vld [vmem:[%s15487_s9 + $0x458] sm:$0xff]  ;;  %vm17036_vm15 = vnez %v17035_v22  ;;  %v17125_v22 = vld [vmem:[#allocation162_spill] sm:$0xff] }
 0x74f   : > { %6078 = vmatpush.msra.mxu3 %v5224_v27  ;;  %v5042_v31 = vld [vmem:[%s15487_s9 + $0x1f8] sm:$0xff]  ;;  %v14530_v27 = vpop.f32.mrf.mxu0 }
 0x750   : > { %6751 = vmatmul.msk.f32.gmra.mxu0 %vm17031_vm7, %v17033_v17  ;;  %v5116_v17 = vld [vmem:[%s15487_s9 + $0x448] sm:$0xff]  ;;  %17037 = vst [vmem:[#allocation120_spill] sm:$0xff] %v14530_v27  ;;  %5773 = vmatpush.msra.mxu1 %v5042_v31  ;;  %v17039_v27 = vld [vmem:[#allocation136_spill] sm:$0xff] }
 0x751   : > { %5933 = vmatpush.msra.mxu0 %v5118_v62  ;;  %6079 = vmatpush.msra.mxu3 %v5222_v1  ;;  %v5218_v62 = vld [vmem:[%s15487_s9 + $0x778] sm:$0xff]  ;;  %v14545_v1 = vpop.f32.mrf.mxu2  ;;  %v5040_v31 = vld [vmem:[%s15487_s9 + $0x1e8] sm:$0xff] }
 0x752   : > { %17038 = vst [vmem:[#allocation137_spill] sm:$0xff] %v14545_v1  ;;  %5774 = vmatpush.msra.mxu1 %v5040_v31  ;;  %v5108_v31 = vld [vmem:[%s15487_s9 + $0x408] sm:$0xff]  ;;  %v5202_v1 = vld [vmem:[%s15487_s9 + $0x6f8] sm:$0xff] }
 0x753   : > { %6708 = vmatmul.msk.f32.gmra.mxu1 %vm17036_vm15, %v14518_v0  ;;  %5904 = vmatmul.f32.gmra.mxu3 %v16929_v60 }
 0x754   : > { %5934 = vmatpush.msra.mxu0 %v5116_v17  ;;  %6080 = vmatpush.msra.mxu3 %v5220_v25  ;;  %v5216_v17 = vld [vmem:[%s15487_s9 + $0x768] sm:$0xff]  ;;  %v14561_v25 = vsel %vm17023_vm5, %v4804_v11, %v4807_v14  ;;  %v5214_v11 = vld [vmem:[%s15487_s9 + $0x758] sm:$0xff] }
 0x755   : > { %6023 = vmatpush.msrb.mxu2 %v5202_v1  ;;  %v5208_v1 = vld [vmem:[%s15487_s9 + $0x728] sm:$0xff] }
 0x756   : > { %6769 = vmatmul.msk.f32.gmra.mxu2 %vm16719_vm8, %v14329_v4  ;;  %5935 = vmatpush.msra.mxu0 %v5114_v23  ;;  %v5112_v4 = vld [vmem:[%s15487_s9 + $0x428] sm:$0xff] }
 0x757   : > { %6081 = vmatpush.msra.mxu3 %v5218_v62  ;;  %v17041_v23 = vld [vmem:[#allocation19_spill] sm:$0xff]  ;;  %v5110_v62 = vld [vmem:[%s15487_s9 + $0x418] sm:$0xff]  ;;  %v14578_v49 = vpop.f32.mrf.mxu0 }
 0x758   : > { %6752 = vmatmul.msk.f32.gmra.mxu0 %vm17036_vm15, %v17039_v27  ;;  %v14563_v27 = vpop.f32.mrf.mxu3  ;;  %vm17042_vm8 = vnez %v17041_v23  ;;  %17043 = vst [vmem:[#allocation51_spill] sm:$0xff] %v14578_v49  ;;  %v17044_v49 = vld [vmem:[#allocation84_spill] sm:$0xff]  ;;  %v17130_v23 = vld [vmem:[#allocation118_spill] sm:$0xff] }
 0x759   : > { %17040 = vst [vmem:[#allocation177_spill] sm:$0xff] %v14563_v27  ;;  %5936 = vmatpush.msra.mxu0 %v5112_v4  ;;  %6082 = vmatpush.msra.mxu3 %v5216_v17  ;;  %v4810_v27 = vrot.slane %v14179_v20, 7  ;;  %v5212_v4 = vld [vmem:[%s15487_s9 + $0x748] sm:$0xff]  ;;  %v5038_v17 = vld [vmem:[%s15487_s9 + $0x1d8] sm:$0xff]  ;;  %v14602_v20 = vpop.f32.mrf.mxu2 }
 0x75a   : > { %5775 = vmatpush.msra.mxu1 %v5038_v17  ;;  %17045 = vst [vmem:[#allocation172_spill] sm:$0xff] %v14602_v20  ;;  %v5206_v17 = vld [vmem:[%s15487_s9 + $0x718] sm:$0xff]  ;;  %v17050_v20 = vrot.slane %v14217_v12, 7 }
 0x75b   : > { %6709 = vmatmul.msk.f32.gmra.mxu1 %vm17042_vm8, %v14561_v25  ;;  %5907 = vmatmul.f32.gmra.mxu3 %v16932_v36 }
 0x75c   : > { %5937 = vmatpush.msra.mxu0 %v5110_v62  ;;  %6083 = vmatpush.msra.mxu3 %v5214_v11  ;;  %v5200_v62 = vld [vmem:[%s15487_s9 + $0x6e8] sm:$0xff]  ;;  %v14606_v11 = vsel %vm17023_vm5, %v4807_v14, %v4810_v27 }
 0x75d   : > { %6024 = vmatpush.msrb.mxu2 %v5200_v62  ;;  %v5036_v14 = vld [vmem:[%s15487_s9 + $0x1c8] sm:$0xff] }
 0x75e   : > { %6770 = vmatmul.msk.f32.gmra.mxu2 %vm16561_vm2, %v14359_v52  ;;  %5938 = vmatpush.msra.mxu0 %v5108_v31  ;;  %v5210_v52 = vld [vmem:[%s15487_s9 + $0x738] sm:$0xff]  ;;  %v5196_v62 = vld [vmem:[%s15487_s9 + $0x6c8] sm:$0xff] }
 0x75f   : > { %6084 = vmatpush.msra.mxu3 %v5212_v4  ;;  %v5198_v31 = vld [vmem:[%s15487_s9 + $0x6d8] sm:$0xff]  ;;  %5776 = vmatpush.msra.mxu1 %v5036_v14  ;;  %v17049_v14 = vld [vmem:[#allocation152_spill] sm:$0xff]  ;;  %v17117_v6 = vld [vmem:[#allocation51_spill] sm:$0xff] }
 0x760   : > { %6753 = vmatmul.msk.f32.gmra.mxu0 %vm17042_vm8, %v17044_v49  ;;  %v17046_v49 = vld [vmem:[#allocation24_spill] sm:$0xff]  ;;  %6025 = vmatpush.msrb.mxu2 %v5198_v31  ;;  %v14621_v4 = vpop.f32.mrf.mxu3  ;;  %v5204_v31 = vld [vmem:[%s15487_s9 + $0x708] sm:$0xff] }
 0x761   : > { %vm17047_vm2 = vnez %v17046_v49  ;;  %6085 = vmatpush.msra.mxu3 %v5210_v52  ;;  %17048 = vst [vmem:[#allocation88_spill] sm:$0xff] %v14621_v4  ;;  %v5194_v52 = vld [vmem:[%s15487_s9 + $0x6b8] sm:$0xff]  ;;  %v14638_v4 = vpop.f32.mrf.mxu0 }
 0x762   : > { %6026 = vmatpush.msrb.mxu2 %v5196_v62  ;;  %v14653_v62 = vsel %vm17023_vm5, %v4810_v27, %v17050_v20  ;;  %v4883_v20 = vrot.slane %v16924_v13, 1  ;;  %v5188_v27 = vld [vmem:[%s15487_s9 + $0x688] sm:$0xff]  ;;  %v5186_v13 = vld [vmem:[%s15487_s9 + $0x678] sm:$0xff]  ;;  %vm17054_vm5 = vcmp.lt.s32.totalorder %v16751_v24, 7 }
 0x763   : > { %6710 = vmatmul.msk.f32.gmra.mxu1 %vm17047_vm2, %v14606_v11  ;;  %5910 = vmatmul.f32.gmra.mxu3 %v16934_v42  ;;  %v5160_v24 = vld [vmem:[%s15487_s9 + $0x5a8] sm:$0xff] }
 0x764   : > { %6086 = vmatpush.msra.mxu3 %v5208_v1  ;;  %6027 = vmatpush.msrb.mxu2 %v5194_v52  ;;  %v5192_v1 = vld [vmem:[%s15487_s9 + $0x6a8] sm:$0xff]  ;;  %v5190_v52 = vld [vmem:[%s15487_s9 + $0x698] sm:$0xff] }
 0x766   : > { %6771 = vmatmul.msk.f32.gmra.mxu2 %vm17016_vm10, %v14390_v59  ;;  %6087 = vmatpush.msra.mxu3 %v5206_v17  ;;  %v5034_v59 = vld [vmem:[%s15487_s9 + $0x1b8] sm:$0xff]  ;;  %vm17051_vm10 = vnez %v16491_v8  ;;  %v14659_v17 = vpop.f32.mrf.mxu2 }
 0x767   : > { %5777 = vmatpush.msra.mxu1 %v5034_v59  ;;  %6028 = vmatpush.msrb.mxu2 %v5192_v1  ;;  %v17053_v59 = vld [vmem:[#allocation55_spill] sm:$0xff] }
 0x768   : > { %6754 = vmatmul.msk.f32.gmra.mxu0 %vm17047_vm2, %v17049_v14  ;;  %6088 = vmatpush.msra.mxu3 %v5204_v31  ;;  %v5032_v31 = vld [vmem:[%s15487_s9 + $0x1a8] sm:$0xff]  ;;  %v14674_v14 = vpop.f32.mrf.mxu3 }
 0x769   : > { %17052 = vst [vmem:[#allocation67_spill] sm:$0xff] %v14674_v14  ;;  %6029 = vmatpush.msrb.mxu2 %v5190_v52  ;;  %5778 = vmatpush.msra.mxu1 %v5032_v31  ;;  %v14683_v1 = vpop.f32.mrf.mxu0  ;;  %v5030_v52 = vld [vmem:[%s15487_s9 + $0x198] sm:$0xff] }
 0x76b   : > { %6711 = vmatmul.msk.f32.gmra.mxu1 %vm17051_vm10, %v14653_v62  ;;  %5913 = vmatmul.f32.gmra.mxu3 %v16939_v28 }
 0x76c   : > { %6030 = vmatpush.msrb.mxu2 %v5188_v27  ;;  %v5184_v27 = vld [vmem:[%s15487_s9 + $0x668] sm:$0xff]  ;;  %5779 = vmatpush.msra.mxu1 %v5030_v52 }
 0x76d   : > { %v5180_v52 = vld [vmem:[%s15487_s9 + $0x648] sm:$0xff] }
 0x76e   : > { %6772 = vmatmul.msk.f32.gmra.mxu2 %vm17025_vm1, %v14430_v48  ;;  %v15984_v48 = vrot.slane %v16923_v39, 1  ;;  %v14701_v31 = vpop.f32.mrf.mxu2 }
 0x76f   : > { %6031 = vmatpush.msrb.mxu2 %v5186_v13 }
 0x770   : > { %6755 = vmatmul.msk.f32.gmra.mxu0 %vm17051_vm10, %v17053_v59  ;;  %v14689_v12 = vsel %vm17054_vm5, %v15984_v48, %v4883_v20  ;;  %v4886_v59 = vrot.slane %v16925_v47, 1  ;;  %v5182_v48 = vld [vmem:[%s15487_s9 + $0x658] sm:$0xff]  ;;  %v14711_v13 = vpop.f32.mrf.mxu3  ;;  %v5028_v47 = vld [vmem:[%s15487_s9 + $0x188] sm:$0xff] }
 0x771   : > { %6032 = vmatpush.msrb.mxu2 %v5184_v27  ;;  %17055 = vst [vmem:[#allocation180_spill] sm:$0xff] %v14711_v13  ;;  %5780 = vmatpush.msra.mxu1 %v5028_v47  ;;  %v5026_v27 = vld [vmem:[%s15487_s9 + $0x178] sm:$0xff] }
 0x772   : > { %v14718_v14 = vsel %vm17054_vm5, %v4883_v20, %v4886_v59  ;;  %v4889_v20 = vrot.slane %v12864_v15, 1  ;;  %v5174_v15 = vld [vmem:[%s15487_s9 + $0x618] sm:$0xff] }
 0x773   : > { %6712 = vmatmul.msk.f32.vlgmr.msrb.gmra.mxu1 %vm16879_vm13, %v14689_v12  ;;  %5916 = vmatmul.f32.gmra.mxu3 %v16944_v58 }
 0x774   : > { %6033 = vmatpush.msrb.mxu2 %v5182_v48  ;;  %v5176_v48 = vld [vmem:[%s15487_s9 + $0x628] sm:$0xff]  ;;  %5781 = vmatpush.msra.mxu1 %v5026_v27 }
 0x776   : > { %6773 = vmatmul.msk.f32.gmra.mxu2 %vm17031_vm7, %v14478_v41  ;;  %v5178_v41 = vld [vmem:[%s15487_s9 + $0x638] sm:$0xff] }
 0x777   : > { %6034 = vmatpush.msrb.mxu2 %v5180_v52  ;;  %v14742_v52 = vpop.f32.mrf.mxu2 }
 0x778   : > { %5939 = vmatmul.f32.vlgmr.msra.gmra.mxu0 %v16955_v53  ;;  %v14727_v53 = vpop.f32.mrf.mxu0  ;;  %v14745_v47 = vpop.f32.mrf.mxu3 }
 0x779   : > { %6035 = vmatpush.msrb.mxu2 %v5178_v41 }
 0x77b   : > { %6713 = vmatmul.msk.f32.gmra.mxu1 %vm16661_vm11, %v14718_v14  ;;  %5919 = vmatmul.f32.gmra.mxu3 %v16949_v38 }
 0x77c   : > { %6036 = vmatpush.msrb.mxu2 %v5176_v48  ;;  %v5024_v48 = vld [vmem:[%s15487_s9 + $0x168] sm:$0xff] }
 0x77d   : > { %5782 = vmatpush.msra.mxu1 %v5024_v48  ;;  %v5018_v48 = vld [vmem:[%s15487_s9 + $0x138] sm:$0xff] }
 0x77e   : > { %6774 = vmatmul.msk.f32.gmra.mxu2 %vm17036_vm15, %v14518_v0  ;;  %v14752_v0 = vsel %vm17054_vm5, %v4886_v59, %v4889_v20  ;;  %v4892_v59 = vrot.slane %v12895_v46, 1  ;;  %v5022_v46 = vld [vmem:[%s15487_s9 + $0x158] sm:$0xff] }
 0x77f   : > { %6037 = vmatpush.msrb.mxu2 %v5174_v15  ;;  %5783 = vmatpush.msra.mxu1 %v5022_v46  ;;  %v5260_v46 = vld [vmem:[%s15487_s9 + $0x8c8] sm:$0xff] }
 0x780   : > { %5942 = vmatmul.f32.gmra.mxu0 %v16952_v50  ;;  %v5172_v50 = vld [vmem:[%s15487_s9 + $0x608] sm:$0xff]  ;;  %v14763_v41 = vpop.f32.mrf.mxu0  ;;  %v14777_v27 = vsel %vm17054_vm5, %v4889_v20, %v4892_v59  ;;  %v14779_v15 = vpop.f32.mrf.mxu3  ;;  %v5266_v20 = vld [vmem:[%s15487_s9 + $0x8f8] sm:$0xff] }
 0x781   : > { %6038 = vmatpush.msrb.mxu2 %v5172_v50  ;;  %6123 = vmatpush.msrb.mxu0 %v5266_v20 }
 0x782   : > { %6846 = vmatpush.msrb.mxu3 %v5266_v20 }
 0x783   : > { %6714 = vmatmul.msk.f32.gmra.mxu1 %vm16893_vm3, %v14752_v0  ;;  %6789 = vmatmul.msk.f32.vlgmr.msra.gmra.mxu3 %vm16879_vm13, %v13969_v45  ;;  %v14773_v45 = vpop.f32.mrf.mxu2 }
 0x786   : > { %6775 = vmatmul.msk.f32.gmra.mxu2 %vm17042_vm8, %v14561_v25 }
 0x788   : > { %5945 = vmatmul.f32.gmra.mxu0 %v16959_v5  ;;  %v4895_v5 = vrot.slane %v16929_v60, 1  ;;  %v14794_v25 = vpop.f32.mrf.mxu0  ;;  %v5020_v60 = vld [vmem:[%s15487_s9 + $0x148] sm:$0xff]  ;;  %v14818_v50 = vpop.f32.mrf.mxu3 }
 0x789   : > { %5784 = vmatpush.msra.mxu1 %v5020_v60 }
 0x78b   : > { %6715 = vmatmul.msk.f32.gmra.mxu1 %vm16676_vm12, %v14777_v27  ;;  %6790 = vmatmul.msk.f32.gmra.mxu3 %vm16661_vm11, %v14023_v61  ;;  %v14802_v61 = vsel %vm17054_vm5, %v4892_v59, %v4895_v5  ;;  %v5262_v59 = vld [vmem:[%s15487_s9 + $0x8d8] sm:$0xff] }
 0x78c   : > { %5785 = vmatpush.msra.mxu1 %v5018_v48 }
 0x78e   : > { %6776 = vmatmul.msk.f32.gmra.mxu2 %vm17047_vm2, %v14606_v11  ;;  %v14816_v11 = vpop.f32.mrf.mxu2  ;;  %vm17063_vm2 = vnez %v16412_v43 }
 0x78f   : > { %17056 = vst [vmem:[#allocation54_spill] sm:$0xff] %v14816_v11  ;;  %v17090_v11 = vld [vmem:[#allocation171_spill] sm:$0xff] }
 0x790   : > { %5948 = vmatmul.f32.gmra.mxu0 %v16965_v30  ;;  %v5264_v30 = vld [vmem:[%s15487_s9 + $0x8e8] sm:$0xff]  ;;  %v14866_v48 = vpop.f32.mrf.mxu3 }
 0x791   : > { %6124 = vmatpush.msrb.mxu0 %v5264_v30  ;;  %6847 = vmatpush.msrb.mxu3 %v5264_v30  ;;  %v5256_v30 = vld [vmem:[%s15487_s9 + $0x8a8] sm:$0xff] }
 0x793   : > { %6716 = vmatmul.msk.f32.gmra.mxu1 %vm16904_vm14, %v14802_v61  ;;  %6791 = vmatmul.msk.f32.gmra.mxu3 %vm16893_vm3, %v14082_v34  ;;  %v4898_v34 = vrot.slane %v16932_v36, 1  ;;  %v5258_v36 = vld [vmem:[%s15487_s9 + $0x8b8] sm:$0xff] }
 0x794   : > { %6125 = vmatpush.msrb.mxu0 %v5262_v59  ;;  %6848 = vmatpush.msrb.mxu3 %v5262_v59  ;;  %v4901_v59 = vrot.slane %v16934_v42, 1 }
 0x795   : > { %v14843_v60 = vsel %vm17054_vm5, %v4895_v5, %v4898_v34 }
 0x796   : > { %6777 = vmatmul.msk.f32.gmra.mxu2 %vm17051_vm10, %v14653_v62  ;;  %6126 = vmatpush.msrb.mxu0 %v5260_v46  ;;  %v14839_v62 = vpop.f32.mrf.mxu0  ;;  %vm17058_vm10 = vnez %v16967_v21  ;;  %v14857_v5 = vpop.f32.mrf.mxu2  ;;  %v14876_v42 = vsel %vm17054_vm5, %v4898_v34, %v4901_v59  ;;  %v4904_v34 = vrot.slane %v16939_v28, 1  ;;  %v5246_v28 = vld [vmem:[%s15487_s9 + $0x858] sm:$0xff]  ;;  %v5144_v21 = vld [vmem:[%s15487_s9 + $0x528] sm:$0xff] }
 0x797   : > { %6849 = vmatpush.msrb.mxu3 %v5260_v46  ;;  %17057 = vst [vmem:[#allocation176_spill] sm:$0xff] %v14839_v62  ;;  %v17091_v62 = vld [vmem:[#allocation40_spill] sm:$0xff] }
 0x798   : > { %v14833_v20 = vpop.f32.mrf.mxu1  ;;  %5951 = vmatmul.f32.gmra.mxu0 %v16971_v57  ;;  %v5016_v57 = vld [vmem:[%s15487_s9 + $0x128] sm:$0xff] }
 0x799   : > { %6127 = vmatpush.msrb.mxu0 %v5258_v36  ;;  %5786 = vmatpush.msra.mxu1 %v5016_v57 }
 0x79a   : > { %6850 = vmatpush.msrb.mxu3 %v5258_v36  ;;  %v5252_v36 = vld [vmem:[%s15487_s9 + $0x888] sm:$0xff] }
 0x79b   : > { %6717 = vmatmul.msk.f32.gmra.mxu1 %vm17058_vm10, %v14843_v60  ;;  %6792 = vmatmul.msk.f32.gmra.mxu3 %vm16676_vm12, %v14127_v44  ;;  %v5254_v44 = vld [vmem:[%s15487_s9 + $0x898] sm:$0xff] }
 0x79c   : > { %6128 = vmatpush.msrb.mxu0 %v5256_v30  ;;  %6851 = vmatpush.msrb.mxu3 %v5256_v30  ;;  %v5012_v30 = vld [vmem:[%s15487_s9 + $0x108] sm:$0xff] }
 0x79e   : > { %6778 = vmatmul.msk.f32.vlgmr.msrb.gmra.mxu2 %vm16879_vm13, %v14689_v12  ;;  %6129 = vmatpush.msrb.mxu0 %v5254_v44  ;;  %v5250_v12 = vld [vmem:[%s15487_s9 + $0x878] sm:$0xff]  ;;  %v14890_v57 = vpop.f32.mrf.mxu0 }
 0x79f   : > { %6852 = vmatpush.msrb.mxu3 %v5254_v44  ;;  %17059 = vst [vmem:[#allocation130_spill] sm:$0xff] %v14890_v57  ;;  %v14902_v44 = vpop.f32.mrf.mxu2  ;;  %v17106_v57 = vld [vmem:[#allocation105_spill] sm:$0xff] }
 0x7a0   : > { %v14868_v46 = vpop.f32.mrf.mxu1  ;;  %5954 = vmatmul.f32.gmra.mxu0 %v16975_v16  ;;  %v5014_v16 = vld [vmem:[%s15487_s9 + $0x118] sm:$0xff] }
 0x7a1   : > { %6130 = vmatpush.msrb.mxu0 %v5252_v36  ;;  %5787 = vmatpush.msra.mxu1 %v5014_v16  ;;  %v14914_v16 = vsel %vm17054_vm5, %v4901_v59, %v4904_v34 }
 0x7a2   : > { %6853 = vmatpush.msrb.mxu3 %v5252_v36 }
 0x7a3   : > { %6718 = vmatmul.msk.f32.gmra.mxu1 %vm16914_vm6, %v14876_v42  ;;  %6793 = vmatmul.msk.f32.gmra.mxu3 %vm16904_vm14, %v14177_v35  ;;  %v5248_v35 = vld [vmem:[%s15487_s9 + $0x868] sm:$0xff] }
 0x7a4   : > { %6131 = vmatpush.msrb.mxu0 %v5250_v12  ;;  %5788 = vmatpush.msra.mxu1 %v5012_v30 }
 0x7a5   : > { %6854 = vmatpush.msrb.mxu3 %v5250_v12  ;;  %v5170_v12 = vld [vmem:[%s15487_s9 + $0x5f8] sm:$0xff] }
 0x7a6   : > { %6779 = vmatmul.msk.f32.gmra.mxu2 %vm16661_vm11, %v14718_v14  ;;  %v14907_v14 = vpop.f32.mrf.mxu3  ;;  %6132 = vmatpush.msrb.mxu0 %v5248_v35  ;;  %v14928_v59 = vpop.f32.mrf.mxu0 }
 0x7a7   : > { %6855 = vmatpush.msrb.mxu3 %v5248_v35  ;;  %5973 = vmatpush.msrb.mxu1 %v5170_v12  ;;  %17060 = vst [vmem:[#allocation93_spill] sm:$0xff] %v14928_v59  ;;  %v4907_v35 = vrot.slane %v16944_v58, 1  ;;  %v14943_v12 = vpop.f32.mrf.mxu2  ;;  %v5166_v59 = vld [vmem:[%s15487_s9 + $0x5d8] sm:$0xff] }
 0x7a8   : > { %v14904_v36 = vpop.f32.mrf.mxu1  ;;  %5957 = vmatmul.f32.gmra.mxu0 %v16980_v19  ;;  %v5244_v19 = vld [vmem:[%s15487_s9 + $0x848] sm:$0xff] }
 0x7a9   : > { %6133 = vmatpush.msrb.mxu0 %v5246_v28  ;;  %6856 = vmatpush.msrb.mxu3 %v5246_v28  ;;  %v5240_v28 = vld [vmem:[%s15487_s9 + $0x828] sm:$0xff]  ;;  %v14947_v58 = vsel %vm17054_vm5, %v4904_v34, %v4907_v35  ;;  %v4910_v34 = vrot.slane %v16949_v38, 1 }
 0x7ab   : > { %6719 = vmatmul.msk.f32.gmra.mxu1 %vm16917_vm4, %v14914_v16  ;;  %6794 = vmatmul.msk.f32.gmra.mxu3 %vm17058_vm10, %v14215_v7  ;;  %v5242_v7 = vld [vmem:[%s15487_s9 + $0x838] sm:$0xff]  ;;  %v4913_v38 = vsel %vm17054_vm5, %v4907_v35, %v4910_v34 }
 0x7ac   : > { %6134 = vmatpush.msrb.mxu0 %v5244_v19  ;;  %6857 = vmatpush.msrb.mxu3 %v5244_v19  ;;  %v17061_v19 = vld [vmem:[#allocation56_spill] sm:$0xff] }
 0x7ae   : > { %6780 = vmatmul.msk.f32.gmra.mxu2 %vm16893_vm3, %v14752_v0  ;;  %6135 = vmatpush.msrb.mxu0 %v5242_v7  ;;  %v14949_v0 = vpop.f32.mrf.mxu3  ;;  %v14973_v13 = vpop.f32.mrf.mxu0 }
 0x7af   : > { %6858 = vmatpush.msrb.mxu3 %v5242_v7  ;;  %v5168_v7 = vld [vmem:[%s15487_s9 + $0x5e8] sm:$0xff]  ;;  %17062 = vst [vmem:[#allocation141_spill] sm:$0xff] %v14973_v13 }
 0x7b0   : > { %v14937_v30 = vpop.f32.mrf.mxu1  ;;  %5960 = vmatmul.f32.gmra.mxu0 %v16984_v2  ;;  %v5238_v2 = vld [vmem:[%s15487_s9 + $0x818] sm:$0xff]  ;;  %5974 = vmatpush.msrb.mxu1 %v5168_v7  ;;  %v17065_v7 = vld [vmem:[#allocation178_spill] sm:$0xff] }
 0x7b1   : > { %6136 = vmatpush.msrb.mxu0 %v5240_v28  ;;  %6859 = vmatpush.msrb.mxu3 %v5240_v28 }
 0x7b2   : > { %5975 = vmatpush.msrb.mxu1 %v5166_v59  ;;  %v5164_v59 = vld [vmem:[%s15487_s9 + $0x5c8] sm:$0xff] }
 0x7b3   : > { %6720 = vmatmul.msk.f32.gmra.mxu1 %vm16919_vm0, %v14947_v58  ;;  %6795 = vmatmul.msk.f32.gmra.mxu3 %vm16914_vm6, %v17061_v19  ;;  %v5236_v19 = vld [vmem:[%s15487_s9 + $0x808] sm:$0xff] }
 0x7b4   : > { %6137 = vmatpush.msrb.mxu0 %v5238_v2  ;;  %6860 = vmatpush.msrb.mxu3 %v5238_v2  ;;  %v14988_v2 = vpop.f32.mrf.mxu2 }
 0x7b5   : > { %5976 = vmatpush.msrb.mxu1 %v5164_v59  ;;  %v17069_v59 = vld [vmem:[#allocation63_spill] sm:$0xff] }
 0x7b6   : > { %6781 = vmatmul.msk.f32.gmra.mxu2 %vm16676_vm12, %v14777_v27  ;;  %6138 = vmatpush.msrb.mxu0 %v5236_v19  ;;  %v17064_v27 = vld [vmem:[#allocation46_spill] sm:$0xff] }
 0x7b7   : > { %6861 = vmatpush.msrb.mxu3 %v5236_v19  ;;  %v14998_v19 = vpop.f32.mrf.mxu0 }
 0x7b8   : > { %v14975_v28 = vpop.f32.mrf.mxu1  ;;  %5963 = vmatmul.f32.gmra.mxu0 %v16993_v26  ;;  %v14990_v26 = vpop.f32.mrf.mxu3  ;;  %17066 = vst [vmem:[#allocation119_spill] sm:$0xff] %v14998_v19 }
 0x7bb   : > { %6721 = vmatmul.msk.f32.gmra.mxu1 %vm17063_vm2, %v4913_v38  ;;  %6796 = vmatmul.msk.f32.gmra.mxu3 %vm16917_vm4, %v17064_v27  ;;  %v17067_v27 = vrot.slane %v16923_v39, 1 }
 0x7bd   : > { %v4943_v13 = vsel %vm17054_vm5, %v4910_v34, %v17067_v27  ;;  %v17070_v27 = vld [vmem:[#allocation86_spill] sm:$0xff]  ;;  %vm17072_vm5 = vnez %v16989_v56  ;;  %v17075_v56 = vld [vmem:[#allocation72_spill] sm:$0xff] }
 0x7be   : > { %6782 = vmatmul.msk.f32.gmra.mxu2 %vm16904_vm14, %v14802_v61  ;;  %v5162_v61 = vld [vmem:[%s15487_s9 + $0x5b8] sm:$0xff] }
 0x7bf   : > { %5977 = vmatpush.msrb.mxu1 %v5162_v61  ;;  %v17073_v61 = vld [vmem:[#allocation68_spill] sm:$0xff]  ;;  %v15034_v19 = vpop.f32.mrf.mxu0 }
 0x7c0   : > { %v14995_v35 = vpop.f32.mrf.mxu1  ;;  %5966 = vmatmul.f32.gmra.mxu0 %v17065_v7  ;;  %v15012_v7 = vpop.f32.mrf.mxu2  ;;  %17074 = vst [vmem:[#allocation57_spill] sm:$0xff] %v15034_v19  ;;  %v17079_v19 = vld [vmem:[#allocation115_spill] sm:$0xff] }
 0x7c1   : > { %v15020_v39 = vpop.f32.mrf.mxu3  ;;  %5978 = vmatpush.msrb.mxu1 %v5160_v24 }
 0x7c3   : > { %6722 = vmatmul.msk.f32.gmra.mxu1 %vm16297_vm9, %v4943_v13  ;;  %6797 = vmatmul.msk.f32.gmra.mxu3 %vm16919_vm0, %v17069_v59  ;;  %v17071_v59 = vld [vmem:[#allocation64_spill] sm:$0xff] }
 0x7c6   : > { %6783 = vmatmul.msk.f32.gmra.mxu2 %vm17058_vm10, %v14843_v60  ;;  %v5158_v60 = vld [vmem:[%s15487_s9 + $0x598] sm:$0xff] }
 0x7c7   : > { %5979 = vmatpush.msrb.mxu1 %v5158_v60  ;;  %v15054_v60 = vpop.f32.mrf.mxu0 }
 0x7c8   : > { %v15022_v34 = vpop.f32.mrf.mxu1  ;;  %5969 = vmatmul.f32.gmra.mxu0 %v17070_v27  ;;  %v15039_v24 = vpop.f32.mrf.mxu2  ;;  %17080 = vst [vmem:[#allocation106_spill] sm:$0xff] %v15054_v60  ;;  %v17084_v60 = vld [vmem:[#allocation96_spill] sm:$0xff] }
 0x7c9   : > { %5980 = vmatpush.msrb.mxu1 %v5156_v63 }
 0x7cb   : > { %6756 = vmatmul.msk.f32.vlgmr.msra.gmra.mxu1 %vm17072_vm5, %v17071_v59  ;;  %6798 = vmatmul.msk.f32.gmra.mxu3 %vm17063_vm2, %v17073_v61  ;;  %v15046_v59 = vpop.f32.mrf.mxu3  ;;  %v17077_v61 = vld [vmem:[#allocation161_spill] sm:$0xff]  ;;  %vm17078_vm5 = vnez %v16996_v33 }
 0x7cc   : > { %17076 = vst [vmem:[#allocation74_spill] sm:$0xff] %v15046_v59 }
 0x7ce   : > { %6784 = vmatmul.msk.f32.gmra.mxu2 %vm16914_vm6, %v14876_v42 }
 0x7d0   : > { %v15041_v27 = vpop.f32.mrf.mxu1  ;;  %6800 = vmatmul.msk.f32.vlgmr.msrb.gmra.mxu0 %vm16879_vm13, %v17075_v56  ;;  %v17082_v56 = vld [vmem:[#allocation182_spill] sm:$0xff]  ;;  %v15069_v33 = vpop.f32.mrf.mxu2  ;;  %vm17085_vm13 = vnez %v17004_v54 }
 0x7d1   : > { %v17087_v54 = vld [vmem:[#allocation34_spill] sm:$0xff] }
 0x7d3   : > { %6757 = vmatmul.msk.f32.gmra.mxu1 %vm17078_vm5, %v17077_v61  ;;  %6799 = vmatmul.msk.f32.gmra.mxu3 %vm16297_vm9, %v17079_v19  ;;  %v15072_v19 = vperm.slane %v15062_v9, 0  ;;  %v15074_v61 = vpop.f32.mrf.mxu3  ;;  %v15093_v9 = vpop.f32.mrf.mxu0 }
 0x7d4   : > { %17083 = vst [vmem:[#allocation98_spill] sm:$0xff] %v15074_v61  ;;  %v17089_v61 = vld [vmem:[#allocation155_spill] sm:$0xff] }
 0x7d5   : > { %17088 = vst [vmem:[#allocation9_spill] sm:$0xff] %v15093_v9  ;;  %v17098_v9 = vld [vmem:[#allocation167_spill] sm:$0xff] }
 0x7d6   : > { %6785 = vmatmul.msk.f32.gmra.mxu2 %vm16917_vm4, %v14914_v16  ;;  %v17086_v16 = vld [vmem:[#allocation165_spill] sm:$0xff] }
 0x7d8   : > { %v15064_v42 = vpop.f32.mrf.mxu1  ;;  %6801 = vmatmul.msk.f32.gmra.mxu0 %vm16661_vm11, %v17082_v56  ;;  %v5154_v56 = vld [vmem:[%s15487_s9 + $0x578] sm:$0xff]  ;;  %vm17092_vm11 = vnez %v17010_v10 }
 0x7d9   : > { %5981 = vmatpush.msrb.mxu1 %v5154_v56  ;;  %v15108_v56 = vpop.f32.mrf.mxu2  ;;  %v17096_v10 = vld [vmem:[#allocation149_spill] sm:$0xff] }
 0x7db   : > { %6758 = vmatmul.msk.f32.gmra.mxu1 %vm17085_vm13, %v17084_v60  ;;  %6810 = vmatmul.msk.f32.vlgmr.msrb.gmra.mxu3 %vm16297_vm9, %v17086_v16  ;;  %v5291_v60 = vadd.f32 %v17087_v54, %v15072_v19 }
 0x7dd   : > { %v5341_v59 = vadd.f32 %v17090_v11, %v5291_v60  ;;  %v17094_v11 = vld [vmem:[#allocation127_spill] sm:$0xff]  ;;  %v15121_v60 = vpop.f32.mrf.mxu0 }
 0x7de   : > { %6786 = vmatmul.msk.f32.gmra.mxu2 %vm16919_vm0, %v14947_v58  ;;  %v5152_v58 = vld [vmem:[%s15487_s9 + $0x568] sm:$0xff]  ;;  %17097 = vst [vmem:[#allocation94_spill] sm:$0xff] %v15121_v60 }
 0x7df   : > { %v5391_v63 = vadd.f32 %v14833_v20, %v5341_v59  ;;  %5982 = vmatpush.msrb.mxu1 %v5152_v58  ;;  %v17095_v59 = vld [vmem:[#allocation187_spill] sm:$0xff] }
 0x7e0   : > { %v15095_v16 = vpop.f32.mrf.mxu1  ;;  %6802 = vmatmul.msk.f32.gmra.mxu0 %vm16893_vm3, %v17089_v61  ;;  %v5294_v61 = vadd.f32 %v17093_v37, %v15072_v19  ;;  %vm17099_vm3 = vnez %v17015_v18  ;;  %v17103_v18 = vld [vmem:[#allocation50_spill] sm:$0xff] }
 0x7e1   : > { %v5441_v54 = vadd.f32 %v17094_v11, %v5391_v63  ;;  %v5150_v63 = vld [vmem:[%s15487_s9 + $0x558] sm:$0xff]  ;;  %v15131_v11 = vpop.f32.mrf.mxu2 }
 0x7e2   : > { %5983 = vmatpush.msrb.mxu1 %v5150_v63 }
 0x7e3   : > { %6759 = vmatmul.msk.f32.gmra.mxu1 %vm17092_vm11, %v17091_v62  ;;  %v5344_v62 = vadd.f32 %v17096_v10, %v5294_v61  ;;  %v17102_v61 = vld [vmem:[#allocation164_spill] sm:$0xff] }
 0x7e5   : > { %v5394_v58 = vadd.f32 %v14868_v46, %v5344_v62  ;;  %v5297_v46 = vadd.f32 %v17101_v40, %v15072_v19  ;;  %v17105_v62 = vld [vmem:[#allocation158_spill] sm:$0xff]  ;;  %v17107_v40 = vld [vmem:[#allocation123_spill] sm:$0xff] }
 0x7e6   : > { %6787 = vmatmul.msk.f32.gmra.mxu2 %vm17063_vm2, %v4913_v38  ;;  %v17100_v38 = vld [vmem:[#allocation190_spill] sm:$0xff] }
 0x7e7   : > { %v5491_v37 = vadd.f32 %v17100_v38, %v5441_v54  ;;  %v17104_v54 = vld [vmem:[#allocation186_spill] sm:$0xff]  ;;  %v5347_v38 = vadd.f32 %v17105_v62, %v5297_v46  ;;  %v15155_v46 = vpop.f32.mrf.mxu0  ;;  %v17111_v62 = vld [vmem:[#allocation189_spill] sm:$0xff] }
 0x7e8   : > { %v15115_v20 = vpop.f32.mrf.mxu1  ;;  %6803 = vmatmul.msk.f32.gmra.mxu0 %vm16676_vm12, %v17095_v59  ;;  %v5444_v59 = vadd.f32 %v17102_v61, %v5394_v58  ;;  %v17109_v61 = vld [vmem:[#allocation132_spill] sm:$0xff]  ;;  %vm17139_vm12 = vnez %v16491_v8 }
 0x7e9   : > { %v5397_v60 = vadd.f32 %v14904_v36, %v5347_v38  ;;  %v5300_v36 = vadd.f32 %v17108_v29, %v15072_v19 }
 0x7ea   : > { %v5494_v58 = vadd.f32 %v17107_v40, %v5444_v59  ;;  %v17113_v40 = vld [vmem:[#allocation70_spill] sm:$0xff] }
 0x7eb   : > { %6760 = vmatmul.msk.f32.gmra.mxu1 %vm17099_vm3, %v17098_v9  ;;  %v5541_v9 = vadd.f32 %v17103_v18, %v5491_v37  ;;  %v5148_v37 = vld [vmem:[%s15487_s9 + $0x548] sm:$0xff]  ;;  %v5447_v59 = vadd.f32 %v17109_v61, %v5397_v60 }
 0x7ec   : > { %5984 = vmatpush.msrb.mxu1 %v5148_v37 }
 0x7ee   : > { %6788 = vmatmul.msk.f32.gmra.mxu2 %vm16297_vm9, %v4943_v13  ;;  %5985 = vmatpush.msrb.mxu1 %v5146_v55 }
 0x7f0   : > { %v5590_v10 = vpop.f32.mrf.mxu1  ;;  %6804 = vmatmul.msk.f32.gmra.mxu0 %vm16904_vm14, %v17104_v54  ;;  %5986 = vmatpush.msrb.mxu1 %v5144_v21  ;;  %v17123_v21 = vld [vmem:[#allocation137_spill] sm:$0xff] }
 0x7f1   : > { %v5591_v63 = vadd.f32 %v5590_v10, %v5541_v9  ;;  %v17110_v9 = vld [vmem:[#allocation120_spill] sm:$0xff] }
 0x7f2   : > { %v5544_v10 = vadd.f32 %v17110_v9, %v5494_v58  ;;  %v17114_v58 = vld [vmem:[#allocation159_spill] sm:$0xff] }
 0x7f3   : > { %v5641_v13 = vadd.f32 %v14857_v5, %v5591_v63  ;;  %6761 = vmatmul.msk.f32.gmra.mxu1 %vm17025_vm1, %v17106_v57  ;;  %v5497_v37 = vadd.f32 %v17114_v58, %v5447_v59  ;;  %v17118_v59 = vld [vmem:[#allocation160_spill] sm:$0xff]  ;;  %v17122_v58 = vld [vmem:[#allocation58_spill] sm:$0xff] }
 0x7f5   : > { %v5691_v5 = vadd.f32 %v14745_v47, %v5641_v13  ;;  %v17112_v47 = vld [vmem:[#allocation2_spill] sm:$0xff] }
 0x7f6   : > { %v5350_v38 = vadd.f32 %v17112_v47, %v5300_v36 }
 0x7f7   : > { %v6173_v18 = vmul.f32 0.1, %v5691_v5 }
 0x7f8   : > { %v5593_v54 = vpop.f32.mrf.mxu1  ;;  %6805 = vmatmul.msk.f32.gmra.mxu0 %vm17058_vm10, %v17111_v62  ;;  %v5400_v60 = vadd.f32 %v14937_v30, %v5350_v38  ;;  %v17115_v30 = vld [vmem:[#allocation60_spill] sm:$0xff]  ;;  %v5140_v38 = vld [vmem:[%s15487_s9 + $0x508] sm:$0xff] }
 0x7f9   : > { %v6195_v63 = vmax.f32 %v5691_v5, %v6173_v18  ;;  %v5594_v13 = vadd.f32 %v5593_v54, %v5544_v10  ;;  %v15183_v5 = vpop.f32.mrf.mxu0  ;;  %v5303_v29 = vadd.f32 %v17115_v30, %v15072_v19  ;;  %v5547_v18 = vadd.f32 %v17117_v6, %v5497_v37  ;;  %v5142_v10 = vld [vmem:[%s15487_s9 + $0x518] sm:$0xff] }
 0x7fa   : > { %5987 = vmatpush.msrb.mxu1 %v5142_v10  ;;  %v5306_v37 = vadd.f32 %v17122_v58, %v15072_v19  ;;  %v15224_v10 = vpop.f32.mrf.mxu2 }
 0x7fb   : > { %6217 = vst [vmem:[%s15166_s16] sm:$0xff] %v6195_v63  ;;  %v5644_v57 = vadd.f32 %v14902_v44, %v5594_v13  ;;  %6762 = vmatmul.msk.f32.gmra.mxu1 %vm17031_vm7, %v17113_v40  ;;  %v17116_v44 = vld [vmem:[#allocation168_spill] sm:$0xff] }
 0x7fc   : > { %v5450_v36 = vadd.f32 %v17116_v44, %v5400_v60  ;;  %v17121_v60 = vld [vmem:[#allocation169_spill] sm:$0xff]  ;;  %5988 = vmatpush.msrb.mxu1 %v5140_v38  ;;  %v17124_v44 = vld [vmem:[#allocation154_spill] sm:$0xff] }
 0x7fd   : > { %v5694_v55 = vadd.f32 %v14779_v15, %v5644_v57  ;;  %v17119_v15 = vld [vmem:[#allocation188_spill] sm:$0xff] }
 0x7fe   : > { %v5353_v54 = vadd.f32 %v17119_v15, %v5303_v29  ;;  %v5500_v57 = vadd.f32 %v17121_v60, %v5450_v36  ;;  %v5356_v36 = vadd.f32 %v17125_v22, %v5306_v37  ;;  %v17128_v15 = vld [vmem:[#allocation104_spill] sm:$0xff] }
 0x7ff   : > { %v6175_v61 = vmul.f32 0.1, %v5694_v55  ;;  %v17132_v37 = vld [vmem:[#allocation32_spill] sm:$0xff] }
 0x800   : > { %v5596_v9 = vpop.f32.mrf.mxu1  ;;  %6806 = vmatmul.msk.f32.gmra.mxu0 %vm16914_vm6, %v17118_v59  ;;  %v5403_v63 = vadd.f32 %v14975_v28, %v5353_v54  ;;  %v5550_v28 = vadd.f32 %v14638_v4, %v5500_v57  ;;  %v17127_v4 = vld [vmem:[#allocation89_spill] sm:$0xff]  ;;  %v5309_v54 = vadd.f32 %v17128_v15, %v15072_v19  ;;  %v17136_v22 = vld [vmem:[#allocation192_spill] sm:$0xff] }
 0x801   : > { %v6197_v62 = vmax.f32 %v5694_v55, %v6175_v61  ;;  %v5597_v47 = vadd.f32 %v5596_v9, %v5547_v18  ;;  %v15211_v29 = vpop.f32.mrf.mxu0  ;;  %v17126_v9 = vld [vmem:[#allocation29_spill] sm:$0xff] }
 0x802   : > { %v5453_v55 = vadd.f32 %v17123_v21, %v5403_v63 }
 0x803   : > { %6219 = vst [vmem:[%s15166_s16 + $0x10] sm:$0xff] %v6197_v62  ;;  %v5647_v13 = vadd.f32 %v14943_v12, %v5597_v47  ;;  %6763 = vmatmul.msk.f32.gmra.mxu1 %vm17036_vm15, %v17120_v51  ;;  %v17129_v62 = vld [vmem:[#allocation172_spill] sm:$0xff]  ;;  %vm17133_vm15 = vnez %v17046_v49  ;;  %v17137_v49 = vld [vmem:[#allocation193_spill] sm:$0xff] }
 0x804   : > { %v5503_v59 = vadd.f32 %v17127_v4, %v5453_v55  ;;  %v15247_v55 = vpop.f32.mrf.mxu2 }
 0x805   : > { %v5697_v40 = vadd.f32 %v14818_v50, %v5647_v13  ;;  %v5406_v50 = vadd.f32 %v14995_v35, %v5356_v36  ;;  %v17131_v13 = vld [vmem:[#allocation157_spill] sm:$0xff] }
 0x806   : > { %v5553_v38 = vadd.f32 %v14683_v1, %v5503_v59  ;;  %v5359_v51 = vadd.f32 %v17131_v13, %v5309_v54  ;;  %v17134_v1 = vld [vmem:[#allocation126_spill] sm:$0xff]  ;;  %v17141_v59 = vld [vmem:[#allocation153_spill] sm:$0xff] }
 0x807   : > { %v6177_v30 = vmul.f32 0.1, %v5697_v40  ;;  %v5456_v47 = vadd.f32 %v17129_v62, %v5406_v50  ;;  %v17144_v13 = vld [vmem:[#allocation177_spill] sm:$0xff] }
 0x808   : > { %v5599_v12 = vpop.f32.mrf.mxu1  ;;  %6807 = vmatmul.msk.f32.gmra.mxu0 %vm16917_vm4, %v17124_v44 }
 0x809   : > { %v6199_v61 = vmax.f32 %v5697_v40, %v6177_v30  ;;  %v5600_v6 = vadd.f32 %v5599_v12, %v5550_v28  ;;  %v5409_v40 = vadd.f32 %v15022_v34, %v5359_v51  ;;  %v5506_v21 = vadd.f32 %v17134_v1, %v5456_v47  ;;  %v17135_v30 = vld [vmem:[#allocation175_spill] sm:$0xff]  ;;  %v17146_v1 = vld [vmem:[#allocation48_spill] sm:$0xff] }
 0x80a   : > { %v5312_v28 = vadd.f32 %v17135_v30, %v15072_v19  ;;  %v17142_v47 = vld [vmem:[#allocation59_spill] sm:$0xff] }
 0x80b   : > { %6221 = vst [vmem:[%s15166_s16 + $0x20] sm:$0xff] %v6199_v61  ;;  %v5650_v18 = vadd.f32 %v14988_v2, %v5600_v6  ;;  %6764 = vmatmul.msk.f32.gmra.mxu1 %vm17042_vm8, %v17126_v9  ;;  %v15231_v2 = vpop.f32.mrf.mxu3  ;;  %v5459_v12 = vadd.f32 %v14659_v17, %v5409_v40  ;;  %v5556_v44 = vadd.f32 %v14727_v53, %v5506_v21  ;;  %v17140_v53 = vld [vmem:[#allocation114_spill] sm:$0xff] }
 0x80c   : > { %v5362_v36 = vadd.f32 %v17137_v49, %v5312_v28  ;;  %v15273_v62 = vpop.f32.mrf.mxu2 }
 0x80d   : > { %v5700_v3 = vadd.f32 %v14866_v48, %v5650_v18  ;;  %v15237_v48 = vpop.f32.mrf.mxu0  ;;  %v17138_v18 = vld [vmem:[#allocation90_spill] sm:$0xff]  ;;  %v5509_v9 = vadd.f32 %v17140_v53, %v5459_v12 }
 0x80e   : > { %v5412_v50 = vadd.f32 %v15041_v27, %v5362_v36 }
 0x80f   : > { %v6179_v35 = vmul.f32 0.1, %v5700_v3  ;;  %v5559_v54 = vadd.f32 %v14763_v41, %v5509_v9 }
 0x810   : > { %v5602_v63 = vpop.f32.mrf.mxu1  ;;  %6808 = vmatmul.msk.f32.gmra.mxu0 %vm16919_vm0, %v17130_v23  ;;  %v5462_v15 = vadd.f32 %v14701_v31, %v5412_v50  ;;  %v17143_v23 = vld [vmem:[#allocation99_spill] sm:$0xff] }
 0x811   : > { %v6201_v60 = vmax.f32 %v5700_v3, %v6179_v35  ;;  %v5603_v57 = vadd.f32 %v5602_v63, %v5553_v38  ;;  %v5315_v3 = vadd.f32 %v17141_v59, %v15072_v19  ;;  %v17152_v59 = vld [vmem:[#allocation20_spill] sm:$0xff] }
 0x812   : > { %v5512_v31 = vadd.f32 %v17144_v13, %v5462_v15  ;;  %v17154_v15 = vld [vmem:[#allocation74_spill] sm:$0xff] }
 0x813   : > { %6223 = vst [vmem:[%s15166_s16 + $0x30] sm:$0xff] %v6201_v60  ;;  %v5653_v58 = vadd.f32 %v15012_v7, %v5603_v57  ;;  %6765 = vmatmul.msk.f32.gmra.mxu1 %vm17133_vm15, %v17132_v37  ;;  %v5365_v8 = vadd.f32 %v17142_v47, %v5315_v3  ;;  %v17145_v57 = vld [vmem:[#allocation112_spill] sm:$0xff]  ;;  %v17157_v13 = vld [vmem:[#allocation146_spill] sm:$0xff] }
 0x814   : > { %v5318_v40 = vadd.f32 %v17145_v57, %v15072_v19  ;;  %v5562_v37 = vadd.f32 %v14794_v25, %v5512_v31  ;;  %v15291_v28 = vpop.f32.mrf.mxu2  ;;  %v17158_v31 = vld [vmem:[#allocation180_spill] sm:$0xff]  ;;  %v17159_v57 = vld [vmem:[#allocation98_spill] sm:$0xff] }
 0x815   : > { %v5703_v32 = vadd.f32 %v14907_v14, %v5653_v58  ;;  %v15257_v14 = vpop.f32.mrf.mxu3  ;;  %v15266_v43 = vpop.f32.mrf.mxu0  ;;  %v5415_v63 = vadd.f32 %v15064_v42, %v5365_v8  ;;  %v17156_v8 = vld [vmem:[#allocation130_spill] sm:$0xff] }
 0x816   : > { %v5368_v21 = vadd.f32 %v17146_v1, %v5318_v40 }
 0x817   : > { %v6181_v34 = vmul.f32 0.1, %v5703_v32  ;;  %v5465_v58 = vadd.f32 %v14742_v52, %v5415_v63 }
 0x818   : > { %v5605_v7 = vpop.f32.mrf.mxu1  ;;  %6809 = vmatmul.msk.f32.gmra.mxu0 %vm17063_vm2, %v17136_v22  ;;  %v5418_v12 = vadd.f32 %v15095_v16, %v5368_v21  ;;  %v17149_v22 = vld [vmem:[#allocation191_spill] sm:$0xff] }
 0x819   : > { %v6203_v61 = vmax.f32 %v5703_v32, %v6181_v34  ;;  %v5606_v6 = vadd.f32 %v5605_v7, %v5556_v44  ;;  %v17147_v34 = vld [vmem:[#allocation183_spill] sm:$0xff]  ;;  %v17148_v44 = vld [vmem:[#allocation88_spill] sm:$0xff]  ;;  %v5321_v49 = vadd.f32 %v17149_v22, %v15072_v19 }
 0x81a   : > { %v5515_v52 = vadd.f32 %v17148_v44, %v5465_v58  ;;  %v5468_v36 = vadd.f32 %v14773_v45, %v5418_v12  ;;  %v17153_v19 = vld [vmem:[#allocation67_spill] sm:$0xff]  ;;  %v17161_v12 = vld [vmem:[#allocation61_spill] sm:$0xff] }
 0x81b   : > { %6225 = vst [vmem:[%s15166_s16 + $0x40] sm:$0xff] %v6203_v61  ;;  %v5656_v17 = vadd.f32 %v15039_v24, %v5606_v6  ;;  %6766 = vmatmul.msk.f32.gmra.mxu1 %vm17139_vm12, %v17138_v18  ;;  %v17150_v6 = vld [vmem:[#allocation176_spill] sm:$0xff] }
 0x81c   : > { %v5565_v16 = vadd.f32 %v17150_v6, %v5515_v52  ;;  %v5518_v45 = vadd.f32 %v17153_v19, %v5468_v36  ;;  %v15313_v3 = vpop.f32.mrf.mxu2 }
 0x81d   : > { %v5706_v4 = vadd.f32 %v14949_v0, %v5656_v17  ;;  %v15281_v51 = vpop.f32.mrf.mxu3  ;;  %v15284_v60 = vpop.f32.mrf.mxu0 }
 0x81f   : > { %v6183_v27 = vmul.f32 0.1, %v5706_v4 }
 0x820   : > { %v5608_v24 = vpop.f32.mrf.mxu1 }
 0x821   : > { %v6205_v35 = vmax.f32 %v5706_v4, %v6183_v27  ;;  %v5609_v38 = vadd.f32 %v5608_v24, %v5559_v54  ;;  %v17155_v54 = vld [vmem:[#allocation54_spill] sm:$0xff] }
 0x823   : > { %6227 = vst [vmem:[%s15166_s16 + $0x50] sm:$0xff] %v6205_v35  ;;  %v5659_v0 = vadd.f32 %v15069_v33, %v5609_v38  ;;  %5989 = vmatmul.f32.vlgmr.msrb.gmra.mxu1 %v17143_v23  ;;  %v5568_v35 = vadd.f32 %v17156_v8, %v5518_v45  ;;  %v17167_v8 = vld [vmem:[#allocation43_spill] sm:$0xff] }
 0x824   : > { %v15327_v58 = vpop.f32.mrf.mxu2 }
 0x825   : > { %v5709_v41 = vadd.f32 %v14990_v26, %v5659_v0  ;;  %v15299_v25 = vpop.f32.mrf.mxu3  ;;  %v15305_v50 = vpop.f32.mrf.mxu0 }
 0x827   : > { %v6185_v42 = vmul.f32 0.1, %v5709_v41 }
 0x828   : > { %v5611_v33 = vpop.f32.mrf.mxu1 }
 0x829   : > { %v6207_v32 = vmax.f32 %v5709_v41, %v6185_v42  ;;  %v5612_v30 = vadd.f32 %v5611_v33, %v5562_v37  ;;  %v17160_v37 = vld [vmem:[#allocation93_spill] sm:$0xff] }
 0x82b   : > { %6229 = vst [vmem:[%s15166_s16 + $0x60] sm:$0xff] %v6207_v32  ;;  %v5662_v26 = vadd.f32 %v15108_v56, %v5612_v30  ;;  %5992 = vmatmul.f32.gmra.mxu1 %v17147_v34  ;;  %v17151_v56 = vld [vmem:[#allocation173_spill] sm:$0xff] }
 0x82c   : > { %v5371_v18 = vadd.f32 %v17151_v56, %v5321_v49  ;;  %v15338_v52 = vpop.f32.mrf.mxu2  ;;  %v17162_v49 = vld [vmem:[#allocation108_spill] sm:$0xff] }
 0x82d   : > { %v5712_v7 = vadd.f32 %v15020_v39, %v5662_v26  ;;  %v15318_v38 = vpop.f32.mrf.mxu3 }
 0x82e   : > { %v5421_v39 = vadd.f32 %v15115_v20, %v5371_v18  ;;  %v17164_v18 = vld [vmem:[#allocation179_spill] sm:$0xff] }
 0x82f   : > { %v6187_v61 = vmul.f32 0.1, %v5712_v7 }
 0x830   : > { %v5614_v17 = vpop.f32.mrf.mxu1  ;;  %v5471_v24 = vadd.f32 %v17155_v54, %v5421_v39 }
 0x831   : > { %v6209_v53 = vmax.f32 %v5712_v7, %v6187_v61  ;;  %v5615_v9 = vadd.f32 %v5614_v17, %v5565_v16  ;;  %v17163_v16 = vld [vmem:[#allocation66_spill] sm:$0xff] }
 0x832   : > { %v5521_v41 = vadd.f32 %v17158_v31, %v5471_v24 }
 0x833   : > { %6231 = vst [vmem:[%s15166_s16 + $0x70] sm:$0xff] %v6209_v53  ;;  %v5665_v4 = vadd.f32 %v15131_v11, %v5615_v9  ;;  %5995 = vmatmul.f32.gmra.mxu1 %v17152_v59  ;;  %v15320_v11 = vpop.f32.mrf.mxu0  ;;  %v17165_v59 = vld [vmem:[#allocation42_spill] sm:$0xff] }
 0x834   : > { %v5571_v33 = vadd.f32 %v17160_v37, %v5521_v41 }
 0x835   : > { %v5715_v27 = vadd.f32 %v17154_v15, %v5665_v4  ;;  %v15330_v30 = vpop.f32.mrf.mxu3 }
 0x837   : > { %v6189_v47 = vmul.f32 0.1, %v5715_v27 }
 0x838   : > { %v5617_v63 = vpop.f32.mrf.mxu1 }
 0x839   : > { %v6211_v20 = vmax.f32 %v5715_v27, %v6189_v47  ;;  %v5618_v0 = vadd.f32 %v5617_v63, %v5568_v35  ;;  %v17166_v27 = vld [vmem:[#allocation184_spill] sm:$0xff] }
 0x83b   : > { %6233 = vst [vmem:[%s15166_s16 + $0x80] sm:$0xff] %v6211_v20  ;;  %v5668_v23 = vadd.f32 %v15224_v10, %v5618_v0  ;;  %5998 = vmatmul.f32.gmra.mxu1 %v17157_v13  ;;  %v15335_v26 = vpop.f32.mrf.mxu0 }
 0x83d   : > { %v5718_v40 = vadd.f32 %v17159_v57, %v5668_v23  ;;  %v15342_v36 = vpop.f32.mrf.mxu3  ;;  %v17171_v57 = vld [vmem:[#allocation71_spill] sm:$0xff] }
 0x83f   : > { %v6191_v42 = vmul.f32 0.1, %v5718_v40 }
 0x840   : > { %v5620_v1 = vpop.f32.mrf.mxu1 }
 0x841   : > { %v6213_v21 = vmax.f32 %v5718_v40, %v6191_v42  ;;  %v5621_v32 = vadd.f32 %v5620_v1, %v5571_v33  ;;  %v15392_v40 = vperm.slane %v17171_v57, 1  ;;  %v17174_v57 = vld [vmem:[#allocation119_spill] sm:$0xff] }
 0x843   : > { %6235 = vst [vmem:[%s15166_s16 + $0x90] sm:$0xff] %v6213_v21  ;;  %v5671_v10 = vadd.f32 %v15247_v55, %v5621_v32  ;;  %6001 = vmatmul.f32.gmra.mxu1 %v17161_v12  ;;  %v15344_v61 = vpop.f32.mrf.mxu0  ;;  %v15346_v55 = vpop.f32.mrf.mxu2  ;;  %v5765_v42 = vadd.f32 %v15211_v29, %v15392_v40  ;;  %v5771_v29 = vadd.f32 %v15266_v43, %v15392_v40  ;;  %v17175_v43 = vld [vmem:[#allocation57_spill] sm:$0xff] }
 0x845   : > { %v5721_v34 = vadd.f32 %v15231_v2, %v5671_v10  ;;  %v15349_v17 = vpop.f32.mrf.mxu3  ;;  %v5768_v10 = vadd.f32 %v15237_v48, %v15392_v40 }
 0x847   : > { %v6193_v44 = vmul.f32 0.1, %v5721_v34 }
 0x848   : > { %v5790_v7 = vpop.f32.mrf.mxu1 }
 0x849   : > { %v6215_v22 = vmax.f32 %v5721_v34, %v6193_v44  ;;  %v17173_v34 = vld [vmem:[#allocation141_spill] sm:$0xff] }
 0x84a   : > { %v5741_v44 = vadd.f32 %v17173_v34, %v15392_v40 }
 0x84b   : > { %6237 = vst [vmem:[%s15166_s16 + $0xa0] sm:$0xff] %v6215_v22  ;;  %6004 = vmatmul.f32.gmra.mxu1 %v17162_v49  ;;  %v15351_v2 = vpop.f32.mrf.mxu0  ;;  %v15354_v53 = vpop.f32.mrf.mxu2 }
 0x84d   : > { %v15356_v9 = vpop.f32.mrf.mxu3 }
 0x850   : > { %v5793_v6 = vpop.f32.mrf.mxu1 }
 0x853   : > { %6007 = vmatmul.f32.gmra.mxu1 %v17163_v16  ;;  %v15358_v4 = vpop.f32.mrf.mxu0  ;;  %v15361_v19 = vpop.f32.mrf.mxu2  ;;  %v5791_v16 = vadd.f32 %v5790_v7, %v5741_v44 }
 0x855   : > { %v15365_v15 = vpop.f32.mrf.mxu3 }
 0x858   : > { %v5796_v56 = vpop.f32.mrf.mxu1 }
 0x85b   : > { %6010 = vmatmul.f32.gmra.mxu1 %v17164_v18  ;;  %v15368_v54 = vpop.f32.mrf.mxu0  ;;  %v15370_v24 = vpop.f32.mrf.mxu2 }
 0x85d   : > { %v15375_v35 = vpop.f32.mrf.mxu3 }
 0x860   : > { %v5799_v39 = vpop.f32.mrf.mxu1 }
 0x863   : > { %6013 = vmatmul.f32.gmra.mxu1 %v17165_v59  ;;  %v15377_v63 = vpop.f32.mrf.mxu0  ;;  %v15381_v0 = vpop.f32.mrf.mxu2  ;;  %v5841_v59 = vadd.f32 %v15273_v62, %v5791_v16  ;;  %v5747_v62 = vadd.f32 %v17175_v43, %v15392_v40  ;;  %v17177_v43 = vld [vmem:[#allocation9_spill] sm:$0xff] }
 0x865   : > { %v15383_v23 = vpop.f32.mrf.mxu3  ;;  %v5891_v34 = vadd.f32 %v15257_v14, %v5841_v59 }
 0x866   : > { %17168 = vst [vmem:[#allocation140_spill] sm:$0xff] %v15383_v23 }
 0x867   : > { %v5941_v44 = vadd.f32 %v15284_v60, %v5891_v34 }
 0x868   : > { %v15363_v45 = vpop.f32.mrf.mxu1 }
 0x86b   : > { %6016 = vmatmul.f32.gmra.mxu1 %v17166_v27  ;;  %v15385_v13 = vpop.f32.mrf.mxu0  ;;  %v15389_v41 = vpop.f32.mrf.mxu2 }
 0x86c   : > { %17169 = vst [vmem:[#allocation133_spill] sm:$0xff] %v15385_v13  ;;  %v5797_v13 = vadd.f32 %v5796_v56, %v5747_v62  ;;  %v5753_v62 = vadd.f32 %v17177_v43, %v15392_v40 }
 0x86d   : > { %17170 = vst [vmem:[#allocation52_spill] sm:$0xff] %v15389_v41  ;;  %v6090_v37 = vpop.f32.mrf.mxu3 }
 0x86e   : > { %v5847_v14 = vadd.f32 %v15313_v3, %v5797_v13 }
 0x870   : > { %v15372_v47 = vpop.f32.mrf.mxu1 }
 0x873   : > { %6019 = vmatmul.f32.gmra.mxu1 %v17167_v8  ;;  %v15398_v21 = vpop.f32.mrf.mxu0  ;;  %v6040_v32 = vpop.f32.mrf.mxu2 }
 0x874   : > { %17172 = vst [vmem:[#allocation73_spill] sm:$0xff] %v15398_v21 }
 0x875   : > { %v6093_v49 = vpop.f32.mrf.mxu3 }
 0x878   : > { %v15379_v20 = vpop.f32.mrf.mxu1 }
 0x87b   : > { %v6140_v18 = vpop.f32.mrf.mxu0  ;;  %v6043_v27 = vpop.f32.mrf.mxu2 }
 0x880   : > { %v15387_v31 = vpop.f32.mrf.mxu1 }
 0x883   : > { %v6046_v23 = vpop.f32.mrf.mxu2 }
 0x888   : > { %v5814_v33 = vpop.f32.mrf.mxu1 }
 0x889   : > { %v15396_v1 = vadd.f32 %v5814_v33, %v5765_v42  ;;  %v5744_v42 = vadd.f32 %v17174_v57, %v15392_v40 }
 0x88b   : > { %v5794_v33 = vadd.f32 %v5793_v6, %v5744_v42  ;;  %v17176_v42 = vld [vmem:[#allocation106_spill] sm:$0xff] }
 0x88d   : > { %v5844_v7 = vadd.f32 %v15291_v28, %v5794_v33  ;;  %v5750_v33 = vadd.f32 %v17176_v42, %v15392_v40 }
 0x890   : > { %v5817_v12 = vpop.f32.mrf.mxu1 }
 0x891   : > { %v15404_v22 = vadd.f32 %v5817_v12, %v5768_v10  ;;  %v6096_v10 = vpop.f32.mrf.mxu3  ;;  %v6143_v12 = vpop.f32.mrf.mxu0 }
 0x898   : > { %v5820_v8 = vpop.f32.mrf.mxu1 }
 0x899   : > { %v15411_v48 = vadd.f32 %v5820_v8, %v5771_v29  ;;  %v5894_v29 = vadd.f32 %v15281_v51, %v5844_v7  ;;  %v6099_v8 = vpop.f32.mrf.mxu3  ;;  %v6146_v57 = vpop.f32.mrf.mxu0  ;;  %v5897_v51 = vadd.f32 %v15299_v25, %v5847_v14 }
 0x89a   : > { %v6049_v7 = vpop.f32.mrf.mxu2 }
 0x89b   : > { %v5944_v28 = vadd.f32 %v15305_v50, %v5894_v29  ;;  %v5947_v50 = vadd.f32 %v15320_v11, %v5897_v51 }
 0x8a0   : > { %v5990_v21 = vpop.f32.mrf.mxu1 }
 0x8a1   : > { %v5991_v16 = vadd.f32 %v5990_v21, %v5941_v44  ;;  %v5800_v44 = vadd.f32 %v5799_v39, %v5750_v33  ;;  %v6149_v29 = vpop.f32.mrf.mxu0 }
 0x8a3   : > { %v6041_v41 = vadd.f32 %v6040_v32, %v5991_v16  ;;  %v5850_v3 = vadd.f32 %v15327_v58, %v5800_v44 }
 0x8a5   : > { %v6091_v6 = vadd.f32 %v6090_v37, %v6041_v41  ;;  %v6102_v37 = vpop.f32.mrf.mxu3  ;;  %v5900_v14 = vadd.f32 %v15318_v38, %v5850_v3 }
 0x8a7   : > { %v6141_v59 = vadd.f32 %v6140_v18, %v6091_v6 }
 0x8a8   : > { %v5993_v60 = vpop.f32.mrf.mxu1 }
 0x8a9   : > { %v6174_v34 = vmul.f32 0.1, %v6141_v59  ;;  %v5994_v21 = vadd.f32 %v5993_v60, %v5944_v28  ;;  %v17178_v60 = vld [vmem:[#allocation94_spill] sm:$0xff] }
 0x8aa   : > { %v5756_v42 = vadd.f32 %v17178_v60, %v15392_v40  ;;  %v5865_v60 = vadd.f32 %v15370_v24, %v15396_v1 }
 0x8ab   : > { %v6196_v56 = vmax.f32 %v6141_v59, %v6174_v34  ;;  %v6044_v32 = vadd.f32 %v6043_v27, %v5994_v21  ;;  %v5803_v27 = vadd.f32 %v15363_v45, %v5753_v62  ;;  %v5950_v59 = vadd.f32 %v15335_v26, %v5900_v14 }
 0x8ad   : > { %6218 = vst [vmem:[%s15166_s16 + $0x8] sm:$0xff] %v6196_v56  ;;  %v6094_v41 = vadd.f32 %v6093_v49, %v6044_v32  ;;  %v6052_v49 = vpop.f32.mrf.mxu2  ;;  %v5853_v11 = vadd.f32 %v15338_v52, %v5803_v27  ;;  %v6105_v45 = vpop.f32.mrf.mxu3 }
 0x8af   : > { %v6144_v13 = vadd.f32 %v6143_v12, %v6094_v41  ;;  %v5903_v44 = vadd.f32 %v15330_v30, %v5853_v11  ;;  %v5759_v41 = vadd.f32 %v15155_v46, %v15392_v40  ;;  %v5762_v46 = vadd.f32 %v15183_v5, %v15392_v40 }
 0x8b0   : > { %v5996_v18 = vpop.f32.mrf.mxu1 }
 0x8b1   : > { %v6176_v16 = vmul.f32 0.1, %v6144_v13  ;;  %v5997_v39 = vadd.f32 %v5996_v18, %v5947_v50  ;;  %v5953_v56 = vadd.f32 %v15344_v61, %v5903_v44  ;;  %v5812_v27 = vadd.f32 %v15387_v31, %v5762_v46 }
 0x8b2   : > { %v5915_v44 = vadd.f32 %v15365_v15, %v5865_v60 }
 0x8b3   : > { %v6198_v25 = vmax.f32 %v6144_v13, %v6176_v16  ;;  %v6047_v6 = vadd.f32 %v6046_v23, %v5997_v39  ;;  %v5806_v23 = vadd.f32 %v15372_v47, %v5756_v42  ;;  %v5862_v14 = vadd.f32 %v15361_v19, %v5812_v27 }
 0x8b4   : > { %v5965_v1 = vadd.f32 %v15377_v63, %v5915_v44 }
 0x8b5   : > { %6220 = vst [vmem:[%s15166_s16 + $0x18] sm:$0xff] %v6198_v25  ;;  %v6097_v58 = vadd.f32 %v6096_v10, %v6047_v6  ;;  %v6152_v10 = vpop.f32.mrf.mxu0  ;;  %v6055_v32 = vpop.f32.mrf.mxu2  ;;  %v5912_v31 = vadd.f32 %v15356_v9, %v5862_v14 }
 0x8b6   : > { %v6108_v18 = vpop.f32.mrf.mxu3 }
 0x8b7   : > { %v6147_v12 = vadd.f32 %v6146_v57, %v6097_v58  ;;  %v5856_v57 = vadd.f32 %v15346_v55, %v5806_v23  ;;  %v5962_v19 = vadd.f32 %v15368_v54, %v5912_v31 }
 0x8b8   : > { %v5999_v28 = vpop.f32.mrf.mxu1 }
 0x8b9   : > { %v6178_v33 = vmul.f32 0.1, %v6147_v12  ;;  %v6000_v34 = vadd.f32 %v5999_v28, %v5950_v59  ;;  %v5906_v50 = vadd.f32 %v15342_v36, %v5856_v57 }
 0x8bb   : > { %v6200_v21 = vmax.f32 %v6147_v12, %v6178_v33  ;;  %v6050_v38 = vadd.f32 %v6049_v7, %v6000_v34  ;;  %v5809_v7 = vadd.f32 %v15379_v20, %v5759_v41  ;;  %v5956_v62 = vadd.f32 %v15351_v2, %v5906_v50 }
 0x8bd   : > { %6222 = vst [vmem:[%s15166_s16 + $0x28] sm:$0xff] %v6200_v21  ;;  %v6100_v52 = vadd.f32 %v6099_v8, %v6050_v38  ;;  %v6155_v8 = vpop.f32.mrf.mxu0  ;;  %v5859_v61 = vadd.f32 %v15354_v53, %v5809_v7 }
 0x8be   : > { %v6111_v53 = vpop.f32.mrf.mxu3 }
 0x8bf   : > { %v6150_v26 = vadd.f32 %v6149_v29, %v6100_v52  ;;  %v6058_v29 = vpop.f32.mrf.mxu2  ;;  %v5868_v52 = vadd.f32 %v15381_v0, %v15404_v22  ;;  %v17180_v0 = vld [vmem:[#allocation133_spill] sm:$0xff] }
 0x8c0   : > { %v6002_v51 = vpop.f32.mrf.mxu1 }
 0x8c1   : > { %v6180_v3 = vmul.f32 0.1, %v6150_v26  ;;  %v6003_v47 = vadd.f32 %v6002_v51, %v5953_v56  ;;  %v5918_v41 = vadd.f32 %v15375_v35, %v5868_v52 }
 0x8c3   : > { %v6202_v13 = vmax.f32 %v6150_v26, %v6180_v3  ;;  %v6053_v30 = vadd.f32 %v6052_v49, %v6003_v47  ;;  %v17179_v47 = vld [vmem:[#allocation52_spill] sm:$0xff]  ;;  %v5968_v22 = vadd.f32 %v17180_v0, %v5918_v41 }
 0x8c4   : > { %v5871_v7 = vadd.f32 %v17179_v47, %v15411_v48 }
 0x8c5   : > { %6224 = vst [vmem:[%s15166_s16 + $0x38] sm:$0xff] %v6202_v13  ;;  %v6103_v55 = vadd.f32 %v6102_v37, %v6053_v30  ;;  %v5909_v37 = vadd.f32 %v15349_v17, %v5859_v61  ;;  %v6158_v49 = vpop.f32.mrf.mxu0  ;;  %v17181_v61 = vld [vmem:[#allocation140_spill] sm:$0xff] }
 0x8c6   : > { %v6114_v33 = vpop.f32.mrf.mxu3 }
 0x8c7   : > { %v6153_v43 = vadd.f32 %v6152_v10, %v6103_v55  ;;  %v5959_v58 = vadd.f32 %v15358_v4, %v5909_v37  ;;  %v6061_v28 = vpop.f32.mrf.mxu2 }
 0x8c8   : > { %v6005_v16 = vpop.f32.mrf.mxu1 }
 0x8c9   : > { %v6182_v39 = vmul.f32 0.1, %v6153_v43  ;;  %v6006_v20 = vadd.f32 %v6005_v16, %v5956_v62 }
 0x8cb   : > { %v6204_v36 = vmax.f32 %v6153_v43, %v6182_v39  ;;  %v6056_v25 = vadd.f32 %v6055_v32, %v6006_v20  ;;  %v5921_v43 = vadd.f32 %v17181_v61, %v5871_v7  ;;  %v17182_v39 = vld [vmem:[#allocation73_spill] sm:$0xff] }
 0x8cd   : > { %6226 = vst [vmem:[%s15166_s16 + $0x48] sm:$0xff] %v6204_v36  ;;  %v6106_v6 = vadd.f32 %v6105_v45, %v6056_v25  ;;  %v6161_v23 = vpop.f32.mrf.mxu0  ;;  %v5971_v48 = vadd.f32 %v17182_v39, %v5921_v43 }
 0x8ce   : > { %v6117_v56 = vpop.f32.mrf.mxu3 }
 0x8cf   : > { %v6156_v2 = vadd.f32 %v6155_v8, %v6106_v6  ;;  %v6064_v10 = vpop.f32.mrf.mxu2 }
 0x8d0   : > { %v6008_v5 = vpop.f32.mrf.mxu1 }
 0x8d1   : > { %v6184_v40 = vmul.f32 0.1, %v6156_v2  ;;  %v6009_v11 = vadd.f32 %v6008_v5, %v5959_v58 }
 0x8d3   : > { %v6206_v12 = vmax.f32 %v6156_v2, %v6184_v40  ;;  %v6059_v59 = vadd.f32 %v6058_v29, %v6009_v11 }
 0x8d5   : > { %6228 = vst [vmem:[%s15166_s16 + $0x58] sm:$0xff] %v6206_v12  ;;  %v6109_v17 = vadd.f32 %v6108_v18, %v6059_v59  ;;  %v6164_v3 = vpop.f32.mrf.mxu0 }
 0x8d6   : > { %v6120_v62 = vpop.f32.mrf.mxu3 }
 0x8d7   : > { %v6159_v42 = vadd.f32 %v6158_v49, %v6109_v17  ;;  %v6067_v30 = vpop.f32.mrf.mxu2 }
 0x8d8   : > { %v6011_v4 = vpop.f32.mrf.mxu1 }
 0x8d9   : > { %v6186_v34 = vmul.f32 0.1, %v6159_v42  ;;  %v6012_v45 = vadd.f32 %v6011_v4, %v5962_v19 }
 0x8db   : > { %v6208_v21 = vmax.f32 %v6159_v42, %v6186_v34  ;;  %v6062_v38 = vadd.f32 %v6061_v28, %v6012_v45 }
 0x8dd   : > { %6230 = vst [vmem:[%s15166_s16 + $0x68] sm:$0xff] %v6208_v21  ;;  %v6112_v9 = vadd.f32 %v6111_v53, %v6062_v38  ;;  %v6167_v16 = vpop.f32.mrf.mxu0 }
 0x8de   : > { %v6170_v53 = vpop.f32.mrf.mxu3 }
 0x8df   : > { %v6162_v24 = vadd.f32 %v6161_v23, %v6112_v9  ;;  %v6070_v36 = vpop.f32.mrf.mxu2 }
 0x8e0   : > { %v6014_v54 = vpop.f32.mrf.mxu1 }
 0x8e1   : > { %v6188_v57 = vmul.f32 0.1, %v6162_v24  ;;  %v6015_v26 = vadd.f32 %v6014_v54, %v5965_v1 }
 0x8e3   : > { %v6210_v32 = vmax.f32 %v6162_v24, %v6188_v57  ;;  %v6065_v51 = vadd.f32 %v6064_v10, %v6015_v26 }
 0x8e5   : > { %6232 = vst [vmem:[%s15166_s16 + $0x78] sm:$0xff] %v6210_v32  ;;  %v6115_v15 = vadd.f32 %v6114_v33, %v6065_v51 }
 0x8e7   : > { %v6165_v13 = vadd.f32 %v6164_v3, %v6115_v15 }
 0x8e8   : > { %v6017_v63 = vpop.f32.mrf.mxu1 }
 0x8e9   : > { %v6190_v50 = vmul.f32 0.1, %v6165_v13  ;;  %v6018_v18 = vadd.f32 %v6017_v63, %v5968_v22 }
 0x8eb   : > { %v6212_v55 = vmax.f32 %v6165_v13, %v6190_v50  ;;  %v6068_v8 = vadd.f32 %v6067_v30, %v6018_v18 }
 0x8ed   : > { %6234 = vst [vmem:[%s15166_s16 + $0x88] sm:$0xff] %v6212_v55  ;;  %v6118_v35 = vadd.f32 %v6117_v56, %v6068_v8 }
 0x8ef   : > { %v6168_v46 = vadd.f32 %v6167_v16, %v6118_v35 }
 0x8f0   : > { %v6020_v20 = vpop.f32.mrf.mxu1 }
 0x8f1   : > { %v6192_v29 = vmul.f32 0.1, %v6168_v46  ;;  %v6021_v27 = vadd.f32 %v6020_v20, %v5971_v48 }
 0x8f3   : > { %v6214_v25 = vmax.f32 %v6168_v46, %v6192_v29  ;;  %v6071_v37 = vadd.f32 %v6070_v36, %v6021_v27 }
 0x8f5   : > { %6236 = vst [vmem:[%s15166_s16 + $0x98] sm:$0xff] %v6214_v25  ;;  %v6121_v6 = vadd.f32 %v6120_v62, %v6071_v37 }
 0x8f7   : > { %v6171_v14 = vadd.f32 %v6170_v53, %v6121_v6 }
 0x8f9   : > { %v6194_v2 = vmul.f32 0.1, %v6171_v14 }
 0x8fb   : > { %v6216_v58 = vmax.f32 %v6171_v14, %v6194_v2 }
 0x8fd   : > { %6238 = vst [vmem:[%s15166_s16 + $0xa8] sm:$0xff] %v6216_v58 }
 0x8fe PF: > { %s21_s17 = sadd.s32 1, %s6883_s17  }
 0x8ff   : > { %p18_p4 = scmp.ge.s32.totalorder %s21_s17, 5  }
 0x901   :  { %20 = sbr.rel (!%p18_p4) target bundleno = 1 (0x1), region = 94 }

</bundles_post_ra>
